<compile_context>
chip_gen: v7x
topology: tpu7x:2x2x1
jax: 0.10.0
libtpu: 0.0.40
codegen_flags: <defaults>
</compile_context>

<pallas_src>
import math
import numpy as np
import jax
import jax.numpy as jnp
from jax import lax
from jax.experimental import pallas as pl
from jax.experimental.pallas import tpu as pltpu

# ----- problem sizes (small, consistent with an MNIST-like forward) -----
N, C, H, W = 2, 4, 16, 16          # batch, channels, spatial
CH = 32                            # hidden channels of the synthetic score model
WC = 32                            # padded width  -> WC * C = 128 lanes (lane dense)
HP = 24                            # padded height (multiple of 8); image rows 1..16
LX = WC * C                        # 128  state lanes  (lane = w * C  + c)
LH = WC * CH                       # 1024 hidden lanes (lane = w * CH + ch)
GUARD = 8                          # guard rows above/below the slab in the conv scratch
SROWS = HP + 2 * GUARD             # 40 scratch rows
CROWS = HP + 8                     # 32 rows of the packed constant slabs
NUM_SCAL = 8                       # padded width of the per-step scalar table

SIGMA_MIN, SIGMA_MAX, SIGMA_DATA, RHO = 0.002, 80.0, 0.5, 7.0


# --------------------------------------------------------------------------- kernel
def _make_kernel(num_steps):
    def kernel(scal_ref, x0_ref, z_ref, cmx_ref, cmh_ref, w1_ref, w2_ref,
               out_ref, xg, hg):
        # guard rows zeroed once per program; interior rows are rewritten every step
        xg[0:GUARD, :] = jnp.zeros((GUARD, LX), jnp.float32)
        xg[GUARD + HP:SROWS, :] = jnp.zeros((GUARD, LX), jnp.float32)
        hg[0:GUARD, :] = jnp.zeros((GUARD, LH), jnp.float32)
        hg[GUARD + HP:SROWS, :] = jnp.zeros((GUARD, LH), jnp.float32)

        # loop-invariant constants (read once per program)
        mask_x = cmx_ref[0:HP, :]                 # (HP, 128)  valid-pixel mask
        b2t = cmx_ref[HP:HP + 1, :]               # (1, 128)   conv2 bias, lane-tiled
        mask_h = cmh_ref[0:HP, :]                 # (HP, 1024)
        bb1 = cmh_ref[HP:HP + 1, :]               # (1, 1024)  conv1 bias + temb bias
        twt = cmh_ref[HP + 1:HP + 2, :]           # (1, 1024)  temb weight

        def conv3x3(g_ref, w_ref):
            # g_ref rows: [0,GUARD)=0 | slab (HP rows) | [GUARD+HP,SROWS)=0
            # dx taps are folded into the block-tridiagonal weights; only dy taps remain
            up = g_ref[GUARD - 1:GUARD - 1 + HP, :].astype(jnp.bfloat16)   # slab[r-1]
            mid = g_ref[GUARD:GUARD + HP, :].astype(jnp.bfloat16)          # slab[r]
            dn = g_ref[GUARD + 1:GUARD + 1 + HP, :].astype(jnp.bfloat16)   # slab[r+1]
            return (jnp.dot(up, w_ref[0], preferred_element_type=jnp.float32)
                    + jnp.dot(mid, w_ref[1], preferred_element_type=jnp.float32)
                    + jnp.dot(dn, w_ref[2], preferred_element_type=jnp.float32))

        def step(s, x):
            c_in = scal_ref[s, 0]
            c_out = scal_ref[s, 1]
            c_skip = scal_ref[s, 2]
            nscale = scal_ref[s, 3]
            r_t = scal_ref[s, 4]
            lo = scal_ref[s, 5]
            hi = scal_ref[s, 6]

            # x_t = x + sqrt(t^2 - sigma_min^2) * z  (pad rows/cols of x and z are zero)
            x_t = x + nscale * z_ref[s]                               # (HP, 128) f32

            # conv1 on c_in-scaled input
            xg[GUARD:GUARD + HP, :] = c_in * x_t
            acc1 = conv3x3(xg, w1_ref)                                # (HP, 1024) f32
            # hidden = relu(conv1 + b1 + (tw * rescaled_t + tb)); keep pad region at zero
            h = jnp.maximum(acc1 + bb1 + r_t * twt, 0.0) * mask_h

            # conv2
            hg[GUARD:GUARD + HP, :] = h
            acc2 = conv3x3(hg, w2_ref)                                # (HP, 128) f32

            # denoised = c_out * model_out + c_skip * x_t ; clamp is +-1 on steps > 0
            denoised = c_out * (acc2 + b2t) + c_skip * x_t
            return jnp.clip(denoised, lo, hi) * mask_x

        out_ref[...] = lax.fori_loop(0, num_steps, step, x0_ref[...], unroll=True)

    return kernel


def _build_sampler(num_steps):
    flops = int(num_steps * N * 12 * HP * LX * LH)      # 2 convs * 3 dots * 2 flops/MAC
    bytes_accessed = int(4 * (2 * N * HP * LX + N * num_steps * HP * LX
                              + CROWS * (LX + LH) + num_steps * NUM_SCAL)
                         + 2 * 6 * LX * LH)
    grid_spec = pltpu.PrefetchScalarGridSpec(
        num_scalar_prefetch=0,
        grid=(N,),
        in_specs=[
            # per-step schedule scalars, whole table in SMEM
            pl.BlockSpec((num_steps, NUM_SCAL), lambda b: (0, 0),
                         memory_space=pltpu.MemorySpace.SMEM),
            # initial state for this image
            pl.BlockSpec((None, HP, LX), lambda b: (b, 0, 0)),
            # all per-step noise for this image (resident; tiny)
            pl.BlockSpec((None, num_steps, HP, LX), lambda b: (b, 0, 0, 0)),
            # packed constants: mask_x + b2 ; mask_h + (b1 + tb) + tw
            pl.BlockSpec((CROWS, LX), lambda b: (0, 0)),
            pl.BlockSpec((CROWS, LH), lambda b: (0, 0)),
            # block-tridiagonal bf16 conv weights (dy-indexed), DMA'd once
            pl.BlockSpec((3, LX, LH), lambda b: (0, 0, 0)),
            pl.BlockSpec((3, LH, LX), lambda b: (0, 0, 0)),
        ],
        out_specs=pl.BlockSpec((None, HP, LX), lambda b: (b, 0, 0)),
        scratch_shapes=[pltpu.VMEM((SROWS, LX), jnp.float32),
                        pltpu.VMEM((SROWS, LH), jnp.float32)],
    )
    return pl.pallas_call(
        _make_kernel(num_steps),
        out_shape=jax.ShapeDtypeStruct((N, HP, LX), jnp.float32),
        grid_spec=grid_spec,
        compiler_params=pltpu.CompilerParams(dimension_semantics=("parallel",)),
        cost_estimate=pl.CostEstimate(flops=flops, transcendentals=0,
                                      bytes_accessed=bytes_accessed),
    )


# --------------------------------------------------------------------------- host glue
def rho_schedule(u):
    ri = 1.0 / RHO
    smax = SIGMA_MAX ** ri
    smin = SIGMA_MIN ** ri
    return (smax + u * (smin - smax)) ** RHO


def _pad_to_slab(x):
    """(..., H, W, C) -> zero-padded (..., HP, WC, C) -> lane-dense (..., HP, WC*C)."""
    pad = [(0, 0)] * (x.ndim - 3) + [(1, HP - H - 1), (1, WC - W - 1), (0, 0)]
    xp = jnp.pad(x, pad)
    return xp.reshape(x.shape[:-3] + (HP, WC * x.shape[-1]))


def _make_masks():
    row_ok = (np.arange(HP) >= 1) & (np.arange(HP) <= H)
    col_ok = (np.arange(WC) >= 1) & (np.arange(WC) <= W)
    m2d = (row_ok[:, None] & col_ok[None, :]).astype(np.float32)        # (HP, WC)
    mask_x = np.repeat(m2d[:, :, None], C, axis=2).reshape(HP, LX)
    mask_h = np.repeat(m2d[:, :, None], CH, axis=2).reshape(HP, LH)
    return mask_x, mask_h


def _pack_conv(w):
    """(3, 3, cin, cout) -> (3, WC*cin, WC*cout): dx folded into a block-tridiagonal
    lane structure so only the 3 dy taps remain as row shifts in the kernel."""
    w = np.asarray(w, np.float32)
    _, _, cin, cout = w.shape
    out = np.zeros((3, WC * cin, WC * cout), np.float32)
    for dy in range(3):
        for dx in range(3):
            for wo in range(WC):
                wi = wo + dx - 1
                if 0 <= wi < WC:
                    out[dy, wi * cin:(wi + 1) * cin, wo * cout:(wo + 1) * cout] = w[dy, dx]
    return out


def init_params(key):
    k1, k2, k3, k4 = jax.random.split(key, 4)
    w1 = jax.random.normal(k1, (3, 3, C, CH), jnp.float32) * (1.0 / math.sqrt(9 * C))
    b1 = jnp.zeros((CH,), jnp.float32)
    tw = jax.random.normal(k2, (CH,), jnp.float32) * 0.1
    tb = jax.random.normal(k3, (CH,), jnp.float32) * 0.1
    w2 = jax.random.normal(k4, (3, 3, CH, C), jnp.float32) * (1.0 / math.sqrt(9 * CH))
    b2 = jnp.zeros((C,), jnp.float32)
    return (w1, b1, tw, tb, w2, b2)


def _prepare_operands(params):
    w1, b1, tw, tb, w2, b2 = params
    w1p = jnp.asarray(_pack_conv(w1), jnp.bfloat16)                    # (3, 128, 1024)
    w2p = jnp.asarray(_pack_conv(w2), jnp.bfloat16)                    # (3, 1024, 128)

    mask_x, mask_h = _make_masks()
    bb1 = np.tile(np.asarray(b1 + tb, np.float32), WC)                 # (1024,)
    twt = np.tile(np.asarray(tw, np.float32), WC)                      # (1024,)
    b2t = np.tile(np.asarray(b2, np.float32), WC)                      # (128,)

    cmx = np.zeros((CROWS, LX), np.float32)
    cmx[:HP] = mask_x
    cmx[HP] = b2t
    cmh = np.zeros((CROWS, LH), np.float32)
    cmh[:HP] = mask_h
    cmh[HP] = bb1
    cmh[HP + 1] = twt
    return w1p, w2p, jnp.asarray(cmx), jnp.asarray(cmh)


def consistency_forward(x_nchw, ts, params, key):
    """Mirrors ConsistencyMNIST.forward(x, ts) with return_list=False."""
    w1p, w2p, cmx, cmh = _prepare_operands(params)
    num_steps = len(ts)

    x_nhwc = jnp.transpose(x_nchw, (0, 2, 3, 1)).astype(jnp.float32)   # NCHW -> NHWC
    x0 = _pad_to_slab(x_nhwc)                                          # (N, HP, 128)

    # host-side schedule math -> one small (num_steps, 8) f32 SMEM table
    BIG = 1e30
    rows = []
    for step, sigma in enumerate(ts):
        sigma = float(sigma)
        c_skip = SIGMA_DATA ** 2 / ((sigma - SIGMA_MIN) ** 2 + SIGMA_DATA ** 2)
        c_out = (sigma - SIGMA_MIN) * SIGMA_DATA / (sigma ** 2 + SIGMA_DATA ** 2) ** 0.5
        c_in = 1.0 / (sigma ** 2 + SIGMA_DATA ** 2) ** 0.5
        rescaled_t = 0.25 * math.log(sigma + 1e-44)
        if step == 0:
            noise_scale, clamp_lo, clamp_hi = 0.0, -BIG, BIG           # no noise / no clamp
        else:
            noise_scale = math.sqrt(max(sigma ** 2 - SIGMA_MIN ** 2, 0.0))
            clamp_lo, clamp_hi = -1.0, 1.0
        rows.append([c_in, c_out, c_skip, noise_scale, rescaled_t, clamp_lo, clamp_hi, 0.0])
    scal = jnp.array(rows, jnp.float32)                                # (num_steps, 8)

    # all per-step noise drawn up front (step 0 uses noise_scale = 0, its slice is inert)
    # TODO(synk): torch.randn_like RNG stream cannot be reproduced; jax.random used instead.
    z = jax.random.normal(key, (N, num_steps, H, W, C), jnp.float32)
    z = _pad_to_slab(z)                                                # (N, num_steps, HP, 128)

    sampler = _build_sampler(num_steps)
    out = sampler(scal, x0, z, cmx, cmh, w1p, w2p)                     # (N, HP, 128)

    out = out.reshape(N, HP, WC, C)[:, 1:H + 1, 1:W + 1, :]
    return jnp.transpose(out, (0, 3, 1, 2))                            # back to NCHW


if __name__ == "__main__":
    key = jax.random.PRNGKey(0)
    pkey, xkey, nkey = jax.random.split(key, 3)

    params = init_params(pkey)
    x = jax.random.normal(xkey, (N, C, H, W), jnp.float32)             # NCHW like PyTorch

    # a few sampling sigmas from the rho schedule (ts[0] = sigma_max)
    ts = [rho_schedule(u) for u in (0.0, 0.6, 1.0)]

    out = consistency_forward(x, ts, params, nkey)
    out = jax.block_until_ready(out)

    assert out.shape == (N, C, H, W)
    assert bool(jnp.all(jnp.isfinite(out)))
    assert bool(jnp.all(out <= 1.0)) and bool(jnp.all(out >= -1.0))    # last step is clamped
    print("KERNEL_OK")
</pallas_src>

<mosaic_0001>
module attributes {stable_mosaic.version = 11 : i64} {
  func.func @kernel(%arg0: i32, %arg1: memref<3x8xf32, #tpu.memory_space<smem>>, %arg2: memref<1x24x128xf32, #tpu.memory_space<vmem>>, %arg3: memref<1x3x24x128xf32, #tpu.memory_space<vmem>>, %arg4: memref<32x128xf32, #tpu.memory_space<vmem>>, %arg5: memref<32x1024xf32, #tpu.memory_space<vmem>>, %arg6: memref<3x128x1024xbf16, #tpu.memory_space<vmem>>, %arg7: memref<3x1024x128xbf16, #tpu.memory_space<vmem>>, %arg8: memref<1x24x128xf32, #tpu.memory_space<vmem>>, %arg9: memref<40x128xf32, #tpu.memory_space<vmem>>, %arg10: memref<40x1024xf32, #tpu.memory_space<vmem>>) attributes {dimension_semantics = [#tpu.dimension_semantics<parallel>], iteration_bounds = array<i64: 2>, scalar_prefetch = 0 : i64, scratch_operands = 2 : i64, tpu.core_type = #tpu.core_type<tc>, window_params = [{transform_indices = @transform_0, window_bounds = array<i64: 3, 8>}, {transform_indices = @transform_1, window_bounds = array<i64: 1, 24, 128>}, {transform_indices = @transform_2, window_bounds = array<i64: 1, 3, 24, 128>}, {pipeline_mode = #tpu.pipeline_mode<synchronous>, transform_indices = @transform_3, window_bounds = array<i64: 32, 128>}, {pipeline_mode = #tpu.pipeline_mode<synchronous>, transform_indices = @transform_4, window_bounds = array<i64: 32, 1024>}, {pipeline_mode = #tpu.pipeline_mode<synchronous>, transform_indices = @transform_5, window_bounds = array<i64: 3, 128, 1024>}, {pipeline_mode = #tpu.pipeline_mode<synchronous>, transform_indices = @transform_6, window_bounds = array<i64: 3, 1024, 128>}, {transform_indices = @transform_7, window_bounds = array<i64: 1, 24, 128>}]} {
    %cst = arith.constant 0.000000e+00 : f32
    %0 = vector.broadcast %cst : f32 to vector<8x128xf32>
    %c0 = arith.constant 0 : index
    %c0_0 = arith.constant 0 : index
    %1 = vector.load %arg9[%c0, %c0_0] : memref<40x128xf32, #tpu.memory_space<vmem>>, vector<8x128xf32>
    tpu.vector_store %arg9[%c0, %c0_0], %0 {strides = array<i32>} : memref<40x128xf32, #tpu.memory_space<vmem>>, vector<8x128xf32>,
    %cst_1 = arith.constant 0.000000e+00 : f32
    %2 = vector.broadcast %cst_1 : f32 to vector<8x128xf32>
    %c32 = arith.constant 32 : index
    %c0_2 = arith.constant 0 : index
    %3 = vector.load %arg9[%c32, %c0_2] : memref<40x128xf32, #tpu.memory_space<vmem>>, vector<8x128xf32>
    tpu.vector_store %arg9[%c32, %c0_2], %2 {strides = array<i32>} : memref<40x128xf32, #tpu.memory_space<vmem>>, vector<8x128xf32>,
    %cst_3 = arith.constant 0.000000e+00 : f32
    %4 = vector.broadcast %cst_3 : f32 to vector<8x1024xf32>
    %c0_4 = arith.constant 0 : index
    %c0_5 = arith.constant 0 : index
    %5 = vector.load %arg10[%c0_4, %c0_5] : memref<40x1024xf32, #tpu.memory_space<vmem>>, vector<8x1024xf32>
    tpu.vector_store %arg10[%c0_4, %c0_5], %4 {strides = array<i32>} : memref<40x1024xf32, #tpu.memory_space<vmem>>, vector<8x1024xf32>,
    %cst_6 = arith.constant 0.000000e+00 : f32
    %6 = vector.broadcast %cst_6 : f32 to vector<8x1024xf32>
    %c32_7 = arith.constant 32 : index
    %c0_8 = arith.constant 0 : index
    %7 = vector.load %arg10[%c32_7, %c0_8] : memref<40x1024xf32, #tpu.memory_space<vmem>>, vector<8x1024xf32>
    tpu.vector_store %arg10[%c32_7, %c0_8], %6 {strides = array<i32>} : memref<40x1024xf32, #tpu.memory_space<vmem>>, vector<8x1024xf32>,
    %c0_9 = arith.constant 0 : index
    %c0_10 = arith.constant 0 : index
    %8 = vector.load %arg4[%c0_9, %c0_10] : memref<32x128xf32, #tpu.memory_space<vmem>>, vector<24x128xf32>
    %c24 = arith.constant 24 : index
    %c0_11 = arith.constant 0 : index
    %9 = vector.load %arg4[%c24, %c0_11] : memref<32x128xf32, #tpu.memory_space<vmem>>, vector<1x128xf32>
    %c0_12 = arith.constant 0 : index
    %c0_13 = arith.constant 0 : index
    %10 = vector.load %arg5[%c0_12, %c0_13] : memref<32x1024xf32, #tpu.memory_space<vmem>>, vector<24x1024xf32>
    %c24_14 = arith.constant 24 : index
    %c0_15 = arith.constant 0 : index
    %11 = vector.load %arg5[%c24_14, %c0_15] : memref<32x1024xf32, #tpu.memory_space<vmem>>, vector<1x1024xf32>
    %c25 = arith.constant 25 : index
    %c0_16 = arith.constant 0 : index
    %12 = vector.load %arg5[%c25, %c0_16] : memref<32x1024xf32, #tpu.memory_space<vmem>>, vector<1x1024xf32>
    %c0_17 = arith.constant 0 : index
    %c0_18 = arith.constant 0 : index
    %c0_19 = arith.constant 0 : index
    %13 = vector.load %arg2[%c0_17, %c0_18, %c0_19] : memref<1x24x128xf32, #tpu.memory_space<vmem>>, vector<1x24x128xf32>
    %14 = vector.shape_cast %13 : vector<1x24x128xf32> to vector<24x128xf32>
    %c0_i32 = arith.constant 0 : i32
    %15 = arith.index_cast %c0_i32 : i32 to index
    %c0_20 = arith.constant 0 : index
    %16 = memref.load %arg1[%15, %c0_20] : memref<3x8xf32, #tpu.memory_space<smem>>
    %17 = arith.index_cast %c0_i32 : i32 to index
    %c1 = arith.constant 1 : index
    %18 = memref.load %arg1[%17, %c1] : memref<3x8xf32, #tpu.memory_space<smem>>
    %19 = arith.index_cast %c0_i32 : i32 to index
    %c2 = arith.constant 2 : index
    %20 = memref.load %arg1[%19, %c2] : memref<3x8xf32, #tpu.memory_space<smem>>
    %21 = arith.index_cast %c0_i32 : i32 to index
    %c3 = arith.constant 3 : index
    %22 = memref.load %arg1[%21, %c3] : memref<3x8xf32, #tpu.memory_space<smem>>
    %23 = arith.index_cast %c0_i32 : i32 to index
    %c4 = arith.constant 4 : index
    %24 = memref.load %arg1[%23, %c4] : memref<3x8xf32, #tpu.memory_space<smem>>
    %25 = arith.index_cast %c0_i32 : i32 to index
    %c5 = arith.constant 5 : index
    %26 = memref.load %arg1[%25, %c5] : memref<3x8xf32, #tpu.memory_space<smem>>
    %27 = arith.index_cast %c0_i32 : i32 to index
    %c6 = arith.constant 6 : index
    %28 = memref.load %arg1[%27, %c6] : memref<3x8xf32, #tpu.memory_space<smem>>
    %c0_21 = arith.constant 0 : index
    %29 = arith.index_cast %c0_i32 : i32 to index
    %c0_22 = arith.constant 0 : index
    %c0_23 = arith.constant 0 : index
    %30 = vector.load %arg3[%c0_21, %29, %c0_22, %c0_23] : memref<1x3x24x128xf32, #tpu.memory_space<vmem>>, vector<1x1x24x128xf32>
    %31 = vector.shape_cast %30 : vector<1x1x24x128xf32> to vector<24x128xf32>
    %32 = vector.broadcast %22 : f32 to vector<24x128xf32>
    %33 = arith.mulf %32, %31 : vector<24x128xf32>
    %34 = arith.addf %14, %33 : vector<24x128xf32>
    %35 = vector.broadcast %16 : f32 to vector<24x128xf32>
    %36 = arith.mulf %35, %34 : vector<24x128xf32>
    %c8 = arith.constant 8 : index
    %c0_24 = arith.constant 0 : index
    %37 = vector.load %arg9[%c8, %c0_24] : memref<40x128xf32, #tpu.memory_space<vmem>>, vector<24x128xf32>
    tpu.vector_store %arg9[%c8, %c0_24], %36 {strides = array<i32>} : memref<40x128xf32, #tpu.memory_space<vmem>>, vector<24x128xf32>,
    %c7 = arith.constant 7 : index
    %c0_25 = arith.constant 0 : index
    %38 = vector.load %arg9[%c7, %c0_25] : memref<40x128xf32, #tpu.memory_space<vmem>>, vector<24x128xf32>
    %39 = arith.truncf %38 : vector<24x128xf32> to vector<24x128xbf16>
    %c8_26 = arith.constant 8 : index
    %c0_27 = arith.constant 0 : index
    %40 = vector.load %arg9[%c8_26, %c0_27] : memref<40x128xf32, #tpu.memory_space<vmem>>, vector<24x128xf32>
    %41 = arith.truncf %40 : vector<24x128xf32> to vector<24x128xbf16>
    %c9 = arith.constant 9 : index
    %c0_28 = arith.constant 0 : index
    %42 = vector.load %arg9[%c9, %c0_28] : memref<40x128xf32, #tpu.memory_space<vmem>>, vector<24x128xf32>
    %43 = arith.truncf %42 : vector<24x128xf32> to vector<24x128xbf16>
    %c0_29 = arith.constant 0 : index
    %c0_30 = arith.constant 0 : index
    %c0_31 = arith.constant 0 : index
    %44 = vector.load %arg6[%c0_29, %c0_30, %c0_31] : memref<3x128x1024xbf16, #tpu.memory_space<vmem>>, vector<1x128x1024xbf16>
    %45 = vector.shape_cast %44 : vector<1x128x1024xbf16> to vector<128x1024xbf16>
    %cst_32 = arith.constant dense<0.000000e+00> : vector<24x1024xf32>
    %46 = tpu.matmul %39, %45, %cst_32 {dimension_numbers = #tpu.dot_dimension_numbers<[1], [0], [0], [1], [0, 0, 1, 1], [], []>} : vector<24x128xbf16>, vector<128x1024xbf16>, vector<24x1024xf32> -> vector<24x1024xf32>
    %c1_33 = arith.constant 1 : index
    %c0_34 = arith.constant 0 : index
    %c0_35 = arith.constant 0 : index
    %47 = vector.load %arg6[%c1_33, %c0_34, %c0_35] : memref<3x128x1024xbf16, #tpu.memory_space<vmem>>, vector<1x128x1024xbf16>
    %48 = vector.shape_cast %47 : vector<1x128x1024xbf16> to vector<128x1024xbf16>
    %cst_36 = arith.constant dense<0.000000e+00> : vector<24x1024xf32>
    %49 = tpu.matmul %41, %48, %cst_36 {dimension_numbers = #tpu.dot_dimension_numbers<[1], [0], [0], [1], [0, 0, 1, 1], [], []>} : vector<24x128xbf16>, vector<128x1024xbf16>, vector<24x1024xf32> -> vector<24x1024xf32>
    %50 = arith.addf %46, %49 : vector<24x1024xf32>
    %c2_37 = arith.constant 2 : index
    %c0_38 = arith.constant 0 : index
    %c0_39 = arith.constant 0 : index
    %51 = vector.load %arg6[%c2_37, %c0_38, %c0_39] : memref<3x128x1024xbf16, #tpu.memory_space<vmem>>, vector<1x128x1024xbf16>
    %52 = vector.shape_cast %51 : vector<1x128x1024xbf16> to vector<128x1024xbf16>
    %cst_40 = arith.constant dense<0.000000e+00> : vector<24x1024xf32>
    %53 = tpu.matmul %43, %52, %cst_40 {dimension_numbers = #tpu.dot_dimension_numbers<[1], [0], [0], [1], [0, 0, 1, 1], [], []>} : vector<24x128xbf16>, vector<128x1024xbf16>, vector<24x1024xf32> -> vector<24x1024xf32>
    %54 = arith.addf %50, %53 : vector<24x1024xf32>
    %55 = vector.broadcast %11 : vector<1x1024xf32> to vector<24x1024xf32>
    %56 = arith.addf %54, %55 : vector<24x1024xf32>
    %57 = vector.broadcast %24 : f32 to vector<1x1024xf32>
    %58 = arith.mulf %57, %12 : vector<1x1024xf32>
    %59 = vector.broadcast %58 : vector<1x1024xf32> to vector<24x1024xf32>
    %60 = arith.addf %56, %59 : vector<24x1024xf32>
    %cst_41 = arith.constant 0.000000e+00 : f32
    %61 = vector.broadcast %cst_41 : f32 to vector<24x1024xf32>
    %62 = arith.maximumf %60, %61 : vector<24x1024xf32>
    %63 = arith.mulf %62, %10 : vector<24x1024xf32>
    %c8_42 = arith.constant 8 : index
    %c0_43 = arith.constant 0 : index
    %64 = vector.load %arg10[%c8_42, %c0_43] : memref<40x1024xf32, #tpu.memory_space<vmem>>, vector<24x1024xf32>
    tpu.vector_store %arg10[%c8_42, %c0_43], %63 {strides = array<i32>} : memref<40x1024xf32, #tpu.memory_space<vmem>>, vector<24x1024xf32>,
    %c7_44 = arith.constant 7 : index
    %c0_45 = arith.constant 0 : index
    %65 = vector.load %arg10[%c7_44, %c0_45] : memref<40x1024xf32, #tpu.memory_space<vmem>>, vector<24x1024xf32>
    %66 = arith.truncf %65 : vector<24x1024xf32> to vector<24x1024xbf16>
    %c8_46 = arith.constant 8 : index
    %c0_47 = arith.constant 0 : index
    %67 = vector.load %arg10[%c8_46, %c0_47] : memref<40x1024xf32, #tpu.memory_space<vmem>>, vector<24x1024xf32>
    %68 = arith.truncf %67 : vector<24x1024xf32> to vector<24x1024xbf16>
    %c9_48 = arith.constant 9 : index
    %c0_49 = arith.constant 0 : index
    %69 = vector.load %arg10[%c9_48, %c0_49] : memref<40x1024xf32, #tpu.memory_space<vmem>>, vector<24x1024xf32>
    %70 = arith.truncf %69 : vector<24x1024xf32> to vector<24x1024xbf16>
    %c0_50 = arith.constant 0 : index
    %c0_51 = arith.constant 0 : index
    %c0_52 = arith.constant 0 : index
    %71 = vector.load %arg7[%c0_50, %c0_51, %c0_52] : memref<3x1024x128xbf16, #tpu.memory_space<vmem>>, vector<1x1024x128xbf16>
    %72 = vector.shape_cast %71 : vector<1x1024x128xbf16> to vector<1024x128xbf16>
    %cst_53 = arith.constant dense<0.000000e+00> : vector<24x128xf32>
    %73 = tpu.matmul %66, %72, %cst_53 {dimension_numbers = #tpu.dot_dimension_numbers<[1], [0], [0], [1], [0, 0, 1, 1], [], []>} : vector<24x1024xbf16>, vector<1024x128xbf16>, vector<24x128xf32> -> vector<24x128xf32>
    %c1_54 = arith.constant 1 : index
    %c0_55 = arith.constant 0 : index
    %c0_56 = arith.constant 0 : index
    %74 = vector.load %arg7[%c1_54, %c0_55, %c0_56] : memref<3x1024x128xbf16, #tpu.memory_space<vmem>>, vector<1x1024x128xbf16>
    %75 = vector.shape_cast %74 : vector<1x1024x128xbf16> to vector<1024x128xbf16>
    %cst_57 = arith.constant dense<0.000000e+00> : vector<24x128xf32>
    %76 = tpu.matmul %68, %75, %cst_57 {dimension_numbers = #tpu.dot_dimension_numbers<[1], [0], [0], [1], [0, 0, 1, 1], [], []>} : vector<24x1024xbf16>, vector<1024x128xbf16>, vector<24x128xf32> -> vector<24x128xf32>
    %77 = arith.addf %73, %76 : vector<24x128xf32>
    %c2_58 = arith.constant 2 : index
    %c0_59 = arith.constant 0 : index
    %c0_60 = arith.constant 0 : index
    %78 = vector.load %arg7[%c2_58, %c0_59, %c0_60] : memref<3x1024x128xbf16, #tpu.memory_space<vmem>>, vector<1x1024x128xbf16>
    %79 = vector.shape_cast %78 : vector<1x1024x128xbf16> to vector<1024x128xbf16>
    %cst_61 = arith.constant dense<0.000000e+00> : vector<24x128xf32>
    %80 = tpu.matmul %70, %79, %cst_61 {dimension_numbers = #tpu.dot_dimension_numbers<[1], [0], [0], [1], [0, 0, 1, 1], [], []>} : vector<24x1024xbf16>, vector<1024x128xbf16>, vector<24x128xf32> -> vector<24x128xf32>
    %81 = arith.addf %77, %80 : vector<24x128xf32>
    %82 = vector.broadcast %9 : vector<1x128xf32> to vector<24x128xf32>
    %83 = arith.addf %81, %82 : vector<24x128xf32>
    %84 = vector.broadcast %18 : f32 to vector<24x128xf32>
    %85 = arith.mulf %84, %83 : vector<24x128xf32>
    %86 = vector.broadcast %20 : f32 to vector<24x128xf32>
    %87 = arith.mulf %86, %34 : vector<24x128xf32>
    %88 = arith.addf %85, %87 : vector<24x128xf32>
    %89 = vector.broadcast %26 : f32 to vector<24x128xf32>
    %90 = arith.maximumf %89, %88 : vector<24x128xf32>
    %91 = vector.broadcast %28 : f32 to vector<24x128xf32>
    %92 = arith.minimumf %91, %90 : vector<24x128xf32>
    %93 = arith.mulf %92, %8 : vector<24x128xf32>
    %c1_i32 = arith.constant 1 : i32
    %94 = arith.index_cast %c1_i32 : i32 to index
    %c0_62 = arith.constant 0 : index
    %95 = memref.load %arg1[%94, %c0_62] : memref<3x8xf32, #tpu.memory_space<smem>>
    %96 = arith.index_cast %c1_i32 : i32 to index
    %c1_63 = arith.constant 1 : index
    %97 = memref.load %arg1[%96, %c1_63] : memref<3x8xf32, #tpu.memory_space<smem>>
    %98 = arith.index_cast %c1_i32 : i32 to index
    %c2_64 = arith.constant 2 : index
    %99 = memref.load %arg1[%98, %c2_64] : memref<3x8xf32, #tpu.memory_space<smem>>
    %100 = arith.index_cast %c1_i32 : i32 to index
    %c3_65 = arith.constant 3 : index
    %101 = memref.load %arg1[%100, %c3_65] : memref<3x8xf32, #tpu.memory_space<smem>>
    %102 = arith.index_cast %c1_i32 : i32 to index
    %c4_66 = arith.constant 4 : index
    %103 = memref.load %arg1[%102, %c4_66] : memref<3x8xf32, #tpu.memory_space<smem>>
    %104 = arith.index_cast %c1_i32 : i32 to index
    %c5_67 = arith.constant 5 : index
    %105 = memref.load %arg1[%104, %c5_67] : memref<3x8xf32, #tpu.memory_space<smem>>
    %106 = arith.index_cast %c1_i32 : i32 to index
    %c6_68 = arith.constant 6 : index
    %107 = memref.load %arg1[%106, %c6_68] : memref<3x8xf32, #tpu.memory_space<smem>>
    %c0_69 = arith.constant 0 : index
    %108 = arith.index_cast %c1_i32 : i32 to index
    %c0_70 = arith.constant 0 : index
    %c0_71 = arith.constant 0 : index
    %109 = vector.load %arg3[%c0_69, %108, %c0_70, %c0_71] : memref<1x3x24x128xf32, #tpu.memory_space<vmem>>, vector<1x1x24x128xf32>
    %110 = vector.shape_cast %109 : vector<1x1x24x128xf32> to vector<24x128xf32>
    %111 = vector.broadcast %101 : f32 to vector<24x128xf32>
    %112 = arith.mulf %111, %110 : vector<24x128xf32>
    %113 = arith.addf %93, %112 : vector<24x128xf32>
    %114 = vector.broadcast %95 : f32 to vector<24x128xf32>
    %115 = arith.mulf %114, %113 : vector<24x128xf32>
    %c8_72 = arith.constant 8 : index
    %c0_73 = arith.constant 0 : index
    %116 = vector.load %arg9[%c8_72, %c0_73] : memref<40x128xf32, #tpu.memory_space<vmem>>, vector<24x128xf32>
    tpu.vector_store %arg9[%c8_72, %c0_73], %115 {strides = array<i32>} : memref<40x128xf32, #tpu.memory_space<vmem>>, vector<24x128xf32>,
    %c7_74 = arith.constant 7 : index
    %c0_75 = arith.constant 0 : index
    %117 = vector.load %arg9[%c7_74, %c0_75] : memref<40x128xf32, #tpu.memory_space<vmem>>, vector<24x128xf32>
    %118 = arith.truncf %117 : vector<24x128xf32> to vector<24x128xbf16>
    %c8_76 = arith.constant 8 : index
    %c0_77 = arith.constant 0 : index
    %119 = vector.load %arg9[%c8_76, %c0_77] : memref<40x128xf32, #tpu.memory_space<vmem>>, vector<24x128xf32>
    %120 = arith.truncf %119 : vector<24x128xf32> to vector<24x128xbf16>
    %c9_78 = arith.constant 9 : index
    %c0_79 = arith.constant 0 : index
    %121 = vector.load %arg9[%c9_78, %c0_79] : memref<40x128xf32, #tpu.memory_space<vmem>>, vector<24x128xf32>
    %122 = arith.truncf %121 : vector<24x128xf32> to vector<24x128xbf16>
    %c0_80 = arith.constant 0 : index
    %c0_81 = arith.constant 0 : index
    %c0_82 = arith.constant 0 : index
    %123 = vector.load %arg6[%c0_80, %c0_81, %c0_82] : memref<3x128x1024xbf16, #tpu.memory_space<vmem>>, vector<1x128x1024xbf16>
    %124 = vector.shape_cast %123 : vector<1x128x1024xbf16> to vector<128x1024xbf16>
    %cst_83 = arith.constant dense<0.000000e+00> : vector<24x1024xf32>
    %125 = tpu.matmul %118, %124, %cst_83 {dimension_numbers = #tpu.dot_dimension_numbers<[1], [0], [0], [1], [0, 0, 1, 1], [], []>} : vector<24x128xbf16>, vector<128x1024xbf16>, vector<24x1024xf32> -> vector<24x1024xf32>
    %c1_84 = arith.constant 1 : index
    %c0_85 = arith.constant 0 : index
    %c0_86 = arith.constant 0 : index
    %126 = vector.load %arg6[%c1_84, %c0_85, %c0_86] : memref<3x128x1024xbf16, #tpu.memory_space<vmem>>, vector<1x128x1024xbf16>
    %127 = vector.shape_cast %126 : vector<1x128x1024xbf16> to vector<128x1024xbf16>
    %cst_87 = arith.constant dense<0.000000e+00> : vector<24x1024xf32>
    %128 = tpu.matmul %120, %127, %cst_87 {dimension_numbers = #tpu.dot_dimension_numbers<[1], [0], [0], [1], [0, 0, 1, 1], [], []>} : vector<24x128xbf16>, vector<128x1024xbf16>, vector<24x1024xf32> -> vector<24x1024xf32>
    %129 = arith.addf %125, %128 : vector<24x1024xf32>
    %c2_88 = arith.constant 2 : index
    %c0_89 = arith.constant 0 : index
    %c0_90 = arith.constant 0 : index
    %130 = vector.load %arg6[%c2_88, %c0_89, %c0_90] : memref<3x128x1024xbf16, #tpu.memory_space<vmem>>, vector<1x128x1024xbf16>
    %131 = vector.shape_cast %130 : vector<1x128x1024xbf16> to vector<128x1024xbf16>
    %cst_91 = arith.constant dense<0.000000e+00> : vector<24x1024xf32>
    %132 = tpu.matmul %122, %131, %cst_91 {dimension_numbers = #tpu.dot_dimension_numbers<[1], [0], [0], [1], [0, 0, 1, 1], [], []>} : vector<24x128xbf16>, vector<128x1024xbf16>, vector<24x1024xf32> -> vector<24x1024xf32>
    %133 = arith.addf %129, %132 : vector<24x1024xf32>
    %134 = vector.broadcast %11 : vector<1x1024xf32> to vector<24x1024xf32>
    %135 = arith.addf %133, %134 : vector<24x1024xf32>
    %136 = vector.broadcast %103 : f32 to vector<1x1024xf32>
    %137 = arith.mulf %136, %12 : vector<1x1024xf32>
    %138 = vector.broadcast %137 : vector<1x1024xf32> to vector<24x1024xf32>
    %139 = arith.addf %135, %138 : vector<24x1024xf32>
    %cst_92 = arith.constant 0.000000e+00 : f32
    %140 = vector.broadcast %cst_92 : f32 to vector<24x1024xf32>
    %141 = arith.maximumf %139, %140 : vector<24x1024xf32>
    %142 = arith.mulf %141, %10 : vector<24x1024xf32>
    %c8_93 = arith.constant 8 : index
    %c0_94 = arith.constant 0 : index
    %143 = vector.load %arg10[%c8_93, %c0_94] : memref<40x1024xf32, #tpu.memory_space<vmem>>, vector<24x1024xf32>
    tpu.vector_store %arg10[%c8_93, %c0_94], %142 {strides = array<i32>} : memref<40x1024xf32, #tpu.memory_space<vmem>>, vector<24x1024xf32>,
    %c7_95 = arith.constant 7 : index
    %c0_96 = arith.constant 0 : index
    %144 = vector.load %arg10[%c7_95, %c0_96] : memref<40x1024xf32, #tpu.memory_space<vmem>>, vector<24x1024xf32>
    %145 = arith.truncf %144 : vector<24x1024xf32> to vector<24x1024xbf16>
    %c8_97 = arith.constant 8 : index
    %c0_98 = arith.constant 0 : index
    %146 = vector.load %arg10[%c8_97, %c0_98] : memref<40x1024xf32, #tpu.memory_space<vmem>>, vector<24x1024xf32>
    %147 = arith.truncf %146 : vector<24x1024xf32> to vector<24x1024xbf16>
    %c9_99 = arith.constant 9 : index
    %c0_100 = arith.constant 0 : index
    %148 = vector.load %arg10[%c9_99, %c0_100] : memref<40x1024xf32, #tpu.memory_space<vmem>>, vector<24x1024xf32>
    %149 = arith.truncf %148 : vector<24x1024xf32> to vector<24x1024xbf16>
    %c0_101 = arith.constant 0 : index
    %c0_102 = arith.constant 0 : index
    %c0_103 = arith.constant 0 : index
    %150 = vector.load %arg7[%c0_101, %c0_102, %c0_103] : memref<3x1024x128xbf16, #tpu.memory_space<vmem>>, vector<1x1024x128xbf16>
    %151 = vector.shape_cast %150 : vector<1x1024x128xbf16> to vector<1024x128xbf16>
    %cst_104 = arith.constant dense<0.000000e+00> : vector<24x128xf32>
    %152 = tpu.matmul %145, %151, %cst_104 {dimension_numbers = #tpu.dot_dimension_numbers<[1], [0], [0], [1], [0, 0, 1, 1], [], []>} : vector<24x1024xbf16>, vector<1024x128xbf16>, vector<24x128xf32> -> vector<24x128xf32>
    %c1_105 = arith.constant 1 : index
    %c0_106 = arith.constant 0 : index
    %c0_107 = arith.constant 0 : index
    %153 = vector.load %arg7[%c1_105, %c0_106, %c0_107] : memref<3x1024x128xbf16, #tpu.memory_space<vmem>>, vector<1x1024x128xbf16>
    %154 = vector.shape_cast %153 : vector<1x1024x128xbf16> to vector<1024x128xbf16>
    %cst_108 = arith.constant dense<0.000000e+00> : vector<24x128xf32>
    %155 = tpu.matmul %147, %154, %cst_108 {dimension_numbers = #tpu.dot_dimension_numbers<[1], [0], [0], [1], [0, 0, 1, 1], [], []>} : vector<24x1024xbf16>, vector<1024x128xbf16>, vector<24x128xf32> -> vector<24x128xf32>
    %156 = arith.addf %152, %155 : vector<24x128xf32>
    %c2_109 = arith.constant 2 : index
    %c0_110 = arith.constant 0 : index
    %c0_111 = arith.constant 0 : index
    %157 = vector.load %arg7[%c2_109, %c0_110, %c0_111] : memref<3x1024x128xbf16, #tpu.memory_space<vmem>>, vector<1x1024x128xbf16>
    %158 = vector.shape_cast %157 : vector<1x1024x128xbf16> to vector<1024x128xbf16>
    %cst_112 = arith.constant dense<0.000000e+00> : vector<24x128xf32>
    %159 = tpu.matmul %149, %158, %cst_112 {dimension_numbers = #tpu.dot_dimension_numbers<[1], [0], [0], [1], [0, 0, 1, 1], [], []>} : vector<24x1024xbf16>, vector<1024x128xbf16>, vector<24x128xf32> -> vector<24x128xf32>
    %160 = arith.addf %156, %159 : vector<24x128xf32>
    %161 = vector.broadcast %9 : vector<1x128xf32> to vector<24x128xf32>
    %162 = arith.addf %160, %161 : vector<24x128xf32>
    %163 = vector.broadcast %97 : f32 to vector<24x128xf32>
    %164 = arith.mulf %163, %162 : vector<24x128xf32>
    %165 = vector.broadcast %99 : f32 to vector<24x128xf32>
    %166 = arith.mulf %165, %113 : vector<24x128xf32>
    %167 = arith.addf %164, %166 : vector<24x128xf32>
    %168 = vector.broadcast %105 : f32 to vector<24x128xf32>
    %169 = arith.maximumf %168, %167 : vector<24x128xf32>
    %170 = vector.broadcast %107 : f32 to vector<24x128xf32>
    %171 = arith.minimumf %170, %169 : vector<24x128xf32>
    %172 = arith.mulf %171, %8 : vector<24x128xf32>
    %c2_i32 = arith.constant 2 : i32
    %173 = arith.index_cast %c2_i32 : i32 to index
    %c0_113 = arith.constant 0 : index
    %174 = memref.load %arg1[%173, %c0_113] : memref<3x8xf32, #tpu.memory_space<smem>>
    %175 = arith.index_cast %c2_i32 : i32 to index
    %c1_114 = arith.constant 1 : index
    %176 = memref.load %arg1[%175, %c1_114] : memref<3x8xf32, #tpu.memory_space<smem>>
    %177 = arith.index_cast %c2_i32 : i32 to index
    %c2_115 = arith.constant 2 : index
    %178 = memref.load %arg1[%177, %c2_115] : memref<3x8xf32, #tpu.memory_space<smem>>
    %179 = arith.index_cast %c2_i32 : i32 to index
    %c3_116 = arith.constant 3 : index
    %180 = memref.load %arg1[%179, %c3_116] : memref<3x8xf32, #tpu.memory_space<smem>>
    %181 = arith.index_cast %c2_i32 : i32 to index
    %c4_117 = arith.constant 4 : index
    %182 = memref.load %arg1[%181, %c4_117] : memref<3x8xf32, #tpu.memory_space<smem>>
    %183 = arith.index_cast %c2_i32 : i32 to index
    %c5_118 = arith.constant 5 : index
    %184 = memref.load %arg1[%183, %c5_118] : memref<3x8xf32, #tpu.memory_space<smem>>
    %185 = arith.index_cast %c2_i32 : i32 to index
    %c6_119 = arith.constant 6 : index
    %186 = memref.load %arg1[%185, %c6_119] : memref<3x8xf32, #tpu.memory_space<smem>>
    %c0_120 = arith.constant 0 : index
    %187 = arith.index_cast %c2_i32 : i32 to index
    %c0_121 = arith.constant 0 : index
    %c0_122 = arith.constant 0 : index
    %188 = vector.load %arg3[%c0_120, %187, %c0_121, %c0_122] : memref<1x3x24x128xf32, #tpu.memory_space<vmem>>, vector<1x1x24x128xf32>
    %189 = vector.shape_cast %188 : vector<1x1x24x128xf32> to vector<24x128xf32>
    %190 = vector.broadcast %180 : f32 to vector<24x128xf32>
    %191 = arith.mulf %190, %189 : vector<24x128xf32>
    %192 = arith.addf %172, %191 : vector<24x128xf32>
    %193 = vector.broadcast %174 : f32 to vector<24x128xf32>
    %194 = arith.mulf %193, %192 : vector<24x128xf32>
    %c8_123 = arith.constant 8 : index
    %c0_124 = arith.constant 0 : index
    %195 = vector.load %arg9[%c8_123, %c0_124] : memref<40x128xf32, #tpu.memory_space<vmem>>, vector<24x128xf32>
    tpu.vector_store %arg9[%c8_123, %c0_124], %194 {strides = array<i32>} : memref<40x128xf32, #tpu.memory_space<vmem>>, vector<24x128xf32>,
    %c7_125 = arith.constant 7 : index
    %c0_126 = arith.constant 0 : index
    %196 = vector.load %arg9[%c7_125, %c0_126] : memref<40x128xf32, #tpu.memory_space<vmem>>, vector<24x128xf32>
    %197 = arith.truncf %196 : vector<24x128xf32> to vector<24x128xbf16>
    %c8_127 = arith.constant 8 : index
    %c0_128 = arith.constant 0 : index
    %198 = vector.load %arg9[%c8_127, %c0_128] : memref<40x128xf32, #tpu.memory_space<vmem>>, vector<24x128xf32>
    %199 = arith.truncf %198 : vector<24x128xf32> to vector<24x128xbf16>
    %c9_129 = arith.constant 9 : index
    %c0_130 = arith.constant 0 : index
    %200 = vector.load %arg9[%c9_129, %c0_130] : memref<40x128xf32, #tpu.memory_space<vmem>>, vector<24x128xf32>
    %201 = arith.truncf %200 : vector<24x128xf32> to vector<24x128xbf16>
    %c0_131 = arith.constant 0 : index
    %c0_132 = arith.constant 0 : index
    %c0_133 = arith.constant 0 : index
    %202 = vector.load %arg6[%c0_131, %c0_132, %c0_133] : memref<3x128x1024xbf16, #tpu.memory_space<vmem>>, vector<1x128x1024xbf16>
    %203 = vector.shape_cast %202 : vector<1x128x1024xbf16> to vector<128x1024xbf16>
    %cst_134 = arith.constant dense<0.000000e+00> : vector<24x1024xf32>
    %204 = tpu.matmul %197, %203, %cst_134 {dimension_numbers = #tpu.dot_dimension_numbers<[1], [0], [0], [1], [0, 0, 1, 1], [], []>} : vector<24x128xbf16>, vector<128x1024xbf16>, vector<24x1024xf32> -> vector<24x1024xf32>
    %c1_135 = arith.constant 1 : index
    %c0_136 = arith.constant 0 : index
    %c0_137 = arith.constant 0 : index
    %205 = vector.load %arg6[%c1_135, %c0_136, %c0_137] : memref<3x128x1024xbf16, #tpu.memory_space<vmem>>, vector<1x128x1024xbf16>
    %206 = vector.shape_cast %205 : vector<1x128x1024xbf16> to vector<128x1024xbf16>
    %cst_138 = arith.constant dense<0.000000e+00> : vector<24x1024xf32>
    %207 = tpu.matmul %199, %206, %cst_138 {dimension_numbers = #tpu.dot_dimension_numbers<[1], [0], [0], [1], [0, 0, 1, 1], [], []>} : vector<24x128xbf16>, vector<128x1024xbf16>, vector<24x1024xf32> -> vector<24x1024xf32>
    %208 = arith.addf %204, %207 : vector<24x1024xf32>
    %c2_139 = arith.constant 2 : index
    %c0_140 = arith.constant 0 : index
    %c0_141 = arith.constant 0 : index
    %209 = vector.load %arg6[%c2_139, %c0_140, %c0_141] : memref<3x128x1024xbf16, #tpu.memory_space<vmem>>, vector<1x128x1024xbf16>
    %210 = vector.shape_cast %209 : vector<1x128x1024xbf16> to vector<128x1024xbf16>
    %cst_142 = arith.constant dense<0.000000e+00> : vector<24x1024xf32>
    %211 = tpu.matmul %201, %210, %cst_142 {dimension_numbers = #tpu.dot_dimension_numbers<[1], [0], [0], [1], [0, 0, 1, 1], [], []>} : vector<24x128xbf16>, vector<128x1024xbf16>, vector<24x1024xf32> -> vector<24x1024xf32>
    %212 = arith.addf %208, %211 : vector<24x1024xf32>
    %213 = vector.broadcast %11 : vector<1x1024xf32> to vector<24x1024xf32>
    %214 = arith.addf %212, %213 : vector<24x1024xf32>
    %215 = vector.broadcast %182 : f32 to vector<1x1024xf32>
    %216 = arith.mulf %215, %12 : vector<1x1024xf32>
    %217 = vector.broadcast %216 : vector<1x1024xf32> to vector<24x1024xf32>
    %218 = arith.addf %214, %217 : vector<24x1024xf32>
    %cst_143 = arith.constant 0.000000e+00 : f32
    %219 = vector.broadcast %cst_143 : f32 to vector<24x1024xf32>
    %220 = arith.maximumf %218, %219 : vector<24x1024xf32>
    %221 = arith.mulf %220, %10 : vector<24x1024xf32>
    %c8_144 = arith.constant 8 : index
    %c0_145 = arith.constant 0 : index
    %222 = vector.load %arg10[%c8_144, %c0_145] : memref<40x1024xf32, #tpu.memory_space<vmem>>, vector<24x1024xf32>
    tpu.vector_store %arg10[%c8_144, %c0_145], %221 {strides = array<i32>} : memref<40x1024xf32, #tpu.memory_space<vmem>>, vector<24x1024xf32>,
    %c7_146 = arith.constant 7 : index
    %c0_147 = arith.constant 0 : index
    %223 = vector.load %arg10[%c7_146, %c0_147] : memref<40x1024xf32, #tpu.memory_space<vmem>>, vector<24x1024xf32>
    %224 = arith.truncf %223 : vector<24x1024xf32> to vector<24x1024xbf16>
    %c8_148 = arith.constant 8 : index
    %c0_149 = arith.constant 0 : index
    %225 = vector.load %arg10[%c8_148, %c0_149] : memref<40x1024xf32, #tpu.memory_space<vmem>>, vector<24x1024xf32>
    %226 = arith.truncf %225 : vector<24x1024xf32> to vector<24x1024xbf16>
    %c9_150 = arith.constant 9 : index
    %c0_151 = arith.constant 0 : index
    %227 = vector.load %arg10[%c9_150, %c0_151] : memref<40x1024xf32, #tpu.memory_space<vmem>>, vector<24x1024xf32>
    %228 = arith.truncf %227 : vector<24x1024xf32> to vector<24x1024xbf16>
    %c0_152 = arith.constant 0 : index
    %c0_153 = arith.constant 0 : index
    %c0_154 = arith.constant 0 : index
    %229 = vector.load %arg7[%c0_152, %c0_153, %c0_154] : memref<3x1024x128xbf16, #tpu.memory_space<vmem>>, vector<1x1024x128xbf16>
    %230 = vector.shape_cast %229 : vector<1x1024x128xbf16> to vector<1024x128xbf16>
    %cst_155 = arith.constant dense<0.000000e+00> : vector<24x128xf32>
    %231 = tpu.matmul %224, %230, %cst_155 {dimension_numbers = #tpu.dot_dimension_numbers<[1], [0], [0], [1], [0, 0, 1, 1], [], []>} : vector<24x1024xbf16>, vector<1024x128xbf16>, vector<24x128xf32> -> vector<24x128xf32>
    %c1_156 = arith.constant 1 : index
    %c0_157 = arith.constant 0 : index
    %c0_158 = arith.constant 0 : index
    %232 = vector.load %arg7[%c1_156, %c0_157, %c0_158] : memref<3x1024x128xbf16, #tpu.memory_space<vmem>>, vector<1x1024x128xbf16>
    %233 = vector.shape_cast %232 : vector<1x1024x128xbf16> to vector<1024x128xbf16>
    %cst_159 = arith.constant dense<0.000000e+00> : vector<24x128xf32>
    %234 = tpu.matmul %226, %233, %cst_159 {dimension_numbers = #tpu.dot_dimension_numbers<[1], [0], [0], [1], [0, 0, 1, 1], [], []>} : vector<24x1024xbf16>, vector<1024x128xbf16>, vector<24x128xf32> -> vector<24x128xf32>
    %235 = arith.addf %231, %234 : vector<24x128xf32>
    %c2_160 = arith.constant 2 : index
    %c0_161 = arith.constant 0 : index
    %c0_162 = arith.constant 0 : index
    %236 = vector.load %arg7[%c2_160, %c0_161, %c0_162] : memref<3x1024x128xbf16, #tpu.memory_space<vmem>>, vector<1x1024x128xbf16>
    %237 = vector.shape_cast %236 : vector<1x1024x128xbf16> to vector<1024x128xbf16>
    %cst_163 = arith.constant dense<0.000000e+00> : vector<24x128xf32>
    %238 = tpu.matmul %228, %237, %cst_163 {dimension_numbers = #tpu.dot_dimension_numbers<[1], [0], [0], [1], [0, 0, 1, 1], [], []>} : vector<24x1024xbf16>, vector<1024x128xbf16>, vector<24x128xf32> -> vector<24x128xf32>
    %239 = arith.addf %235, %238 : vector<24x128xf32>
    %240 = vector.broadcast %9 : vector<1x128xf32> to vector<24x128xf32>
    %241 = arith.addf %239, %240 : vector<24x128xf32>
    %242 = vector.broadcast %176 : f32 to vector<24x128xf32>
    %243 = arith.mulf %242, %241 : vector<24x128xf32>
    %244 = vector.broadcast %178 : f32 to vector<24x128xf32>
    %245 = arith.mulf %244, %192 : vector<24x128xf32>
    %246 = arith.addf %243, %245 : vector<24x128xf32>
    %247 = vector.broadcast %184 : f32 to vector<24x128xf32>
    %248 = arith.maximumf %247, %246 : vector<24x128xf32>
    %249 = vector.broadcast %186 : f32 to vector<24x128xf32>
    %250 = arith.minimumf %249, %248 : vector<24x128xf32>
    %251 = arith.mulf %250, %8 : vector<24x128xf32>
    %c3_i32 = arith.constant 3 : i32
    %c0_164 = arith.constant 0 : index
    %c0_165 = arith.constant 0 : index
    %c0_166 = arith.constant 0 : index
    %252 = vector.load %arg8[%c0_164, %c0_165, %c0_166] : memref<1x24x128xf32, #tpu.memory_space<vmem>>, vector<1x24x128xf32>
    %253 = vector.shape_cast %252 : vector<1x24x128xf32> to vector<24x128xf32>
    %254 = vector.shape_cast %251 : vector<24x128xf32> to vector<1x24x128xf32>
    tpu.vector_store %arg8[%c0_164, %c0_165, %c0_166], %254 {strides = array<i32>} : memref<1x24x128xf32, #tpu.memory_space<vmem>>, vector<1x24x128xf32>,
    return
  }
  func.func @transform_0(%arg0: i32) -> (i32, i32) {
    %c0_i32 = arith.constant 0 : i32
    %c0_i32_0 = arith.constant 0 : i32
    %c0_i32_1 = arith.constant 0 : i32
    return %c0_i32, %c0_i32_0 : i32, i32
  }
  func.func @transform_1(%arg0: i32) -> (i32, i32, i32) {
    %c0_i32 = arith.constant 0 : i32
    %c0_i32_0 = arith.constant 0 : i32
    %c0_i32_1 = arith.constant 0 : i32
    return %arg0, %c0_i32, %c0_i32_0 : i32, i32, i32
  }
  func.func @transform_2(%arg0: i32) -> (i32, i32, i32, i32) {
    %c0_i32 = arith.constant 0 : i32
    %c0_i32_0 = arith.constant 0 : i32
    %c0_i32_1 = arith.constant 0 : i32
    %c0_i32_2 = arith.constant 0 : i32
    return %arg0, %c0_i32, %c0_i32_0, %c0_i32_1 : i32, i32, i32, i32
  }
  func.func @transform_3(%arg0: i32) -> (i32, i32) {
    %c0_i32 = arith.constant 0 : i32
    %c0_i32_0 = arith.constant 0 : i32
    %c0_i32_1 = arith.constant 0 : i32
    return %c0_i32, %c0_i32_0 : i32, i32
  }
  func.func @transform_4(%arg0: i32) -> (i32, i32) {
    %c0_i32 = arith.constant 0 : i32
    %c0_i32_0 = arith.constant 0 : i32
    %c0_i32_1 = arith.constant 0 : i32
    return %c0_i32, %c0_i32_0 : i32, i32
  }
  func.func @transform_5(%arg0: i32) -> (i32, i32, i32) {
    %c0_i32 = arith.constant 0 : i32
    %c0_i32_0 = arith.constant 0 : i32
    %c0_i32_1 = arith.constant 0 : i32
    %c0_i32_2 = arith.constant 0 : i32
    return %c0_i32, %c0_i32_0, %c0_i32_1 : i32, i32, i32
  }
  func.func @transform_6(%arg0: i32) -> (i32, i32, i32) {
    %c0_i32 = arith.constant 0 : i32
    %c0_i32_0 = arith.constant 0 : i32
    %c0_i32_1 = arith.constant 0 : i32
    %c0_i32_2 = arith.constant 0 : i32
    return %c0_i32, %c0_i32_0, %c0_i32_1 : i32, i32, i32
  }
  func.func @transform_7(%arg0: i32) -> (i32, i32, i32) {
    %c0_i32 = arith.constant 0 : i32
    %c0_i32_0 = arith.constant 0 : i32
    %c0_i32_1 = arith.constant 0 : i32
    return %arg0, %c0_i32, %c0_i32_0 : i32, i32, i32
  }
}

</mosaic_0001>

<bundles_post_ra>
// kernel: tpu_custom_call.1
= control target key start
LH: loop header
LB: loop body
LE: loop exit
PB: predicated region body
PF: predicated region fallthrough
CT: control target
= control target key end

     0   :  { %s19619_s0 = inlined_call_operand.hbm [shape: f32[3,8], index: 0, kind: input, shape index: {}]   ;;  %s19620_s1 = inlined_call_operand.hbm [shape: f32[2,24,128], index: 1, kind: input, shape index: {}]   ;;  %s19621_s2 = inlined_call_operand.hbm [shape: f32[2,3,24,128], index: 2, kind: input, shape index: {}]   ;;  %s19622_s3 = inlined_call_operand.hbm [shape: f32[32,128], index: 3, kind: input, shape index: {}]   ;;  %s19623_s4 = inlined_call_operand.hbm [shape: f32[32,1024], index: 4, kind: input, shape index: {}]   ;;  %s19624_s5 = inlined_call_operand.hbm [shape: bf16[3,128,1024], index: 5, kind: input, shape index: {}]   ;;  %s19625_s6 = inlined_call_operand.hbm [shape: bf16[3,1024,128], index: 6, kind: input, shape index: {}]   ;;  %s19626_s7 = inlined_call_operand.hbm [shape: f32[2,24,128], index: 7, kind: output, shape index: {}]  }
   0x1   :  { %19674 = sst [smem:[#allocation43_spill]] %s19619_s0 }
   0x2   :  { %19675 = sst [smem:[#allocation44_spill]] %s19620_s1 }
   0x3   :  { %19676 = sst [smem:[#allocation45_spill]] %s19622_s3 }
   0x4   :  { %19677 = sst [smem:[#allocation46_spill]] %s19623_s4 }
   0x5   :  { %19678 = sst [smem:[#allocation47_spill]] %s19624_s5 }
   0x6   :  { %12 = vsyncpa [#allocation7], 0 }
   0x7   :  { %13 = vsyncpa [#allocation5], 0 }
   0x8   :  { %15 = vsyncpa [#allocation5 + $0x1], 0 }
   0x9   :  { %16 = vsyncpa [#allocation10], 0 }
   0xa   :  { %18 = vsyncpa [#allocation10 + $0x1], 0 }
   0xb   :  { %19 = vsyncpa [#allocation13], 0 }
   0xc   :  { %20 = vsyncpa [#allocation16], 0 }
   0xd   :  { %21 = vsyncpa [#allocation6], 0 }
   0xe   :  { %23 = vsyncpa [#allocation6 + $0x1], 0  ;;  %s17681_s24 = smov 0   ;;  %s17683_s25 = smov 0  }
   0xf   :  { %s17685_s26 = smov 0   ;;  %s17687_s27 = smov 0  }
  0x10 LB: > { %s17622_s28 = smov [#allocation11]   ;;  %s17702_s30 = sadd.s32 4294967295, %s17620_s27   ;;  %s17620_s27 = sphi %s17687_s27, %s19777_s27   ;;  %s17616_s26 = sphi %s17685_s26, %s19776_s26   ;;  %s17612_s25 = sphi %s17683_s25, %s19775_s25   ;;  %s17608_s24 = sphi %s17681_s24, %s19774_s24  }
  0x11   : > { %s238_s29 = sshll.u32 %s17622_s28, 4  ;;  %p14296_p0 = scmp.ge.s32.totalorder %s17620_s27, 1  ;;  %s17707_s29 = int_to_ptr.vmem [resolvable:$true] %s238_s29 }
  0x12   : > { %p19627_p1 = scmp.eq.s32.totalorder %s17702_s30, 0  ;;  %p217_p2 = scmp.lt.s32.totalorder %s17620_s27, 3 }
  0x13   : > { %s17623_s9 = smov [#allocation12]   ;;  %s19681_s3 = sld [smem:[#allocation45_spill]] }
  0x14   : > { %p17709_p3 = pnand %p14296_p0, %p217_p2  ;;  %s251_s10 = sshll.u32 %s17623_s9, 4  ;;  %s17722_s10 = int_to_ptr.vmem [resolvable:$true] %s251_s10 }
  0x16   : > { %s19679_s8 = scalar_select %p17709_p3, 1, 0 }
  0x17   : > { %p16630_p5 = pneg %p17709_p3 }
  0x19   : > { %p17718_p6 = pnand %p16630_p5, %p19627_p1  ;;  %s17349_s14 = scalar_lea.hbm %s19681_s3, 512 }
  0x1a   : > { %p17350_p7 = scmp.ne.s32.totalorder %s19681_s3, %s17349_s14  ;;  %p17356_p11 = scmp.lt.u32.totalorder %s17349_s14, %s19681_s3 }
  0x1b   : > { %p17732_p8 = pneg %p17718_p6 }
  0x1d   : > { %p17352_p9 = pnand %p17732_p8, %p17350_p7 }
  0x1f   : > { %p17353_p10 = pneg %p17352_p9 }
  0x21   : > { %p17358_p12 = pnand %p17356_p11, %p17353_p10 }
  0x23   : > { %17361 = shalt.err (!%p17358_p12)
}
  0x24   : > { %s17362_s20 = scalar_lea.vmem %s17707_s29, 512  ;;  %p17370_p5 = scmp.lt.s32.totalorder %s17707_s29, %s17707_s29 }
  0x25   : > { %p17363_p13 = scmp.ne.s32.totalorder %s17707_s29, %s17362_s20  ;;  %p17371_p4 = scmp.lt.s32.totalorder %s17362_s20, %s17362_s20 }
  0x27   : > { %p17365_p0 = pnand %p17363_p13, %p17732_p8  ;;  %p17372_p7 = por %p17371_p4, %p17370_p5 }
  0x29   : > { %p17366_p2 = pneg %p17365_p0 }
  0x2b   : > { %p17373_p9 = pnand %p17372_p7, %p17366_p2 }
  0x2d   : > { %17376 = shalt.err (!%p17373_p9)
}
  0x2e   : > { %s19629_s21 = smov 128   ;;  %s19631_s22 = smov 8  }
  0x2f   : > { %16636 = dma.hbm_to_vmem [thread:$0]  (!%p17718_p6), %s19681_s3, 512, %s17707_s29, [#allocation10], %s19629_s21, %s19629_s21, %s19631_s22  }
  0x30   : > { %s19683_s4 = sld [smem:[#allocation46_spill]] }
  0x36   : > { %s17377_s13 = scalar_lea.hbm %s19683_s4, 4096 }
  0x37   : > { %p17378_p4 = scmp.ne.s32.totalorder %s19683_s4, %s17377_s13  ;;  %p17384_p12 = scmp.lt.u32.totalorder %s17377_s13, %s19683_s4 }
  0x39   : > { %p17380_p10 = pnand %p17378_p4, %p17732_p8 }
  0x3b   : > { %p17381_p11 = pneg %p17380_p10 }
  0x3d   : > { %p17386_p13 = pnand %p17384_p12, %p17381_p11 }
  0x3f   : > { %17389 = shalt.err (!%p17386_p13)
}
  0x40   : > { %s17390_s29 = scalar_lea.vmem %s17722_s10, 4096  ;;  %p17398_p7 = scmp.lt.s32.totalorder %s17722_s10, %s17722_s10 }
  0x41   : > { %p17391_p0 = scmp.ne.s32.totalorder %s17722_s10, %s17390_s29  ;;  %p17399_p9 = scmp.lt.s32.totalorder %s17390_s29, %s17390_s29 }
  0x43   : > { %p17393_p2 = pnand %p17391_p0, %p17732_p8  ;;  %p17400_p4 = por %p17399_p9, %p17398_p7 }
  0x45   : > { %p17394_p5 = pneg %p17393_p2 }
  0x47   : > { %p17401_p10 = pnand %p17400_p4, %p17394_p5 }
  0x49   : > { %17404 = shalt.err (!%p17401_p10)
}
  0x4a   : > { %s17626_s19 = smov 1024   ;;  %s17627_s20 = smov 64  }
  0x4b   : > { %16639 = dma.hbm_to_vmem [thread:$0]  (!%p17718_p6), %s19683_s4, 4096, %s17722_s10, [#allocation13], %s17626_s19, %s17626_s19, %s17627_s20  }
  0x4c   : > { %s19684_s0 = sld [smem:[#allocation43_spill]] }
  0x52   : > { %s17405_s13 = scalar_lea.hbm %s19684_s0, 64 }
  0x53   : > { %p17406_p11 = scmp.ne.s32.totalorder %s19684_s0, %s17405_s13  ;;  %p17412_p0 = scmp.lt.u32.totalorder %s17405_s13, %s19684_s0 }
  0x55   : > { %p17408_p12 = pnand %p17406_p11, %p17732_p8 }
  0x57   : > { %p17409_p13 = pneg %p17408_p12 }
  0x59   : > { %p17414_p2 = pnand %p17412_p0, %p17409_p13 }
  0x5b   : > { %17417 = shalt.err (!%p17414_p2)
}
  0x5c   : > { %s17628_s29 = smov [#allocation4]   ;;  %s17629_s23 = smov [#allocation14]  }
  0x5d   : > { %16633 = dma.hbm_to_smem (!%p17718_p6), %s19684_s0, 64, %s17628_s29, [#allocation7]  }
  0x5e   : > { %s264_s28 = sshll.u32 %s17629_s23, 4  ;;  %s19685_s5 = sld [smem:[#allocation47_spill]]  ;;  %s265_s28 = int_to_ptr.vmem [resolvable:$true] %s264_s28 }
  0x64   : > { %s17418_s14 = scalar_lea.hbm %s19685_s5, 24576 }
  0x65   : > { %p17419_p5 = scmp.ne.s32.totalorder %s19685_s5, %s17418_s14  ;;  %p17425_p4 = scmp.lt.u32.totalorder %s17418_s14, %s19685_s5 }
  0x67   : > { %p17421_p7 = pnand %p17419_p5, %p17732_p8 }
  0x69   : > { %p17422_p9 = pneg %p17421_p7 }
  0x6b   : > { %p17427_p10 = pnand %p17425_p4, %p17422_p9 }
  0x6d   : > { %17430 = shalt.err (!%p17427_p10)
}
  0x6e   : > { %s17431_s29 = scalar_lea.vmem %s265_s28, 24576  ;;  %p17439_p0 = scmp.lt.s32.totalorder %s265_s28, %s265_s28 }
  0x6f   : > { %p17432_p11 = scmp.ne.s32.totalorder %s265_s28, %s17431_s29  ;;  %p17440_p2 = scmp.lt.s32.totalorder %s17431_s29, %s17431_s29 }
  0x71   : > { %p17434_p12 = pnand %p17432_p11, %p17732_p8  ;;  %p17441_p1 = por %p17440_p2, %p17439_p0 }
  0x73   : > { %p17435_p13 = pneg %p17434_p12 }
  0x75   : > { %p17442_p3 = pnand %p17441_p1, %p17435_p13 }
  0x77   : > { %17445 = shalt.err (!%p17442_p3)
}
  0x78   : > { %s17630_s10 = smov 512   ;;  %s17631_s19 = smov 32  }
  0x79   : > { %16642 = dma.hbm_to_vmem [thread:$0]  (!%p17718_p6), %s19685_s5, 24576, %s265_s28, [#allocation13], %s17630_s10, %s17630_s10, %s17631_s19  }
  0x7a   : > { %s17632_s12 = smov [#allocation15]   ;;  %s17446_s13 = scalar_lea.hbm %s19625_s6, 24576 }
  0x7b   : > { %s277_s14 = sshll.u32 %s17632_s12, 4  ;;  %p17447_p1 = scmp.ne.s32.totalorder %s19625_s6, %s17446_s13  ;;  %s278_s14 = int_to_ptr.vmem [resolvable:$true] %s277_s14 }
  0x7c   : > { %p17453_p7 = scmp.lt.u32.totalorder %s17446_s13, %s19625_s6 }
  0x7d   : > { %p17449_p3 = pnand %p17447_p1, %p17732_p8 }
  0x7f   : > { %p17450_p5 = pneg %p17449_p3 }
  0x81   : > { %p17455_p9 = pnand %p17453_p7, %p17450_p5 }
  0x83   : > { %17458 = shalt.err (!%p17455_p9)
}
  0x84   : > { %s17459_s28 = scalar_lea.vmem %s278_s14, 24576  ;;  %p17467_p12 = scmp.lt.s32.totalorder %s278_s14, %s278_s14 }
  0x85   : > { %p17460_p4 = scmp.ne.s32.totalorder %s278_s14, %s17459_s28  ;;  %p17468_p13 = scmp.lt.s32.totalorder %s17459_s28, %s17459_s28 }
  0x87   : > { %p17462_p10 = pnand %p17460_p4, %p17732_p8  ;;  %p17469_p0 = por %p17468_p13, %p17467_p12 }
  0x89   : > { %p17463_p11 = pneg %p17462_p10 }
  0x8b   : > { %p17470_p2 = pnand %p17469_p0, %p17463_p11 }
  0x8d   : > { %17473 = shalt.err (!%p17470_p2)
}
  0x8e   : > { %s17633_s10 = smov 4   ;;  %s14295_s11 = sadd.s32 4294967294, %s17620_s27  }
  0x8f   : > { %16645 = dma.hbm_to_vmem [thread:$0]  (!%p17718_p6), %s19625_s6, 24576, %s278_s14, [#allocation16], %s17627_s20, %s17627_s20, %s17633_s10  }
  0x90   : > { %s17836_s17 = sadd.s32 1, %s17620_s27   ;;  %s57_s23 = sadd.s32 1, %s17616_s26 }
  0x91   : > { %s54_s19 = ssub.s32 %s17620_s27, %s17836_s17  ;;  %p64_p1 = scmp.ne.s32.totalorder %s17616_s26, %s17612_s25 }
  0x92   : > { %p55_p8 = scmp.eq.s32.totalorder %s54_s19, 0  ;;  %p65_p3 = scmp.eq.s32.totalorder %s17620_s27, 0 }
  0x93   : > { %p70_p5 = scmp.ne.s32.totalorder %s17612_s25, %s17608_s24  ;;  %p19686_p9 = scmp.eq.s32.totalorder %s17702_s30, 0 }
  0x94   : > { %s17847_s9 = scalar_select %p55_p8, %s17616_s26, %s57_s23  }
  0x95   : > { %p66_p7 = por %p65_p3, %p64_p1  ;;  %p17851_p4 = por %p19686_p9, %p70_p5 }
  0x96   : > { %p204_p6 = scmp.eq.s32.totalorder %s17702_s30, 1  ;;  %p210_p10 = scmp.eq.s32.totalorder %s14295_s11, 1 }
  0x97   : > { %p16662_p11 = scmp.lt.s32.totalorder %s17620_s27, 2  ;;  %s17858_s20 = sand.u32 1, %s17616_s26  }
  0x98   : > { %p17860_p12 = por %p204_p6, %p64_p1  ;;  %p17864_p13 = por %p210_p10, %p70_p5 }
  0x99   : > { %s16597_s16 = smul.u32 24, %s17858_s20  ;;  %p17870_p0 = pnand %p16662_p11, %p66_p7 }
  0x9a   : > { %s19688_s14 = scalar_select %p17860_p12, 1, 0 }
  0x9b   : > { %s19689_s15 = scalar_select %p17864_p13, 1, 0 }
  0x9c   : > { %s16598_s13 = smul.u32 384, %s17620_s27  ;;  %s19691_s1 = sld [smem:[#allocation44_spill]] }
  0x9d   : > { %s295_s22 = scalar_lea.vmem [#allocation8], %s16597_s16  ;;  %s292_s19 = scalar_lea.sflag [#allocation5], %s17858_s20 }
  0x9e   : > { %s302_s11 = sshll.u32 %s295_s22, 4  ;;  %p17476_p8 = pneg %p17870_p0  ;;  %s17880_s11 = int_to_ptr.vmem [resolvable:$true] %s302_s11 }
  0xa2   : > { %s17878_s21 = scalar_lea.hbm %s19691_s1, %s16598_s13  ;;  %s17479_s10 = scalar_lea.hbm %s19691_s1, 768 }
  0xa3   : > { %s17474_s23 = scalar_lea.hbm %s17878_s21, 384  ;;  %p17480_p5 = scmp.lt.u32.totalorder %s17878_s21, %s19691_s1 }
  0xa4   : > { %p17475_p2 = scmp.ne.s32.totalorder %s17878_s21, %s17474_s23  ;;  %p17481_p7 = scmp.lt.u32.totalorder %s17479_s10, %s17474_s23 }
  0xa5   : > { %p17483_p6 = scmp.lt.u32.totalorder %s17474_s23, %s17878_s21 }
  0xa6   : > { %p17477_p1 = pnand %p17476_p8, %p17475_p2  ;;  %p17482_p9 = por %p17481_p7, %p17480_p5 }
  0xa8   : > { %p17478_p3 = pneg %p17477_p1  ;;  %p17484_p10 = por %p17483_p6, %p17482_p9 }
  0xaa   : > { %p17485_p11 = pnand %p17484_p10, %p17478_p3 }
  0xac   : > { %17488 = shalt.err (!%p17485_p11)
}
  0xad   : > { %s17489_s16 = scalar_lea.vmem %s17880_s11, 384  ;;  %s17634_s22 = smov [#allocation8]  }
  0xae   : > { %p17490_p2 = scmp.ne.s32.totalorder %s17880_s11, %s17489_s16  ;;  %s17494_s28 = sshll.u32 %s17634_s22, 4  ;;  %s17495_s28 = int_to_ptr.vmem [resolvable:$false] %s17494_s28 }
  0xaf   : > { %s17496_s0 = scalar_lea.vmem %s17495_s28, 768  ;;  %p17497_p12 = scmp.lt.s32.totalorder %s17880_s11, %s17495_s28 }
  0xb0   : > { %p17492_p1 = pnand %p17490_p2, %p17476_p8  ;;  %p17498_p5 = scmp.lt.s32.totalorder %s17496_s0, %s17489_s16 }
  0xb2   : > { %p17493_p13 = pneg %p17492_p1  ;;  %p17499_p7 = por %p17498_p5, %p17497_p12 }
  0xb4   : > { %p17500_p9 = pnand %p17499_p7, %p17493_p13 }
  0xb6   : > { %17503 = shalt.err (!%p17500_p9)
}
  0xb7   : > { %s19692_s29 = smov 8   ;;  %s19693_s23 = smov 128  }
  0xb8   : > { %16649 = dma.hbm_to_vmem [thread:$0]  (!%p17870_p0), %s17878_s21, 384, %s17880_s11, %s292_s19, %s19693_s23, %s19693_s23, %s19692_s29  }
  0xb9   : > { %s16599_s13 = smul.u32 72, %s17858_s20  ;;  %s19694_s3 = sand.u32 1, %s17620_s27  }
  0xba   : > { %s16600_s10 = smul.u32 1152, %s17620_s27  ;;  %s17924_s4 = scalar_lea.sflag [#allocation10], %s19694_s3 }
  0xbb   : > { %s316_s0 = scalar_lea.vmem [#allocation9], %s16599_s13  ;;  %s17509_s11 = scalar_lea.hbm %s19621_s2, 2304 }
  0xbc   : > { %s17918_s28 = scalar_lea.hbm %s19621_s2, %s16600_s10  ;;  %s323_s1 = sshll.u32 %s316_s0, 4  ;;  %s17920_s1 = int_to_ptr.vmem [resolvable:$true] %s323_s1 }
  0xbd   : > { %s17504_s5 = scalar_lea.hbm %s17918_s28, 1152  ;;  %p17510_p6 = scmp.lt.u32.totalorder %s17918_s28, %s19621_s2 }
  0xbe   : > { %p17505_p12 = scmp.ne.s32.totalorder %s17918_s28, %s17504_s5  ;;  %p17511_p10 = scmp.lt.u32.totalorder %s17509_s11, %s17504_s5 }
  0xbf   : > { %p17513_p2 = scmp.lt.u32.totalorder %s17504_s5, %s17918_s28 }
  0xc0   : > { %p17507_p13 = pnand %p17505_p12, %p17476_p8  ;;  %p17512_p11 = por %p17511_p10, %p17510_p6 }
  0xc2   : > { %p17508_p3 = pneg %p17507_p13  ;;  %p17514_p1 = por %p17513_p2, %p17512_p11 }
  0xc4   : > { %p17515_p5 = pnand %p17514_p1, %p17508_p3 }
  0xc6   : > { %17518 = shalt.err (!%p17515_p5)
}
  0xc7   : > { %s17519_s3 = scalar_lea.vmem %s17920_s1, 1152  ;;  %s17635_s13 = smov [#allocation9]  }
  0xc8   : > { %p17520_p7 = scmp.ne.s32.totalorder %s17920_s1, %s17519_s3  ;;  %s17524_s16 = sshll.u32 %s17635_s13, 4  ;;  %s17525_s16 = int_to_ptr.vmem [resolvable:$false] %s17524_s16 }
  0xc9   : > { %s17526_s22 = scalar_lea.vmem %s17525_s16, 2304  ;;  %p17527_p13 = scmp.lt.s32.totalorder %s17920_s1, %s17525_s16 }
  0xca   : > { %p17522_p9 = pnand %p17520_p7, %p17476_p8  ;;  %p17528_p6 = scmp.lt.s32.totalorder %s17526_s22, %s17519_s3 }
  0xcc   : > { %p17523_p12 = pneg %p17522_p9  ;;  %p17529_p10 = por %p17528_p6, %p17527_p13 }
  0xce   : > { %p17530_p11 = pnand %p17529_p10, %p17523_p12 }
  0xd0   : > { %17533 = shalt.err (!%p17530_p11)
}
  0xd1   : > { %16652 = dma.hbm_to_vmem [thread:$0]  (!%p17870_p0), %s17918_s28, 1152, %s17920_s1, %s17924_s4, %s19693_s23, %s19693_s23, %s19692_s29  }
  0xd2   : > { %p19695_p8 = scmp.ne.s32.totalorder %s19679_s8, 0 }
  0xd4   : > { %335 = sbr.rel (%p19695_p8) target bundleno = 2576 (0xa10), region = 48 }
  0xdb   : > { %p19696_p3 = scmp.eq.s32.totalorder %s17702_s30, 0 }
  0xdd   : > { %17579 = dma.done.wait (%p19696_p3), [#allocation7], 64   ;;  %p19697_p2 = pmov %p19696_p3 }
  0xde   : > { %s17960_s5 = sand.u32 1, %s17612_s25  }
  0xdf   : > { %17581 = vsyncadd (%p19697_p2), [#allocation7], 4294967232  ;;  %s16601_s18 = smul.u32 24, %s17960_s5  ;;  %s342_s0 = scalar_lea.sflag [#allocation5], %s17960_s5 }
  0xe1   : > { %s17966_s1 = scalar_lea.vmem [#allocation8], %s16601_s18 }
  0xe2   : > { %17583 = dma.done.wait (%p17851_p4), %s342_s0, 384  }
  0xe3   : > { %17585 = vsyncadd (%p17851_p4), %s342_s0, 4294966912  ;;  %s350_s4 = sand.u32 1, %s17702_s30   ;;  %s16602_s8 = smul.u32 72, %s17960_s5 }
  0xe4   : > { %s351_s29 = scalar_lea.sflag [#allocation10], %s350_s4 }
  0xe5   : > { %s17974_s23 = scalar_lea.vmem [#allocation9], %s16602_s8 }
  0xe6   : > { %17587 = dma.done.wait (%p17851_p4), %s351_s29, 1152  }
  0xe7   : > { %17589 = vsyncadd (%p17851_p4), %s351_s29, 4294966144  ;;  %p19698_p0 = pmov %p19697_p2 }
  0xe9   : > { %17591 = dma.done.wait (%p19698_p0), [#allocation10], 512   ;;  %p19699_p1 = pmov %p19698_p0 }
  0xea   : > { %p19700_p5 = pmov %p19698_p0 }
  0xeb   : > { %17593 = vsyncadd (%p19699_p1), [#allocation10], 4294966784 }
  0xec   : > { %17595 = dma.done.wait (%p19700_p5), [#allocation13], 28672   ;;  %p19701_p7 = pmov %p19698_p0 }
  0xed   : > { %p19702_p9 = pmov %p19698_p0 }
  0xee   : > { %17597 = vsyncadd (%p19701_p7), [#allocation13], 4294938624 }
  0xef   : > { %17599 = dma.done.wait (%p19702_p9), [#allocation16], 24576   ;;  %p19703_p12 = pmov %p19698_p0 }
  0xf1   : > { %17601 = vsyncadd (%p19703_p12), [#allocation16], 4294942720 }
  0xf2   : > { %375 = sfence }
  0xf3   : > { %v569_v0 = vld [vmem:[#allocation14 + $0x200] sm:$0xff]  ;;  %v570_v2 = vld [vmem:[#allocation14 + $0x208] sm:$0xff]  ;;  %v19634_v8 = vmov 0   ;;  %s17994_s12 = sld [smem:[#allocation4 + $0x3]]  ;;  %v17637_v15 = vmov 0.0   ;;  %s17996_s28 = sld [smem:[#allocation4]] }
  0xf4   : > { %v573_v1 = vld [vmem:[#allocation14 + $0x220] sm:$0xff]  ;;  %v574_v4 = vld [vmem:[#allocation14 + $0x228] sm:$0xff]  ;;  %985 = vmatprep.mubr.bf16.mxu0 %v19634_v8  ;;  %1036 = vmatprep.mubr.bf16.mxu1 %v19634_v8  ;;  %408 = vst [vmem:[#allocation2] sm:$0xff] %v17637_v15  ;;  %409 = vst [vmem:[#allocation2 + $0x20] sm:$0xff] %v17637_v15  ;;  %s14314_s20 = sld [smem:[#allocation4 + $0x4]]  ;;  %s14312_s21 = sld [smem:[#allocation4 + $0x2]] }
  0xf5   : > { %v14318_v3 = vcombine.high %v569_v0, %v573_v1  ;;  %v14317_v5 = vcombine.low %v569_v0, %v573_v1  ;;  %v577_v6 = vld [vmem:[#allocation14 + $0x240] sm:$0xff]  ;;  %v14320_v9 = vcombine.high %v570_v2, %v574_v4  ;;  %v14319_v10 = vcombine.low %v570_v2, %v574_v4  ;;  %v578_v12 = vld [vmem:[#allocation14 + $0x248] sm:$0xff]  ;;  %410 = vst [vmem:[#allocation3] sm:$0xff] %v17637_v15  ;;  %v472_v39 = vld [vmem:[%s17974_s23] sm:$0xff]  ;;  %s14311_s11 = sld [smem:[#allocation4 + $0x1]]  ;;  %s14315_s19 = sld [smem:[#allocation4 + $0x5]] }
  0xf6   : > { %v581_v7 = vld [vmem:[#allocation14 + $0x260] sm:$0xff]  ;;  %v582_v13 = vld [vmem:[#allocation14 + $0x268] sm:$0xff]  ;;  %411 = vst [vmem:[#allocation3 + $0x8] sm:$0xff] %v17637_v15  ;;  %412 = vst [vmem:[#allocation3 + $0x10] sm:$0xff] %v17637_v15  ;;  %vm3451_vm0 = vsmask.f32 4352 }
  0xf7   : > { %v14326_v11 = vcombine.high %v577_v6, %v581_v7  ;;  %v585_v14 = vld [vmem:[#allocation14 + $0x280] sm:$0xff]  ;;  %413 = vst [vmem:[#allocation3 + $0x18] sm:$0xff] %v17637_v15  ;;  %414 = vst [vmem:[#allocation3 + $0x20] sm:$0xff] %v17637_v15  ;;  %953 = vmatprep.subr.bf16.mxu0 %v14318_v3  ;;  %v14328_v16 = vcombine.high %v578_v12, %v582_v13  ;;  %v586_v18 = vld [vmem:[#allocation14 + $0x288] sm:$0xff]  ;;  %1004 = vmatprep.subr.bf16.mxu1 %v14320_v9  ;;  %vm4309_vm1 = vsmask.f32 7424 }
  0xf8   : > { %415 = vst [vmem:[#allocation3 + $0x28] sm:$0xff] %v17637_v15  ;;  %416 = vst [vmem:[#allocation3 + $0x30] sm:$0xff] %v17637_v15  ;;  %v589_v17 = vld [vmem:[#allocation14 + $0x2a0] sm:$0xff]  ;;  %v590_v19 = vld [vmem:[#allocation14 + $0x2a8] sm:$0xff]  ;;  %954 = vmatpush1.bf16.msra.mxu0 %v14317_v5  ;;  %v14325_v20 = vcombine.low %v577_v6, %v581_v7  ;;  %1005 = vmatpush1.bf16.msra.mxu1 %v14319_v10  ;;  %v14327_v21 = vcombine.low %v578_v12, %v582_v13  ;;  %s14705_s10 = sld [smem:[#allocation4 + $0x83]]  ;;  %s14316_s3 = sld [smem:[#allocation4 + $0x6]] }
  0xf9   : > { %417 = vst [vmem:[#allocation3 + $0x38] sm:$0xff] %v17637_v15  ;;  %418 = vst [vmem:[#allocation3 + $0x100] sm:$0xff] %v17637_v15  ;;  %955 = vmatprep.subr.bf16.mxu0 %v14326_v11  ;;  %v14334_v22 = vcombine.high %v585_v14, %v589_v17  ;;  %1006 = vmatprep.subr.bf16.mxu1 %v14328_v16  ;;  %v14336_v23 = vcombine.high %v586_v18, %v590_v19  ;;  %v593_v24 = vld [vmem:[#allocation14 + $0x2c0] sm:$0xff]  ;;  %v594_v26 = vld [vmem:[#allocation14 + $0x2c8] sm:$0xff]  ;;  %v475_v34 = vstv %s17994_s12  ;;  %s14702_s13 = sld [smem:[#allocation4 + $0x80]]  ;;  %s14706_s16 = sld [smem:[#allocation4 + $0x84]] }
  0xfa   : > { %419 = vst [vmem:[#allocation3 + $0x108] sm:$0xff] %v17637_v15  ;;  %420 = vst [vmem:[#allocation3 + $0x110] sm:$0xff] %v17637_v15  ;;  %v597_v25 = vld [vmem:[#allocation14 + $0x2e0] sm:$0xff]  ;;  %v598_v27 = vld [vmem:[#allocation14 + $0x2e8] sm:$0xff]  ;;  %v14333_v28 = vcombine.low %v585_v14, %v589_v17  ;;  %v14335_v29 = vcombine.low %v586_v18, %v590_v19  ;;  %v476_v44 = vmul.f32 %v475_v34, %v472_v39  ;;  %v482_v49 = vstv %s17996_s28  ;;  %s14703_s22 = sld [smem:[#allocation4 + $0x81]]  ;;  %s14704_s0 = sld [smem:[#allocation4 + $0x82]] }
  0xfb   : > { %421 = vst [vmem:[#allocation3 + $0x118] sm:$0xff] %v17637_v15  ;;  %422 = vst [vmem:[#allocation3 + $0x120] sm:$0xff] %v17637_v15  ;;  %v14342_v30 = vcombine.high %v593_v24, %v597_v25  ;;  %v14344_v31 = vcombine.high %v594_v26, %v598_v27  ;;  %v601_v32 = vld [vmem:[#allocation14 + $0x300] sm:$0xff]  ;;  %v602_v35 = vld [vmem:[#allocation14 + $0x308] sm:$0xff]  ;;  %v14341_v37 = vcombine.low %v593_v24, %v597_v25  ;;  %s14708_s4 = sld [smem:[#allocation4 + $0x86]]  ;;  %s19098_s8 = sld [smem:[#allocation4 + $0x103]] }
  0xfc   : > { %423 = vst [vmem:[#allocation3 + $0x128] sm:$0xff] %v17637_v15  ;;  %424 = vst [vmem:[#allocation3 + $0x130] sm:$0xff] %v17637_v15  ;;  %956 = vmatpush1.bf16.msra.mxu0 %v14325_v20  ;;  %1007 = vmatpush1.bf16.msra.mxu1 %v14327_v21  ;;  %v605_v33 = vld [vmem:[#allocation14 + $0x320] sm:$0xff]  ;;  %v606_v36 = vld [vmem:[#allocation14 + $0x328] sm:$0xff]  ;;  %v14343_v40 = vcombine.low %v594_v26, %v598_v27  ;;  %s15096_s29 = sld [smem:[#allocation4 + $0x100]]  ;;  %s15097_s12 = sld [smem:[#allocation4 + $0x101]] }
  0xfd   : > { %425 = vst [vmem:[#allocation3 + $0x138] sm:$0xff] %v17637_v15  ;;  %957 = vmatprep.subr.bf16.mxu0 %v14334_v22  ;;  %1008 = vmatprep.subr.bf16.mxu1 %v14336_v23  ;;  %v462_v38 = vld [vmem:[%s17966_s1] sm:$0xff]  ;;  %v14350_v41 = vcombine.high %v601_v32, %v605_v33  ;;  %v463_v42 = vld [vmem:[%s17966_s1 + $0x8] sm:$0xff]  ;;  %v14352_v45 = vcombine.high %v602_v35, %v606_v36  ;;  %v464_v1 = vld [vmem:[%s17966_s1 + $0x10] sm:$0xff]  ;;  %s14707_s1 = sld [smem:[#allocation4 + $0x85]]  ;;  %s15098_s28 = sld [smem:[#allocation4 + $0x102]] }
  0xfe   : > { %v473_v43 = vld [vmem:[%s17974_s23 + $0x8] sm:$0xff]  ;;  %v610_v50 = vld [vmem:[#allocation14 + $0x348] sm:$0xff]  ;;  %v18004_v52 = vadd.f32 %v476_v44, %v462_v38  ;;  %v14349_v53 = vcombine.low %v601_v32, %v605_v33  ;;  %v14351_v55 = vcombine.low %v602_v35, %v606_v36  ;;  %v571_v18 = vld [vmem:[#allocation14 + $0x210] sm:$0xff]  ;;  %p19771_p13 = scmp.ne.s32.totalorder %s19688_s14, 0 }
  0xff   : > { %v609_v46 = vld [vmem:[#allocation14 + $0x340] sm:$0xff]  ;;  %v477_v48 = vmul.f32 %v475_v34, %v473_v43  ;;  %v614_v51 = vld [vmem:[#allocation14 + $0x368] sm:$0xff]  ;;  %v575_v19 = vld [vmem:[#allocation14 + $0x230] sm:$0xff] }
 0x100   : > { %958 = vmatpush1.bf16.msra.mxu0 %v14333_v28  ;;  %1009 = vmatpush1.bf16.msra.mxu1 %v14335_v29  ;;  %v613_v47 = vld [vmem:[#allocation14 + $0x360] sm:$0xff]  ;;  %v483_v57 = vmul.f32 %v482_v49, %v18004_v52  ;;  %v14360_v58 = vcombine.high %v610_v50, %v614_v51  ;;  %v618_v62 = vld [vmem:[#allocation14 + $0x388] sm:$0xff]  ;;  %v14359_v3 = vcombine.low %v610_v50, %v614_v51  ;;  %v572_v20 = vld [vmem:[#allocation14 + $0x218] sm:$0xff] }
 0x101   : > { %959 = vmatprep.subr.bf16.mxu0 %v14342_v30  ;;  %1010 = vmatprep.subr.bf16.mxu1 %v14344_v31  ;;  %v18006_v54 = vadd.f32 %v477_v48, %v463_v42  ;;  %v14358_v56 = vcombine.high %v609_v46, %v613_v47  ;;  %v617_v59 = vld [vmem:[#allocation14 + $0x380] sm:$0xff]  ;;  %v622_v63 = vld [vmem:[#allocation14 + $0x3a8] sm:$0xff]  ;;  %v14357_v0 = vcombine.low %v609_v46, %v613_v47  ;;  %v576_v21 = vld [vmem:[#allocation14 + $0x238] sm:$0xff] }
 0x102   : > { %v621_v60 = vld [vmem:[#allocation14 + $0x3a0] sm:$0xff]  ;;  %486 = vst [vmem:[#allocation2 + $0x8] sm:$0xff] %v483_v57  ;;  %v14368_v6 = vcombine.high %v618_v62, %v622_v63  ;;  %v626_v10 = vld [vmem:[#allocation14 + $0x3c8] sm:$0xff]  ;;  %v14367_v14 = vcombine.low %v618_v62, %v622_v63  ;;  %v14322_v24 = vcombine.high %v571_v18, %v575_v19  ;;  %v14324_v25 = vcombine.high %v572_v20, %v576_v21  ;;  %v579_v26 = vld [vmem:[#allocation14 + $0x250] sm:$0xff] }
 0x103   : > { %v484_v61 = vmul.f32 %v482_v49, %v18006_v54  ;;  %v474_v2 = vld [vmem:[%s17974_s23 + $0x10] sm:$0xff]  ;;  %v14366_v4 = vcombine.high %v617_v59, %v621_v60  ;;  %v14365_v13 = vcombine.low %v617_v59, %v621_v60  ;;  %v583_v27 = vld [vmem:[#allocation14 + $0x270] sm:$0xff]  ;;  %v580_v29 = vld [vmem:[#allocation14 + $0x258] sm:$0xff]  ;;  %v14321_v31 = vcombine.low %v571_v18, %v575_v19 }
 0x104   : > { %960 = vmatpush1.bf16.msra.mxu0 %v14341_v37  ;;  %1011 = vmatpush1.bf16.msra.mxu1 %v14343_v40  ;;  %v478_v5 = vmul.f32 %v475_v34, %v474_v2  ;;  %v625_v7 = vld [vmem:[#allocation14 + $0x3c0] sm:$0xff]  ;;  %v630_v11 = vld [vmem:[#allocation14 + $0x3e8] sm:$0xff]  ;;  %v584_v30 = vld [vmem:[#allocation14 + $0x278] sm:$0xff]  ;;  %v14323_v32 = vcombine.low %v572_v20, %v576_v21  ;;  %v14330_v33 = vcombine.high %v579_v26, %v583_v27 }
 0x105   : > { %961 = vmatprep.subr.bf16.mxu0 %v14350_v41  ;;  %1012 = vmatprep.subr.bf16.mxu1 %v14352_v45  ;;  %487 = vst [vmem:[#allocation2 + $0x10] sm:$0xff] %v484_v61  ;;  %v629_v9 = vld [vmem:[#allocation14 + $0x3e0] sm:$0xff]  ;;  %v14376_v17 = vcombine.high %v626_v10, %v630_v11  ;;  %v14375_v23 = vcombine.low %v626_v10, %v630_v11  ;;  %v587_v35 = vld [vmem:[#allocation14 + $0x290] sm:$0xff]  ;;  %v588_v37 = vld [vmem:[#allocation14 + $0x298] sm:$0xff] }
 0x106   : > { %v18012_v12 = vadd.f32 %v478_v5, %v464_v1  ;;  %v14374_v15 = vcombine.high %v625_v7, %v629_v9  ;;  %v14373_v22 = vcombine.low %v625_v7, %v629_v9  ;;  %v18015_v28 = vpack.c.bf16 %v484_v61, %v483_v57  ;;  %v591_v36 = vld [vmem:[#allocation14 + $0x2b0] sm:$0xff]  ;;  %v592_v38 = vld [vmem:[#allocation14 + $0x2b8] sm:$0xff] }
 0x107   : > { %v14332_v34 = vcombine.high %v580_v29, %v584_v30  ;;  %v14329_v39 = vcombine.low %v579_v26, %v583_v27  ;;  %v14331_v40 = vcombine.low %v580_v29, %v584_v30  ;;  %v14338_v41 = vcombine.high %v587_v35, %v591_v36  ;;  %v595_v43 = vld [vmem:[#allocation14 + $0x2d0] sm:$0xff]  ;;  %v596_v45 = vld [vmem:[#allocation14 + $0x2d8] sm:$0xff]  ;;  %v505_v26 = vld [vmem:[#allocation14 + $0x8] sm:$0xff] }
 0x108   : > { %962 = vmatpush1.bf16.msra.mxu0 %v14349_v53  ;;  %1013 = vmatpush1.bf16.msra.mxu1 %v14351_v55  ;;  %19704 = vst [vmem:[#allocation25_spill] sm:$0xff] %v18012_v12  ;;  %v485_v16 = vmul.f32 %v482_v49, %v18012_v12  ;;  %v14340_v42 = vcombine.high %v588_v37, %v592_v38  ;;  %v599_v44 = vld [vmem:[#allocation14 + $0x2f0] sm:$0xff]  ;;  %v600_v46 = vld [vmem:[#allocation14 + $0x2f8] sm:$0xff]  ;;  %v509_v27 = vld [vmem:[#allocation14 + $0x28] sm:$0xff] }
 0x109   : > { %963 = vmatprep.subr.bf16.mxu0 %v14358_v56  ;;  %1014 = vmatprep.subr.bf16.mxu1 %v14360_v58  ;;  %v14337_v48 = vcombine.low %v587_v35, %v591_v36  ;;  %v14339_v49 = vcombine.low %v588_v37, %v592_v38  ;;  %v14346_v50 = vcombine.high %v595_v43, %v599_v44  ;;  %v603_v53 = vld [vmem:[#allocation14 + $0x310] sm:$0xff]  ;;  %v604_v56 = vld [vmem:[#allocation14 + $0x318] sm:$0xff]  ;;  %v513_v35 = vld [vmem:[#allocation14 + $0x48] sm:$0xff] }
 0x10a   : > { %488 = vst [vmem:[#allocation2 + $0x18] sm:$0xff] %v485_v16  ;;  %v18020_v47 = vpack.c.bf16 %v485_v16, %v485_v16  ;;  %v14348_v51 = vcombine.high %v596_v45, %v600_v46  ;;  %v607_v55 = vld [vmem:[#allocation14 + $0x330] sm:$0xff]  ;;  %v608_v57 = vld [vmem:[#allocation14 + $0x338] sm:$0xff]  ;;  %v14345_v58 = vcombine.low %v595_v43, %v599_v44  ;;  %v14347_v59 = vcombine.low %v596_v45, %v600_v46  ;;  %v517_v36 = vld [vmem:[#allocation14 + $0x68] sm:$0xff] }
 0x10b   : > { %v14354_v60 = vcombine.high %v603_v53, %v607_v55  ;;  %v14356_v61 = vcombine.high %v604_v56, %v608_v57  ;;  %v611_v62 = vld [vmem:[#allocation14 + $0x350] sm:$0xff]  ;;  %v616_v1 = vld [vmem:[#allocation14 + $0x378] sm:$0xff]  ;;  %v14353_v2 = vcombine.low %v603_v53, %v607_v55  ;;  %v14383_v38 = vcombine.low %v505_v26, %v509_v27  ;;  %v521_v43 = vld [vmem:[#allocation14 + $0x88] sm:$0xff] }
 0x10c   : > { %964 = vmatpush1.bf16.msra.mxu0 %v14357_v0  ;;  %1015 = vmatpush1.bf16.msra.mxu1 %v14359_v3  ;;  %v615_v63 = vld [vmem:[#allocation14 + $0x370] sm:$0xff]  ;;  %v612_v0 = vld [vmem:[#allocation14 + $0x358] sm:$0xff]  ;;  %v14355_v3 = vcombine.low %v604_v56, %v608_v57  ;;  %v525_v44 = vld [vmem:[#allocation14 + $0xa8] sm:$0xff] }
 0x10d   : > { %965 = vmatprep.subr.bf16.mxu0 %v14366_v4  ;;  %1016 = vmatprep.subr.bf16.mxu1 %v14368_v6  ;;  %v14362_v4 = vcombine.high %v611_v62, %v615_v63  ;;  %v14364_v5 = vcombine.high %v612_v0, %v616_v1  ;;  %v619_v6 = vld [vmem:[#allocation14 + $0x390] sm:$0xff]  ;;  %v620_v9 = vld [vmem:[#allocation14 + $0x398] sm:$0xff]  ;;  %v14361_v11 = vcombine.low %v611_v62, %v615_v63  ;;  %v528_v46 = vld [vmem:[#allocation14 + $0xc0] sm:$0xff] }
 0x10e   : > { %v623_v7 = vld [vmem:[#allocation14 + $0x3b0] sm:$0xff]  ;;  %v624_v10 = vld [vmem:[#allocation14 + $0x3b8] sm:$0xff]  ;;  %v533_v53 = vld [vmem:[#allocation14 + $0xe8] sm:$0xff]  ;;  %v14400_v55 = vcombine.high %v521_v43, %v525_v44 }
 0x10f   : > { %v627_v16 = vld [vmem:[#allocation14 + $0x3d0] sm:$0xff]  ;;  %v628_v18 = vld [vmem:[#allocation14 + $0x3d8] sm:$0xff]  ;;  %v14369_v20 = vcombine.low %v619_v6, %v623_v7  ;;  %v14371_v21 = vcombine.low %v620_v9, %v624_v10  ;;  %v536_v57 = vld [vmem:[#allocation14 + $0x100] sm:$0xff] }
 0x110   : > { %966 = vmatpush1.bf16.msra.mxu0 %v14365_v13  ;;  %1017 = vmatpush1.bf16.msra.mxu1 %v14367_v14  ;;  %v14363_v13 = vcombine.low %v612_v0, %v616_v1  ;;  %v14370_v14 = vcombine.high %v619_v6, %v623_v7  ;;  %v632_v19 = vld [vmem:[#allocation14 + $0x3f8] sm:$0xff]  ;;  %v544_v0 = vld [vmem:[#allocation14 + $0x140] sm:$0xff] }
 0x111   : > { %967 = vmatprep.subr.bf16.mxu0 %v14374_v15  ;;  %1018 = vmatprep.subr.bf16.mxu1 %v14376_v17  ;;  %v14372_v15 = vcombine.high %v620_v9, %v624_v10  ;;  %v631_v17 = vld [vmem:[#allocation14 + $0x3f0] sm:$0xff]  ;;  %v14379_v30 = vcombine.low %v628_v18, %v632_v19  ;;  %v548_v1 = vld [vmem:[#allocation14 + $0x160] sm:$0xff] }
 0x112   : > { %v14377_v29 = vcombine.low %v627_v16, %v631_v17  ;;  %v552_v9 = vld [vmem:[#allocation14 + $0x180] sm:$0xff] }
 0x113   : > { %v556_v10 = vld [vmem:[#allocation14 + $0x1a0] sm:$0xff] }
 0x114   : > { %968 = vmatpush1.bf16.msra.mxu0 %v14373_v22  ;;  %1019 = vmatpush1.bf16.msra.mxu1 %v14375_v23  ;;  %v14378_v22 = vcombine.high %v627_v16, %v631_v17  ;;  %v14380_v23 = vcombine.high %v628_v18, %v632_v19  ;;  %v14421_v16 = vcombine.low %v544_v0, %v548_v1  ;;  %v560_v17 = vld [vmem:[#allocation14 + $0x1c0] sm:$0xff] }
 0x115   : > { %1055 = vmatprep.subr.bf16.mxu0 %v14322_v24  ;;  %1106 = vmatprep.subr.bf16.mxu1 %v14324_v25  ;;  %v504_v24 = vld [vmem:[#allocation14] sm:$0xff] }
 0x116   : > { %v508_v25 = vld [vmem:[#allocation14 + $0x20] sm:$0xff] }
 0x117   : > { %986 = vmatmul.mubr.bf16.vlgmr.msra.gmra.mrb[0].mxu0 %v18015_v28  ;;  %1037 = vmatmul.mubr.bf16.vlgmr.msra.gmra.mrb[0].mxu1 %v18015_v28  ;;  %v14381_v37 = vcombine.low %v504_v24, %v508_v25  ;;  %v564_v18 = vld [vmem:[#allocation14 + $0x1e0] sm:$0xff] }
 0x118   : > { %1056 = vmatpush1.bf16.msra.mxu0 %v14321_v31  ;;  %1107 = vmatpush1.bf16.msra.mxu1 %v14323_v32  ;;  %v14382_v31 = vcombine.high %v504_v24, %v508_v25  ;;  %v14384_v32 = vcombine.high %v505_v26, %v509_v27  ;;  %v14429_v24 = vcombine.low %v552_v9, %v556_v10  ;;  %v506_v25 = vld [vmem:[#allocation14 + $0x10] sm:$0xff] }
 0x119   : > { %1057 = vmatprep.subr.bf16.mxu0 %v14330_v33  ;;  %1108 = vmatprep.subr.bf16.mxu1 %v14332_v34  ;;  %v512_v33 = vld [vmem:[#allocation14 + $0x40] sm:$0xff]  ;;  %v510_v26 = vld [vmem:[#allocation14 + $0x30] sm:$0xff] }
 0x11a   : > { %995 = vmatprep.mubr.bf16.mxu0 %v19634_v8  ;;  %1046 = vmatprep.mubr.bf16.mxu1 %v19634_v8  ;;  %v516_v34 = vld [vmem:[#allocation14 + $0x60] sm:$0xff] }
 0x11b   : > { %v14389_v45 = vcombine.low %v512_v33, %v516_v34 }
 0x11c   : > { %1058 = vmatpush1.bf16.msra.mxu0 %v14329_v39  ;;  %1109 = vmatpush1.bf16.msra.mxu1 %v14331_v40  ;;  %v14390_v39 = vcombine.high %v512_v33, %v516_v34  ;;  %v14392_v40 = vcombine.high %v513_v35, %v517_v36  ;;  %v489_v33 = vld [vmem:[#allocation2 + $0x7] sm:$0xff]  ;;  %v490_v34 = vld [vmem:[#allocation2 + $0xf] sm:$0xff] }
 0x11d   : > { %1059 = vmatprep.subr.bf16.mxu0 %v14338_v41  ;;  %1110 = vmatprep.subr.bf16.mxu1 %v14340_v42  ;;  %v520_v41 = vld [vmem:[#allocation14 + $0x80] sm:$0xff] }
 0x11e   : > { %v524_v42 = vld [vmem:[#allocation14 + $0xa0] sm:$0xff] }
 0x11f   : > { %996 = vmatmul.mubr.bf16.gmra.mrb[4].mxu0 %v18020_v47  ;;  %1047 = vmatmul.mubr.bf16.gmra.mrb[4].mxu1 %v18020_v47  ;;  %v14397_v56 = vcombine.low %v520_v41, %v524_v42 }
 0x120   : > { %1060 = vmatpush1.bf16.msra.mxu0 %v14337_v48  ;;  %1111 = vmatpush1.bf16.msra.mxu1 %v14339_v49  ;;  %v532_v48 = vld [vmem:[#allocation14 + $0xe0] sm:$0xff]  ;;  %v14391_v49 = vcombine.low %v513_v35, %v517_v36  ;;  %v14437_v35 = vcombine.low %v560_v17, %v564_v18  ;;  %v514_v36 = vld [vmem:[#allocation14 + $0x50] sm:$0xff] }
 0x121   : > { %1061 = vmatprep.subr.bf16.mxu0 %v14346_v50  ;;  %1112 = vmatprep.subr.bf16.mxu1 %v14348_v51  ;;  %v14398_v50 = vcombine.high %v520_v41, %v524_v42  ;;  %v529_v51 = vld [vmem:[#allocation14 + $0xc8] sm:$0xff]  ;;  %v14405_v63 = vcombine.low %v528_v46, %v532_v48  ;;  %v519_v41 = vld [vmem:[#allocation14 + $0x78] sm:$0xff] }
 0x122   : > { %1087 = vmatprep.mubr.bf16.mxu0 %v19634_v8  ;;  %1138 = vmatprep.mubr.bf16.mxu1 %v19634_v8  ;;  %v14408_v62 = vcombine.high %v529_v51, %v533_v53 }
 0x124   : > { %1062 = vmatpush1.bf16.msra.mxu0 %v14345_v58  ;;  %1113 = vmatpush1.bf16.msra.mxu1 %v14347_v59  ;;  %v14399_v58 = vcombine.low %v521_v43, %v525_v44  ;;  %v14406_v59 = vcombine.high %v528_v46, %v532_v48  ;;  %v18035_v43 = vpack.c.bf16 %v490_v34, %v489_v33  ;;  %v526_v46 = vld [vmem:[#allocation14 + $0xb0] sm:$0xff] }
 0x125   : > { %1063 = vmatprep.subr.bf16.mxu0 %v14354_v60  ;;  %1114 = vmatprep.subr.bf16.mxu1 %v14356_v61  ;;  %v537_v60 = vld [vmem:[#allocation14 + $0x108] sm:$0xff]  ;;  %v14385_v44 = vcombine.low %v506_v25, %v510_v26 }
 0x126   : > { %v541_v61 = vld [vmem:[#allocation14 + $0x128] sm:$0xff] }
 0x127   : > { %v14416_v6 = vcombine.high %v537_v60, %v541_v61 }
 0x128   : > { %1064 = vmatpush1.bf16.msra.mxu0 %v14353_v2  ;;  %1115 = vmatpush1.bf16.msra.mxu1 %v14355_v3  ;;  %v14407_v2 = vcombine.low %v529_v51, %v533_v53  ;;  %v527_v51 = vld [vmem:[#allocation14 + $0xb8] sm:$0xff] }
 0x129   : > { %1065 = vmatprep.subr.bf16.mxu0 %v14362_v4  ;;  %1116 = vmatprep.subr.bf16.mxu1 %v14364_v5  ;;  %v545_v4 = vld [vmem:[#allocation14 + $0x148] sm:$0xff] }
 0x12a   : > { %v549_v5 = vld [vmem:[#allocation14 + $0x168] sm:$0xff] }
 0x12b   : > { %v14423_v19 = vcombine.low %v545_v4, %v549_v5 }
 0x12c   : > { %1066 = vmatpush1.bf16.msra.mxu0 %v14361_v11  ;;  %1117 = vmatpush1.bf16.msra.mxu1 %v14363_v13  ;;  %v14415_v11 = vcombine.low %v537_v60, %v541_v61  ;;  %v553_v13 = vld [vmem:[#allocation14 + $0x188] sm:$0xff]  ;;  %v531_v60 = vld [vmem:[#allocation14 + $0xd8] sm:$0xff] }
 0x12d   : > { %1067 = vmatprep.subr.bf16.mxu0 %v14370_v14  ;;  %1118 = vmatprep.subr.bf16.mxu1 %v14372_v15  ;;  %v557_v14 = vld [vmem:[#allocation14 + $0x1a8] sm:$0xff]  ;;  %v14424_v15 = vcombine.high %v545_v4, %v549_v5  ;;  %v535_v61 = vld [vmem:[#allocation14 + $0xf8] sm:$0xff] }
 0x12e   : > { %v14431_v27 = vcombine.low %v553_v13, %v557_v14  ;;  %v539_v5 = vld [vmem:[#allocation14 + $0x118] sm:$0xff] }
 0x130   : > { %1068 = vmatpush1.bf16.msra.mxu0 %v14369_v20  ;;  %1119 = vmatpush1.bf16.msra.mxu1 %v14371_v21  ;;  %v14430_v20 = vcombine.high %v552_v9, %v556_v10  ;;  %v561_v21 = vld [vmem:[#allocation14 + $0x1c8] sm:$0xff]  ;;  %v546_v10 = vld [vmem:[#allocation14 + $0x150] sm:$0xff] }
 0x131   : > { %1069 = vmatprep.subr.bf16.mxu0 %v14378_v22  ;;  %1120 = vmatprep.subr.bf16.mxu1 %v14380_v23  ;;  %v565_v22 = vld [vmem:[#allocation14 + $0x1e8] sm:$0xff]  ;;  %v14432_v23 = vcombine.high %v553_v13, %v557_v14  ;;  %v547_v14 = vld [vmem:[#allocation14 + $0x158] sm:$0xff] }
 0x134   : > { %1070 = vmatpush1.bf16.msra.mxu0 %v14377_v29  ;;  %1121 = vmatpush1.bf16.msra.mxu1 %v14379_v30  ;;  %v14438_v29 = vcombine.high %v560_v17, %v564_v18  ;;  %v507_v30 = vld [vmem:[#allocation14 + $0x18] sm:$0xff]  ;;  %v554_v18 = vld [vmem:[#allocation14 + $0x190] sm:$0xff] }
 0x135   : > { %1477 = vmatprep.subr.bf16.mxu0 %v14382_v31  ;;  %1528 = vmatprep.subr.bf16.mxu1 %v14384_v32  ;;  %v511_v31 = vld [vmem:[#allocation14 + $0x38] sm:$0xff]  ;;  %v14440_v32 = vcombine.high %v561_v21, %v565_v22 }
 0x136   : > { %v14388_v42 = vcombine.high %v507_v30, %v511_v31  ;;  %v14387_v48 = vcombine.low %v507_v30, %v511_v31  ;;  %v563_v31 = vld [vmem:[#allocation14 + $0x1d8] sm:$0xff] }
 0x137   : > { %1088 = vmatmul.mubr.bf16.vlgmr.msra.gmra.mrb[8].mxu0 %v18015_v28  ;;  %1139 = vmatmul.mubr.bf16.vlgmr.msra.gmra.mrb[8].mxu1 %v18015_v28  ;;  %v540_v28 = vld [vmem:[#allocation14 + $0x120] sm:$0xff] }
 0x138   : > { %1478 = vmatpush1.bf16.msra.mxu0 %v14381_v37  ;;  %1529 = vmatpush1.bf16.msra.mxu1 %v14383_v38  ;;  %v14414_v3 = vcombine.high %v536_v57, %v540_v28  ;;  %v14413_v7 = vcombine.low %v536_v57, %v540_v28  ;;  %v518_v37 = vld [vmem:[#allocation14 + $0x70] sm:$0xff]  ;;  %v14439_v38 = vcombine.low %v561_v21, %v565_v22  ;;  %v555_v22 = vld [vmem:[#allocation14 + $0x198] sm:$0xff] }
 0x139   : > { %1479 = vmatprep.subr.bf16.mxu0 %v14390_v39  ;;  %1530 = vmatprep.subr.bf16.mxu1 %v14392_v40  ;;  %v14386_v39 = vcombine.high %v506_v25, %v510_v26  ;;  %v515_v40 = vld [vmem:[#allocation14 + $0x58] sm:$0xff]  ;;  %v530_v57 = vld [vmem:[#allocation14 + $0xd0] sm:$0xff] }
 0x13a   : > { %1097 = vmatprep.mubr.bf16.mxu0 %v19634_v8  ;;  %1148 = vmatprep.mubr.bf16.mxu1 %v19634_v8  ;;  %v14396_v53 = vcombine.high %v515_v40, %v519_v41  ;;  %v534_v28 = vld [vmem:[#allocation14 + $0xf0] sm:$0xff] }
 0x13b   : > { %v14410_v4 = vcombine.high %v530_v57, %v534_v28  ;;  %v14409_v9 = vcombine.low %v530_v57, %v534_v28  ;;  %v562_v26 = vld [vmem:[#allocation14 + $0x1d0] sm:$0xff] }
 0x13c   : > { %1480 = vmatpush1.bf16.msra.mxu0 %v14389_v45  ;;  %1531 = vmatpush1.bf16.msra.mxu1 %v14391_v49  ;;  %v522_v45 = vld [vmem:[#allocation14 + $0x90] sm:$0xff]  ;;  %v14394_v49 = vcombine.high %v514_v36, %v518_v37 }
 0x13d   : > { %1481 = vmatprep.subr.bf16.mxu0 %v14398_v50  ;;  %1532 = vmatprep.subr.bf16.mxu1 %v14400_v55  ;;  %v523_v50 = vld [vmem:[#allocation14 + $0x98] sm:$0xff]  ;;  %v491_v55 = vld [vmem:[#allocation2 + $0x17] sm:$0xff] }
 0x13f   : > { %1098 = vmatmul.mubr.bf16.gmra.mrb[12].mxu0 %v18020_v47  ;;  %1149 = vmatmul.mubr.bf16.gmra.mrb[12].mxu1 %v18020_v47  ;;  %v14422_v47 = vcombine.high %v544_v0, %v548_v1  ;;  %v14401_v0 = vcombine.low %v522_v45, %v526_v46  ;;  %v538_v1 = vld [vmem:[#allocation14 + $0x110] sm:$0xff] }
 0x140   : > { %1482 = vmatpush1.bf16.msra.mxu0 %v14397_v56  ;;  %1533 = vmatpush1.bf16.msra.mxu1 %v14399_v58  ;;  %v14393_v56 = vcombine.low %v514_v36, %v518_v37  ;;  %v14395_v58 = vcombine.low %v515_v40, %v519_v41  ;;  %v1686_v36 = vld [vmem:[#allocation14 + $0x420] sm:$0xff]  ;;  %v1687_v40 = vld [vmem:[#allocation14 + $0x428] sm:$0xff] }
 0x141   : > { %1483 = vmatprep.subr.bf16.mxu0 %v14406_v59  ;;  %1534 = vmatprep.subr.bf16.mxu1 %v14408_v62  ;;  %v14402_v59 = vcombine.high %v522_v45, %v526_v46  ;;  %v14404_v62 = vcombine.high %v523_v50, %v527_v51  ;;  %v1694_v45 = vld [vmem:[#allocation14 + $0x460] sm:$0xff] }
 0x142   : > { %1509 = vmatprep.mubr.bf16.mxu0 %v19634_v8  ;;  %1560 = vmatprep.mubr.bf16.mxu1 %v19634_v8 }
 0x144   : > { %1484 = vmatpush1.bf16.msra.mxu0 %v14405_v63  ;;  %1535 = vmatpush1.bf16.msra.mxu1 %v14407_v2  ;;  %v18041_v63 = vpack.c.bf16 %v491_v55, %v491_v55  ;;  %v542_v2 = vld [vmem:[#allocation14 + $0x130] sm:$0xff]  ;;  %v1698_v55 = vld [vmem:[#allocation14 + $0x480] sm:$0xff] }
 0x145   : > { %1485 = vmatprep.subr.bf16.mxu0 %v14414_v3  ;;  %1536 = vmatprep.subr.bf16.mxu1 %v14416_v6  ;;  %v14403_v3 = vcombine.low %v523_v50, %v527_v51  ;;  %v543_v6 = vld [vmem:[#allocation14 + $0x138] sm:$0xff]  ;;  %v14418_v13 = vcombine.high %v538_v1, %v542_v2  ;;  %v14417_v17 = vcombine.low %v538_v1, %v542_v2  ;;  %v1695_v50 = vld [vmem:[#allocation14 + $0x468] sm:$0xff] }
 0x148   : > { %1486 = vmatpush1.bf16.msra.mxu0 %v14413_v7  ;;  %1537 = vmatpush1.bf16.msra.mxu1 %v14415_v11  ;;  %v14412_v7 = vcombine.high %v531_v60, %v535_v61  ;;  %v550_v11 = vld [vmem:[#allocation14 + $0x170] sm:$0xff] }
 0x149   : > { %1487 = vmatprep.subr.bf16.mxu0 %v14422_v47  ;;  %1538 = vmatprep.subr.bf16.mxu1 %v14424_v15  ;;  %v14411_v47 = vcombine.low %v531_v60, %v535_v61  ;;  %v551_v15 = vld [vmem:[#allocation14 + $0x178] sm:$0xff]  ;;  %v14426_v21 = vcombine.high %v546_v10, %v550_v11  ;;  %v14425_v25 = vcombine.low %v546_v10, %v550_v11  ;;  %v1715_v11 = vld [vmem:[#allocation14 + $0x508] sm:$0xff] }
 0x14c   : > { %1488 = vmatpush1.bf16.msra.mxu0 %v14421_v16  ;;  %1539 = vmatpush1.bf16.msra.mxu1 %v14423_v19  ;;  %v14420_v16 = vcombine.high %v539_v5, %v543_v6  ;;  %v558_v19 = vld [vmem:[#allocation14 + $0x1b0] sm:$0xff] }
 0x14d   : > { %1489 = vmatprep.subr.bf16.mxu0 %v14430_v20  ;;  %1540 = vmatprep.subr.bf16.mxu1 %v14432_v23  ;;  %v14419_v20 = vcombine.low %v539_v5, %v543_v6  ;;  %v559_v23 = vld [vmem:[#allocation14 + $0x1b8] sm:$0xff]  ;;  %v14434_v30 = vcombine.high %v554_v18, %v558_v19  ;;  %v14433_v34 = vcombine.low %v554_v18, %v558_v19  ;;  %v1723_v19 = vld [vmem:[#allocation14 + $0x548] sm:$0xff] }
 0x14e   : > { %v14436_v33 = vcombine.high %v555_v22, %v559_v23  ;;  %v14435_v37 = vcombine.low %v555_v22, %v559_v23  ;;  %v1730_v23 = vld [vmem:[#allocation14 + $0x580] sm:$0xff] }
 0x150   : > { %1490 = vmatpush1.bf16.msra.mxu0 %v14429_v24  ;;  %1541 = vmatpush1.bf16.msra.mxu1 %v14431_v27  ;;  %v14428_v24 = vcombine.high %v547_v14, %v551_v15  ;;  %v566_v27 = vld [vmem:[#allocation14 + $0x1f0] sm:$0xff] }
 0x151   : > { %1491 = vmatprep.subr.bf16.mxu0 %v14438_v29  ;;  %1542 = vmatprep.subr.bf16.mxu1 %v14440_v32  ;;  %v14427_v29 = vcombine.low %v547_v14, %v551_v15  ;;  %v567_v32 = vld [vmem:[#allocation14 + $0x1f8] sm:$0xff]  ;;  %v1722_v15 = vld [vmem:[#allocation14 + $0x540] sm:$0xff] }
 0x152   : > { %v14444_v41 = vcombine.high %v563_v31, %v567_v32  ;;  %v14443_v46 = vcombine.low %v563_v31, %v567_v32  ;;  %v1738_v31 = vld [vmem:[#allocation14 + $0x5c0] sm:$0xff] }
 0x153   : > { %v1742_v32 = vld [vmem:[#allocation14 + $0x5e0] sm:$0xff] }
 0x154   : > { %1492 = vmatpush1.bf16.msra.mxu0 %v14437_v35  ;;  %1543 = vmatpush1.bf16.msra.mxu1 %v14439_v38  ;;  %v1682_v35 = vld [vmem:[#allocation14 + $0x400] sm:$0xff]  ;;  %v14442_v38 = vcombine.high %v562_v26, %v566_v27 }
 0x155   : > { %1579 = vmatprep.subr.bf16.mxu0 %v14386_v39  ;;  %1630 = vmatprep.subr.bf16.mxu1 %v14388_v42  ;;  %v1683_v39 = vld [vmem:[#allocation14 + $0x408] sm:$0xff]  ;;  %v14441_v42 = vcombine.low %v562_v26, %v566_v27 }
 0x156   : > { %v14448_v51 = vcombine.high %v1683_v39, %v1687_v40  ;;  %v14447_v57 = vcombine.low %v1683_v39, %v1687_v40  ;;  %v1731_v26 = vld [vmem:[#allocation14 + $0x588] sm:$0xff]  ;;  %v1684_v39 = vld [vmem:[#allocation14 + $0x410] sm:$0xff] }
 0x157   : > { %1510 = vmatmul.mubr.bf16.vlgmr.msra.gmra.mrb[0].mxu0 %v18035_v43  ;;  %1561 = vmatmul.mubr.bf16.vlgmr.msra.gmra.mrb[0].mxu1 %v18035_v43  ;;  %v1735_v27 = vld [vmem:[#allocation14 + $0x5a8] sm:$0xff]  ;;  %v1688_v40 = vld [vmem:[#allocation14 + $0x430] sm:$0xff] }
 0x158   : > { %1580 = vmatpush1.bf16.msra.mxu0 %v14385_v44  ;;  %1631 = vmatpush1.bf16.msra.mxu1 %v14387_v48  ;;  %v1690_v44 = vld [vmem:[#allocation14 + $0x440] sm:$0xff]  ;;  %v14446_v48 = vcombine.high %v1682_v35, %v1686_v36 }
 0x159   : > { %1581 = vmatprep.subr.bf16.mxu0 %v14394_v49  ;;  %1632 = vmatprep.subr.bf16.mxu1 %v14396_v53  ;;  %v1691_v49 = vld [vmem:[#allocation14 + $0x448] sm:$0xff]  ;;  %v14445_v53 = vcombine.low %v1682_v35, %v1686_v36  ;;  %v14454_v28 = vcombine.high %v1690_v44, %v1694_v45  ;;  %v14453_v61 = vcombine.low %v1690_v44, %v1694_v45  ;;  %v1685_v44 = vld [vmem:[#allocation14 + $0x418] sm:$0xff] }
 0x15a   : > { %1519 = vmatprep.mubr.bf16.mxu0 %v19634_v8  ;;  %1570 = vmatprep.mubr.bf16.mxu1 %v19634_v8  ;;  %v14456_v60 = vcombine.high %v1691_v49, %v1695_v50  ;;  %v14455_v1 = vcombine.low %v1691_v49, %v1695_v50  ;;  %v1739_v35 = vld [vmem:[#allocation14 + $0x5c8] sm:$0xff]  ;;  %v1689_v45 = vld [vmem:[#allocation14 + $0x438] sm:$0xff]  ;;  %v14501_v50 = vcombine.low %v1738_v31, %v1742_v32 }
 0x15b   : > { %v1743_v36 = vld [vmem:[#allocation14 + $0x5e8] sm:$0xff] }
 0x15c   : > { %1582 = vmatpush1.bf16.msra.mxu0 %v14393_v56  ;;  %1633 = vmatpush1.bf16.msra.mxu1 %v14395_v58  ;;  %v1702_v56 = vld [vmem:[#allocation14 + $0x4a0] sm:$0xff]  ;;  %v1699_v58 = vld [vmem:[#allocation14 + $0x488] sm:$0xff] }
 0x15d   : > { %1583 = vmatprep.subr.bf16.mxu0 %v14402_v59  ;;  %1634 = vmatprep.subr.bf16.mxu1 %v14404_v62  ;;  %v1703_v59 = vld [vmem:[#allocation14 + $0x4a8] sm:$0xff]  ;;  %v1706_v62 = vld [vmem:[#allocation14 + $0x4c0] sm:$0xff]  ;;  %v14462_v2 = vcombine.high %v1698_v55, %v1702_v56  ;;  %v14461_v6 = vcombine.low %v1698_v55, %v1702_v56  ;;  %v14503_v55 = vcombine.low %v1739_v35, %v1743_v36 }
 0x15e   : > { %v14464_v5 = vcombine.high %v1699_v58, %v1703_v59  ;;  %v500_v49 = vld [vmem:[#allocation2 + $0x11] sm:$0xff]  ;;  %v14450_v56 = vcombine.high %v1684_v39, %v1688_v40 }
 0x15f   : > { %1520 = vmatmul.mubr.bf16.gmra.mrb[16].mxu0 %v18041_v63  ;;  %1571 = vmatmul.mubr.bf16.gmra.mrb[16].mxu1 %v18041_v63 }
 0x160   : > { %1584 = vmatpush1.bf16.msra.mxu0 %v14401_v0  ;;  %1635 = vmatpush1.bf16.msra.mxu1 %v14403_v3  ;;  %v1710_v0 = vld [vmem:[#allocation14 + $0x4e0] sm:$0xff]  ;;  %v1707_v3 = vld [vmem:[#allocation14 + $0x4c8] sm:$0xff] }
 0x161   : > { %1585 = vmatprep.subr.bf16.mxu0 %v14410_v4  ;;  %1636 = vmatprep.subr.bf16.mxu1 %v14412_v7  ;;  %v1711_v4 = vld [vmem:[#allocation14 + $0x4e8] sm:$0xff]  ;;  %v1714_v7 = vld [vmem:[#allocation14 + $0x500] sm:$0xff]  ;;  %v14470_v10 = vcombine.high %v1706_v62, %v1710_v0  ;;  %v14469_v14 = vcombine.low %v1706_v62, %v1710_v0  ;;  %v1704_v62 = vld [vmem:[#allocation14 + $0x4b0] sm:$0xff]  ;;  %v14451_v0 = vcombine.low %v1685_v44, %v1689_v45 }
 0x162   : > { %1611 = vmatprep.mubr.bf16.mxu0 %v19634_v8  ;;  %1662 = vmatprep.mubr.bf16.mxu1 %v19634_v8 }
 0x164   : > { %1586 = vmatpush1.bf16.msra.mxu0 %v14409_v9  ;;  %1637 = vmatpush1.bf16.msra.mxu1 %v14411_v47  ;;  %v14463_v9 = vcombine.low %v1699_v58, %v1703_v59  ;;  %v1719_v47 = vld [vmem:[#allocation14 + $0x528] sm:$0xff]  ;;  %v14452_v58 = vcombine.high %v1685_v44, %v1689_v45  ;;  %v1741_v45 = vld [vmem:[#allocation14 + $0x5d8] sm:$0xff] }
 0x165   : > { %1587 = vmatprep.subr.bf16.mxu0 %v14418_v13  ;;  %1638 = vmatprep.subr.bf16.mxu1 %v14420_v16  ;;  %v14472_v13 = vcombine.high %v1707_v3, %v1711_v4  ;;  %v1726_v16 = vld [vmem:[#allocation14 + $0x560] sm:$0xff] }
 0x168   : > { %1588 = vmatpush1.bf16.msra.mxu0 %v14417_v17  ;;  %1639 = vmatpush1.bf16.msra.mxu1 %v14419_v20  ;;  %v14471_v17 = vcombine.low %v1707_v3, %v1711_v4  ;;  %v1727_v20 = vld [vmem:[#allocation14 + $0x568] sm:$0xff]  ;;  %v1705_v3 = vld [vmem:[#allocation14 + $0x4b8] sm:$0xff] }
 0x169   : > { %1589 = vmatprep.subr.bf16.mxu0 %v14426_v21  ;;  %1640 = vmatprep.subr.bf16.mxu1 %v14428_v24  ;;  %v14480_v21 = vcombine.high %v1715_v11, %v1719_v47  ;;  %v14479_v24 = vcombine.low %v1715_v11, %v1719_v47  ;;  %v1709_v11 = vld [vmem:[#allocation14 + $0x4d8] sm:$0xff] }
 0x16a   : > { %v1713_v47 = vld [vmem:[#allocation14 + $0x4f8] sm:$0xff] }
 0x16c   : > { %1590 = vmatpush1.bf16.msra.mxu0 %v14425_v25  ;;  %1641 = vmatpush1.bf16.msra.mxu1 %v14427_v29  ;;  %v14486_v25 = vcombine.high %v1722_v15, %v1726_v16  ;;  %v14488_v29 = vcombine.high %v1723_v19, %v1727_v20 }
 0x16d   : > { %1591 = vmatprep.subr.bf16.mxu0 %v14434_v30  ;;  %1642 = vmatprep.subr.bf16.mxu1 %v14436_v33  ;;  %v14485_v30 = vcombine.low %v1722_v15, %v1726_v16  ;;  %v14487_v33 = vcombine.low %v1723_v19, %v1727_v20  ;;  %v1716_v16 = vld [vmem:[#allocation14 + $0x510] sm:$0xff]  ;;  %v1717_v20 = vld [vmem:[#allocation14 + $0x518] sm:$0xff] }
 0x170   : > { %1592 = vmatpush1.bf16.msra.mxu0 %v14433_v34  ;;  %1643 = vmatpush1.bf16.msra.mxu1 %v14435_v37  ;;  %v14496_v37 = vcombine.high %v1731_v26, %v1735_v27 }
 0x171   : > { %1593 = vmatprep.subr.bf16.mxu0 %v14442_v38  ;;  %1644 = vmatprep.subr.bf16.mxu1 %v14444_v41  ;;  %v14495_v41 = vcombine.low %v1731_v26, %v1735_v27  ;;  %v1725_v27 = vld [vmem:[#allocation14 + $0x558] sm:$0xff] }
 0x174   : > { %1594 = vmatpush1.bf16.msra.mxu0 %v14441_v42  ;;  %1645 = vmatpush1.bf16.msra.mxu1 %v14443_v46  ;;  %v14502_v42 = vcombine.high %v1738_v31, %v1742_v32  ;;  %v14504_v46 = vcombine.high %v1739_v35, %v1743_v36  ;;  %v1732_v32 = vld [vmem:[#allocation14 + $0x590] sm:$0xff]  ;;  %v1733_v36 = vld [vmem:[#allocation14 + $0x598] sm:$0xff] }
 0x175   : > { %2066 = vmatprep.subr.bf16.mxu0 %v14446_v48  ;;  %2117 = vmatprep.subr.bf16.mxu1 %v14448_v51  ;;  %v499_v48 = vld [vmem:[#allocation2 + $0x9] sm:$0xff]  ;;  %v1692_v51 = vld [vmem:[#allocation14 + $0x450] sm:$0xff] }
 0x176   : > { %v18055_v59 = vpack.c.bf16 %v500_v49, %v499_v48 }
 0x177   : > { %1612 = vmatmul.mubr.bf16.vlgmr.msra.gmra.mrb[8].mxu0 %v18035_v43  ;;  %1663 = vmatmul.mubr.bf16.vlgmr.msra.gmra.mrb[8].mxu1 %v18035_v43  ;;  %v1718_v43 = vld [vmem:[#allocation14 + $0x520] sm:$0xff] }
 0x178   : > { %2067 = vmatpush1.bf16.msra.mxu0 %v14445_v53  ;;  %2118 = vmatpush1.bf16.msra.mxu1 %v14447_v57  ;;  %v14478_v18 = vcombine.high %v1714_v7, %v1718_v43  ;;  %v14477_v22 = vcombine.low %v1714_v7, %v1718_v43  ;;  %v1696_v53 = vld [vmem:[#allocation14 + $0x470] sm:$0xff]  ;;  %v1693_v57 = vld [vmem:[#allocation14 + $0x458] sm:$0xff] }
 0x179   : > { %2068 = vmatprep.subr.bf16.mxu0 %v14454_v28  ;;  %2119 = vmatprep.subr.bf16.mxu1 %v14456_v60  ;;  %v1697_v28 = vld [vmem:[#allocation14 + $0x478] sm:$0xff]  ;;  %v14449_v60 = vcombine.low %v1684_v39, %v1688_v40  ;;  %v1708_v7 = vld [vmem:[#allocation14 + $0x4d0] sm:$0xff] }
 0x17a   : > { %1621 = vmatprep.mubr.bf16.mxu0 %v19634_v8  ;;  %1672 = vmatprep.mubr.bf16.mxu1 %v19634_v8  ;;  %v14460_v4 = vcombine.high %v1693_v57, %v1697_v28  ;;  %v1712_v43 = vld [vmem:[#allocation14 + $0x4f0] sm:$0xff] }
 0x17b   : > { %v14474_v19 = vcombine.high %v1708_v7, %v1712_v43  ;;  %v1740_v40 = vld [vmem:[#allocation14 + $0x5d0] sm:$0xff] }
 0x17c   : > { %2069 = vmatpush1.bf16.msra.mxu0 %v14453_v61  ;;  %2120 = vmatpush1.bf16.msra.mxu1 %v14455_v1  ;;  %v1700_v61 = vld [vmem:[#allocation14 + $0x490] sm:$0xff]  ;;  %v14458_v1 = vcombine.high %v1692_v51, %v1696_v53 }
 0x17d   : > { %2070 = vmatprep.subr.bf16.mxu0 %v14462_v2  ;;  %2121 = vmatprep.subr.bf16.mxu1 %v14464_v5  ;;  %v1701_v2 = vld [vmem:[#allocation14 + $0x498] sm:$0xff]  ;;  %v14465_v15 = vcombine.low %v1700_v61, %v1704_v62 }
 0x17e   : > { %v501_v5 = vld [vmem:[#allocation2 + $0x19] sm:$0xff] }
 0x17f   : > { %1622 = vmatmul.mubr.bf16.gmra.mrb[20].mxu0 %v18041_v63  ;;  %1673 = vmatmul.mubr.bf16.gmra.mrb[20].mxu1 %v18041_v63  ;;  %v1734_v63 = vld [vmem:[#allocation14 + $0x5a0] sm:$0xff] }
 0x180   : > { %2071 = vmatpush1.bf16.msra.mxu0 %v14461_v6  ;;  %2122 = vmatpush1.bf16.msra.mxu1 %v14463_v9  ;;  %v14494_v34 = vcombine.high %v1730_v23, %v1734_v63  ;;  %v14493_v38 = vcombine.low %v1730_v23, %v1734_v63  ;;  %v14457_v6 = vcombine.low %v1692_v51, %v1696_v53  ;;  %v1724_v63 = vld [vmem:[#allocation14 + $0x550] sm:$0xff] }
 0x181   : > { %2072 = vmatprep.subr.bf16.mxu0 %v14470_v10  ;;  %2123 = vmatprep.subr.bf16.mxu1 %v14472_v13  ;;  %v14459_v9 = vcombine.low %v1693_v57, %v1697_v28  ;;  %v14466_v10 = vcombine.high %v1700_v61, %v1704_v62  ;;  %v14468_v13 = vcombine.high %v1701_v2, %v1705_v3  ;;  %v16717_v57 = vld [vmem:[#allocation15 + $0x240] sm:$0xff]   ;;  %v16721_v61 = vld [vmem:[#allocation15 + $0x248] sm:$0xff]  }
 0x182   : > { %2098 = vmatprep.mubr.bf16.mxu0 %v19634_v8  ;;  %2149 = vmatprep.mubr.bf16.mxu1 %v19634_v8  ;;  %v14473_v23 = vcombine.low %v1708_v7, %v1712_v43  ;;  %v16718_v28 = vld [vmem:[#allocation15 + $0x2c0] sm:$0xff]   ;;  %v16722_v62 = vld [vmem:[#allocation15 + $0x2c8] sm:$0xff]   ;;  %v16731_v7 = vld [vmem:[#allocation15 + $0x218] sm:$0xff]  }
 0x183   : > { %v16732_v43 = vld [vmem:[#allocation15 + $0x298] sm:$0xff]  }
 0x184   : > { %2073 = vmatpush1.bf16.msra.mxu0 %v14469_v14  ;;  %2124 = vmatpush1.bf16.msra.mxu1 %v14471_v17  ;;  %v18061_v14 = vpack.c.bf16 %v501_v5, %v501_v5  ;;  %v1720_v17 = vld [vmem:[#allocation14 + $0x530] sm:$0xff]  ;;  %v16729_v5 = vld [vmem:[#allocation15 + $0x258] sm:$0xff]  }
 0x185   : > { %2074 = vmatprep.subr.bf16.mxu0 %v14478_v18  ;;  %2125 = vmatprep.subr.bf16.mxu1 %v14480_v21  ;;  %v14467_v18 = vcombine.low %v1701_v2, %v1705_v3  ;;  %v1721_v21 = vld [vmem:[#allocation14 + $0x538] sm:$0xff]  ;;  %v14482_v26 = vcombine.high %v1716_v16, %v1720_v17  ;;  %v14481_v31 = vcombine.low %v1716_v16, %v1720_v17  ;;  %v16726_v2 = vld [vmem:[#allocation15 + $0x2d0] sm:$0xff]   ;;  %v16740_v16 = vld [vmem:[#allocation15 + $0x2a8] sm:$0xff]  }
 0x186   : > { %v16727_v3 = vld [vmem:[#allocation15 + $0x210] sm:$0xff]  }
 0x187   : > { %v16741_v17 = vld [vmem:[#allocation15 + $0x270] sm:$0xff]  }
 0x188   : > { %2075 = vmatpush1.bf16.msra.mxu0 %v14477_v22  ;;  %2126 = vmatpush1.bf16.msra.mxu1 %v14479_v24  ;;  %v14476_v22 = vcombine.high %v1709_v11, %v1713_v47  ;;  %v1728_v24 = vld [vmem:[#allocation14 + $0x570] sm:$0xff] }
 0x189   : > { %2076 = vmatprep.subr.bf16.mxu0 %v14486_v25  ;;  %2127 = vmatprep.subr.bf16.mxu1 %v14488_v29  ;;  %v14475_v25 = vcombine.low %v1709_v11, %v1713_v47  ;;  %v1729_v29 = vld [vmem:[#allocation14 + $0x578] sm:$0xff]  ;;  %v14490_v35 = vcombine.high %v1724_v63, %v1728_v24  ;;  %v14489_v39 = vcombine.low %v1724_v63, %v1728_v24  ;;  %v16735_v11 = vld [vmem:[#allocation15 + $0x220] sm:$0xff]  }
 0x18a   : > { %v16736_v47 = vld [vmem:[#allocation15 + $0x2a0] sm:$0xff]   ;;  %v16745_v63 = vld [vmem:[#allocation15 + $0x278] sm:$0xff]  }
 0x18c   : > { %2077 = vmatpush1.bf16.msra.mxu0 %v14485_v30  ;;  %2128 = vmatpush1.bf16.msra.mxu1 %v14487_v33  ;;  %v14484_v30 = vcombine.high %v1717_v20, %v1721_v21  ;;  %v1736_v33 = vld [vmem:[#allocation14 + $0x5b0] sm:$0xff] }
 0x18d   : > { %2078 = vmatprep.subr.bf16.mxu0 %v14494_v34  ;;  %2129 = vmatprep.subr.bf16.mxu1 %v14496_v37  ;;  %v14483_v34 = vcombine.low %v1717_v20, %v1721_v21  ;;  %v1737_v37 = vld [vmem:[#allocation14 + $0x5b8] sm:$0xff]  ;;  %v14498_v44 = vcombine.high %v1732_v32, %v1736_v33  ;;  %v14497_v49 = vcombine.low %v1732_v32, %v1736_v33  ;;  %v16744_v20 = vld [vmem:[#allocation15 + $0x2b0] sm:$0xff]   ;;  %v16749_v33 = vld [vmem:[#allocation15 + $0x340] sm:$0xff]  }
 0x18e   : > { %v14500_v48 = vcombine.high %v1733_v36, %v1737_v37 }
 0x190   : > { %2079 = vmatpush1.bf16.msra.mxu0 %v14493_v38  ;;  %2130 = vmatpush1.bf16.msra.mxu1 %v14495_v41  ;;  %v14492_v38 = vcombine.high %v1725_v27, %v1729_v29  ;;  %v1744_v41 = vld [vmem:[#allocation14 + $0x5f0] sm:$0xff] }
 0x191   : > { %2080 = vmatprep.subr.bf16.mxu0 %v14502_v42  ;;  %2131 = vmatprep.subr.bf16.mxu1 %v14504_v46  ;;  %v14491_v42 = vcombine.low %v1725_v27, %v1729_v29  ;;  %v1745_v46 = vld [vmem:[#allocation14 + $0x5f8] sm:$0xff]  ;;  %v14506_v51 = vcombine.high %v1740_v40, %v1744_v41 }
 0x192   : > { %v14508_v53 = vcombine.high %v1741_v45, %v1745_v46 }
 0x194   : > { %2081 = vmatpush1.bf16.msra.mxu0 %v14501_v50  ;;  %2132 = vmatpush1.bf16.msra.mxu1 %v14503_v55  ;;  %v14499_v50 = vcombine.low %v1733_v36, %v1737_v37  ;;  %v14505_v55 = vcombine.low %v1740_v40, %v1744_v41 }
 0x195   : > { %2168 = vmatprep.subr.bf16.mxu0 %v14450_v56  ;;  %2219 = vmatprep.subr.bf16.mxu1 %v14452_v58  ;;  %v14507_v56 = vcombine.low %v1741_v45, %v1745_v46  ;;  %v16719_v58 = vld [vmem:[#allocation15 + $0x200] sm:$0xff]  }
 0x197   : > { %2099 = vmatmul.mubr.bf16.vlgmr.msra.gmra.mrb[0].mxu0 %v18055_v59  ;;  %2150 = vmatmul.mubr.bf16.vlgmr.msra.gmra.mrb[0].mxu1 %v18055_v59 }
 0x198   : > { %2169 = vmatpush1.bf16.msra.mxu0 %v14449_v60  ;;  %2220 = vmatpush1.bf16.msra.mxu1 %v14451_v0  ;;  %v16720_v60 = vld [vmem:[#allocation15 + $0x280] sm:$0xff]   ;;  %v16723_v0 = vld [vmem:[#allocation15 + $0x208] sm:$0xff]  }
 0x199   : > { %2170 = vmatprep.subr.bf16.mxu0 %v14458_v1  ;;  %2221 = vmatprep.subr.bf16.mxu1 %v14460_v4  ;;  %v16725_v1 = vld [vmem:[#allocation15 + $0x250] sm:$0xff]  }
 0x19a   : > { %2108 = vmatprep.mubr.bf16.mxu0 %v19634_v8  ;;  %2159 = vmatprep.mubr.bf16.mxu1 %v19634_v8  ;;  %v16728_v4 = vld [vmem:[#allocation15 + $0x290] sm:$0xff]  }
 0x19c   : > { %2171 = vmatpush1.bf16.msra.mxu0 %v14457_v6  ;;  %2222 = vmatpush1.bf16.msra.mxu1 %v14459_v9  ;;  %v16730_v6 = vld [vmem:[#allocation15 + $0x2d8] sm:$0xff]   ;;  %v16733_v9 = vld [vmem:[#allocation15 + $0x260] sm:$0xff]  }
 0x19d   : > { %2172 = vmatprep.subr.bf16.mxu0 %v14466_v10  ;;  %2223 = vmatprep.subr.bf16.mxu1 %v14468_v13  ;;  %v16734_v10 = vld [vmem:[#allocation15 + $0x2e0] sm:$0xff]   ;;  %v16737_v13 = vld [vmem:[#allocation15 + $0x268] sm:$0xff]  }
 0x19f   : > { %2109 = vmatmul.mubr.bf16.gmra.mrb[24].mxu0 %v18061_v14  ;;  %2160 = vmatmul.mubr.bf16.gmra.mrb[24].mxu1 %v18061_v14 }
 0x1a0   : > { %2173 = vmatpush1.bf16.msra.mxu0 %v14465_v15  ;;  %2224 = vmatpush1.bf16.msra.mxu1 %v14467_v18  ;;  %v16739_v15 = vld [vmem:[#allocation15 + $0x228] sm:$0xff]   ;;  %v16742_v18 = vld [vmem:[#allocation15 + $0x2f0] sm:$0xff]  }
 0x1a1   : > { %2174 = vmatprep.subr.bf16.mxu0 %v14474_v19  ;;  %2225 = vmatprep.subr.bf16.mxu1 %v14476_v22  ;;  %v16743_v19 = vld [vmem:[#allocation15 + $0x230] sm:$0xff]  }
 0x1a2   : > { %2200 = vmatprep.mubr.bf16.mxu0 %v19634_v8  ;;  %2251 = vmatprep.mubr.bf16.mxu1 %v19634_v8 }
 0x1a4   : > { %2175 = vmatpush1.bf16.msra.mxu0 %v14473_v23  ;;  %2226 = vmatpush1.bf16.msra.mxu1 %v14475_v25 }
 0x1a5   : > { %2176 = vmatprep.subr.bf16.mxu0 %v14482_v26  ;;  %2227 = vmatprep.subr.bf16.mxu1 %v14484_v30  ;;  %v16746_v26 = vld [vmem:[#allocation15 + $0x2f8] sm:$0xff]  }
 0x1a6   : > { %v16747_v30 = vld [vmem:[#allocation15 + $0x238] sm:$0xff]  }
 0x1a8   : > { %2177 = vmatpush1.bf16.msra.mxu0 %v14481_v31  ;;  %2228 = vmatpush1.bf16.msra.mxu1 %v14483_v34  ;;  %v16748_v31 = vld [vmem:[#allocation15 + $0x2b8] sm:$0xff]   ;;  %v16750_v34 = vld [vmem:[#allocation15 + $0x3c0] sm:$0xff]  }
 0x1a9   : > { %2178 = vmatprep.subr.bf16.mxu0 %v14490_v35  ;;  %2229 = vmatprep.subr.bf16.mxu1 %v14492_v38 }
 0x1ac   : > { %2179 = vmatpush1.bf16.msra.mxu0 %v14489_v39  ;;  %2230 = vmatpush1.bf16.msra.mxu1 %v14491_v42 }
 0x1ad   : > { %2180 = vmatprep.subr.bf16.mxu0 %v14498_v44  ;;  %2231 = vmatprep.subr.bf16.mxu1 %v14500_v48 }
 0x1b0   : > { %2181 = vmatpush1.bf16.msra.mxu0 %v14497_v49  ;;  %2232 = vmatpush1.bf16.msra.mxu1 %v14499_v50 }
 0x1b1   : > { %2182 = vmatprep.subr.bf16.mxu0 %v14506_v51  ;;  %2233 = vmatprep.subr.bf16.mxu1 %v14508_v53 }
 0x1b4   : > { %2183 = vmatpush1.bf16.msra.mxu0 %v14505_v55  ;;  %2234 = vmatpush1.bf16.msra.mxu1 %v14507_v56 }
 0x1b5   : > { %15493 = vmatprep.subr.bf16.mxu0 %v16717_v57  ;;  %15521 = vmatprep.subr.bf16.mxu1 %v16718_v28 }
 0x1b7   : > { %2201 = vmatmul.mubr.bf16.vlgmr.msra.gmra.mrb[8].mxu0 %v18055_v59  ;;  %2252 = vmatmul.mubr.bf16.vlgmr.msra.gmra.mrb[8].mxu1 %v18055_v59  ;;  %v16724_v59 = vld [vmem:[#allocation15 + $0x288] sm:$0xff]  }
 0x1b8   : > { %2210 = vmatprep.mubr.bf16.mxu0 %v19634_v8  ;;  %2261 = vmatprep.mubr.bf16.mxu1 %v19634_v8 }
 0x1b9   : > { %15494 = vmatpush3.bf16.msra.mxu0 %v16719_v58  ;;  %15522 = vmatpush3.bf16.msra.mxu1 %v16720_v60 }
 0x1ba   : > { %15495 = vmatprep.subr.bf16.mxu0 %v16721_v61  ;;  %15523 = vmatprep.subr.bf16.mxu1 %v16722_v62 }
 0x1bd   : > { %15496 = vmatpush3.bf16.msra.mxu0 %v16723_v0  ;;  %15524 = vmatpush3.bf16.msra.mxu1 %v16724_v59 }
 0x1be   : > { %15497 = vmatprep.subr.bf16.mxu0 %v16725_v1  ;;  %15525 = vmatprep.subr.bf16.mxu1 %v16726_v2 }
 0x1bf   : > { %2211 = vmatmul.mubr.bf16.gmra.mrb[28].mxu0 %v18061_v14  ;;  %2262 = vmatmul.mubr.bf16.gmra.mrb[28].mxu1 %v18061_v14  ;;  %v16738_v14 = vld [vmem:[#allocation15 + $0x2e8] sm:$0xff]  }
 0x1c1   : > { %15498 = vmatpush3.bf16.msra.mxu0 %v16727_v3  ;;  %15526 = vmatpush3.bf16.msra.mxu1 %v16728_v4 }
 0x1c2   : > { %15499 = vmatprep.subr.bf16.mxu0 %v16729_v5  ;;  %15527 = vmatprep.subr.bf16.mxu1 %v16730_v6 }
 0x1c5   : > { %15500 = vmatpush3.bf16.msra.mxu0 %v16731_v7  ;;  %15528 = vmatpush3.bf16.msra.mxu1 %v16732_v43  ;;  %v2295_v7 = vlaneseq  ;;  %v459_v43 = vld [vmem:[#allocation12 + $0xc1] ss:$8 sm:$0xf] }
 0x1c6   : > { %15501 = vmatprep.subr.bf16.mxu0 %v16733_v9  ;;  %15529 = vmatprep.subr.bf16.mxu1 %v16734_v10  ;;  %v455_v10 = vld [vmem:[#allocation12 + $0xc0] ss:$8 sm:$0xf] }
 0x1c7   : > { %v18089_v9 = vshrl.u32 %v2295_v7, 7 }
 0x1c9   : > { %15502 = vmatpush3.bf16.msra.mxu0 %v16735_v11  ;;  %15530 = vmatpush3.bf16.msra.mxu1 %v16736_v47  ;;  %v456_v11 = vld [vmem:[#allocation12 + $0xc0] ss:$8 sm:$0xf0]  ;;  %v460_v47 = vld [vmem:[#allocation12 + $0xc1] ss:$8 sm:$0xf0] }
 0x1ca   : > { %15503 = vmatprep.subr.bf16.mxu0 %v16737_v13  ;;  %15531 = vmatprep.subr.bf16.mxu1 %v16738_v14  ;;  %v18091_v13 = vor.u32 %v460_v47, %v459_v43  ;;  %v18094_v14 = vsub.s32 0, %v18089_v9 }
 0x1cc   : > { %19705 = vst [vmem:[#allocation26_spill] sm:$0xff] %v18091_v13  ;;  %19706 = vst [vmem:[#allocation27_spill] sm:$0xff] %v18094_v14 }
 0x1cd   : > { %15504 = vmatpush3.bf16.msra.mxu0 %v16739_v15  ;;  %15532 = vmatpush3.bf16.msra.mxu1 %v16740_v16  ;;  %v2359_v15 = vstv %s14314_s20  ;;  %v18096_v16 = vor.u32 %v456_v11, %v455_v10  ;;  %s15101_s20 = sld [smem:[#allocation4 + $0x105]] }
 0x1ce   : > { %15505 = vmatprep.subr.bf16.mxu0 %v16741_v17  ;;  %15533 = vmatprep.subr.bf16.mxu1 %v16742_v18  ;;  %v18099_v17 = vsub.s32 2, %v18089_v9  ;;  %v18102_v18 = vsub.s32 1, %v18089_v9 }
 0x1d0   : > { %19707 = vst [vmem:[#allocation28_spill] sm:$0xff] %v18099_v17  ;;  %19708 = vst [vmem:[#allocation29_spill] sm:$0xff] %v18102_v18 }
 0x1d1   : > { %15506 = vmatpush3.bf16.msra.mxu0 %v16743_v19  ;;  %15534 = vmatpush3.bf16.msra.mxu1 %v16744_v20  ;;  %v18105_v19 = vmul.f32 %v2359_v15, %v18091_v13  ;;  %v18108_v20 = vsub.s32 3, %v18089_v9 }
 0x1d2   : > { %15507 = vmatprep.subr.bf16.mxu0 %v16745_v63  ;;  %15535 = vmatprep.subr.bf16.mxu1 %v16746_v26 }
 0x1d3   : > { %19709 = vst [vmem:[#allocation30_spill] sm:$0xff] %v18108_v20  ;;  %v18124_v63 = vrot.slane %v18105_v19, %v18094_v14  ;;  %v18132_v26 = vrot.slane %v18105_v19, %v18099_v17 }
 0x1d5   : > { %15508 = vmatpush3.bf16.msra.mxu0 %v16747_v30  ;;  %15536 = vmatpush3.bf16.msra.mxu1 %v16748_v31 }
 0x1d6   : > { %15549 = vmatprep.subr.bf16.mxu0 %v16749_v33  ;;  %15577 = vmatprep.subr.bf16.mxu1 %v16750_v34  ;;  %v430_v33 = vld [vmem:[#allocation12] sm:$0xff] }
 0x1f2   : > { %v997_v21 = vpop.f32.mrb[4].mxu0  ;;  %v1048_v23 = vpop.f32.mrb[4].mxu1 }
 0x1f3   : > { %v999_v22 = vpop.f32.mrb[5].mxu0  ;;  %v1050_v25 = vpop.f32.mrb[5].mxu1 }
 0x1f4   : > { %v1001_v24 = vpop.f32.mrb[6].mxu0  ;;  %v1052_v29 = vpop.f32.mrb[6].mxu1 }
 0x1f5   : > { %v1002_v27 = vpop.f32.mrb[7].mxu0  ;;  %v1053_v32 = vpop.f32.mrb[7].mxu1  ;;  %v18128_v24 = vrot.slane %v18096_v16, %v18108_v20 }
 0x1f6   : > { %v18136_v27 = vrot.slane %v18105_v19, %v18102_v18  ;;  %v18141_v32 = vrot.slane %v18105_v19, %v18108_v20 }
 0x1f7   : > { %19713 = vst [vmem:[#allocation34_spill] sm:$0xff] %v18128_v24 }
 0x212   : > { %v1099_v35 = vpop.f32.mrb[12].mxu0  ;;  %v1150_v37 = vpop.f32.mrb[12].mxu1 }
 0x213   : > { %v1101_v36 = vpop.f32.mrb[13].mxu0  ;;  %v1152_v39 = vpop.f32.mrb[13].mxu1 }
 0x214   : > { %v1103_v38 = vpop.f32.mrb[14].mxu0  ;;  %v1154_v41 = vpop.f32.mrb[14].mxu1 }
 0x215   : > { %v1104_v40 = vpop.f32.mrb[15].mxu0  ;;  %v1155_v42 = vpop.f32.mrb[15].mxu1 }
 0x216   : > { %v431_v40 = vld [vmem:[#allocation12 + $0x8] sm:$0xff] }
 0x232   : > { %v1521_v44 = vpop.f32.mrb[16].mxu0  ;;  %v1572_v46 = vpop.f32.mrb[16].mxu1 }
 0x233   : > { %v18073_v45 = vadd.f32 %v1521_v44, %v997_v21  ;;  %v1523_v48 = vpop.f32.mrb[17].mxu0  ;;  %v18075_v49 = vadd.f32 %v1572_v46, %v1048_v23  ;;  %v1574_v51 = vpop.f32.mrb[17].mxu1  ;;  %v18112_v21 = vrot.slane %v18096_v16, %v18094_v14  ;;  %v18120_v23 = vrot.slane %v18096_v16, %v18102_v18  ;;  %v445_v18 = vld [vmem:[#allocation12 + $0x78] sm:$0xff] }
 0x234   : > { %v18077_v50 = vadd.f32 %v1523_v48, %v999_v22  ;;  %v1525_v53 = vpop.f32.mrb[18].mxu0  ;;  %v18079_v55 = vadd.f32 %v1574_v51, %v1050_v25  ;;  %v1576_v57 = vpop.f32.mrb[18].mxu1  ;;  %v18116_v22 = vrot.slane %v18096_v16, %v18099_v17  ;;  %v18149_v48 = vsub.s32 4, %v18089_v9  ;;  %v2503_v17 = vld [vmem:[#allocation3 + $0x28] sm:$0x80] }
 0x235   : > { %v1526_v56 = vpop.f32.mrb[19].mxu0  ;;  %v1577_v28 = vpop.f32.mrb[19].mxu1  ;;  %19710 = vst [vmem:[#allocation31_spill] sm:$0xff] %v18112_v21  ;;  %19712 = vst [vmem:[#allocation33_spill] sm:$0xff] %v18120_v23  ;;  %v438_v57 = vld [vmem:[#allocation12 + $0x40] sm:$0xff] }
 0x236   : > { %19711 = vst [vmem:[#allocation32_spill] sm:$0xff] %v18116_v22  ;;  %19714 = vst [vmem:[#allocation35_spill] sm:$0xff] %v18149_v48  ;;  %v433_v56 = vld [vmem:[#allocation12 + $0x18] sm:$0xff] }
 0x252   : > { %v1623_v58 = vpop.f32.mrb[20].mxu0  ;;  %v1674_v61 = vpop.f32.mrb[20].mxu1 }
 0x253   : > { %v18081_v60 = vadd.f32 %v1623_v58, %v1099_v35  ;;  %v1625_v62 = vpop.f32.mrb[21].mxu0  ;;  %v18083_v0 = vadd.f32 %v1674_v61, %v1150_v37  ;;  %v1676_v1 = vpop.f32.mrb[21].mxu1 }
 0x254   : > { %v18085_v59 = vadd.f32 %v1625_v62, %v1101_v36  ;;  %v1627_v2 = vpop.f32.mrb[22].mxu0  ;;  %v18087_v3 = vadd.f32 %v1676_v1, %v1152_v39  ;;  %v1678_v5 = vpop.f32.mrb[22].mxu1  ;;  %v432_v39 = vld [vmem:[#allocation12 + $0x10] sm:$0xff] }
 0x255   : > { %v1628_v4 = vpop.f32.mrb[23].mxu0  ;;  %v1679_v6 = vpop.f32.mrb[23].mxu1  ;;  %v439_v5 = vld [vmem:[#allocation12 + $0x48] sm:$0xff] }
 0x256   : > { %v440_v4 = vld [vmem:[#allocation12 + $0x50] sm:$0xff] }
 0x26a   : > { %v2100_v25 = vpop.f32.mrb[0].mxu0  ;;  %v2151_v30 = vpop.f32.mrb[0].mxu1 }
 0x26b   : > { %v2335_v29 = vadd.f32 %v18112_v21, %v2100_v25  ;;  %v2102_v31 = vpop.f32.mrb[1].mxu0  ;;  %v2337_v34 = vadd.f32 %v18116_v22, %v2151_v30  ;;  %v2153_v36 = vpop.f32.mrb[1].mxu1  ;;  %v2499_v30 = vld [vmem:[#allocation3 + $0x8] sm:$0x80] }
 0x26c   : > { %v2336_v35 = vadd.f32 %v18120_v23, %v2102_v31  ;;  %v2104_v37 = vpop.f32.mrb[2].mxu0  ;;  %v2338_v41 = vadd.f32 %v18128_v24, %v2153_v36  ;;  %v2155_v44 = vpop.f32.mrb[2].mxu1 }
 0x26d   : > { %v2402_v38 = vadd.f32 %v18124_v63, %v2335_v29  ;;  %v2343_v42 = vadd.f32 %v18112_v21, %v2104_v37  ;;  %v2106_v46 = vpop.f32.mrb[3].mxu0  ;;  %v2404_v51 = vadd.f32 %v18132_v26, %v2337_v34  ;;  %v2345_v28 = vadd.f32 %v18116_v22, %v2155_v44  ;;  %v2157_v61 = vpop.f32.mrb[3].mxu1  ;;  %v441_v37 = vld [vmem:[#allocation12 + $0x58] sm:$0xff] }
 0x26e   : > { %v2403_v53 = vadd.f32 %v18136_v27, %v2336_v35  ;;  %v2344_v58 = vadd.f32 %v18120_v23, %v2106_v46  ;;  %v2405_v1 = vadd.f32 %v18141_v32, %v2338_v41  ;;  %v2346_v6 = vadd.f32 %v18128_v24, %v2157_v61  ;;  %v2501_v41 = vld [vmem:[#allocation3 + $0x18] sm:$0x80] }
 0x26f   : > { %v2426_v62 = vmax.f32 %v2402_v38, 0.0  ;;  %v2410_v2 = vadd.f32 %v18124_v63, %v2343_v42  ;;  %v2428_v7 = vmax.f32 %v2404_v51, 0.0  ;;  %v2412_v10 = vadd.f32 %v18132_v26, %v2345_v28 }
 0x270   : > { %v2427_v43 = vmax.f32 %v2403_v53, 0.0  ;;  %v2411_v11 = vadd.f32 %v18136_v27, %v2344_v58  ;;  %v2429_v15 = vmax.f32 %v2405_v1, 0.0  ;;  %v2413_v29 = vadd.f32 %v18141_v32, %v2346_v6 }
 0x271   : > { %v18160_v47 = vmul.f32 %v2426_v62, %v430_v33  ;;  %v2434_v25 = vmax.f32 %v2410_v2, 0.0  ;;  %v18163_v31 = vmul.f32 %v2428_v7, %v432_v39  ;;  %v2436_v35 = vmax.f32 %v2412_v10, 0.0  ;;  %v16751_v2 = vld [vmem:[#allocation15 + $0x300] sm:$0xff]  }
 0x272   : > { %v2451_v34 = vmul.f32 %v2427_v43, %v431_v40  ;;  %v2435_v36 = vmax.f32 %v2411_v11, 0.0  ;;  %v2110_v38 = vpop.f32.mrb[24].mxu0  ;;  %v2453_v42 = vmul.f32 %v2429_v15, %v433_v56  ;;  %v2437_v33 = vmax.f32 %v2413_v29, 0.0  ;;  %v2161_v51 = vpop.f32.mrb[24].mxu1  ;;  %v16752_v10 = vld [vmem:[#allocation15 + $0x380] sm:$0xff]   ;;  %v16753_v15 = vld [vmem:[#allocation15 + $0x348] sm:$0xff]  }
 0x273   : > { %2474 = vst [vmem:[#allocation3 + $0x40] sm:$0xff] %v18160_v47  ;;  %v18166_v44 = vmul.f32 %v2434_v25, %v438_v57  ;;  %v2286_v46 = vadd.f32 %v2110_v38, %v18073_v45  ;;  %v2112_v53 = vpop.f32.mrb[25].mxu0  ;;  %2476 = vst [vmem:[#allocation3 + $0x50] sm:$0xff] %v18163_v31  ;;  %v18170_v39 = vmul.f32 %v2436_v35, %v440_v4  ;;  %v2163_v61 = vpop.f32.mrb[25].mxu1  ;;  %v448_v25 = vld [vmem:[#allocation12 + $0x90] sm:$0xff]  ;;  %v447_v29 = vld [vmem:[#allocation12 + $0x88] sm:$0xff] }
 0x274   : > { %2475 = vst [vmem:[#allocation3 + $0x48] sm:$0xff] %v2451_v34  ;;  %v18172_v40 = vmul.f32 %v2435_v36, %v439_v5  ;;  %v2288_v28 = vadd.f32 %v2161_v51, %v18075_v49  ;;  %v2287_v58 = vadd.f32 %v2112_v53, %v18077_v50  ;;  %v2114_v56 = vpop.f32.mrb[26].mxu0  ;;  %2477 = vst [vmem:[#allocation3 + $0x58] sm:$0xff] %v2453_v42  ;;  %v2165_v5 = vpop.f32.mrb[26].mxu1  ;;  %v446_v49 = vld [vmem:[#allocation12 + $0x80] sm:$0xff] }
 0x275   : > { %2482 = vst [vmem:[#allocation3 + $0x80] sm:$0xff] %v18166_v44  ;;  %v18177_v57 = vmul.f32 %v2437_v33, %v441_v37  ;;  %v2351_v45 = vadd.f32 %v18112_v21, %v2286_v46  ;;  %v2289_v62 = vadd.f32 %v2163_v61, %v18079_v55  ;;  %v2531_v1 = vpack.c.bf16 %v2451_v34, %v2499_v30  ;;  %v2115_v4 = vpop.f32.mrb[27].mxu0  ;;  %v2166_v11 = vpop.f32.mrb[27].mxu1  ;;  %v2498_v37 = vld [vmem:[#allocation3] sm:$0x80]  ;;  %v16756_v5 = vld [vmem:[#allocation15 + $0x388] sm:$0xff]  }
 0x276   : > { %2484 = vst [vmem:[#allocation3 + $0x90] sm:$0xff] %v18170_v39  ;;  %2483 = vst [vmem:[#allocation3 + $0x88] sm:$0xff] %v18172_v40  ;;  %v2353_v50 = vadd.f32 %v18116_v22, %v2288_v28  ;;  %v2352_v6 = vadd.f32 %v18120_v23, %v2287_v58  ;;  %v2555_v7 = vpack.c.bf16 %v18172_v40, %v2451_v34  ;;  %v443_v21 = vld [vmem:[#allocation12 + $0x68] sm:$0xff] }
 0x277   : > { %v2533_v43 = vpack.c.bf16 %v2453_v42, %v2501_v41  ;;  %2485 = vst [vmem:[#allocation3 + $0x98] sm:$0xff] %v18177_v57  ;;  %v2418_v55 = vadd.f32 %v18124_v63, %v2351_v45  ;;  %v2354_v30 = vadd.f32 %v18128_v24, %v2289_v62  ;;  %v2557_v35 = vpack.c.bf16 %v18177_v57, %v2453_v42  ;;  %v449_v41 = vld [vmem:[#allocation12 + $0x98] sm:$0xff]  ;;  %v16754_v63 = vld [vmem:[#allocation15 + $0x3c8] sm:$0xff]   ;;  %v2500_v45 = vld [vmem:[#allocation3 + $0x10] sm:$0x80] }
 0x278   : > { %v2554_v36 = vpack.c.bf16 %v18166_v44, %v18160_v47  ;;  %v2420_v34 = vadd.f32 %v18132_v26, %v2353_v50  ;;  %v2419_v38 = vadd.f32 %v18136_v27, %v2352_v6  ;;  %3291 = vmatprep.mubr.bf16.mxu0 %v2555_v7  ;;  %v2556_v33 = vpack.c.bf16 %v18170_v39, %v18163_v31  ;;  %v16755_v42 = vld [vmem:[#allocation15 + $0x308] sm:$0xff]  }
 0x279   : > { %v3470_v46 = vshrl.u32 %v2531_v1, 16  ;;  %v2442_v51 = vmax.f32 %v2418_v55, 0.0  ;;  %v2421_v53 = vadd.f32 %v18141_v32, %v2354_v30  ;;  %3339 = vmatprep.mubr.bf16.mxu1 %v2557_v35  ;;  %v3473_v28 = vshll.u32 %v2531_v1, 16  ;;  %v16757_v32 = vld [vmem:[#allocation15 + $0x350] sm:$0xff]  }
 0x27a   : > { %3292 = vmatmul.mubr.bf16.vlgmr.msra.gmra.mrb[32].mxu0 %v2554_v36  ;;  %v3504_v58 = vshrl.u32 %v2533_v43, 16  ;;  %v2444_v61 = vmax.f32 %v2420_v34, 0.0  ;;  %v2443_v56 = vmax.f32 %v2419_v38, 0.0  ;;  %3340 = vmatmul.mubr.bf16.vlgmr.msra.gmra.mrb[32].mxu1 %v2556_v33  ;;  %v18198_v26 = vsub.s32 6, %v18089_v9  ;;  %v16761_v36 = vld [vmem:[#allocation15 + $0x358] sm:$0xff]  }
 0x27b   : > { %15550 = vmatpush3.bf16.msra.mxu0 %v16751_v2  ;;  %v3507_v27 = vshll.u32 %v2533_v43, 16  ;;  %v2466_v62 = vmul.f32 %v2442_v51, %v446_v49  ;;  %v2445_v4 = vmax.f32 %v2421_v53, 0.0  ;;  %15578 = vmatpush3.bf16.msra.mxu1 %v16752_v10  ;;  %v18201_v50 = vsub.s32 5, %v18089_v9  ;;  %v16758_v2 = vld [vmem:[#allocation15 + $0x3d0] sm:$0xff]  }
 0x27c   : > { %19715 = vst [vmem:[#allocation36_spill] sm:$0xff] %v18198_v26  ;;  %15551 = vmatprep.subr.bf16.mxu0 %v16753_v15  ;;  %v18204_v1 = vsub.s32 7, %v18089_v9  ;;  %v2468_v6 = vmul.f32 %v2444_v61, %v448_v25  ;;  %v2467_v7 = vmul.f32 %v2443_v56, %v447_v29  ;;  %15579 = vmatprep.subr.bf16.mxu1 %v16754_v63  ;;  %v18206_v11 = vrot.slane %v3470_v46, 3  ;;  %v16759_v10 = vld [vmem:[#allocation15 + $0x310] sm:$0xff]   ;;  %v2571_v46 = vld [vmem:[#allocation3 + $0x48] sm:$0xfe] }
 0x27d   : > { %19716 = vst [vmem:[#allocation37_spill] sm:$0xff] %v18201_v50  ;;  %v2530_v43 = vpack.c.bf16 %v18160_v47, %v2498_v37  ;;  %2490 = vst [vmem:[#allocation3 + $0xc0] sm:$0xff] %v2466_v62  ;;  %v2469_v49 = vmul.f32 %v2445_v4, %v449_v41  ;;  %v18209_v15 = vrot.slane %v3473_v28, 4  ;;  %v18211_v55 = vrot.slane %v3504_v58, 3  ;;  %v2579_v35 = vld [vmem:[#allocation3 + $0x88] sm:$0xff]  ;;  %v16760_v29 = vld [vmem:[#allocation15 + $0x390] sm:$0xff]  }
 0x27e   : > { %19717 = vst [vmem:[#allocation38_spill] sm:$0xff] %v18204_v1  ;;  %v2532_v30 = vpack.c.bf16 %v18163_v31, %v2500_v45  ;;  %2492 = vst [vmem:[#allocation3 + $0xd0] sm:$0xff] %v2468_v6  ;;  %v2563_v9 = vpack.c.bf16 %v2467_v7, %v2467_v7  ;;  %v2562_v25 = vpack.c.bf16 %v2466_v62, %v2466_v62  ;;  %v18214_v34 = vrot.slane %v3507_v27, 4  ;;  %v2581_v37 = vld [vmem:[#allocation3 + $0x98] sm:$0xff] }
 0x27f   : > { %2491 = vst [vmem:[#allocation3 + $0xc8] sm:$0xff] %v2467_v7  ;;  %15552 = vmatpush3.bf16.msra.mxu0 %v16755_v42  ;;  %v3453_v47 = vshrl.u32 %v2530_v43, 16  ;;  %2493 = vst [vmem:[#allocation3 + $0xd8] sm:$0xff] %v2469_v49  ;;  %15580 = vmatpush3.bf16.msra.mxu1 %v16756_v5  ;;  %v2565_v38 = vpack.c.bf16 %v2469_v49, %v2469_v49  ;;  %v16762_v41 = vld [vmem:[#allocation15 + $0x3d8] sm:$0xff]   ;;  %v3456_v33 = vshll.u32 %v2530_v43, 16  ;;  %v16765_v5 = vld [vmem:[#allocation15 + $0x360] sm:$0xff]  }
 0x280   : > { %15553 = vmatprep.subr.bf16.mxu0 %v16757_v32  ;;  %v3487_v63 = vshrl.u32 %v2532_v30, 16  ;;  %v3490_v31 = vshll.u32 %v2532_v30, 16  ;;  %3299 = vmatprep.mubr.bf16.mxu0 %v2563_v9  ;;  %v2564_v51 = vpack.c.bf16 %v2468_v6, %v2468_v6  ;;  %v18218_v53 = vrot.slane %v18096_v16, %v18149_v48  ;;  %v2573_v28 = vld [vmem:[#allocation3 + $0x58] sm:$0xfe]  ;;  %v2578_v7 = vld [vmem:[#allocation3 + $0x80] sm:$0xff] }
 0x281   : > { %15581 = vmatprep.subr.bf16.mxu1 %v16758_v2  ;;  %v18220_v42 = vpack.c.bf16 %v2579_v35, %v2571_v46  ;;  %3347 = vmatprep.mubr.bf16.mxu1 %v2565_v38  ;;  %v18224_v58 = vrot.slane %v18105_v19, %v18149_v48  ;;  %v18228_v61 = vrot.slane %v18096_v16, %v18198_v26  ;;  %v16763_v56 = vld [vmem:[#allocation15 + $0x318] sm:$0xff]   ;;  %v18240_v32 = vrot.slane %v3453_v47, 3  ;;  %v16766_v30 = vld [vmem:[#allocation15 + $0x3e0] sm:$0xff]  }
 0x282   : > { %19718 = vst [vmem:[#allocation39_spill] sm:$0xff] %v18218_v53  ;;  %3300 = vmatmul.mubr.bf16.gmra.mrb[36].mxu0 %v2562_v25  ;;  %v18230_v27 = vpack.c.bf16 %v2581_v37, %v2573_v28  ;;  %3348 = vmatmul.mubr.bf16.gmra.mrb[36].mxu1 %v2564_v51  ;;  %v18234_v45 = vrot.slane %v18096_v16, %v18201_v50  ;;  %v16764_v4 = vld [vmem:[#allocation15 + $0x398] sm:$0xff]   ;;  %v18242_v6 = vrot.slane %v3456_v33, 4  ;;  %v18252_v49 = vrot.slane %v3487_v63, 3  ;;  %v16767_v46 = vld [vmem:[#allocation15 + $0x320] sm:$0xff]  }
 0x283   : > { %19719 = vst [vmem:[#allocation40_spill] sm:$0xff] %v18228_v61  ;;  %15554 = vmatpush3.bf16.msra.mxu0 %v16759_v10  ;;  %v18238_v62 = vrot.slane %v18096_v16, %v18204_v1  ;;  %15582 = vmatpush3.bf16.msra.mxu1 %v16760_v29  ;;  %v18246_v2 = vrot.slane %v18105_v19, %v18198_v26  ;;  %v18254_v16 = vrot.slane %v3490_v31, 4 }
 0x284   : > { %19720 = vst [vmem:[#allocation41_spill] sm:$0xff] %v18234_v45  ;;  %v18250_v43 = vrot.slane %v18105_v19, %v18201_v50  ;;  %15555 = vmatprep.subr.bf16.mxu0 %v16761_v36  ;;  %v18258_v10 = vrot.slane %v18105_v19, %v18204_v1  ;;  %15583 = vmatprep.subr.bf16.mxu1 %v16762_v41  ;;  %v2522_v25 = vld [vmem:[#allocation3 + $0xc0] sm:$0x7f]  ;;  %v16769_v19 = vld [vmem:[#allocation15 + $0x368] sm:$0xff]   ;;  %v16773_v50 = vld [vmem:[#allocation15 + $0x370] sm:$0xff]  }
 0x285   : > { %19721 = vst [vmem:[#allocation42_spill] sm:$0xff] %v18238_v62  ;;  %v2570_v36 = vld [vmem:[#allocation3 + $0x40] sm:$0xfe]  ;;  %v2538_v37 = vpack.c.bf16 %v2522_v25, %v18166_v44  ;;  %v2524_v38 = vld [vmem:[#allocation3 + $0xd0] sm:$0x7f] }
 0x286   : > { %v2523_v47 = vld [vmem:[#allocation3 + $0xc8] sm:$0x7f]  ;;  %v18268_v41 = vpack.c.bf16 %v2578_v7, %v2570_v36  ;;  %v2525_v31 = vld [vmem:[#allocation3 + $0xd8] sm:$0x7f]  ;;  %v2540_v28 = vpack.c.bf16 %v2524_v38, %v18170_v39  ;;  %v16768_v25 = vld [vmem:[#allocation15 + $0x3a0] sm:$0xff]  }
 0x287   : > { %v2539_v63 = vpack.c.bf16 %v2523_v47, %v18172_v40  ;;  %15556 = vmatpush3.bf16.msra.mxu0 %v16763_v56  ;;  %v2541_v44 = vpack.c.bf16 %v2525_v31, %v18177_v57  ;;  %15584 = vmatpush3.bf16.msra.mxu1 %v16764_v4  ;;  %v3461_v7 = vshrl.u32 %v2538_v37, 16  ;;  %v3464_v36 = vshll.u32 %v2538_v37, 16  ;;  %v16770_v56 = vld [vmem:[#allocation15 + $0x3e8] sm:$0xff]  }
 0x288   : > { %15557 = vmatprep.subr.bf16.mxu0 %v16765_v5  ;;  %15585 = vmatprep.subr.bf16.mxu1 %v16766_v30  ;;  %v3495_v33 = vshrl.u32 %v2540_v28, 16  ;;  %v3498_v51 = vshll.u32 %v2540_v28, 16  ;;  %v16771_v4 = vld [vmem:[#allocation15 + $0x328] sm:$0xff]  }
 0x289   : > { %v3478_v47 = vshrl.u32 %v2539_v63, 16  ;;  %v3481_v29 = vshll.u32 %v2539_v63, 16  ;;  %v3512_v39 = vshrl.u32 %v2541_v44, 16  ;;  %v3515_v38 = vshll.u32 %v2541_v44, 16  ;;  %v16772_v63 = vld [vmem:[#allocation15 + $0x3a8] sm:$0xff]  }
 0x28a   : > { %v3463_v8 = vrot.slane %v3461_v7, 3  ;;  %v3466_v9 = vrot.slane %v3464_v36, 4  ;;  %v2202_v57 = vpop.f32.mrb[8].mxu0  ;;  %v3497_v35 = vrot.slane %v3495_v33, 3  ;;  %v3500_v37 = vrot.slane %v3498_v51, 4  ;;  %v2253_v40 = vpop.f32.mrb[8].mxu1 }
 0x28b   : > { %15558 = vmatpush3.bf16.msra.mxu0 %v16767_v46  ;;  %v3480_v5 = vrot.slane %v3478_v47, 3  ;;  %v3483_v31 = vrot.slane %v3481_v29, 4  ;;  %v2339_v1 = vadd.f32 %v18218_v53, %v2202_v57  ;;  %v2204_v30 = vpop.f32.mrb[9].mxu0  ;;  %15586 = vmatpush3.bf16.msra.mxu1 %v16768_v25  ;;  %v3514_v28 = vrot.slane %v3512_v39, 3  ;;  %v434_v7 = vld [vmem:[#allocation12 + $0x20] sm:$0xff]  ;;  %v2255_v29 = vpop.f32.mrb[9].mxu1 }
 0x28c   : > { %15559 = vmatprep.subr.bf16.mxu0 %v16769_v19  ;;  %v3517_v26 = vrot.slane %v3515_v38, 4  ;;  %v18279_v44 = vor.u32 %v3466_v9, %v3463_v8  ;;  %v2341_v46 = vadd.f32 %v18228_v61, %v2253_v40  ;;  %v2340_v36 = vadd.f32 %v18234_v45, %v2204_v30  ;;  %v2206_v33 = vpop.f32.mrb[10].mxu0  ;;  %15587 = vmatprep.subr.bf16.mxu1 %v16770_v56  ;;  %v16774_v51 = vld [vmem:[#allocation15 + $0x3f0] sm:$0xff]   ;;  %v435_v38 = vld [vmem:[#allocation12 + $0x28] sm:$0xff]  ;;  %v2257_v40 = vpop.f32.mrb[10].mxu1 }
 0x28d   : > { %v16775_v47 = vld [vmem:[#allocation15 + $0x330] sm:$0xff]   ;;  %v18283_v57 = vor.u32 %v3483_v31, %v3480_v5  ;;  %v18285_v25 = vor.u32 %v3500_v37, %v3497_v35  ;;  %v2406_v19 = vadd.f32 %v18224_v58, %v2339_v1  ;;  %v2342_v8 = vadd.f32 %v18238_v62, %v2255_v29  ;;  %v2208_v48 = vpop.f32.mrb[11].mxu0  ;;  %v437_v31 = vld [vmem:[#allocation12 + $0x38] sm:$0xff]  ;;  %v442_v35 = vld [vmem:[#allocation12 + $0x60] sm:$0xff]  ;;  %v2259_v23 = vpop.f32.mrb[11].mxu1 }
 0x28e   : > { %v436_v39 = vld [vmem:[#allocation12 + $0x30] sm:$0xff]  ;;  %v2347_v9 = vadd.f32 %v18218_v53, %v2206_v33  ;;  %v18290_v24 = vor.u32 %v3517_v26, %v3514_v28  ;;  %v2408_v56 = vadd.f32 %v18246_v2, %v2341_v46  ;;  %v2407_v5 = vadd.f32 %v18250_v43, %v2340_v36  ;;  %v16777_v29 = vld [vmem:[#allocation15 + $0x378] sm:$0xff]  }
 0x28f   : > { %v16776_v30 = vld [vmem:[#allocation15 + $0x3b0] sm:$0xff]   ;;  %v2349_v37 = vadd.f32 %v18228_v61, %v2257_v40  ;;  %v2348_v1 = vadd.f32 %v18234_v45, %v2208_v48  ;;  %15560 = vmatpush3.bf16.msra.mxu0 %v16771_v4  ;;  %v2430_v33 = vmax.f32 %v2406_v19, 0.0  ;;  %v2409_v22 = vadd.f32 %v18258_v10, %v2342_v8  ;;  %15588 = vmatpush3.bf16.msra.mxu1 %v16772_v63  ;;  %v16778_v36 = vld [vmem:[#allocation15 + $0x3f8] sm:$0xff]  }
 0x290   : > { %v2414_v26 = vadd.f32 %v18224_v58, %v2347_v9  ;;  %v444_v28 = vld [vmem:[#allocation12 + $0x70] sm:$0xff]  ;;  %v2350_v46 = vadd.f32 %v18238_v62, %v2259_v23  ;;  %15561 = vmatprep.subr.bf16.mxu0 %v16773_v50  ;;  %v2432_v20 = vmax.f32 %v2408_v56, 0.0  ;;  %v2431_v40 = vmax.f32 %v2407_v5, 0.0  ;;  %15589 = vmatprep.subr.bf16.mxu1 %v16774_v51  ;;  %v16779_v19 = vld [vmem:[#allocation15 + $0x338] sm:$0xff]  }
 0x291   : > { %v2416_v48 = vadd.f32 %v18246_v2, %v2349_v37  ;;  %v2415_v4 = vadd.f32 %v18250_v43, %v2348_v1  ;;  %v18301_v8 = vmul.f32 %v2430_v33, %v434_v7  ;;  %v2433_v9 = vmax.f32 %v2409_v22, 0.0  ;;  %v16780_v37 = vld [vmem:[#allocation15 + $0x3b8] sm:$0xff]  }
 0x292   : > { %v2438_v14 = vmax.f32 %v2414_v26, 0.0  ;;  %v2417_v13 = vadd.f32 %v18258_v10, %v2350_v46  ;;  %v18304_v23 = vmul.f32 %v2432_v20, %v436_v39  ;;  %v2455_v50 = vmul.f32 %v2431_v40, %v435_v38  ;;  %v2212_v5 = vpop.f32.mrb[28].mxu0  ;;  %v2263_v22 = vpop.f32.mrb[28].mxu1  ;;  %v2505_v20 = vld [vmem:[#allocation3 + $0x38] sm:$0x80]  ;;  %v16781_v39 = vld [vmem:[#allocation15 + $0x40] sm:$0xff]  }
 0x293   : > { %v2440_v63 = vmax.f32 %v2416_v48, 0.0  ;;  %v2439_v56 = vmax.f32 %v2415_v4, 0.0  ;;  %15562 = vmatpush3.bf16.msra.mxu0 %v16775_v47  ;;  %2478 = vst [vmem:[#allocation3 + $0x60] sm:$0xff] %v18301_v8  ;;  %v2457_v1 = vmul.f32 %v2433_v9, %v437_v31  ;;  %v2290_v7 = vadd.f32 %v2212_v5, %v18081_v60  ;;  %v2214_v33 = vpop.f32.mrb[29].mxu0  ;;  %15590 = vmatpush3.bf16.msra.mxu1 %v16776_v30  ;;  %v16782_v60 = vld [vmem:[#allocation15 + $0xc0] sm:$0xff]   ;;  %v452_v9 = vld [vmem:[#allocation12 + $0xb0] sm:$0xff] }
 0x294   : > { %v18307_v51 = vmul.f32 %v2438_v14, %v442_v35  ;;  %v2441_v12 = vmax.f32 %v2417_v13, 0.0  ;;  %15563 = vmatprep.subr.bf16.mxu0 %v16777_v29  ;;  %2480 = vst [vmem:[#allocation3 + $0x70] sm:$0xff] %v18304_v23  ;;  %2479 = vst [vmem:[#allocation3 + $0x68] sm:$0xff] %v2455_v50  ;;  %v2292_v31 = vadd.f32 %v2263_v22, %v18083_v0  ;;  %v2265_v13 = vpop.f32.mrb[29].mxu1  ;;  %15591 = vmatprep.subr.bf16.mxu1 %v16778_v36  ;;  %v2216_v35 = vpop.f32.mrb[30].mxu0 }
 0x295   : > { %v18311_v38 = vmul.f32 %v2440_v63, %v444_v28  ;;  %v18313_v47 = vmul.f32 %v2439_v56, %v443_v21  ;;  %v2291_v14 = vadd.f32 %v2214_v33, %v18085_v59  ;;  %2481 = vst [vmem:[#allocation3 + $0x78] sm:$0xff] %v2457_v1  ;;  %v2355_v29 = vadd.f32 %v18218_v53, %v2290_v7  ;;  %v16783_v21 = vld [vmem:[#allocation15] sm:$0xff]   ;;  %v2217_v46 = vpop.f32.mrb[31].mxu0  ;;  %v2267_v0 = vpop.f32.mrb[30].mxu1  ;;  %v2595_v48 = vld [vmem:[#allocation3 + $0x108] sm:$0x1] }
 0x296   : > { %2486 = vst [vmem:[#allocation3 + $0xa0] sm:$0xff] %v18307_v51  ;;  %v18318_v30 = vmul.f32 %v2441_v12, %v445_v18  ;;  %v2293_v26 = vadd.f32 %v2265_v13, %v18087_v3  ;;  %v18322_v28 = vpack.c.bf16 %v2455_v50, %v2503_v17  ;;  %v450_v59 = vld [vmem:[#allocation12 + $0xa0] sm:$0xff]  ;;  %v2357_v36 = vadd.f32 %v18228_v61, %v2292_v31  ;;  %v2268_v17 = vpop.f32.mrb[31].mxu1  ;;  %v451_v63 = vld [vmem:[#allocation12 + $0xa8] sm:$0xff]  ;;  %v2597_v22 = vld [vmem:[#allocation3 + $0x118] sm:$0x1] }
 0x297   : > { %2488 = vst [vmem:[#allocation3 + $0xb0] sm:$0xff] %v18311_v38  ;;  %2487 = vst [vmem:[#allocation3 + $0xa8] sm:$0xff] %v18313_v47  ;;  %v2356_v40 = vadd.f32 %v18234_v45, %v2291_v14  ;;  %15564 = vmatpush3.bf16.msra.mxu0 %v16779_v19  ;;  %v2559_v12 = vpack.c.bf16 %v18313_v47, %v2455_v50  ;;  %v18329_v18 = vpack.c.bf16 %v2457_v1, %v2505_v20  ;;  %v16784_v3 = vld [vmem:[#allocation15 + $0x80] sm:$0xff]   ;;  %v16785_v19 = vld [vmem:[#allocation15 + $0x48] sm:$0xff]  }
 0x298   : > { %2489 = vst [vmem:[#allocation3 + $0xb8] sm:$0xff] %v18318_v30  ;;  %v2422_v4 = vadd.f32 %v18224_v58, %v2355_v29  ;;  %v2358_v56 = vadd.f32 %v18238_v62, %v2293_v26  ;;  %15592 = vmatpush3.bf16.msra.mxu1 %v16780_v37  ;;  %v2561_v5 = vpack.c.bf16 %v18318_v30, %v2457_v1  ;;  %v16786_v7 = vld [vmem:[#allocation15 + $0xc8] sm:$0xff]   ;;  %v3538_v50 = vshrl.u32 %v18322_v28, 16  ;;  %v2589_v13 = vld [vmem:[#allocation3 + $0xd8] sm:$0xff]  ;;  %v2502_v46 = vld [vmem:[#allocation3 + $0x20] sm:$0x80] }
 0x299   : > { %15605 = vmatprep.subr.bf16.mxu0 %v16781_v39  ;;  %v2424_v33 = vadd.f32 %v18246_v2, %v2357_v36  ;;  %v2423_v20 = vadd.f32 %v18250_v43, %v2356_v40  ;;  %3387 = vmatprep.mubr.bf16.mxu0 %v2559_v12  ;;  %v2558_v58 = vpack.c.bf16 %v18307_v51, %v18301_v8  ;;  %v3541_v31 = vshll.u32 %v18322_v28, 16  ;;  %v2587_v37 = vld [vmem:[#allocation3 + $0xc8] sm:$0xff]  ;;  %v453_v29 = vld [vmem:[#allocation12 + $0xb8] sm:$0xff]  ;;  %v2504_v12 = vld [vmem:[#allocation3 + $0x30] sm:$0x80] }
 0x29a   : > { %15633 = vmatprep.subr.bf16.mxu1 %v16782_v60  ;;  %v2446_v14 = vmax.f32 %v2422_v4, 0.0  ;;  %v2425_v1 = vadd.f32 %v18258_v10, %v2358_v56  ;;  %3435 = vmatprep.mubr.bf16.mxu1 %v2561_v5  ;;  %v2560_v39 = vpack.c.bf16 %v18311_v38, %v18304_v23  ;;  %v19722_v2 = vor.u32 %v18209_v15, %v18206_v11  ;;  %v16787_v26 = vld [vmem:[#allocation15 + $0x8] sm:$0xff]   ;;  %v16790_v56 = vld [vmem:[#allocation15 + $0xd0] sm:$0xff]   ;;  %v16815_v61 = vld [vmem:[#allocation15 + $0x100] sm:$0xff]  }
 0x29b   : > { %v2448_v60 = vmax.f32 %v2424_v33, 0.0  ;;  %v2447_v35 = vmax.f32 %v2423_v20, 0.0  ;;  %3388 = vmatmul.mubr.bf16.vlgmr.msra.gmra.mrb[40].mxu0 %v2558_v58  ;;  %v19723_v10 = vor.u32 %v18214_v34, %v18211_v55  ;;  %v19724_v11 = vor.u32 %v18242_v6, %v18240_v32  ;;  %v16788_v40 = vld [vmem:[#allocation15 + $0x88] sm:$0xff]   ;;  %v2580_v32 = vld [vmem:[#allocation3 + $0x90] sm:$0xff] }
 0x29c   : > { %v18349_v43 = vsel %vm3451_vm0, %v19722_v2, %v18283_v57  ;;  %v2470_v0 = vmul.f32 %v2446_v14, %v450_v59  ;;  %v2449_v36 = vmax.f32 %v2425_v1, 0.0  ;;  %3436 = vmatmul.mubr.bf16.vlgmr.msra.gmra.mrb[40].mxu1 %v2560_v39  ;;  %15606 = vmatpush3.bf16.msra.mxu0 %v16783_v21  ;;  %v19725_v55 = vor.u32 %v18254_v16, %v18252_v49  ;;  %v16789_v59 = vld [vmem:[#allocation15 + $0x50] sm:$0xff]   ;;  %v2594_v21 = vld [vmem:[#allocation3 + $0x100] sm:$0x1] }
 0x29d   : > { %v18356_v28 = vsel %vm3451_vm0, %v19723_v10, %v18290_v24  ;;  %v18363_v15 = vsel %vm3451_vm0, %v19724_v11, %v18279_v44  ;;  %v18372_v17 = vpack.c.bf16 %v2595_v48, %v2587_v37  ;;  %v2472_v6 = vmul.f32 %v2448_v60, %v452_v9  ;;  %15634 = vmatpush3.bf16.msra.mxu1 %v16784_v3  ;;  %v2572_v20 = vld [vmem:[#allocation3 + $0x50] sm:$0xfe]  ;;  %v2586_v9 = vld [vmem:[#allocation3 + $0xc0] sm:$0xff]  ;;  %v2596_v14 = vld [vmem:[#allocation3 + $0x110] sm:$0x1] }
 0x29e   : > { %v18370_v34 = vsel %vm3451_vm0, %v19725_v55, %v18285_v25  ;;  %v2471_v4 = vmul.f32 %v2447_v35, %v451_v63  ;;  %15607 = vmatprep.subr.bf16.mxu0 %v16785_v19  ;;  %v18374_v5 = vpack.c.bf16 %v2597_v22, %v2589_v13  ;;  %2494 = vst [vmem:[#allocation3 + $0xe0] sm:$0xff] %v2470_v0  ;;  %v16791_v16 = vld [vmem:[#allocation15 + $0x10] sm:$0xff]   ;;  %v18377_v58 = vrot.slane %v3538_v50, 3  ;;  %v16793_v50 = vld [vmem:[#allocation15 + $0x58] sm:$0xff]  }
 0x29f   : > { %v2473_v49 = vmul.f32 %v2449_v36, %v453_v29  ;;  %15635 = vmatprep.subr.bf16.mxu1 %v16786_v7  ;;  %v2534_v48 = vpack.c.bf16 %v18301_v8, %v2502_v46  ;;  %v4313_v3 = vshll.u32 %v18268_v41, 16  ;;  %2496 = vst [vmem:[#allocation3 + $0xf0] sm:$0xff] %v2472_v6  ;;  %v16792_v19 = vld [vmem:[#allocation15 + $0x90] sm:$0xff]   ;;  %v18381_v22 = vrot.slane %v3541_v31, 4  ;;  %v16794_v35 = vld [vmem:[#allocation15 + $0xd8] sm:$0xff]  }
 0x2a0   : > { %2495 = vst [vmem:[#allocation3 + $0xe8] sm:$0xff] %v2471_v4  ;;  %v2567_v63 = vpack.c.bf16 %v2471_v4, %v2471_v4  ;;  %v3572_v37 = vshrl.u32 %v18329_v18, 16  ;;  %v18384_v1 = vpack.c.bf16 %v2580_v32, %v2572_v20  ;;  %15608 = vmatpush3.bf16.msra.mxu0 %v16787_v26  ;;  %v3575_v8 = vshll.u32 %v18329_v18, 16  ;;  %v2588_v13 = vld [vmem:[#allocation3 + $0xd0] sm:$0xff]  ;;  %v16795_v11 = vld [vmem:[#allocation15 + $0x18] sm:$0xff]  }
 0x2a1   : > { %2497 = vst [vmem:[#allocation3 + $0xf8] sm:$0xff] %v2473_v49  ;;  %v2569_v7 = vpack.c.bf16 %v2473_v49, %v2473_v49  ;;  %v3521_v39 = vshrl.u32 %v2534_v48, 16  ;;  %v3524_v2 = vshll.u32 %v2534_v48, 16  ;;  %15636 = vmatpush3.bf16.msra.mxu1 %v16788_v40  ;;  %v2566_v60 = vpack.c.bf16 %v2470_v0, %v2470_v0  ;;  %15609 = vmatprep.subr.bf16.mxu0 %v16789_v59  ;;  %v16796_v0 = vld [vmem:[#allocation15 + $0x98] sm:$0xff]   ;;  %v16797_v40 = vld [vmem:[#allocation15 + $0x60] sm:$0xff]  }
 0x2a2   : > { %3395 = vmatprep.mubr.bf16.mxu0 %v2567_v63  ;;  %v2536_v31 = vpack.c.bf16 %v18304_v23, %v2504_v12  ;;  %v4330_v29 = vshll.u32 %v18372_v17, 16  ;;  %v4354_v10 = vshll.u32 %v18374_v5, 16  ;;  %v2568_v26 = vpack.c.bf16 %v2472_v6, %v2472_v6  ;;  %15637 = vmatprep.subr.bf16.mxu1 %v16790_v56  ;;  %v16798_v59 = vld [vmem:[#allocation15 + $0xe0] sm:$0xff]  }
 0x2a3   : > { %3443 = vmatprep.mubr.bf16.mxu1 %v2569_v7  ;;  %v18390_v46 = vrot.slane %v3521_v39, 3  ;;  %v18392_v18 = vrot.slane %v3524_v2, 4  ;;  %v18394_v36 = vpack.c.bf16 %v2594_v21, %v2586_v9  ;;  %3396 = vmatmul.mubr.bf16.gmra.mrb[44].mxu0 %v2566_v60  ;;  %v19726_v12 = vshll.u32 %v18220_v42, 16  ;;  %v16800_v60 = vld [vmem:[#allocation15 + $0xa0] sm:$0xff]  }
 0x2a4   : > { %v3555_v55 = vshrl.u32 %v2536_v31, 16  ;;  %v3558_v23 = vshll.u32 %v2536_v31, 16  ;;  %v19727_v4 = vshll.u32 %v18230_v27, 16  ;;  %3444 = vmatmul.mubr.bf16.gmra.mrb[44].mxu1 %v2568_v26  ;;  %15610 = vmatpush3.bf16.msra.mxu0 %v16791_v16  ;;  %v18406_v56 = vrot.slane %v4313_v3, 1  ;;  %v16799_v3 = vld [vmem:[#allocation15 + $0x20] sm:$0xff]   ;;  %v16801_v31 = vld [vmem:[#allocation15 + $0x68] sm:$0xff]  }
 0x2a5   : > { %v18398_v32 = vrot.slane %v19726_v12, 1  ;;  %v18408_v20 = vpack.c.bf16 %v2596_v14, %v2588_v13  ;;  %15638 = vmatpush3.bf16.msra.mxu1 %v16792_v19  ;;  %4020 = vmatprep.mubr.bf16.mxu0 %v18349_v43  ;;  %v18412_v48 = vrot.slane %v3572_v37, 3  ;;  %v18414_v9 = vrot.slane %v3575_v8, 4  ;;  %v2526_v63 = vld [vmem:[#allocation3 + $0xe0] sm:$0x7f]  ;;  %v2583_v12 = vld [vmem:[#allocation3 + $0xa8] sm:$0xff] }
 0x2a6   : > { %v18402_v6 = vrot.slane %v19727_v4, 1  ;;  %v18416_v7 = vrot.slane %v4330_v29, 1  ;;  %v18418_v16 = vrot.slane %v4354_v10, 1  ;;  %4068 = vmatprep.mubr.bf16.mxu1 %v18356_v28  ;;  %15611 = vmatprep.subr.bf16.mxu0 %v16793_v50  ;;  %v2542_v14 = vpack.c.bf16 %v2526_v63, %v18307_v51  ;;  %v2528_v43 = vld [vmem:[#allocation3 + $0xf0] sm:$0x7f]  ;;  %v16802_v10 = vld [vmem:[#allocation15 + $0xe8] sm:$0xff]  }
 0x2a7   : > { %v2527_v39 = vld [vmem:[#allocation3 + $0xe8] sm:$0x7f]  ;;  %v3527_v19 = vor.u32 %v18392_v18, %v18390_v46  ;;  %v4318_v37 = vshll.u32 %v18394_v36, 16  ;;  %v4337_v8 = vshll.u32 %v18384_v1, 16  ;;  %15639 = vmatprep.subr.bf16.mxu1 %v16794_v35  ;;  %v2544_v28 = vpack.c.bf16 %v2528_v43, %v18311_v38 }
 0x2a8   : > { %v2543_v2 = vpack.c.bf16 %v2527_v39, %v18313_v47  ;;  %v2529_v13 = vld [vmem:[#allocation3 + $0xf8] sm:$0x7f]  ;;  %v3557_v50 = vrot.slane %v3555_v55, 3  ;;  %v3560_v29 = vrot.slane %v3558_v23, 4  ;;  %15612 = vmatpush3.bf16.msra.mxu0 %v16795_v11  ;;  %v3529_v26 = vshrl.u32 %v2542_v14, 16  ;;  %v16803_v38 = vld [vmem:[#allocation15 + $0x28] sm:$0xff]  }
 0x2a9   : > { %v2545_v51 = vpack.c.bf16 %v2529_v13, %v18318_v30  ;;  %v3532_v46 = vshll.u32 %v2542_v14, 16  ;;  %v4342_v18 = vshll.u32 %v18408_v20, 16  ;;  %15640 = vmatpush3.bf16.msra.mxu1 %v16796_v0  ;;  %15613 = vmatprep.subr.bf16.mxu0 %v16797_v40  ;;  %v3563_v35 = vshrl.u32 %v2544_v28, 16  ;;  %v2575_v39 = vld [vmem:[#allocation3 + $0x68] sm:$0xfe]  ;;  %v16805_v13 = vld [vmem:[#allocation15 + $0x70] sm:$0xff]  }
 0x2aa   : > { %v3546_v47 = vshrl.u32 %v2543_v2, 16  ;;  %v3549_v4 = vshll.u32 %v2543_v2, 16  ;;  %v3566_v63 = vshll.u32 %v2544_v28, 16  ;;  %15641 = vmatprep.subr.bf16.mxu1 %v16798_v59  ;;  %v3531_v43 = vrot.slane %v3529_v26, 3  ;;  %v16804_v11 = vld [vmem:[#allocation15 + $0xa8] sm:$0xff]   ;;  %v16806_v0 = vld [vmem:[#allocation15 + $0xf0] sm:$0xff]  }
 0x2ab   : > { %v3580_v55 = vshrl.u32 %v2545_v51, 16  ;;  %v3583_v23 = vshll.u32 %v2545_v51, 16  ;;  %v3534_v30 = vrot.slane %v3532_v46, 4  ;;  %v3565_v33 = vrot.slane %v3563_v35, 3  ;;  %v2599_v28 = vld [vmem:[#allocation3 + $0x128] sm:$0x1] }
 0x2ac   : > { %v3548_v49 = vrot.slane %v3546_v47, 3  ;;  %v3551_v14 = vrot.slane %v3549_v4, 4  ;;  %v3568_v21 = vrot.slane %v3566_v63, 4  ;;  %15614 = vmatpush3.bf16.msra.mxu0 %v16799_v3  ;;  %v18432_v45 = vpack.c.bf16 %v2583_v12, %v2575_v39  ;;  %v2585_v59 = vld [vmem:[#allocation3 + $0xb8] sm:$0xff]  ;;  %v2591_v4 = vld [vmem:[#allocation3 + $0xe8] sm:$0xff]  ;;  %v2582_v35 = vld [vmem:[#allocation3 + $0xa0] sm:$0xff] }
 0x2ad   : > { %v3582_v40 = vrot.slane %v3580_v55, 3  ;;  %v3585_v62 = vrot.slane %v3583_v23, 4  ;;  %v18430_v2 = vor.u32 %v3534_v30, %v3531_v43  ;;  %15642 = vmatpush3.bf16.msra.mxu1 %v16800_v60  ;;  %15615 = vmatprep.subr.bf16.mxu0 %v16801_v31  ;;  %v3561_v26 = vor.u32 %v3560_v29, %v3557_v50  ;;  %v2601_v3 = vld [vmem:[#allocation3 + $0x138] sm:$0x1]  ;;  %v2590_v63 = vld [vmem:[#allocation3 + $0xe0] sm:$0xff]  ;;  %v16807_v23 = vld [vmem:[#allocation15 + $0x30] sm:$0xff]  }
 0x2ae   : > { %v18434_v51 = vor.u32 %v3551_v14, %v3548_v49  ;;  %v18436_v46 = vor.u32 %v3568_v21, %v3565_v33  ;;  %v18438_v47 = vrot.slane %v4318_v37, 1  ;;  %v2598_v55 = vld [vmem:[#allocation3 + $0x120] sm:$0x1]  ;;  %15643 = vmatprep.subr.bf16.mxu1 %v16802_v10  ;;  %v3578_v12 = vor.u32 %v18414_v9, %v18412_v48  ;;  %v2577_v21 = vld [vmem:[#allocation3 + $0x78] sm:$0xfe]  ;;  %v16808_v60 = vld [vmem:[#allocation15 + $0xb0] sm:$0xff]  }
 0x2af   : > { %v18442_v39 = vor.u32 %v3585_v62, %v3582_v40  ;;  %v18446_v49 = vsel %vm3451_vm0, %v3527_v19, %v18430_v2  ;;  %v18448_v33 = vrot.slane %v4337_v8, 1  ;;  %v2593_v37 = vld [vmem:[#allocation3 + $0xf8] sm:$0xff]  ;;  %v19728_v50 = vor.u32 %v18381_v22, %v18377_v58  ;;  %v2574_v48 = vld [vmem:[#allocation3 + $0x60] sm:$0xfe]  ;;  %v2584_v43 = vld [vmem:[#allocation3 + $0xb0] sm:$0xff] }
 0x2b0   : > { %v16809_v31 = vld [vmem:[#allocation15 + $0x78] sm:$0xff]   ;;  %v18459_v62 = vsel %vm3451_vm0, %v3561_v26, %v18436_v46  ;;  %15616 = vmatpush3.bf16.msra.mxu0 %v16803_v38  ;;  %v18465_v8 = vrot.slane %v4342_v18, 1  ;;  %v18469_v22 = vpack.c.bf16 %v2599_v28, %v2591_v4  ;;  %v4373_v30 = vshll.u32 %v18432_v45, 16  ;;  %v2592_v38 = vld [vmem:[#allocation3 + $0xf0] sm:$0xff]  ;;  %v16813_v10 = vld [vmem:[#allocation15 + $0x140] sm:$0xff]  }
 0x2b1   : > { %v18455_v29 = vsel %vm3451_vm0, %v19728_v50, %v18434_v51  ;;  %v16810_v9 = vld [vmem:[#allocation15 + $0xf8] sm:$0xff]   ;;  %v18463_v19 = vsel %vm3451_vm0, %v3578_v12, %v18442_v39  ;;  %15644 = vmatpush3.bf16.msra.mxu1 %v16804_v11  ;;  %15617 = vmatprep.subr.bf16.mxu0 %v16805_v13  ;;  %v18472_v14 = vpack.c.bf16 %v2585_v59, %v2577_v21  ;;  %v2600_v40 = vld [vmem:[#allocation3 + $0x130] sm:$0x1]  ;;  %v2576_v11 = vld [vmem:[#allocation3 + $0x70] sm:$0xfe] }
 0x2b2   : > { %15645 = vmatprep.subr.bf16.mxu1 %v16806_v0  ;;  %v16811_v26 = vld [vmem:[#allocation15 + $0x38] sm:$0xff]   ;;  %v18474_v12 = vpack.c.bf16 %v2601_v3, %v2593_v37  ;;  %v18476_v18 = vpack.c.bf16 %v2582_v35, %v2574_v48  ;;  %v18478_v50 = vpack.c.bf16 %v2598_v55, %v2590_v63  ;;  %v4378_v59 = vshll.u32 %v18469_v22, 16  ;;  %v16814_v4 = vld [vmem:[#allocation15 + $0x1c0] sm:$0xff]  }
 0x2b3   : > { %v16812_v13 = vld [vmem:[#allocation15 + $0xb8] sm:$0xff]   ;;  %v4397_v21 = vshll.u32 %v18472_v14, 16  ;;  %v18488_v55 = vrot.slane %v4373_v30, 1  ;;  %v4395_v37 = vshrl.u32 %v18472_v14, 16  ;;  %v18491_v48 = vpack.c.bf16 %v2584_v43, %v2576_v11  ;;  %v16817_v30 = vld [vmem:[#allocation15 + $0x148] sm:$0xff]   ;;  %v16896_v14 = vld [vmem:[#allocation15 + $0x5a0] sm:$0xff]  }
 0x2b4   : > { %15618 = vmatpush3.bf16.msra.mxu0 %v16807_v23  ;;  %v4402_v3 = vshll.u32 %v18474_v12, 16  ;;  %v4361_v35 = vshll.u32 %v18476_v18, 16  ;;  %v4366_v63 = vshll.u32 %v18478_v50, 16  ;;  %v18493_v28 = vrot.slane %v4378_v59, 1  ;;  %v16819_v11 = vld [vmem:[#allocation15 + $0x108] sm:$0xff]  }
 0x2b5   : > { %15646 = vmatpush3.bf16.msra.mxu1 %v16808_v60  ;;  %15619 = vmatprep.subr.bf16.mxu0 %v16809_v31  ;;  %v18495_v23 = vrot.slane %v4397_v21, 1  ;;  %v4359_v0 = vshrl.u32 %v18476_v18, 16  ;;  %v18498_v58 = vpack.c.bf16 %v2600_v40, %v2592_v38  ;;  %v4385_v60 = vshll.u32 %v18491_v48, 16  ;;  %v16816_v31 = vld [vmem:[#allocation15 + $0x180] sm:$0xff]   ;;  %v16818_v38 = vld [vmem:[#allocation15 + $0x1c8] sm:$0xff]  }
 0x2b6   : > { %15647 = vmatprep.subr.bf16.mxu1 %v16810_v9  ;;  %v18500_v53 = vrot.slane %v4402_v3, 1  ;;  %v18503_v43 = vrot.slane %v4361_v35, 1  ;;  %v18505_v9 = vrot.slane %v4366_v63, 1  ;;  %v4421_v21 = vshrl.u32 %v18469_v22, 16  ;;  %v16826_v63 = vld [vmem:[#allocation15 + $0x1d8] sm:$0xff]  }
 0x2b7   : > { %v4390_v59 = vshll.u32 %v18498_v58, 16  ;;  %v18509_v40 = vrot.slane %v4385_v60, 1  ;;  %v4427_v3 = vshrl.u32 %v18474_v12, 16  ;;  %v16822_v60 = vld [vmem:[#allocation15 + $0x1d0] sm:$0xff]  }
 0x2b8   : > { %15620 = vmatpush3.bf16.msra.mxu0 %v16811_v26  ;;  %v16825_v26 = vld [vmem:[#allocation15 + $0x158] sm:$0xff]  }
 0x2b9   : > { %15648 = vmatpush3.bf16.msra.mxu1 %v16812_v13  ;;  %15661 = vmatprep.subr.bf16.mxu0 %v16813_v10  ;;  %v18514_v35 = vrot.slane %v4390_v59, 1  ;;  %v16820_v10 = vld [vmem:[#allocation15 + $0x188] sm:$0xff]   ;;  %v16821_v13 = vld [vmem:[#allocation15 + $0x150] sm:$0xff]   ;;  %v4429_v18 = vor.u32 %v4427_v3, %v18500_v53 }
 0x2ba   : > { %15689 = vmatprep.subr.bf16.mxu1 %v16814_v4  ;;  %v16823_v4 = vld [vmem:[#allocation15 + $0x110] sm:$0xff]  }
 0x2bb   : > { %4021 = vmatmul.mubr.bf16.vlgmr.msra.gmra.mrb[48].mxu0 %v18363_v15  ;;  %v16824_v59 = vld [vmem:[#allocation15 + $0x190] sm:$0xff]   ;;  %v16830_v15 = vld [vmem:[#allocation15 + $0x1e0] sm:$0xff]  }
 0x2bc   : > { %4069 = vmatmul.mubr.bf16.vlgmr.msra.gmra.mrb[48].mxu1 %v18370_v34  ;;  %4028 = vmatprep.mubr.bf16.mxu0 %v18283_v57  ;;  %v16827_v57 = vld [vmem:[#allocation15 + $0x118] sm:$0xff]   ;;  %v16831_v34 = vld [vmem:[#allocation15 + $0x120] sm:$0xff]  }
 0x2bd   : > { %4076 = vmatprep.mubr.bf16.mxu1 %v18290_v24  ;;  %15662 = vmatpush3.bf16.msra.mxu0 %v16815_v61  ;;  %v16828_v24 = vld [vmem:[#allocation15 + $0x198] sm:$0xff]   ;;  %v16829_v61 = vld [vmem:[#allocation15 + $0x160] sm:$0xff]  }
 0x2be   : > { %15690 = vmatpush3.bf16.msra.mxu1 %v16816_v31  ;;  %15663 = vmatprep.subr.bf16.mxu0 %v16817_v30  ;;  %v16832_v31 = vld [vmem:[#allocation15 + $0x1a0] sm:$0xff]   ;;  %v16833_v30 = vld [vmem:[#allocation15 + $0x168] sm:$0xff]  }
 0x2bf   : > { %15691 = vmatprep.subr.bf16.mxu1 %v16818_v38  ;;  %v16838_v38 = vld [vmem:[#allocation15 + $0x1f0] sm:$0xff]  }
 0x2c1   : > { %15664 = vmatpush3.bf16.msra.mxu0 %v16819_v11  ;;  %v16836_v11 = vld [vmem:[#allocation15 + $0x1a8] sm:$0xff]  }
 0x2c2   : > { %15692 = vmatpush3.bf16.msra.mxu1 %v16820_v10  ;;  %15665 = vmatprep.subr.bf16.mxu0 %v16821_v13  ;;  %v16840_v10 = vld [vmem:[#allocation15 + $0x1b0] sm:$0xff]   ;;  %v16843_v13 = vld [vmem:[#allocation15 + $0x138] sm:$0xff]  }
 0x2c3   : > { %4029 = vmatmul.mubr.bf16.gmra.mrb[52].mxu0 %v18279_v44  ;;  %15693 = vmatprep.subr.bf16.mxu1 %v16822_v60  ;;  %v16834_v44 = vld [vmem:[#allocation15 + $0x1e8] sm:$0xff]   ;;  %v16844_v60 = vld [vmem:[#allocation15 + $0x1b8] sm:$0xff]  }
 0x2c4   : > { %4077 = vmatmul.mubr.bf16.gmra.mrb[52].mxu1 %v18285_v25  ;;  %4116 = vmatprep.mubr.bf16.mxu0 %v18455_v29  ;;  %v16835_v25 = vld [vmem:[#allocation15 + $0x128] sm:$0xff]   ;;  %v16837_v29 = vld [vmem:[#allocation15 + $0x170] sm:$0xff]  }
 0x2c5   : > { %15666 = vmatpush3.bf16.msra.mxu0 %v16823_v4  ;;  %4164 = vmatprep.mubr.bf16.mxu1 %v18463_v19  ;;  %v16839_v19 = vld [vmem:[#allocation15 + $0x130] sm:$0xff]   ;;  %v16845_v4 = vld [vmem:[#allocation15 + $0x440] sm:$0xff]  }
 0x2c6   : > { %15694 = vmatpush3.bf16.msra.mxu1 %v16824_v59  ;;  %15667 = vmatprep.subr.bf16.mxu0 %v16825_v26  ;;  %v16841_v26 = vld [vmem:[#allocation15 + $0x178] sm:$0xff]   ;;  %v16846_v59 = vld [vmem:[#allocation15 + $0x4c0] sm:$0xff]  }
 0x2c7   : > { %15695 = vmatprep.subr.bf16.mxu1 %v16826_v63  ;;  %v16842_v63 = vld [vmem:[#allocation15 + $0x1f8] sm:$0xff]  }
 0x2c9   : > { %15668 = vmatpush3.bf16.msra.mxu0 %v16827_v57  ;;  %v16847_v57 = vld [vmem:[#allocation15 + $0x400] sm:$0xff]  }
 0x2ca   : > { %15696 = vmatpush3.bf16.msra.mxu1 %v16828_v24  ;;  %15669 = vmatprep.subr.bf16.mxu0 %v16829_v61  ;;  %v16848_v24 = vld [vmem:[#allocation15 + $0x480] sm:$0xff]   ;;  %v16849_v61 = vld [vmem:[#allocation15 + $0x448] sm:$0xff]  }
 0x2cb   : > { %15697 = vmatprep.subr.bf16.mxu1 %v16830_v15  ;;  %v16850_v15 = vld [vmem:[#allocation15 + $0x4c8] sm:$0xff]  }
 0x2cd   : > { %15670 = vmatpush3.bf16.msra.mxu0 %v16831_v34  ;;  %v16851_v34 = vld [vmem:[#allocation15 + $0x408] sm:$0xff]  }
 0x2ce   : > { %15698 = vmatpush3.bf16.msra.mxu1 %v16832_v31  ;;  %15671 = vmatprep.subr.bf16.mxu0 %v16833_v30  ;;  %v16852_v31 = vld [vmem:[#allocation15 + $0x488] sm:$0xff]   ;;  %v16853_v30 = vld [vmem:[#allocation15 + $0x450] sm:$0xff]  }
 0x2cf   : > { %15699 = vmatprep.subr.bf16.mxu1 %v16834_v44  ;;  %v16854_v44 = vld [vmem:[#allocation15 + $0x4d0] sm:$0xff]  }
 0x2d1   : > { %15672 = vmatpush3.bf16.msra.mxu0 %v16835_v25  ;;  %v16855_v25 = vld [vmem:[#allocation15 + $0x410] sm:$0xff]  }
 0x2d2   : > { %15700 = vmatpush3.bf16.msra.mxu1 %v16836_v11  ;;  %15673 = vmatprep.subr.bf16.mxu0 %v16837_v29  ;;  %v16856_v11 = vld [vmem:[#allocation15 + $0x490] sm:$0xff]   ;;  %v16857_v29 = vld [vmem:[#allocation15 + $0x458] sm:$0xff]  }
 0x2d3   : > { %15701 = vmatprep.subr.bf16.mxu1 %v16838_v38 }
 0x2d5   : > { %15674 = vmatpush3.bf16.msra.mxu0 %v16839_v19 }
 0x2d6   : > { %15702 = vmatpush3.bf16.msra.mxu1 %v16840_v10  ;;  %15675 = vmatprep.subr.bf16.mxu0 %v16841_v26  ;;  %v16859_v10 = vld [vmem:[#allocation15 + $0x418] sm:$0xff]   ;;  %v16861_v26 = vld [vmem:[#allocation15 + $0x460] sm:$0xff]  }
 0x2d7   : > { %15703 = vmatprep.subr.bf16.mxu1 %v16842_v63  ;;  %v16865_v63 = vld [vmem:[#allocation15 + $0x468] sm:$0xff]  }
 0x2d9   : > { %15676 = vmatpush3.bf16.msra.mxu0 %v16843_v13  ;;  %v16866_v13 = vld [vmem:[#allocation15 + $0x4e8] sm:$0xff]  }
 0x2da   : > { %15704 = vmatpush3.bf16.msra.mxu1 %v16844_v60  ;;  %15717 = vmatprep.subr.bf16.mxu0 %v16845_v4  ;;  %v16868_v60 = vld [vmem:[#allocation15 + $0x4a8] sm:$0xff]   ;;  %v16869_v4 = vld [vmem:[#allocation15 + $0x470] sm:$0xff]  }
 0x2db   : > { %15745 = vmatprep.subr.bf16.mxu1 %v16846_v59  ;;  %v16870_v59 = vld [vmem:[#allocation15 + $0x4f0] sm:$0xff]  }
 0x2dc   : > { %4117 = vmatmul.mubr.bf16.vlgmr.msra.gmra.mrb[56].mxu0 %v18446_v49  ;;  %v19729_v49 = vshrl.u32 %v18220_v42, 16 }
 0x2dd   : > { %4165 = vmatmul.mubr.bf16.vlgmr.msra.gmra.mrb[56].mxu1 %v18459_v62  ;;  %4124 = vmatprep.mubr.bf16.mxu0 %v18434_v51  ;;  %v16858_v62 = vld [vmem:[#allocation15 + $0x4d8] sm:$0xff]   ;;  %v19730_v51 = vshrl.u32 %v18230_v27, 16  ;;  %v16862_v27 = vld [vmem:[#allocation15 + $0x4e0] sm:$0xff]  }
 0x2de   : > { %4172 = vmatprep.mubr.bf16.mxu1 %v18442_v39  ;;  %15718 = vmatpush3.bf16.msra.mxu0 %v16847_v57  ;;  %v4328_v38 = vor.u32 %v18398_v32, %v19729_v49  ;;  %v16860_v32 = vld [vmem:[#allocation15 + $0x498] sm:$0xff]   ;;  %v16871_v57 = vld [vmem:[#allocation15 + $0x430] sm:$0xff]   ;;  %v16880_v49 = vld [vmem:[#allocation15 + $0x580] sm:$0xff]  }
 0x2df   : > { %15746 = vmatpush3.bf16.msra.mxu1 %v16848_v24  ;;  %15719 = vmatprep.subr.bf16.mxu0 %v16849_v61  ;;  %v4352_v39 = vor.u32 %v18402_v6, %v19730_v51  ;;  %v16863_v6 = vld [vmem:[#allocation15 + $0x420] sm:$0xff]   ;;  %v16872_v24 = vld [vmem:[#allocation15 + $0x4b0] sm:$0xff]   ;;  %v16873_v61 = vld [vmem:[#allocation15 + $0x478] sm:$0xff]  }
 0x2e0   : > { %15747 = vmatprep.subr.bf16.mxu1 %v16850_v15  ;;  %v4333_v19 = vsel %vm4309_vm1, %v4328_v38, %v18416_v7  ;;  %v16874_v15 = vld [vmem:[#allocation15 + $0x4f8] sm:$0xff]   ;;  %v16881_v38 = vld [vmem:[#allocation15 + $0x548] sm:$0xff]  }
 0x2e1   : > { %v4357_v42 = vsel %vm4309_vm1, %v4352_v39, %v18418_v16  ;;  %v16882_v39 = vld [vmem:[#allocation15 + $0x5c8] sm:$0xff]  }
 0x2e2   : > { %15720 = vmatpush3.bf16.msra.mxu0 %v16851_v34  ;;  %v16875_v34 = vld [vmem:[#allocation15 + $0x438] sm:$0xff]  }
 0x2e3   : > { %15748 = vmatpush3.bf16.msra.mxu1 %v16852_v31  ;;  %15721 = vmatprep.subr.bf16.mxu0 %v16853_v30  ;;  %v16876_v31 = vld [vmem:[#allocation15 + $0x4b8] sm:$0xff]   ;;  %v16877_v30 = vld [vmem:[#allocation15 + $0x540] sm:$0xff]  }
 0x2e4   : > { %4125 = vmatmul.mubr.bf16.gmra.mrb[60].mxu0 %v18430_v2  ;;  %15749 = vmatprep.subr.bf16.mxu1 %v16854_v44  ;;  %v16864_v2 = vld [vmem:[#allocation15 + $0x4a0] sm:$0xff]  }
 0x2e5   : > { %4173 = vmatmul.mubr.bf16.gmra.mrb[60].mxu1 %v18436_v46  ;;  %4862 = vmatprep.mubr.bf16.mxu0 %v4333_v19  ;;  %v16867_v46 = vld [vmem:[#allocation15 + $0x428] sm:$0xff]   ;;  %v16878_v44 = vld [vmem:[#allocation15 + $0x5c0] sm:$0xff]  }
 0x2e6   : > { %15722 = vmatpush3.bf16.msra.mxu0 %v16855_v25  ;;  %4910 = vmatprep.mubr.bf16.mxu1 %v4357_v42  ;;  %v16879_v25 = vld [vmem:[#allocation15 + $0x500] sm:$0xff]  }
 0x2e7   : > { %15750 = vmatpush3.bf16.msra.mxu1 %v16856_v11  ;;  %15723 = vmatprep.subr.bf16.mxu0 %v16857_v29  ;;  %v19731_v11 = vshrl.u32 %v18268_v41, 16 }
 0x2e8   : > { %15751 = vmatprep.subr.bf16.mxu1 %v16858_v62  ;;  %v19732_v62 = vshrl.u32 %v18384_v1, 16 }
 0x2e9   : > { %v4316_v29 = vor.u32 %v18406_v56, %v19731_v11  ;;  %v19734_v56 = vshrl.u32 %v18374_v5, 16  ;;  %v16908_v11 = vld [vmem:[#allocation15 + $0x5b8] sm:$0xff]  }
 0x2ea   : > { %15724 = vmatpush3.bf16.msra.mxu0 %v16859_v10  ;;  %v4340_v51 = vor.u32 %v18448_v33, %v19732_v62  ;;  %v19733_v10 = vshrl.u32 %v18372_v17, 16  ;;  %v16884_v33 = vld [vmem:[#allocation15 + $0x588] sm:$0xff]   ;;  %v16887_v17 = vld [vmem:[#allocation15 + $0x510] sm:$0xff]  }
 0x2eb   : > { %15752 = vmatpush3.bf16.msra.mxu1 %v16860_v32  ;;  %15725 = vmatprep.subr.bf16.mxu0 %v16861_v26  ;;  %v4321_v19 = vsel %vm4309_vm1, %v4316_v29, %v18438_v47  ;;  %v4417_v1 = vor.u32 %v19734_v56, %v18418_v16  ;;  %v16883_v32 = vld [vmem:[#allocation15 + $0x508] sm:$0xff]   ;;  %v16885_v26 = vld [vmem:[#allocation15 + $0x550] sm:$0xff]   ;;  %v19736_v16 = vshrl.u32 %v18432_v45, 16  ;;  %v4364_v29 = vor.u32 %v18503_v43, %v4359_v0 }
 0x2ec   : > { %15753 = vmatprep.subr.bf16.mxu1 %v16862_v27  ;;  %v4411_v42 = vor.u32 %v19733_v10, %v18416_v7  ;;  %v4345_v41 = vsel %vm4309_vm1, %v4340_v51, %v18465_v8  ;;  %v16886_v27 = vld [vmem:[#allocation15 + $0x5d0] sm:$0xff]   ;;  %v4423_v51 = vor.u32 %v4421_v21, %v18493_v28  ;;  %v19739_v0 = vshrl.u32 %v18478_v50, 16 }
 0x2ed   : > { %v16888_v7 = vld [vmem:[#allocation15 + $0x590] sm:$0xff]   ;;  %v4369_v62 = vsel %vm4309_vm1, %v4364_v29, %v18505_v9  ;;  %v19740_v43 = vshrl.u32 %v18498_v58, 16 }
 0x2ee   : > { %15726 = vmatpush3.bf16.msra.mxu0 %v16863_v6  ;;  %v16889_v6 = vld [vmem:[#allocation15 + $0x558] sm:$0xff]  }
 0x2ef   : > { %15754 = vmatpush3.bf16.msra.mxu1 %v16864_v2  ;;  %15727 = vmatprep.subr.bf16.mxu0 %v16865_v63  ;;  %v19735_v2 = vshrl.u32 %v18394_v36, 16  ;;  %v4376_v63 = vor.u32 %v18488_v55, %v19736_v16  ;;  %v16892_v55 = vld [vmem:[#allocation15 + $0x598] sm:$0xff]   ;;  %v4426_v22 = vor.u32 %v19740_v43, %v18514_v35  ;;  %v5163_v43 = vld [vmem:[#allocation14 + $0x228] sm:$0xff] }
 0x2f0   : > { %15755 = vmatprep.subr.bf16.mxu1 %v16866_v13  ;;  %v16890_v13 = vld [vmem:[#allocation15 + $0x5d8] sm:$0xff]  }
 0x2f1   : > { %v4408_v5 = vor.u32 %v19735_v2, %v18438_v47  ;;  %v4381_v36 = vsel %vm4309_vm1, %v4376_v63, %v18493_v28  ;;  %v16891_v47 = vld [vmem:[#allocation15 + $0x518] sm:$0xff]   ;;  %v19741_v28 = vmov 0  }
 0x2f2   : > { %15728 = vmatpush3.bf16.msra.mxu0 %v16867_v46  ;;  %v19737_v46 = vshrl.u32 %v18408_v20, 16  ;;  %v16894_v20 = vld [vmem:[#allocation15 + $0x5e0] sm:$0xff]  }
 0x2f3   : > { %15756 = vmatpush3.bf16.msra.mxu1 %v16868_v60  ;;  %15729 = vmatprep.subr.bf16.mxu0 %v16869_v4  ;;  %v4400_v4 = vor.u32 %v18495_v23, %v4395_v37  ;;  %v16897_v37 = vld [vmem:[#allocation15 + $0x568] sm:$0xff]  }
 0x2f4   : > { %15757 = vmatprep.subr.bf16.mxu1 %v16870_v59  ;;  %v4414_v60 = vor.u32 %v19737_v46, %v18465_v8  ;;  %v16893_v59 = vld [vmem:[#allocation15 + $0x560] sm:$0xff]   ;;  %v16898_v23 = vld [vmem:[#allocation15 + $0x5e8] sm:$0xff]  }
 0x2f5   : > { %v4405_v45 = vsel %vm4309_vm1, %v4400_v4, %v18500_v53  ;;  %v16895_v8 = vld [vmem:[#allocation15 + $0x520] sm:$0xff]  }
 0x2f6   : > { %15730 = vmatpush3.bf16.msra.mxu0 %v16871_v57  ;;  %v16899_v57 = vld [vmem:[#allocation15 + $0x528] sm:$0xff]  }
 0x2f7   : > { %15758 = vmatpush3.bf16.msra.mxu1 %v16872_v24  ;;  %15731 = vmatprep.subr.bf16.mxu0 %v16873_v61  ;;  %v16900_v24 = vld [vmem:[#allocation15 + $0x5a8] sm:$0xff]   ;;  %v16901_v61 = vld [vmem:[#allocation15 + $0x570] sm:$0xff]  }
 0x2f8   : > { %15759 = vmatprep.subr.bf16.mxu1 %v16874_v15  ;;  %v16902_v15 = vld [vmem:[#allocation15 + $0x5f0] sm:$0xff]  }
 0x2fa   : > { %15732 = vmatpush3.bf16.msra.mxu0 %v16875_v34  ;;  %v16903_v34 = vld [vmem:[#allocation15 + $0x530] sm:$0xff]  }
 0x2fb   : > { %15760 = vmatpush3.bf16.msra.mxu1 %v16876_v31  ;;  %15773 = vmatprep.subr.bf16.mxu0 %v16877_v30  ;;  %v16904_v31 = vld [vmem:[#allocation15 + $0x5b0] sm:$0xff]   ;;  %v16905_v30 = vld [vmem:[#allocation15 + $0x578] sm:$0xff]  }
 0x2fc   : > { %15801 = vmatprep.subr.bf16.mxu1 %v16878_v44  ;;  %v16906_v44 = vld [vmem:[#allocation15 + $0x5f8] sm:$0xff]  }
 0x2fd   : > { %4863 = vmatmul.mubr.bf16.vlgmr.msra.gmra.mrb[64].mxu0 %v4321_v19 }
 0x2fe   : > { %4911 = vmatmul.mubr.bf16.vlgmr.msra.gmra.mrb[64].mxu1 %v4345_v41  ;;  %4870 = vmatprep.mubr.bf16.mxu0 %v4411_v42 }
 0x2ff   : > { %4918 = vmatprep.mubr.bf16.mxu1 %v4417_v1  ;;  %15774 = vmatpush3.bf16.msra.mxu0 %v16879_v25  ;;  %v16907_v25 = vld [vmem:[#allocation15 + $0x538] sm:$0xff]  }
 0x300   : > { %15802 = vmatpush3.bf16.msra.mxu1 %v16880_v49  ;;  %15775 = vmatprep.subr.bf16.mxu0 %v16881_v38  ;;  %v19738_v49 = vshrl.u32 %v18491_v48, 16  ;;  %v4420_v48 = vor.u32 %v19739_v0, %v18505_v9 }
 0x301   : > { %15803 = vmatprep.subr.bf16.mxu1 %v16882_v39 }
 0x302   : > { %v4388_v38 = vor.u32 %v18509_v40, %v19738_v49 }
 0x303   : > { %15776 = vmatpush3.bf16.msra.mxu0 %v16883_v32 }
 0x304   : > { %15804 = vmatpush3.bf16.msra.mxu1 %v16884_v33  ;;  %15777 = vmatprep.subr.bf16.mxu0 %v16885_v26  ;;  %v4393_v39 = vsel %vm4309_vm1, %v4388_v38, %v18514_v35 }
 0x305   : > { %4871 = vmatmul.mubr.bf16.gmra.mrb[68].mxu0 %v4408_v5  ;;  %15805 = vmatprep.subr.bf16.mxu1 %v16886_v27 }
 0x306   : > { %4919 = vmatmul.mubr.bf16.gmra.mrb[68].mxu1 %v4414_v60  ;;  %4958 = vmatprep.mubr.bf16.mxu0 %v4381_v36 }
 0x307   : > { %15778 = vmatpush3.bf16.msra.mxu0 %v16887_v17  ;;  %5006 = vmatprep.mubr.bf16.mxu1 %v4405_v45 }
 0x308   : > { %15806 = vmatpush3.bf16.msra.mxu1 %v16888_v7  ;;  %15779 = vmatprep.subr.bf16.mxu0 %v16889_v6 }
 0x309   : > { %15807 = vmatprep.subr.bf16.mxu1 %v16890_v13 }
 0x30b   : > { %15780 = vmatpush3.bf16.msra.mxu0 %v16891_v47 }
 0x30c   : > { %15808 = vmatpush3.bf16.msra.mxu1 %v16892_v55  ;;  %15781 = vmatprep.subr.bf16.mxu0 %v16893_v59 }
 0x30d   : > { %15809 = vmatprep.subr.bf16.mxu1 %v16894_v20 }
 0x30f   : > { %15782 = vmatpush3.bf16.msra.mxu0 %v16895_v8 }
 0x310   : > { %15810 = vmatpush3.bf16.msra.mxu1 %v16896_v14  ;;  %15783 = vmatprep.subr.bf16.mxu0 %v16897_v37 }
 0x311   : > { %15811 = vmatprep.subr.bf16.mxu1 %v16898_v23 }
 0x313   : > { %15784 = vmatpush3.bf16.msra.mxu0 %v16899_v57 }
 0x314   : > { %15812 = vmatpush3.bf16.msra.mxu1 %v16900_v24  ;;  %15785 = vmatprep.subr.bf16.mxu0 %v16901_v61 }
 0x315   : > { %15813 = vmatprep.subr.bf16.mxu1 %v16902_v15 }
 0x317   : > { %15786 = vmatpush3.bf16.msra.mxu0 %v16903_v34 }
 0x318   : > { %15814 = vmatpush3.bf16.msra.mxu1 %v16904_v31  ;;  %15787 = vmatprep.subr.bf16.mxu0 %v16905_v30 }
 0x319   : > { %15815 = vmatprep.subr.bf16.mxu1 %v16906_v44 }
 0x31b   : > { %15788 = vmatpush3.bf16.msra.mxu0 %v16907_v25 }
 0x31c   : > { %15816 = vmatpush3.bf16.msra.mxu1 %v16908_v11 }
 0x31e   : > { %4959 = vmatmul.mubr.bf16.vlgmr.msra.gmra.mrb[72].mxu0 %v4369_v62  ;;  %v5158_v62 = vld [vmem:[#allocation14 + $0x200] sm:$0xff] }
 0x31f   : > { %5007 = vmatmul.mubr.bf16.vlgmr.msra.gmra.mrb[72].mxu1 %v4393_v39  ;;  %4966 = vmatprep.mubr.bf16.mxu0 %v4423_v51  ;;  %v5162_v51 = vld [vmem:[#allocation14 + $0x220] sm:$0xff]  ;;  %v5159_v39 = vld [vmem:[#allocation14 + $0x208] sm:$0xff] }
 0x320   : > { %5014 = vmatprep.mubr.bf16.mxu1 %v4429_v18  ;;  %v14712_v0 = vcombine.low %v5158_v62, %v5162_v51 }
 0x326   : > { %4967 = vmatmul.mubr.bf16.gmra.mrb[76].mxu0 %v4420_v48  ;;  %v14713_v48 = vcombine.high %v5158_v62, %v5162_v51 }
 0x327   : > { %5015 = vmatmul.mubr.bf16.gmra.mrb[76].mxu1 %v4426_v22  ;;  %5574 = vmatprep.mubr.bf16.mxu0 %v19741_v28 }
 0x328   : > { %5625 = vmatprep.mubr.bf16.mxu1 %v19741_v28  ;;  %5542 = vmatprep.subr.bf16.mxu0 %v14713_v48  ;;  %v18604_v48 = vld [vmem:[#allocation14 + $0x210] sm:$0xff] }
 0x329   : > { %5543 = vmatpush1.bf16.msra.mxu0 %v14712_v0  ;;  %v5198_v0 = vld [vmem:[#allocation14 + $0x340] sm:$0xff] }
 0x34d   : > { %v15509_v40 = vpop.f32.mrb[32].mxu0  ;;  %v15537_v12 = vpop.f32.mrb[32].mxu1 }
 0x34e   : > { %v15510_v53 = vpop.f32.mrb[33].mxu0  ;;  %v15538_v3 = vpop.f32.mrb[33].mxu1 }
 0x34f   : > { %v15511_v21 = vadd.f32 %v15510_v53, %v15509_v40  ;;  %v15512_v19 = vpop.f32.mrb[34].mxu0  ;;  %v15539_v10 = vadd.f32 %v15538_v3, %v15537_v12  ;;  %v15540_v42 = vpop.f32.mrb[34].mxu1  ;;  %v14714_v12 = vcombine.low %v5159_v39, %v5163_v43  ;;  %v14715_v53 = vcombine.high %v5159_v39, %v5163_v43  ;;  %v18606_v43 = vld [vmem:[#allocation14 + $0x230] sm:$0xff] }
 0x350   : > { %v15513_v50 = vpop.f32.mrb[35].mxu0  ;;  %v15541_v41 = vpop.f32.mrb[35].mxu1 }
 0x351   : > { %v15514_v9 = vadd.f32 %v15513_v50, %v15512_v19  ;;  %v3342_v56 = vadd.f32 %v15539_v10, %v15511_v21  ;;  %v15542_v58 = vadd.f32 %v15541_v41, %v15540_v42  ;;  %5593 = vmatprep.subr.bf16.mxu1 %v14715_v53  ;;  %v18610_v53 = vld [vmem:[#allocation14 + $0x218] sm:$0xff] }
 0x352   : > { %5594 = vmatpush1.bf16.msra.mxu1 %v14714_v12  ;;  %v5202_v12 = vld [vmem:[#allocation14 + $0x360] sm:$0xff] }
 0x353   : > { %v3345_v35 = vadd.f32 %v15542_v58, %v15514_v9  ;;  %v5166_v58 = vld [vmem:[#allocation14 + $0x240] sm:$0xff] }
 0x355   : > { %v15515_v1 = vpop.f32.mrb[36].mxu0  ;;  %v15543_v32 = vpop.f32.mrb[36].mxu1 }
 0x356   : > { %v15516_v33 = vpop.f32.mrb[37].mxu0  ;;  %v15544_v27 = vpop.f32.mrb[37].mxu1 }
 0x357   : > { %v15517_v26 = vadd.f32 %v15516_v33, %v15515_v1  ;;  %v15518_v17 = vpop.f32.mrb[38].mxu0  ;;  %v15545_v7 = vadd.f32 %v15544_v27, %v15543_v32  ;;  %v15546_v6 = vpop.f32.mrb[38].mxu1  ;;  %v5167_v1 = vld [vmem:[#allocation14 + $0x248] sm:$0xff] }
 0x358   : > { %v15519_v2 = vpop.f32.mrb[39].mxu0  ;;  %v15547_v5 = vpop.f32.mrb[39].mxu1  ;;  %v5171_v27 = vld [vmem:[#allocation14 + $0x268] sm:$0xff]  ;;  %v5174_v17 = vld [vmem:[#allocation14 + $0x280] sm:$0xff] }
 0x359   : > { %v3350_v16 = vadd.f32 %v15545_v7, %v15517_v26  ;;  %v5178_v7 = vld [vmem:[#allocation14 + $0x2a0] sm:$0xff]  ;;  %v14722_v5 = vcombine.low %v5167_v1, %v5171_v27 }
 0x36e   : > { %v15565_v63 = vpop.f32.mrb[40].mxu0 }
 0x36f   : > { %v15593_v13 = vpop.f32.mrb[40].mxu1  ;;  %v15566_v46 = vpop.f32.mrb[41].mxu0 }
 0x370   : > { %v15567_v60 = vadd.f32 %v15566_v46, %v15565_v63  ;;  %v15594_v4 = vpop.f32.mrb[41].mxu1  ;;  %v15568_v36 = vpop.f32.mrb[42].mxu0  ;;  %v5175_v63 = vld [vmem:[#allocation14 + $0x288] sm:$0xff]  ;;  %v5182_v46 = vld [vmem:[#allocation14 + $0x2c0] sm:$0xff] }
 0x371   : > { %v15595_v47 = vadd.f32 %v15594_v4, %v15593_v13  ;;  %v15596_v45 = vpop.f32.mrb[42].mxu1  ;;  %v15569_v55 = vpop.f32.mrb[43].mxu0  ;;  %v5179_v13 = vld [vmem:[#allocation14 + $0x2a8] sm:$0xff] }
 0x372   : > { %v3390_v59 = vadd.f32 %v15567_v60, %v3342_v56  ;;  %v15570_v20 = vadd.f32 %v15569_v55, %v15568_v36  ;;  %v15597_v8 = vpop.f32.mrb[43].mxu1  ;;  %v14729_v60 = vcombine.high %v5174_v17, %v5178_v7  ;;  %v14731_v4 = vcombine.high %v5175_v63, %v5179_v13  ;;  %v5186_v36 = vld [vmem:[#allocation14 + $0x2e0] sm:$0xff] }
 0x373   : > { %v15598_v14 = vadd.f32 %v15597_v8, %v15596_v45  ;;  %v5187_v45 = vld [vmem:[#allocation14 + $0x2e8] sm:$0xff]  ;;  %v14736_v51 = vcombine.low %v5182_v46, %v5186_v36 }
 0x374   : > { %v3438_v37 = vadd.f32 %v15595_v47, %v3390_v59  ;;  %v3393_v23 = vadd.f32 %v15570_v20, %v3345_v35  ;;  %v5170_v35 = vld [vmem:[#allocation14 + $0x260] sm:$0xff]  ;;  %v5183_v47 = vld [vmem:[#allocation14 + $0x2c8] sm:$0xff]  ;;  %v14728_v20 = vcombine.low %v5174_v17, %v5178_v7 }
 0x375   : > { %v14720_v33 = vcombine.low %v5166_v58, %v5170_v35  ;;  %v14721_v26 = vcombine.high %v5166_v58, %v5170_v35  ;;  %v14738_v39 = vcombine.low %v5183_v47, %v5187_v45  ;;  %v5210_v58 = vld [vmem:[#allocation14 + $0x3a0] sm:$0xff]  ;;  %v5207_v35 = vld [vmem:[#allocation14 + $0x388] sm:$0xff] }
 0x376   : > { %v3441_v57 = vadd.f32 %v15598_v14, %v3393_v23  ;;  %v15571_v24 = vpop.f32.mrb[44].mxu0  ;;  %v14737_v23 = vcombine.high %v5182_v46, %v5186_v36  ;;  %v5214_v17 = vld [vmem:[#allocation14 + $0x3c0] sm:$0xff]  ;;  %v14717_v36 = vcombine.high %v18604_v48, %v18606_v43 }
 0x377   : > { %v15599_v61 = vpop.f32.mrb[44].mxu1  ;;  %v15572_v15 = vpop.f32.mrb[45].mxu0  ;;  %5544 = vmatprep.subr.bf16.mxu0 %v14721_v26  ;;  %v5218_v7 = vld [vmem:[#allocation14 + $0x3e0] sm:$0xff] }
 0x378   : > { %v15573_v34 = vadd.f32 %v15572_v15, %v15571_v24  ;;  %v15600_v31 = vpop.f32.mrb[45].mxu1  ;;  %v15574_v30 = vpop.f32.mrb[46].mxu0  ;;  %5545 = vmatpush1.bf16.msra.mxu0 %v14720_v33  ;;  %v14739_v15 = vcombine.high %v5183_v47, %v5187_v45 }
 0x379   : > { %v15601_v44 = vadd.f32 %v15600_v31, %v15599_v61  ;;  %v15602_v25 = vpop.f32.mrb[46].mxu1  ;;  %v15575_v11 = vpop.f32.mrb[47].mxu0  ;;  %5546 = vmatprep.subr.bf16.mxu0 %v14729_v60  ;;  %v5194_v31 = vld [vmem:[#allocation14 + $0x320] sm:$0xff]  ;;  %v14768_v60 = vcombine.low %v5214_v17, %v5218_v7 }
 0x37a   : > { %v3398_v29 = vadd.f32 %v15573_v34, %v3350_v16  ;;  %v15603_v49 = vpop.f32.mrb[47].mxu1  ;;  %v14723_v16 = vcombine.high %v5167_v1, %v5171_v27  ;;  %v5190_v34 = vld [vmem:[#allocation14 + $0x300] sm:$0xff]  ;;  %v5191_v11 = vld [vmem:[#allocation14 + $0x308] sm:$0xff] }
 0x37b   : > { %v5211_v1 = vld [vmem:[#allocation14 + $0x3a8] sm:$0xff] }
 0x37c   : > { %v18597_v38 = vadd.f32 %v15601_v44, %v3398_v29  ;;  %5595 = vmatprep.subr.bf16.mxu1 %v14723_v16  ;;  %v5195_v29 = vld [vmem:[#allocation14 + $0x328] sm:$0xff]  ;;  %5547 = vmatpush1.bf16.msra.mxu0 %v14728_v20  ;;  %v14763_v27 = vcombine.high %v5207_v35, %v5211_v1 }
 0x37d   : > { %5596 = vmatpush1.bf16.msra.mxu1 %v14722_v5  ;;  %5548 = vmatprep.subr.bf16.mxu0 %v14737_v23  ;;  %v5219_v5 = vld [vmem:[#allocation14 + $0x3e8] sm:$0xff] }
 0x37e   : > { %5597 = vmatprep.subr.bf16.mxu1 %v14731_v4 }
 0x380   : > { %5549 = vmatpush1.bf16.msra.mxu0 %v14736_v51 }
 0x38e   : > { %v15621_v18 = vpop.f32.mrb[48].mxu0 }
 0x38f   : > { %v15649_v22 = vpop.f32.mrb[48].mxu1  ;;  %v15622_v40 = vpop.f32.mrb[49].mxu0 }
 0x390   : > { %v15623_v21 = vadd.f32 %v15622_v40, %v15621_v18  ;;  %v15650_v3 = vpop.f32.mrb[49].mxu1  ;;  %v15624_v19 = vpop.f32.mrb[50].mxu0  ;;  %v14745_v18 = vcombine.high %v5190_v34, %v5194_v31  ;;  %v14747_v40 = vcombine.high %v5191_v11, %v5195_v29 }
 0x391   : > { %v15651_v10 = vadd.f32 %v15650_v3, %v15649_v22  ;;  %v15652_v42 = vpop.f32.mrb[50].mxu1  ;;  %v15625_v50 = vpop.f32.mrb[51].mxu0  ;;  %v5203_v3 = vld [vmem:[#allocation14 + $0x368] sm:$0xff] }
 0x392   : > { %v4023_v9 = vadd.f32 %v15623_v21, %v3438_v37  ;;  %v15626_v41 = vadd.f32 %v15625_v50, %v15624_v19  ;;  %v15653_v56 = vpop.f32.mrb[51].mxu1  ;;  %v14730_v37 = vcombine.low %v5175_v63, %v5179_v13  ;;  %v5199_v21 = vld [vmem:[#allocation14 + $0x348] sm:$0xff]  ;;  %v14716_v19 = vcombine.low %v18604_v48, %v18606_v43  ;;  %5550 = vmatprep.subr.bf16.mxu0 %v14745_v18  ;;  %v5185_v48 = vld [vmem:[#allocation14 + $0x2d8] sm:$0xff] }
 0x393   : > { %v15654_v32 = vadd.f32 %v15653_v56, %v15652_v42  ;;  %v14744_v42 = vcombine.low %v5190_v34, %v5194_v31  ;;  %v14746_v50 = vcombine.low %v5191_v11, %v5195_v29  ;;  %v5206_v56 = vld [vmem:[#allocation14 + $0x380] sm:$0xff]  ;;  %v14754_v33 = vcombine.low %v5199_v21, %v5203_v3  ;;  %v5189_v43 = vld [vmem:[#allocation14 + $0x2f8] sm:$0xff] }
 0x394   : > { %v18599_v6 = vadd.f32 %v15651_v10, %v4023_v9  ;;  %v4026_v2 = vadd.f32 %v15626_v41, %v3441_v57  ;;  %5598 = vmatpush1.bf16.msra.mxu1 %v14730_v37  ;;  %v14753_v9 = vcombine.high %v5198_v0, %v5202_v12  ;;  %v14755_v41 = vcombine.high %v5199_v21, %v5203_v3 }
 0x395   : > { %5599 = vmatprep.subr.bf16.mxu1 %v14739_v15  ;;  %5551 = vmatpush1.bf16.msra.mxu0 %v14744_v42  ;;  %v14761_v26 = vcombine.high %v5206_v56, %v5210_v58  ;;  %v14760_v16 = vcombine.low %v5206_v56, %v5210_v58  ;;  %v14762_v63 = vcombine.low %v5207_v35, %v5211_v1 }
 0x396   : > { %v18601_v55 = vadd.f32 %v15654_v32, %v4026_v2  ;;  %v15627_v59 = vpop.f32.mrb[52].mxu0  ;;  %v14752_v32 = vcombine.low %v5198_v0, %v5202_v12  ;;  %5552 = vmatprep.subr.bf16.mxu0 %v14753_v9  ;;  %v5215_v2 = vld [vmem:[#allocation14 + $0x3c8] sm:$0xff]  ;;  %v14769_v13 = vcombine.high %v5214_v17, %v5218_v7 }
 0x397   : > { %v15655_v8 = vpop.f32.mrb[52].mxu1  ;;  %v15628_v14 = vpop.f32.mrb[53].mxu0  ;;  %v14771_v46 = vcombine.high %v5215_v2, %v5219_v5  ;;  %v14770_v4 = vcombine.low %v5215_v2, %v5219_v5 }
 0x398   : > { %v15629_v57 = vadd.f32 %v15628_v14, %v15627_v59  ;;  %v15656_v24 = vpop.f32.mrb[53].mxu1  ;;  %v15630_v61 = vpop.f32.mrb[54].mxu0  ;;  %5600 = vmatpush1.bf16.msra.mxu1 %v14738_v39 }
 0x399   : > { %v15657_v30 = vadd.f32 %v15656_v24, %v15655_v8  ;;  %v15658_v44 = vpop.f32.mrb[54].mxu1  ;;  %v15631_v25 = vpop.f32.mrb[55].mxu0  ;;  %5601 = vmatprep.subr.bf16.mxu1 %v14747_v40  ;;  %5553 = vmatpush1.bf16.msra.mxu0 %v14752_v32 }
 0x39a   : > { %v4031_v49 = vadd.f32 %v15629_v57, %v18597_v38  ;;  %v15659_v62 = vpop.f32.mrb[55].mxu1  ;;  %v18612_v38 = vld [vmem:[#allocation14 + $0x238] sm:$0xff]  ;;  %5554 = vmatprep.subr.bf16.mxu0 %v14761_v26 }
 0x39b   : > { %v14718_v10 = vcombine.low %v18610_v53, %v18612_v38  ;;  %v14719_v47 = vcombine.high %v18610_v53, %v18612_v38 }
 0x39c   : > { %v18608_v22 = vadd.f32 %v15657_v30, %v4031_v49  ;;  %5602 = vmatpush1.bf16.msra.mxu1 %v14746_v50 }
 0x39d   : > { %5603 = vmatprep.subr.bf16.mxu1 %v14755_v41  ;;  %5555 = vmatpush1.bf16.msra.mxu0 %v14760_v16 }
 0x39e   : > { %5556 = vmatprep.subr.bf16.mxu0 %v14769_v13 }
 0x3a0   : > { %5604 = vmatpush1.bf16.msra.mxu1 %v14754_v33 }
 0x3a1   : > { %5605 = vmatprep.subr.bf16.mxu1 %v14763_v27  ;;  %5557 = vmatpush1.bf16.msra.mxu0 %v14768_v60 }
 0x3a2   : > { %5644 = vmatprep.subr.bf16.mxu0 %v14717_v36 }
 0x3a4   : > { %5606 = vmatpush1.bf16.msra.mxu1 %v14762_v63 }
 0x3a5   : > { %5607 = vmatprep.subr.bf16.mxu1 %v14771_v46 }
 0x3a8   : > { %5608 = vmatpush1.bf16.msra.mxu1 %v14770_v4 }
 0x3a9   : > { %5695 = vmatprep.subr.bf16.mxu1 %v14719_v47 }
 0x3af   : > { %v15677_v45 = vpop.f32.mrb[56].mxu0 }
 0x3b0   : > { %v15705_v59 = vpop.f32.mrb[56].mxu1  ;;  %v15678_v20 = vpop.f32.mrb[57].mxu0 }
 0x3b1   : > { %v15679_v8 = vadd.f32 %v15678_v20, %v15677_v45  ;;  %v15706_v14 = vpop.f32.mrb[57].mxu1  ;;  %v15680_v37 = vpop.f32.mrb[58].mxu0 }
 0x3b2   : > { %v15707_v23 = vadd.f32 %v15706_v14, %v15705_v59  ;;  %v15708_v57 = vpop.f32.mrb[58].mxu1  ;;  %v15681_v24 = vpop.f32.mrb[59].mxu0 }
 0x3b3   : > { %v4119_v61 = vadd.f32 %v15679_v8, %v18599_v6  ;;  %v15682_v15 = vadd.f32 %v15681_v24, %v15680_v37  ;;  %v15709_v34 = vpop.f32.mrb[59].mxu1 }
 0x3b4   : > { %v15710_v31 = vadd.f32 %v15709_v34, %v15708_v57 }
 0x3b5   : > { %v4167_v30 = vadd.f32 %v15707_v23, %v4119_v61  ;;  %v4122_v44 = vadd.f32 %v15682_v15, %v18601_v55 }
 0x3b7   : > { %v18624_v25 = vadd.f32 %v15710_v31, %v4122_v44  ;;  %v15683_v11 = vpop.f32.mrb[60].mxu0  ;;  %v14701_v44 = vld [vmem:[#allocation11 + $0x18] ss:$0 sm:$0xff] }
 0x3b8   : > { %v15711_v29 = vpop.f32.mrb[60].mxu1  ;;  %v15684_v49 = vpop.f32.mrb[61].mxu0 }
 0x3b9   : > { %v15685_v62 = vadd.f32 %v15684_v49, %v15683_v11  ;;  %v15712_v51 = vpop.f32.mrb[61].mxu1  ;;  %v15686_v39 = vpop.f32.mrb[62].mxu0  ;;  %v5036_v11 = vstv %s14312_s21  ;;  %s15102_s21 = sld [smem:[#allocation4 + $0x106]] }
 0x3ba   : > { %v15713_v18 = vadd.f32 %v15712_v51, %v15711_v29  ;;  %v15714_v0 = vpop.f32.mrb[62].mxu1  ;;  %v15687_v40 = vpop.f32.mrb[63].mxu0  ;;  %v5032_v51 = vstv %s14311_s11  ;;  %s406_s11 = scalar_lea.vmem [#allocation17], %s16601_s18  ;;  %s14136_s18 = scalar_lea.sflag [#allocation6], %s17960_s5 }
 0x3bb   : > { %v4127_v12 = vadd.f32 %v15685_v62, %v18608_v22  ;;  %v15715_v6 = vpop.f32.mrb[63].mxu1  ;;  %v5037_v40 = vmul.f32 %v5036_v11, %v18004_v52  ;;  %v14709_v52 = vld [vmem:[%s17974_s23 + $0x18] sm:$0xff] }
 0x3bd   : > { %v18627_v21 = vadd.f32 %v15713_v18, %v4127_v12 }
 0x3d0   : > { %v15733_v3 = vpop.f32.mrb[64].mxu0 }
 0x3d1   : > { %v15761_v42 = vpop.f32.mrb[64].mxu1  ;;  %v15734_v50 = vpop.f32.mrb[65].mxu0 }
 0x3d2   : > { %v15735_v55 = vadd.f32 %v15734_v50, %v15733_v3  ;;  %v15762_v9 = vpop.f32.mrb[65].mxu1  ;;  %v15736_v41 = vpop.f32.mrb[66].mxu0 }
 0x3d3   : > { %v15763_v56 = vadd.f32 %v15762_v9, %v15761_v42  ;;  %v15764_v58 = vpop.f32.mrb[66].mxu1  ;;  %v15737_v35 = vpop.f32.mrb[67].mxu0 }
 0x3d4   : > { %v15738_v1 = vadd.f32 %v15737_v35, %v15736_v41  ;;  %v15765_v32 = vpop.f32.mrb[67].mxu1 }
 0x3d5   : > { %v4913_v33 = vadd.f32 %v15763_v56, %v15735_v55  ;;  %v15766_v26 = vadd.f32 %v15765_v32, %v15764_v58 }
 0x3d7   : > { %v4916_v27 = vadd.f32 %v15766_v26, %v15738_v1  ;;  %v5043_v1 = vstv %s14315_s19  ;;  %s16603_s19 = smul.u32 384, %s17702_s30  ;;  %s17638_s30 = smov [#allocation17]  }
 0x3d8   : > { %v15739_v17 = vpop.f32.mrb[68].mxu0 }
 0x3d9   : > { %v15767_v7 = vpop.f32.mrb[68].mxu1  ;;  %v15740_v22 = vpop.f32.mrb[69].mxu0 }
 0x3da   : > { %v15741_v2 = vadd.f32 %v15740_v22, %v15739_v17  ;;  %v15768_v5 = vpop.f32.mrb[69].mxu1  ;;  %v15742_v16 = vpop.f32.mrb[70].mxu0 }
 0x3db   : > { %v15769_v63 = vadd.f32 %v15768_v5, %v15767_v7  ;;  %v15770_v13 = vpop.f32.mrb[70].mxu1  ;;  %v15743_v46 = vpop.f32.mrb[71].mxu0  ;;  %v14710_v16 = vld [vmem:[%s17974_s23 + $0x20] sm:$0xff] }
 0x3dc   : > { %v15771_v60 = vpop.f32.mrb[71].mxu1  ;;  %v19742_v46 = vld [vmem:[#allocation25_spill] sm:$0xff] }
 0x3dd   : > { %v4921_v4 = vadd.f32 %v15769_v63, %v15741_v2  ;;  %v426_v2 = vld [vmem:[#allocation11] sm:$0xff]  ;;  %v5039_v60 = vmul.f32 %v5036_v11, %v19742_v46  ;;  %v5212_v46 = vld [vmem:[#allocation14 + $0x3b0] sm:$0xff] }
 0x3f1   : > { %v15789_v36 = vpop.f32.mrb[72].mxu0 }
 0x3f2   : > { %v15817_v47 = vpop.f32.mrb[72].mxu1  ;;  %v15790_v45 = vpop.f32.mrb[73].mxu0 }
 0x3f3   : > { %v15791_v59 = vadd.f32 %v15790_v45, %v15789_v36  ;;  %v15818_v20 = vpop.f32.mrb[73].mxu1  ;;  %v15792_v8 = vpop.f32.mrb[74].mxu0 }
 0x3f4   : > { %v15819_v14 = vadd.f32 %v15818_v20, %v15817_v47  ;;  %v15820_v37 = vpop.f32.mrb[74].mxu1  ;;  %v15793_v23 = vpop.f32.mrb[75].mxu0  ;;  %v5072_v20 = vstv %s14702_s13 }
 0x3f5   : > { %v4961_v57 = vadd.f32 %v15791_v59, %v4913_v33  ;;  %v15794_v24 = vadd.f32 %v15793_v23, %v15792_v8  ;;  %v15821_v61 = vpop.f32.mrb[75].mxu1  ;;  %v5065_v33 = vstv %s14705_s10  ;;  %s14149_s10 = sshll.u32 %s406_s11, 4  ;;  %s19575_s10 = int_to_ptr.vmem [resolvable:$true] %s14149_s10 }
 0x3f6   : > { %v15822_v15 = vadd.f32 %v15821_v61, %v15820_v37  ;;  %v5066_v5 = vmul.f32 %v14709_v52, %v5065_v33  ;;  %v5067_v45 = vmul.f32 %v14710_v16, %v5065_v33  ;;  %v5197_v52 = vld [vmem:[#allocation14 + $0x338] sm:$0xff] }
 0x3f7   : > { %v5009_v34 = vadd.f32 %v15819_v14, %v4961_v57  ;;  %v4964_v31 = vadd.f32 %v15794_v24, %v4916_v27  ;;  %v5047_v27 = vstv %s14316_s3  ;;  %v428_v24 = vld [vmem:[#allocation11 + $0x10] sm:$0xff] }
 0x3f9   : > { %v5022_v29 = vadd.f32 %v5009_v34, %v4167_v30  ;;  %v5012_v49 = vadd.f32 %v15822_v15, %v4964_v31  ;;  %v15795_v62 = vpop.f32.mrb[76].mxu0  ;;  %v5038_v30 = vmul.f32 %v5036_v11, %v18006_v54  ;;  %v5168_v15 = vld [vmem:[#allocation14 + $0x250] sm:$0xff]  ;;  %v5169_v31 = vld [vmem:[#allocation14 + $0x258] sm:$0xff] }
 0x3fa   : > { %v15823_v39 = vpop.f32.mrb[76].mxu1  ;;  %v15796_v18 = vpop.f32.mrb[77].mxu0  ;;  %v5172_v34 = vld [vmem:[#allocation14 + $0x270] sm:$0xff] }
 0x3fb   : > { %v5029_v0 = vadd.f32 %v14701_v44, %v5022_v29  ;;  %v5023_v12 = vadd.f32 %v5012_v49, %v18624_v25  ;;  %v15797_v6 = vadd.f32 %v15796_v18, %v15795_v62  ;;  %v15824_v3 = vpop.f32.mrb[77].mxu1  ;;  %v15798_v42 = vpop.f32.mrb[78].mxu0 }
 0x3fc   : > { %v15825_v50 = vadd.f32 %v15824_v3, %v15823_v39  ;;  %v15826_v55 = vpop.f32.mrb[78].mxu1  ;;  %v15799_v9 = vpop.f32.mrb[79].mxu0  ;;  %v14725_v39 = vcombine.high %v5168_v15, %v5172_v34  ;;  %v14724_v42 = vcombine.low %v5168_v15, %v5172_v34  ;;  %v5094_v34 = vld [vmem:[#allocation14] sm:$0xff] }
 0x3fd   : > { %v5033_v41 = vmul.f32 %v5032_v51, %v5029_v0  ;;  %v5030_v56 = vadd.f32 %v14701_v44, %v5023_v12  ;;  %v4969_v58 = vadd.f32 %v15797_v6, %v4921_v4  ;;  %v15827_v35 = vpop.f32.mrb[79].mxu1  ;;  %v427_v4 = vld [vmem:[#allocation11 + $0x8] sm:$0xff]  ;;  %v5176_v0 = vld [vmem:[#allocation14 + $0x290] sm:$0xff]  ;;  %v5177_v12 = vld [vmem:[#allocation14 + $0x298] sm:$0xff] }
 0x3fe   : > { %v5181_v6 = vld [vmem:[#allocation14 + $0x2b8] sm:$0xff]  ;;  %v5192_v35 = vld [vmem:[#allocation14 + $0x310] sm:$0xff] }
 0x3ff   : > { %v5040_v32 = vadd.f32 %v5037_v40, %v5033_v41  ;;  %v5034_v26 = vmul.f32 %v5032_v51, %v5030_v56  ;;  %v5017_v25 = vadd.f32 %v15825_v50, %v4969_v58  ;;  %v5180_v40 = vld [vmem:[#allocation14 + $0x2b0] sm:$0xff]  ;;  %v14735_v41 = vcombine.high %v5177_v12, %v5181_v6 }
 0x400   : > { %v14733_v9 = vcombine.high %v5176_v0, %v5180_v40  ;;  %v5184_v56 = vld [vmem:[#allocation14 + $0x2d0] sm:$0xff]  ;;  %v14732_v53 = vcombine.low %v5176_v0, %v5180_v40  ;;  %v14734_v38 = vcombine.low %v5177_v12, %v5181_v6  ;;  %v14743_v58 = vcombine.high %v5185_v48, %v5189_v43  ;;  %v5106_v0 = vld [vmem:[#allocation14 + $0x60] sm:$0xff]  ;;  %v5103_v40 = vld [vmem:[#allocation14 + $0x48] sm:$0xff] }
 0x401   : > { %v5044_v17 = vmax.f32 %v5043_v1, %v5040_v32  ;;  %v5041_v7 = vadd.f32 %v5038_v30, %v5034_v26  ;;  %v5024_v22 = vadd.f32 %v5017_v25, %v18627_v21  ;;  %v14711_v21 = vld [vmem:[%s17974_s23 + $0x28] sm:$0xff]  ;;  %v5188_v30 = vld [vmem:[#allocation14 + $0x2f0] sm:$0xff]  ;;  %v14742_v26 = vcombine.low %v5185_v48, %v5189_v43  ;;  %v5107_v12 = vld [vmem:[#allocation14 + $0x68] sm:$0xff] }
 0x402   : > { %v5068_v49 = vmul.f32 %v14711_v21, %v5065_v33  ;;  %v5193_v32 = vld [vmem:[#allocation14 + $0x318] sm:$0xff]  ;;  %v14740_v33 = vcombine.low %v5184_v56, %v5188_v30  ;;  %v14786_v43 = vcombine.low %v5103_v40, %v5107_v12 }
 0x403   : > { %v5048_v54 = vmin.f32 %v5047_v27, %v5044_v17  ;;  %v5045_v63 = vmax.f32 %v5043_v1, %v5041_v7  ;;  %v5031_v13 = vadd.f32 %v14701_v44, %v5024_v22  ;;  %v5173_v44 = vld [vmem:[#allocation14 + $0x278] sm:$0xff]  ;;  %v5200_v17 = vld [vmem:[#allocation14 + $0x350] sm:$0xff]  ;;  %v14750_v16 = vcombine.low %v5193_v32, %v5197_v52 }
 0x404   : > { %v14727_v18 = vcombine.high %v5169_v31, %v5173_v44  ;;  %v14726_v50 = vcombine.low %v5169_v31, %v5173_v44  ;;  %v5204_v7 = vld [vmem:[#allocation14 + $0x370] sm:$0xff]  ;;  %v5201_v22 = vld [vmem:[#allocation14 + $0x358] sm:$0xff]  ;;  %v5098_v31 = vld [vmem:[#allocation14 + $0x20] sm:$0xff] }
 0x405   : > { %v5051_v36 = vmul.f32 %v5048_v54, %v426_v2  ;;  %v5049_v47 = vmin.f32 %v5047_v27, %v5045_v63  ;;  %v5035_v59 = vmul.f32 %v5032_v51, %v5031_v13  ;;  %v5205_v2 = vld [vmem:[#allocation14 + $0x378] sm:$0xff]  ;;  %v14757_v54 = vcombine.high %v5200_v17, %v5204_v7  ;;  %v5208_v13 = vld [vmem:[#allocation14 + $0x390] sm:$0xff]  ;;  %v5095_v44 = vld [vmem:[#allocation14 + $0x8] sm:$0xff] }
 0x406   : > { %v14759_v63 = vcombine.high %v5201_v22, %v5205_v2  ;;  %v5221_v21 = vld [vmem:[#allocation14 + $0x3f8] sm:$0xff]  ;;  %v14776_v6 = vcombine.low %v5094_v34, %v5098_v31 }
 0x407   : > { %v18636_v8 = vadd.f32 %v5066_v5, %v5051_v36  ;;  %v5052_v14 = vmul.f32 %v5049_v47, %v427_v4  ;;  %v5042_v37 = vadd.f32 %v5039_v60, %v5035_v59  ;;  %v5209_v60 = vld [vmem:[#allocation14 + $0x398] sm:$0xff]  ;;  %v14756_v36 = vcombine.low %v5200_v17, %v5204_v7  ;;  %v5131_v17 = vld [vmem:[#allocation14 + $0x128] sm:$0xff] }
 0x408   : > { %v5213_v4 = vld [vmem:[#allocation14 + $0x3b8] sm:$0xff]  ;;  %v14758_v47 = vcombine.low %v5201_v22, %v5205_v2 }
 0x409   : > { %v5073_v23 = vmul.f32 %v5072_v20, %v18636_v8  ;;  %v18640_v57 = vadd.f32 %v5067_v45, %v5052_v14  ;;  %v5046_v61 = vmax.f32 %v5043_v1, %v5042_v37  ;;  %v5196_v1 = vld [vmem:[#allocation14 + $0x330] sm:$0xff]  ;;  %v14765_v45 = vcombine.high %v5208_v13, %v5212_v46  ;;  %v5217_v37 = vld [vmem:[#allocation14 + $0x3d8] sm:$0xff] }
 0x40a   : > { %v14749_v25 = vcombine.high %v5192_v35, %v5196_v1  ;;  %v14748_v5 = vcombine.low %v5192_v35, %v5196_v1  ;;  %v14767_v59 = vcombine.high %v5209_v60, %v5213_v4  ;;  %v5220_v14 = vld [vmem:[#allocation14 + $0x3f0] sm:$0xff]  ;;  %v14775_v15 = vcombine.high %v5217_v37, %v5221_v21  ;;  %v5119_v35 = vld [vmem:[#allocation14 + $0xc8] sm:$0xff] }
 0x40b   : > { %5076 = vst [vmem:[#allocation2 + $0x8] sm:$0xff] %v5073_v23  ;;  %v5074_v11 = vmul.f32 %v5072_v20, %v18640_v57  ;;  %v5050_v29 = vmin.f32 %v5047_v27, %v5046_v61  ;;  %v14751_v27 = vcombine.high %v5193_v32, %v5197_v52  ;;  %v5123_v1 = vld [vmem:[#allocation14 + $0xe8] sm:$0xff] }
 0x40c   : > { %v14802_v22 = vcombine.low %v5119_v35, %v5123_v1 }
 0x40d   : > { %5077 = vst [vmem:[#allocation2 + $0x10] sm:$0xff] %v5074_v11  ;;  %v5053_v62 = vmul.f32 %v5050_v29, %v428_v24  ;;  %v18643_v51 = vpack.c.bf16 %v5074_v11, %v5073_v23  ;;  %v14764_v23 = vcombine.low %v5208_v13, %v5212_v46  ;;  %v14766_v24 = vcombine.low %v5209_v60, %v5213_v4  ;;  %v5099_v11 = vld [vmem:[#allocation14 + $0x28] sm:$0xff] }
 0x40e   : > { %v5139_v13 = vld [vmem:[#allocation14 + $0x168] sm:$0xff] }
 0x40f   : > { %v18645_v3 = vadd.f32 %v5068_v49, %v5053_v62  ;;  %5575 = vmatmul.mubr.bf16.vlgmr.msra.gmra.mrb[80].mxu0 %v18643_v51  ;;  %5626 = vmatmul.mubr.bf16.vlgmr.msra.gmra.mrb[80].mxu1 %v18643_v51  ;;  %v14774_v49 = vcombine.low %v5217_v37, %v5221_v21  ;;  %v14777_v62 = vcombine.high %v5094_v34, %v5098_v31 }
 0x410   : > { %5645 = vmatpush1.bf16.msra.mxu0 %v14716_v19  ;;  %5696 = vmatpush1.bf16.msra.mxu1 %v14718_v10  ;;  %v14741_v10 = vcombine.high %v5184_v56, %v5188_v30  ;;  %v5111_v56 = vld [vmem:[#allocation14 + $0x88] sm:$0xff] }
 0x411   : > { %v5075_v55 = vmul.f32 %v5072_v20, %v18645_v3  ;;  %5646 = vmatprep.subr.bf16.mxu0 %v14725_v39  ;;  %5697 = vmatprep.subr.bf16.mxu1 %v14727_v18  ;;  %v5216_v20 = vld [vmem:[#allocation14 + $0x3d0] sm:$0xff]  ;;  %v14779_v39 = vcombine.high %v5095_v44, %v5099_v11  ;;  %v5102_v18 = vld [vmem:[#allocation14 + $0x40] sm:$0xff]  ;;  %v5115_v30 = vld [vmem:[#allocation14 + $0xa8] sm:$0xff] }
 0x412   : > { %5584 = vmatprep.mubr.bf16.mxu0 %v19741_v28  ;;  %5635 = vmatprep.mubr.bf16.mxu1 %v19741_v28  ;;  %v14773_v61 = vcombine.high %v5216_v20, %v5220_v14  ;;  %v14772_v29 = vcombine.low %v5216_v20, %v5220_v14  ;;  %v14784_v48 = vcombine.low %v5102_v18, %v5106_v0 }
 0x413   : > { %5078 = vst [vmem:[#allocation2 + $0x18] sm:$0xff] %v5075_v55  ;;  %v18658_v19 = vpack.c.bf16 %v5075_v55, %v5075_v55  ;;  %v14787_v55 = vcombine.high %v5103_v40, %v5107_v12 }
 0x414   : > { %5647 = vmatpush1.bf16.msra.mxu0 %v14724_v42  ;;  %5698 = vmatpush1.bf16.msra.mxu1 %v14726_v50  ;;  %v14778_v42 = vcombine.low %v5095_v44, %v5099_v11  ;;  %v14785_v50 = vcombine.high %v5102_v18, %v5106_v0 }
 0x415   : > { %5648 = vmatprep.subr.bf16.mxu0 %v14733_v9  ;;  %5699 = vmatprep.subr.bf16.mxu1 %v14735_v41  ;;  %v5110_v9 = vld [vmem:[#allocation14 + $0x80] sm:$0xff] }
 0x416   : > { %v5114_v41 = vld [vmem:[#allocation14 + $0xa0] sm:$0xff] }
 0x417   : > { %5585 = vmatmul.mubr.bf16.gmra.mrb[84].mxu0 %v18658_v19  ;;  %5636 = vmatmul.mubr.bf16.gmra.mrb[84].mxu1 %v18658_v19  ;;  %v14792_v32 = vcombine.low %v5110_v9, %v5114_v41 }
 0x418   : > { %5649 = vmatpush1.bf16.msra.mxu0 %v14732_v53  ;;  %5700 = vmatpush1.bf16.msra.mxu1 %v14734_v38  ;;  %v14793_v53 = vcombine.high %v5110_v9, %v5114_v41  ;;  %v14795_v38 = vcombine.high %v5111_v56, %v5115_v30  ;;  %v5109_v9 = vld [vmem:[#allocation14 + $0x78] sm:$0xff] }
 0x419   : > { %5650 = vmatprep.subr.bf16.mxu0 %v14741_v10  ;;  %5701 = vmatprep.subr.bf16.mxu1 %v14743_v58  ;;  %v5118_v10 = vld [vmem:[#allocation14 + $0xc0] sm:$0xff] }
 0x41a   : > { %5676 = vmatprep.mubr.bf16.mxu0 %v19741_v28  ;;  %5727 = vmatprep.mubr.bf16.mxu1 %v19741_v28  ;;  %v5122_v58 = vld [vmem:[#allocation14 + $0xe0] sm:$0xff] }
 0x41b   : > { %v14801_v52 = vcombine.high %v5118_v10, %v5122_v58  ;;  %v14800_v7 = vcombine.low %v5118_v10, %v5122_v58  ;;  %v5079_v41 = vld [vmem:[#allocation2 + $0x7] sm:$0xff]  ;;  %v5116_v10 = vld [vmem:[#allocation14 + $0xb0] sm:$0xff] }
 0x41c   : > { %5651 = vmatpush1.bf16.msra.mxu0 %v14740_v33  ;;  %5702 = vmatpush1.bf16.msra.mxu1 %v14742_v26  ;;  %v14803_v33 = vcombine.high %v5119_v35, %v5123_v1  ;;  %v5126_v26 = vld [vmem:[#allocation14 + $0x100] sm:$0xff]  ;;  %v5113_v58 = vld [vmem:[#allocation14 + $0x98] sm:$0xff] }
 0x41d   : > { %5652 = vmatprep.subr.bf16.mxu0 %v14749_v25  ;;  %5703 = vmatprep.subr.bf16.mxu1 %v14751_v27  ;;  %v5130_v25 = vld [vmem:[#allocation14 + $0x120] sm:$0xff]  ;;  %v5127_v27 = vld [vmem:[#allocation14 + $0x108] sm:$0xff]  ;;  %v5117_v35 = vld [vmem:[#allocation14 + $0xb8] sm:$0xff] }
 0x41e   : > { %v14809_v2 = vcombine.high %v5126_v26, %v5130_v25  ;;  %v14808_v46 = vcombine.low %v5126_v26, %v5130_v25  ;;  %v5124_v26 = vld [vmem:[#allocation14 + $0xf0] sm:$0xff] }
 0x41f   : > { %v5081_v25 = vld [vmem:[#allocation2 + $0x17] sm:$0xff] }
 0x420   : > { %5653 = vmatpush1.bf16.msra.mxu0 %v14748_v5  ;;  %5704 = vmatpush1.bf16.msra.mxu1 %v14750_v16  ;;  %v14811_v5 = vcombine.high %v5127_v27, %v5131_v17  ;;  %v5134_v16 = vld [vmem:[#allocation14 + $0x140] sm:$0xff] }
 0x421   : > { %5654 = vmatprep.subr.bf16.mxu0 %v14757_v54  ;;  %5705 = vmatprep.subr.bf16.mxu1 %v14759_v63  ;;  %v5138_v54 = vld [vmem:[#allocation14 + $0x160] sm:$0xff]  ;;  %v5135_v63 = vld [vmem:[#allocation14 + $0x148] sm:$0xff] }
 0x422   : > { %v14817_v60 = vcombine.high %v5134_v16, %v5138_v54  ;;  %v14819_v4 = vcombine.high %v5135_v63, %v5139_v13  ;;  %v14816_v20 = vcombine.low %v5134_v16, %v5138_v54  ;;  %v14818_v14 = vcombine.low %v5135_v63, %v5139_v13  ;;  %v5128_v54 = vld [vmem:[#allocation14 + $0x110] sm:$0xff]  ;;  %v5129_v13 = vld [vmem:[#allocation14 + $0x118] sm:$0xff] }
 0x423   : > { %v5132_v63 = vld [vmem:[#allocation14 + $0x130] sm:$0xff] }
 0x424   : > { %5655 = vmatpush1.bf16.msra.mxu0 %v14756_v36  ;;  %5706 = vmatpush1.bf16.msra.mxu1 %v14758_v47  ;;  %v5142_v36 = vld [vmem:[#allocation14 + $0x180] sm:$0xff] }
 0x425   : > { %5656 = vmatprep.subr.bf16.mxu0 %v14765_v45  ;;  %5707 = vmatprep.subr.bf16.mxu1 %v14767_v59  ;;  %v5146_v47 = vld [vmem:[#allocation14 + $0x1a0] sm:$0xff]  ;;  %v5143_v45 = vld [vmem:[#allocation14 + $0x188] sm:$0xff] }
 0x426   : > { %v5147_v59 = vld [vmem:[#allocation14 + $0x1a8] sm:$0xff]  ;;  %v14825_v37 = vcombine.high %v5142_v36, %v5146_v47  ;;  %v14824_v34 = vcombine.low %v5142_v36, %v5146_v47  ;;  %v5136_v47 = vld [vmem:[#allocation14 + $0x150] sm:$0xff] }
 0x427   : > { %v14827_v21 = vcombine.high %v5143_v45, %v5147_v59  ;;  %v14826_v31 = vcombine.low %v5143_v45, %v5147_v59  ;;  %v5140_v45 = vld [vmem:[#allocation14 + $0x170] sm:$0xff]  ;;  %v5137_v59 = vld [vmem:[#allocation14 + $0x158] sm:$0xff] }
 0x428   : > { %5657 = vmatpush1.bf16.msra.mxu0 %v14764_v23  ;;  %5708 = vmatpush1.bf16.msra.mxu1 %v14766_v24  ;;  %v5150_v23 = vld [vmem:[#allocation14 + $0x1c0] sm:$0xff] }
 0x429   : > { %5658 = vmatprep.subr.bf16.mxu0 %v14773_v61  ;;  %5709 = vmatprep.subr.bf16.mxu1 %v14775_v15  ;;  %v5154_v24 = vld [vmem:[#allocation14 + $0x1e0] sm:$0xff]  ;;  %v5151_v61 = vld [vmem:[#allocation14 + $0x1c8] sm:$0xff] }
 0x42a   : > { %v5155_v15 = vld [vmem:[#allocation14 + $0x1e8] sm:$0xff]  ;;  %v14833_v44 = vcombine.high %v5150_v23, %v5154_v24  ;;  %v14832_v18 = vcombine.low %v5150_v23, %v5154_v24  ;;  %v5144_v24 = vld [vmem:[#allocation14 + $0x190] sm:$0xff] }
 0x42b   : > { %v14835_v11 = vcombine.high %v5151_v61, %v5155_v15  ;;  %v14834_v0 = vcombine.low %v5151_v61, %v5155_v15  ;;  %v5148_v61 = vld [vmem:[#allocation14 + $0x1b0] sm:$0xff]  ;;  %v5145_v15 = vld [vmem:[#allocation14 + $0x198] sm:$0xff] }
 0x42c   : > { %5659 = vmatpush1.bf16.msra.mxu0 %v14772_v29  ;;  %5710 = vmatpush1.bf16.msra.mxu1 %v14774_v49  ;;  %v5096_v29 = vld [vmem:[#allocation14 + $0x10] sm:$0xff] }
 0x42d   : > { %6066 = vmatprep.subr.bf16.mxu0 %v14777_v62  ;;  %6117 = vmatprep.subr.bf16.mxu1 %v14779_v39  ;;  %v5100_v49 = vld [vmem:[#allocation14 + $0x30] sm:$0xff]  ;;  %v5097_v62 = vld [vmem:[#allocation14 + $0x18] sm:$0xff] }
 0x42e   : > { %v5101_v39 = vld [vmem:[#allocation14 + $0x38] sm:$0xff]  ;;  %v14781_v40 = vcombine.high %v5096_v29, %v5100_v49 }
 0x42f   : > { %5677 = vmatmul.mubr.bf16.vlgmr.msra.gmra.mrb[88].mxu0 %v18643_v51  ;;  %5728 = vmatmul.mubr.bf16.vlgmr.msra.gmra.mrb[88].mxu1 %v18643_v51  ;;  %v14794_v51 = vcombine.low %v5111_v56, %v5115_v30  ;;  %v14783_v12 = vcombine.high %v5097_v62, %v5101_v39  ;;  %v14780_v56 = vcombine.low %v5096_v29, %v5100_v49  ;;  %v5152_v49 = vld [vmem:[#allocation14 + $0x1d0] sm:$0xff] }
 0x430   : > { %6067 = vmatpush1.bf16.msra.mxu0 %v14776_v6  ;;  %6118 = vmatpush1.bf16.msra.mxu1 %v14778_v42  ;;  %v5104_v6 = vld [vmem:[#allocation14 + $0x50] sm:$0xff]  ;;  %v14782_v30 = vcombine.low %v5097_v62, %v5101_v39  ;;  %v5153_v39 = vld [vmem:[#allocation14 + $0x1d8] sm:$0xff] }
 0x431   : > { %6068 = vmatprep.subr.bf16.mxu0 %v14785_v50  ;;  %6119 = vmatprep.subr.bf16.mxu1 %v14787_v55  ;;  %v5108_v42 = vld [vmem:[#allocation14 + $0x70] sm:$0xff]  ;;  %v5080_v50 = vld [vmem:[#allocation2 + $0xf] sm:$0xff]  ;;  %v5105_v55 = vld [vmem:[#allocation14 + $0x58] sm:$0xff] }
 0x432   : > { %5686 = vmatprep.mubr.bf16.mxu0 %v19741_v28  ;;  %5737 = vmatprep.mubr.bf16.mxu1 %v19741_v28  ;;  %v14788_v1 = vcombine.low %v5104_v6, %v5108_v42  ;;  %v5156_v62 = vld [vmem:[#allocation14 + $0x1f0] sm:$0xff] }
 0x434   : > { %6069 = vmatpush1.bf16.msra.mxu0 %v14784_v48  ;;  %6120 = vmatpush1.bf16.msra.mxu1 %v14786_v43  ;;  %v18672_v48 = vpack.c.bf16 %v5080_v50, %v5079_v41  ;;  %v14789_v43 = vcombine.high %v5104_v6, %v5108_v42  ;;  %v6270_v42 = vld [vmem:[#allocation14 + $0x400] sm:$0xff]  ;;  %v14836_v41 = vcombine.low %v5152_v49, %v5156_v62 }
 0x435   : > { %6070 = vmatprep.subr.bf16.mxu0 %v14793_v53  ;;  %6121 = vmatprep.subr.bf16.mxu1 %v14795_v38  ;;  %v14791_v53 = vcombine.high %v5105_v55, %v5109_v9  ;;  %v5112_v38 = vld [vmem:[#allocation14 + $0x90] sm:$0xff]  ;;  %v6274_v50 = vld [vmem:[#allocation14 + $0x420] sm:$0xff] }
 0x437   : > { %5687 = vmatmul.mubr.bf16.gmra.mrb[92].mxu0 %v18658_v19  ;;  %5738 = vmatmul.mubr.bf16.gmra.mrb[92].mxu1 %v18658_v19  ;;  %v14810_v19 = vcombine.low %v5127_v27, %v5131_v17  ;;  %v5121_v27 = vld [vmem:[#allocation14 + $0xd8] sm:$0xff] }
 0x438   : > { %6071 = vmatpush1.bf16.msra.mxu0 %v14792_v32  ;;  %6122 = vmatpush1.bf16.msra.mxu1 %v14794_v51  ;;  %v14790_v32 = vcombine.low %v5105_v55, %v5109_v9  ;;  %v14797_v51 = vcombine.high %v5112_v38, %v5116_v10  ;;  %v5125_v17 = vld [vmem:[#allocation14 + $0xf8] sm:$0xff]  ;;  %v6271_v55 = vld [vmem:[#allocation14 + $0x408] sm:$0xff] }
 0x439   : > { %6072 = vmatprep.subr.bf16.mxu0 %v14801_v52  ;;  %6123 = vmatprep.subr.bf16.mxu1 %v14803_v33  ;;  %v14799_v52 = vcombine.high %v5113_v58, %v5117_v35  ;;  %v5120_v33 = vld [vmem:[#allocation14 + $0xd0] sm:$0xff]  ;;  %v14807_v16 = vcombine.high %v5121_v27, %v5125_v17  ;;  %v6275_v9 = vld [vmem:[#allocation14 + $0x428] sm:$0xff] }
 0x43a   : > { %6098 = vmatprep.mubr.bf16.mxu0 %v19741_v28  ;;  %6149 = vmatprep.mubr.bf16.mxu1 %v19741_v28 }
 0x43c   : > { %6073 = vmatpush1.bf16.msra.mxu0 %v14800_v7  ;;  %6124 = vmatpush1.bf16.msra.mxu1 %v14802_v22  ;;  %v14796_v7 = vcombine.low %v5112_v38, %v5116_v10  ;;  %v14798_v22 = vcombine.low %v5113_v58, %v5117_v35  ;;  %v6282_v38 = vld [vmem:[#allocation14 + $0x460] sm:$0xff]  ;;  %v6279_v10 = vld [vmem:[#allocation14 + $0x448] sm:$0xff]  ;;  %v14840_v35 = vcombine.low %v6270_v42, %v6274_v50 }
 0x43d   : > { %6074 = vmatprep.subr.bf16.mxu0 %v14809_v2  ;;  %6125 = vmatprep.subr.bf16.mxu1 %v14811_v5  ;;  %v18678_v2 = vpack.c.bf16 %v5081_v25, %v5081_v25  ;;  %v14805_v5 = vcombine.high %v5120_v33, %v5124_v26  ;;  %v6283_v58 = vld [vmem:[#allocation14 + $0x468] sm:$0xff] }
 0x43e   : > { %v6291_v25 = vld [vmem:[#allocation14 + $0x4a8] sm:$0xff] }
 0x440   : > { %6075 = vmatpush1.bf16.msra.mxu0 %v14808_v46  ;;  %6126 = vmatpush1.bf16.msra.mxu1 %v14810_v19  ;;  %v5133_v46 = vld [vmem:[#allocation14 + $0x138] sm:$0xff]  ;;  %v14804_v19 = vcombine.low %v5120_v33, %v5124_v26  ;;  %v6290_v33 = vld [vmem:[#allocation14 + $0x4a0] sm:$0xff]  ;;  %v6287_v26 = vld [vmem:[#allocation14 + $0x488] sm:$0xff] }
 0x441   : > { %6076 = vmatprep.subr.bf16.mxu0 %v14817_v60  ;;  %6127 = vmatprep.subr.bf16.mxu1 %v14819_v4  ;;  %v14806_v60 = vcombine.low %v5121_v27, %v5125_v17  ;;  %v14813_v4 = vcombine.high %v5128_v54, %v5132_v63  ;;  %v14815_v36 = vcombine.high %v5129_v13, %v5133_v46 }
 0x442   : > { %v14850_v17 = vcombine.low %v6279_v10, %v6283_v58 }
 0x444   : > { %6077 = vmatpush1.bf16.msra.mxu0 %v14816_v20  ;;  %6128 = vmatpush1.bf16.msra.mxu1 %v14818_v14  ;;  %v5141_v20 = vld [vmem:[#allocation14 + $0x178] sm:$0xff]  ;;  %v14812_v14 = vcombine.low %v5128_v54, %v5132_v63  ;;  %v6295_v54 = vld [vmem:[#allocation14 + $0x4c8] sm:$0xff] }
 0x445   : > { %6078 = vmatprep.subr.bf16.mxu0 %v14825_v37  ;;  %6129 = vmatprep.subr.bf16.mxu1 %v14827_v21  ;;  %v14814_v37 = vcombine.low %v5129_v13, %v5133_v46  ;;  %v14821_v21 = vcombine.high %v5136_v47, %v5140_v45  ;;  %v14823_v23 = vcombine.high %v5137_v59, %v5141_v20  ;;  %v6299_v63 = vld [vmem:[#allocation14 + $0x4e8] sm:$0xff] }
 0x448   : > { %6079 = vmatpush1.bf16.msra.mxu0 %v14824_v34  ;;  %6130 = vmatpush1.bf16.msra.mxu1 %v14826_v31  ;;  %v5149_v34 = vld [vmem:[#allocation14 + $0x1b8] sm:$0xff]  ;;  %v14820_v31 = vcombine.low %v5136_v47, %v5140_v45  ;;  %v6307_v47 = vld [vmem:[#allocation14 + $0x528] sm:$0xff] }
 0x449   : > { %6080 = vmatprep.subr.bf16.mxu0 %v14833_v44  ;;  %6131 = vmatprep.subr.bf16.mxu1 %v14835_v11  ;;  %v14822_v44 = vcombine.low %v5137_v59, %v5141_v20  ;;  %v14829_v11 = vcombine.high %v5144_v24, %v5148_v61  ;;  %v14831_v29 = vcombine.high %v5145_v15, %v5149_v34 }
 0x44a   : > { %v14866_v59 = vcombine.low %v6295_v54, %v6299_v63 }
 0x44c   : > { %6081 = vmatpush1.bf16.msra.mxu0 %v14832_v18  ;;  %6132 = vmatpush1.bf16.msra.mxu1 %v14834_v0  ;;  %v5157_v18 = vld [vmem:[#allocation14 + $0x1f8] sm:$0xff]  ;;  %v14828_v0 = vcombine.low %v5144_v24, %v5148_v61  ;;  %v6315_v24 = vld [vmem:[#allocation14 + $0x568] sm:$0xff] }
 0x44d   : > { %6168 = vmatprep.subr.bf16.mxu0 %v14781_v40  ;;  %6219 = vmatprep.subr.bf16.mxu1 %v14783_v12  ;;  %v14830_v40 = vcombine.low %v5145_v15, %v5149_v34  ;;  %v14837_v12 = vcombine.high %v5152_v49, %v5156_v62  ;;  %v14839_v6 = vcombine.high %v5153_v39, %v5157_v18 }
 0x44f   : > { %6099 = vmatmul.mubr.bf16.vlgmr.msra.gmra.mrb[80].mxu0 %v18672_v48  ;;  %6150 = vmatmul.mubr.bf16.vlgmr.msra.gmra.mrb[80].mxu1 %v18672_v48 }
 0x450   : > { %6169 = vmatpush1.bf16.msra.mxu0 %v14780_v56  ;;  %6220 = vmatpush1.bf16.msra.mxu1 %v14782_v30  ;;  %v14838_v56 = vcombine.low %v5153_v39, %v5157_v18  ;;  %v14841_v30 = vcombine.high %v6270_v42, %v6274_v50 }
 0x451   : > { %6170 = vmatprep.subr.bf16.mxu0 %v14789_v43  ;;  %6221 = vmatprep.subr.bf16.mxu1 %v14791_v53  ;;  %v14843_v43 = vcombine.high %v6271_v55, %v6275_v9  ;;  %v6278_v53 = vld [vmem:[#allocation14 + $0x440] sm:$0xff] }
 0x452   : > { %6108 = vmatprep.mubr.bf16.mxu0 %v19741_v28  ;;  %6159 = vmatprep.mubr.bf16.mxu1 %v19741_v28  ;;  %v14848_v27 = vcombine.low %v6278_v53, %v6282_v38 }
 0x454   : > { %6171 = vmatpush1.bf16.msra.mxu0 %v14788_v1  ;;  %6222 = vmatpush1.bf16.msra.mxu1 %v14790_v32  ;;  %v14842_v1 = vcombine.low %v6271_v55, %v6275_v9  ;;  %v14849_v32 = vcombine.high %v6278_v53, %v6282_v38 }
 0x455   : > { %6172 = vmatprep.subr.bf16.mxu0 %v14797_v51  ;;  %6223 = vmatprep.subr.bf16.mxu1 %v14799_v52  ;;  %v14851_v51 = vcombine.high %v6279_v10, %v6283_v58  ;;  %v6286_v52 = vld [vmem:[#allocation14 + $0x480] sm:$0xff] }
 0x456   : > { %v14856_v13 = vcombine.low %v6286_v52, %v6290_v33 }
 0x457   : > { %6109 = vmatmul.mubr.bf16.gmra.mrb[96].mxu0 %v18678_v2  ;;  %6160 = vmatmul.mubr.bf16.gmra.mrb[96].mxu1 %v18678_v2 }
 0x458   : > { %6173 = vmatpush1.bf16.msra.mxu0 %v14796_v7  ;;  %6224 = vmatpush1.bf16.msra.mxu1 %v14798_v22  ;;  %v14857_v7 = vcombine.high %v6286_v52, %v6290_v33  ;;  %v14859_v22 = vcombine.high %v6287_v26, %v6291_v25  ;;  %v6285_v52 = vld [vmem:[#allocation14 + $0x478] sm:$0xff]  ;;  %v5089_v33 = vld [vmem:[#allocation2 + $0x9] sm:$0xff] }
 0x459   : > { %6174 = vmatprep.subr.bf16.mxu0 %v14805_v5  ;;  %6225 = vmatprep.subr.bf16.mxu1 %v14807_v16  ;;  %v6294_v5 = vld [vmem:[#allocation14 + $0x4c0] sm:$0xff] }
 0x45a   : > { %6200 = vmatprep.mubr.bf16.mxu0 %v19741_v28  ;;  %6251 = vmatprep.mubr.bf16.mxu1 %v19741_v28  ;;  %v6298_v16 = vld [vmem:[#allocation14 + $0x4e0] sm:$0xff] }
 0x45b   : > { %v14865_v46 = vcombine.high %v6294_v5, %v6298_v16  ;;  %v14864_v45 = vcombine.low %v6294_v5, %v6298_v16  ;;  %v6292_v5 = vld [vmem:[#allocation14 + $0x4b0] sm:$0xff]  ;;  %v6289_v16 = vld [vmem:[#allocation14 + $0x498] sm:$0xff] }
 0x45c   : > { %6175 = vmatpush1.bf16.msra.mxu0 %v14804_v19  ;;  %6226 = vmatpush1.bf16.msra.mxu1 %v14806_v60  ;;  %v14867_v19 = vcombine.high %v6295_v54, %v6299_v63  ;;  %v6302_v60 = vld [vmem:[#allocation14 + $0x500] sm:$0xff]  ;;  %v6293_v54 = vld [vmem:[#allocation14 + $0x4b8] sm:$0xff] }
 0x45d   : > { %6176 = vmatprep.subr.bf16.mxu0 %v14813_v4  ;;  %6227 = vmatprep.subr.bf16.mxu1 %v14815_v36  ;;  %v6306_v4 = vld [vmem:[#allocation14 + $0x520] sm:$0xff]  ;;  %v6303_v36 = vld [vmem:[#allocation14 + $0x508] sm:$0xff] }
 0x45e   : > { %v14873_v20 = vcombine.high %v6302_v60, %v6306_v4  ;;  %v14872_v61 = vcombine.low %v6302_v60, %v6306_v4  ;;  %v6300_v60 = vld [vmem:[#allocation14 + $0x4f0] sm:$0xff] }
 0x45f   : > { %v5091_v4 = vld [vmem:[#allocation2 + $0x19] sm:$0xff] }
 0x460   : > { %6177 = vmatpush1.bf16.msra.mxu0 %v14812_v14  ;;  %6228 = vmatpush1.bf16.msra.mxu1 %v14814_v37  ;;  %v14875_v14 = vcombine.high %v6303_v36, %v6307_v47  ;;  %v6310_v37 = vld [vmem:[#allocation14 + $0x540] sm:$0xff] }
 0x461   : > { %6178 = vmatprep.subr.bf16.mxu0 %v14821_v21  ;;  %6229 = vmatprep.subr.bf16.mxu1 %v14823_v23  ;;  %v6314_v21 = vld [vmem:[#allocation14 + $0x560] sm:$0xff]  ;;  %v6311_v23 = vld [vmem:[#allocation14 + $0x548] sm:$0xff] }
 0x462   : > { %v14881_v15 = vcombine.high %v6310_v37, %v6314_v21  ;;  %v14883_v34 = vcombine.high %v6311_v23, %v6315_v24  ;;  %v14880_v49 = vcombine.low %v6310_v37, %v6314_v21  ;;  %v14882_v62 = vcombine.low %v6311_v23, %v6315_v24  ;;  %v6304_v21 = vld [vmem:[#allocation14 + $0x510] sm:$0xff]  ;;  %v6305_v24 = vld [vmem:[#allocation14 + $0x518] sm:$0xff] }
 0x463   : > { %v6308_v23 = vld [vmem:[#allocation14 + $0x530] sm:$0xff] }
 0x464   : > { %6179 = vmatpush1.bf16.msra.mxu0 %v14820_v31  ;;  %6230 = vmatpush1.bf16.msra.mxu1 %v14822_v44  ;;  %v6318_v31 = vld [vmem:[#allocation14 + $0x580] sm:$0xff] }
 0x465   : > { %6180 = vmatprep.subr.bf16.mxu0 %v14829_v11  ;;  %6231 = vmatprep.subr.bf16.mxu1 %v14831_v29  ;;  %v6322_v44 = vld [vmem:[#allocation14 + $0x5a0] sm:$0xff]  ;;  %v6319_v11 = vld [vmem:[#allocation14 + $0x588] sm:$0xff] }
 0x466   : > { %v6323_v29 = vld [vmem:[#allocation14 + $0x5a8] sm:$0xff]  ;;  %v14889_v39 = vcombine.high %v6318_v31, %v6322_v44  ;;  %v14888_v42 = vcombine.low %v6318_v31, %v6322_v44  ;;  %v6312_v44 = vld [vmem:[#allocation14 + $0x550] sm:$0xff] }
 0x467   : > { %v14891_v18 = vcombine.high %v6319_v11, %v6323_v29  ;;  %v14890_v50 = vcombine.low %v6319_v11, %v6323_v29  ;;  %v6316_v11 = vld [vmem:[#allocation14 + $0x570] sm:$0xff]  ;;  %v6313_v29 = vld [vmem:[#allocation14 + $0x558] sm:$0xff] }
 0x468   : > { %6181 = vmatpush1.bf16.msra.mxu0 %v14828_v0  ;;  %6232 = vmatpush1.bf16.msra.mxu1 %v14830_v40  ;;  %v6326_v0 = vld [vmem:[#allocation14 + $0x5c0] sm:$0xff] }
 0x469   : > { %6182 = vmatprep.subr.bf16.mxu0 %v14837_v12  ;;  %6233 = vmatprep.subr.bf16.mxu1 %v14839_v6  ;;  %v6330_v40 = vld [vmem:[#allocation14 + $0x5e0] sm:$0xff]  ;;  %v6327_v12 = vld [vmem:[#allocation14 + $0x5c8] sm:$0xff] }
 0x46a   : > { %v6331_v6 = vld [vmem:[#allocation14 + $0x5e8] sm:$0xff]  ;;  %v14897_v55 = vcombine.high %v6326_v0, %v6330_v40  ;;  %v14896_v53 = vcombine.low %v6326_v0, %v6330_v40  ;;  %v6320_v40 = vld [vmem:[#allocation14 + $0x590] sm:$0xff] }
 0x46b   : > { %v14899_v9 = vcombine.high %v6327_v12, %v6331_v6  ;;  %v14898_v38 = vcombine.low %v6327_v12, %v6331_v6  ;;  %v6324_v12 = vld [vmem:[#allocation14 + $0x5b0] sm:$0xff]  ;;  %v6321_v6 = vld [vmem:[#allocation14 + $0x598] sm:$0xff] }
 0x46c   : > { %6183 = vmatpush1.bf16.msra.mxu0 %v14836_v41  ;;  %6234 = vmatpush1.bf16.msra.mxu1 %v14838_v56  ;;  %v6272_v41 = vld [vmem:[#allocation14 + $0x410] sm:$0xff] }
 0x46d   : > { %6654 = vmatprep.subr.bf16.mxu0 %v14841_v30  ;;  %6705 = vmatprep.subr.bf16.mxu1 %v14843_v43  ;;  %v6276_v56 = vld [vmem:[#allocation14 + $0x430] sm:$0xff]  ;;  %v6273_v30 = vld [vmem:[#allocation14 + $0x418] sm:$0xff] }
 0x46e   : > { %v6277_v43 = vld [vmem:[#allocation14 + $0x438] sm:$0xff]  ;;  %v14845_v10 = vcombine.high %v6272_v41, %v6276_v56 }
 0x46f   : > { %6201 = vmatmul.mubr.bf16.vlgmr.msra.gmra.mrb[88].mxu0 %v18672_v48  ;;  %6252 = vmatmul.mubr.bf16.vlgmr.msra.gmra.mrb[88].mxu1 %v18672_v48  ;;  %v14858_v48 = vcombine.low %v6287_v26, %v6291_v25  ;;  %v14847_v58 = vcombine.high %v6273_v30, %v6277_v43  ;;  %v14844_v26 = vcombine.low %v6272_v41, %v6276_v56  ;;  %v6328_v56 = vld [vmem:[#allocation14 + $0x5d0] sm:$0xff] }
 0x470   : > { %6655 = vmatpush1.bf16.msra.mxu0 %v14840_v35  ;;  %6706 = vmatpush1.bf16.msra.mxu1 %v14842_v1  ;;  %v6280_v35 = vld [vmem:[#allocation14 + $0x450] sm:$0xff]  ;;  %v14846_v25 = vcombine.low %v6273_v30, %v6277_v43  ;;  %v6329_v43 = vld [vmem:[#allocation14 + $0x5d8] sm:$0xff] }
 0x471   : > { %6656 = vmatprep.subr.bf16.mxu0 %v14849_v32  ;;  %6707 = vmatprep.subr.bf16.mxu1 %v14851_v51  ;;  %v6284_v1 = vld [vmem:[#allocation14 + $0x470] sm:$0xff]  ;;  %v6281_v51 = vld [vmem:[#allocation14 + $0x458] sm:$0xff] }
 0x472   : > { %6210 = vmatprep.mubr.bf16.mxu0 %v19741_v28  ;;  %6261 = vmatprep.mubr.bf16.mxu1 %v19741_v28  ;;  %v5090_v32 = vld [vmem:[#allocation2 + $0x11] sm:$0xff]  ;;  %v14852_v63 = vcombine.low %v6280_v35, %v6284_v1 }
 0x473   : > { %v6332_v30 = vld [vmem:[#allocation14 + $0x5f0] sm:$0xff] }
 0x474   : > { %6657 = vmatpush1.bf16.msra.mxu0 %v14848_v27  ;;  %6708 = vmatpush1.bf16.msra.mxu1 %v14850_v17  ;;  %v18692_v27 = vpack.c.bf16 %v5090_v32, %v5089_v33  ;;  %v14853_v17 = vcombine.high %v6280_v35, %v6284_v1  ;;  %v14900_v1 = vcombine.low %v6328_v56, %v6332_v30  ;;  %v16911_v33 = vld [vmem:[#allocation15 + $0x200] sm:$0xff]  }
 0x475   : > { %6658 = vmatprep.subr.bf16.mxu0 %v14857_v7  ;;  %6709 = vmatprep.subr.bf16.mxu1 %v14859_v22  ;;  %v14855_v7 = vcombine.high %v6281_v51, %v6285_v52  ;;  %v6288_v22 = vld [vmem:[#allocation14 + $0x490] sm:$0xff] }
 0x477   : > { %6211 = vmatmul.mubr.bf16.gmra.mrb[100].mxu0 %v18678_v2  ;;  %6262 = vmatmul.mubr.bf16.gmra.mrb[100].mxu1 %v18678_v2  ;;  %v14874_v2 = vcombine.low %v6303_v36, %v6307_v47  ;;  %v6297_v36 = vld [vmem:[#allocation14 + $0x4d8] sm:$0xff] }
 0x478   : > { %6659 = vmatpush1.bf16.msra.mxu0 %v14856_v13  ;;  %6710 = vmatpush1.bf16.msra.mxu1 %v14858_v48  ;;  %v14854_v13 = vcombine.low %v6281_v51, %v6285_v52  ;;  %v14861_v48 = vcombine.high %v6288_v22, %v6292_v5  ;;  %v6301_v47 = vld [vmem:[#allocation14 + $0x4f8] sm:$0xff]  ;;  %v16909_v51 = vld [vmem:[#allocation15 + $0x240] sm:$0xff]  }
 0x479   : > { %6660 = vmatprep.subr.bf16.mxu0 %v14865_v46  ;;  %6711 = vmatprep.subr.bf16.mxu1 %v14867_v19  ;;  %v14863_v46 = vcombine.high %v6289_v16, %v6293_v54  ;;  %v6296_v19 = vld [vmem:[#allocation14 + $0x4d0] sm:$0xff]  ;;  %v14871_v37 = vcombine.high %v6297_v36, %v6301_v47  ;;  %v16910_v52 = vld [vmem:[#allocation15 + $0x2c0] sm:$0xff]  }
 0x47a   : > { %6686 = vmatprep.mubr.bf16.mxu0 %v19741_v28  ;;  %6737 = vmatprep.mubr.bf16.mxu1 %v19741_v28 }
 0x47c   : > { %6661 = vmatpush1.bf16.msra.mxu0 %v14864_v45  ;;  %6712 = vmatpush1.bf16.msra.mxu1 %v14866_v59  ;;  %v14860_v45 = vcombine.low %v6288_v22, %v6292_v5  ;;  %v14862_v59 = vcombine.low %v6289_v16, %v6293_v54  ;;  %v16917_v22 = vld [vmem:[#allocation15 + $0x250] sm:$0xff]  }
 0x47d   : > { %6662 = vmatprep.subr.bf16.mxu0 %v14873_v20  ;;  %6713 = vmatprep.subr.bf16.mxu1 %v14875_v14  ;;  %v18698_v20 = vpack.c.bf16 %v5091_v4, %v5091_v4  ;;  %v14869_v14 = vcombine.high %v6296_v19, %v6300_v60  ;;  %v16918_v5 = vld [vmem:[#allocation15 + $0x2d0] sm:$0xff]  }
 0x47e   : > { %v16919_v16 = vld [vmem:[#allocation15 + $0x210] sm:$0xff]  }
 0x47f   : > { %v16920_v54 = vld [vmem:[#allocation15 + $0x290] sm:$0xff]  }
 0x480   : > { %6663 = vmatpush1.bf16.msra.mxu0 %v14872_v61  ;;  %6714 = vmatpush1.bf16.msra.mxu1 %v14874_v2  ;;  %v6309_v61 = vld [vmem:[#allocation14 + $0x538] sm:$0xff]  ;;  %v14868_v2 = vcombine.low %v6296_v19, %v6300_v60 }
 0x481   : > { %6664 = vmatprep.subr.bf16.mxu0 %v14881_v15  ;;  %6715 = vmatprep.subr.bf16.mxu1 %v14883_v34  ;;  %v14870_v15 = vcombine.low %v6297_v36, %v6301_v47  ;;  %v14877_v34 = vcombine.high %v6304_v21, %v6308_v23  ;;  %v14879_v31 = vcombine.high %v6305_v24, %v6309_v61  ;;  %v16921_v47 = vld [vmem:[#allocation15 + $0x258] sm:$0xff]  }
 0x484   : > { %6665 = vmatpush1.bf16.msra.mxu0 %v14880_v49  ;;  %6716 = vmatpush1.bf16.msra.mxu1 %v14882_v62  ;;  %v6317_v49 = vld [vmem:[#allocation14 + $0x578] sm:$0xff]  ;;  %v14876_v62 = vcombine.low %v6304_v21, %v6308_v23  ;;  %v16927_v21 = vld [vmem:[#allocation15 + $0x220] sm:$0xff]  }
 0x485   : > { %6666 = vmatprep.subr.bf16.mxu0 %v14889_v39  ;;  %6717 = vmatprep.subr.bf16.mxu1 %v14891_v18  ;;  %v14878_v39 = vcombine.low %v6305_v24, %v6309_v61  ;;  %v14885_v18 = vcombine.high %v6312_v44, %v6316_v11  ;;  %v14887_v0 = vcombine.high %v6313_v29, %v6317_v49  ;;  %v16928_v23 = vld [vmem:[#allocation15 + $0x2a0] sm:$0xff]   ;;  %v16929_v24 = vld [vmem:[#allocation15 + $0x268] sm:$0xff]  }
 0x486   : > { %v16930_v61 = vld [vmem:[#allocation15 + $0x2e8] sm:$0xff]  }
 0x488   : > { %6667 = vmatpush1.bf16.msra.mxu0 %v14888_v42  ;;  %6718 = vmatpush1.bf16.msra.mxu1 %v14890_v50  ;;  %v6325_v42 = vld [vmem:[#allocation14 + $0x5b8] sm:$0xff]  ;;  %v14884_v50 = vcombine.low %v6312_v44, %v6316_v11  ;;  %v16935_v44 = vld [vmem:[#allocation15 + $0x230] sm:$0xff]  }
 0x489   : > { %6668 = vmatprep.subr.bf16.mxu0 %v14897_v55  ;;  %6719 = vmatprep.subr.bf16.mxu1 %v14899_v9  ;;  %v14886_v55 = vcombine.low %v6313_v29, %v6317_v49  ;;  %v14893_v9 = vcombine.high %v6320_v40, %v6324_v12  ;;  %v14895_v41 = vcombine.high %v6321_v6, %v6325_v42  ;;  %v16936_v11 = vld [vmem:[#allocation15 + $0x2b0] sm:$0xff]   ;;  %v16937_v29 = vld [vmem:[#allocation15 + $0x278] sm:$0xff]  }
 0x48a   : > { %v16938_v49 = vld [vmem:[#allocation15 + $0x2f8] sm:$0xff]  }
 0x48c   : > { %6669 = vmatpush1.bf16.msra.mxu0 %v14896_v53  ;;  %6720 = vmatpush1.bf16.msra.mxu1 %v14898_v38  ;;  %v6333_v53 = vld [vmem:[#allocation14 + $0x5f8] sm:$0xff]  ;;  %v14892_v38 = vcombine.low %v6320_v40, %v6324_v12 }
 0x48d   : > { %6756 = vmatprep.subr.bf16.mxu0 %v14845_v10  ;;  %6807 = vmatprep.subr.bf16.mxu1 %v14847_v58  ;;  %v14894_v10 = vcombine.low %v6321_v6, %v6325_v42  ;;  %v14901_v58 = vcombine.high %v6328_v56, %v6332_v30  ;;  %v14903_v35 = vcombine.high %v6329_v43, %v6333_v53 }
 0x48e   : > { %v14902_v32 = vcombine.low %v6329_v43, %v6333_v53 }
 0x48f   : > { %6687 = vmatmul.mubr.bf16.vlgmr.msra.gmra.mrb[80].mxu0 %v18692_v27  ;;  %6738 = vmatmul.mubr.bf16.vlgmr.msra.gmra.mrb[80].mxu1 %v18692_v27 }
 0x490   : > { %6757 = vmatpush1.bf16.msra.mxu0 %v14844_v26  ;;  %6808 = vmatpush1.bf16.msra.mxu1 %v14846_v25  ;;  %v16912_v26 = vld [vmem:[#allocation15 + $0x280] sm:$0xff]   ;;  %v16913_v25 = vld [vmem:[#allocation15 + $0x248] sm:$0xff]  }
 0x491   : > { %6758 = vmatprep.subr.bf16.mxu0 %v14853_v17  ;;  %6809 = vmatprep.subr.bf16.mxu1 %v14855_v7  ;;  %v16914_v17 = vld [vmem:[#allocation15 + $0x2c8] sm:$0xff]  }
 0x492   : > { %6696 = vmatprep.mubr.bf16.mxu0 %v19741_v28  ;;  %6747 = vmatprep.mubr.bf16.mxu1 %v19741_v28  ;;  %v16915_v7 = vld [vmem:[#allocation15 + $0x208] sm:$0xff]  }
 0x494   : > { %6759 = vmatpush1.bf16.msra.mxu0 %v14852_v63  ;;  %6810 = vmatpush1.bf16.msra.mxu1 %v14854_v13 }
 0x495   : > { %6760 = vmatprep.subr.bf16.mxu0 %v14861_v48  ;;  %6811 = vmatprep.subr.bf16.mxu1 %v14863_v46 }
 0x497   : > { %6697 = vmatmul.mubr.bf16.gmra.mrb[104].mxu0 %v18698_v20  ;;  %6748 = vmatmul.mubr.bf16.gmra.mrb[104].mxu1 %v18698_v20 }
 0x498   : > { %6761 = vmatpush1.bf16.msra.mxu0 %v14860_v45  ;;  %6812 = vmatpush1.bf16.msra.mxu1 %v14862_v59  ;;  %v16922_v45 = vld [vmem:[#allocation15 + $0x2d8] sm:$0xff]  }
 0x499   : > { %6762 = vmatprep.subr.bf16.mxu0 %v14869_v14  ;;  %6813 = vmatprep.subr.bf16.mxu1 %v14871_v37  ;;  %v16923_v59 = vld [vmem:[#allocation15 + $0x218] sm:$0xff]   ;;  %v16925_v14 = vld [vmem:[#allocation15 + $0x260] sm:$0xff]  }
 0x49a   : > { %6788 = vmatprep.mubr.bf16.mxu0 %v19741_v28  ;;  %6839 = vmatprep.mubr.bf16.mxu1 %v19741_v28  ;;  %v16926_v37 = vld [vmem:[#allocation15 + $0x2e0] sm:$0xff]  }
 0x49c   : > { %6763 = vmatpush1.bf16.msra.mxu0 %v14868_v2  ;;  %6814 = vmatpush1.bf16.msra.mxu1 %v14870_v15  ;;  %v16931_v2 = vld [vmem:[#allocation15 + $0x228] sm:$0xff]  }
 0x49d   : > { %6764 = vmatprep.subr.bf16.mxu0 %v14877_v34  ;;  %6815 = vmatprep.subr.bf16.mxu1 %v14879_v31  ;;  %v16932_v15 = vld [vmem:[#allocation15 + $0x2a8] sm:$0xff]   ;;  %v16933_v34 = vld [vmem:[#allocation15 + $0x270] sm:$0xff]  }
 0x49e   : > { %v16934_v31 = vld [vmem:[#allocation15 + $0x2f0] sm:$0xff]  }
 0x4a0   : > { %6765 = vmatpush1.bf16.msra.mxu0 %v14876_v62  ;;  %6816 = vmatpush1.bf16.msra.mxu1 %v14878_v39  ;;  %v16939_v62 = vld [vmem:[#allocation15 + $0x238] sm:$0xff]  }
 0x4a1   : > { %6766 = vmatprep.subr.bf16.mxu0 %v14885_v18  ;;  %6817 = vmatprep.subr.bf16.mxu1 %v14887_v0  ;;  %v16940_v39 = vld [vmem:[#allocation15 + $0x2b8] sm:$0xff]   ;;  %v16941_v18 = vld [vmem:[#allocation15 + $0x340] sm:$0xff]  }
 0x4a2   : > { %v16942_v0 = vld [vmem:[#allocation15 + $0x3c0] sm:$0xff]  }
 0x4a4   : > { %6767 = vmatpush1.bf16.msra.mxu0 %v14884_v50  ;;  %6818 = vmatpush1.bf16.msra.mxu1 %v14886_v55 }
 0x4a5   : > { %6768 = vmatprep.subr.bf16.mxu0 %v14893_v9  ;;  %6819 = vmatprep.subr.bf16.mxu1 %v14895_v41 }
 0x4a8   : > { %6769 = vmatpush1.bf16.msra.mxu0 %v14892_v38  ;;  %6820 = vmatpush1.bf16.msra.mxu1 %v14894_v10 }
 0x4a9   : > { %6770 = vmatprep.subr.bf16.mxu0 %v14901_v58  ;;  %6821 = vmatprep.subr.bf16.mxu1 %v14903_v35 }
 0x4ac   : > { %6771 = vmatpush1.bf16.msra.mxu0 %v14900_v1  ;;  %6822 = vmatpush1.bf16.msra.mxu1 %v14902_v32 }
 0x4ad   : > { %15829 = vmatprep.subr.bf16.mxu0 %v16909_v51  ;;  %15857 = vmatprep.subr.bf16.mxu1 %v16910_v52 }
 0x4af   : > { %6789 = vmatmul.mubr.bf16.vlgmr.msra.gmra.mrb[88].mxu0 %v18692_v27  ;;  %6840 = vmatmul.mubr.bf16.vlgmr.msra.gmra.mrb[88].mxu1 %v18692_v27  ;;  %v16916_v27 = vld [vmem:[#allocation15 + $0x288] sm:$0xff]  }
 0x4b0   : > { %6798 = vmatprep.mubr.bf16.mxu0 %v19741_v28  ;;  %6849 = vmatprep.mubr.bf16.mxu1 %v19741_v28 }
 0x4b1   : > { %15830 = vmatpush3.bf16.msra.mxu0 %v16911_v33  ;;  %15858 = vmatpush3.bf16.msra.mxu1 %v16912_v26 }
 0x4b2   : > { %15831 = vmatprep.subr.bf16.mxu0 %v16913_v25  ;;  %15859 = vmatprep.subr.bf16.mxu1 %v16914_v17 }
 0x4b5   : > { %15832 = vmatpush3.bf16.msra.mxu0 %v16915_v7  ;;  %15860 = vmatpush3.bf16.msra.mxu1 %v16916_v27 }
 0x4b6   : > { %15833 = vmatprep.subr.bf16.mxu0 %v16917_v22  ;;  %15861 = vmatprep.subr.bf16.mxu1 %v16918_v5 }
 0x4b7   : > { %6799 = vmatmul.mubr.bf16.gmra.mrb[108].mxu0 %v18698_v20  ;;  %6850 = vmatmul.mubr.bf16.gmra.mrb[108].mxu1 %v18698_v20  ;;  %v16924_v20 = vld [vmem:[#allocation15 + $0x298] sm:$0xff]  }
 0x4b9   : > { %15834 = vmatpush3.bf16.msra.mxu0 %v16919_v16  ;;  %15862 = vmatpush3.bf16.msra.mxu1 %v16920_v54 }
 0x4ba   : > { %15835 = vmatprep.subr.bf16.mxu0 %v16921_v47  ;;  %15863 = vmatprep.subr.bf16.mxu1 %v16922_v45 }
 0x4bd   : > { %15836 = vmatpush3.bf16.msra.mxu0 %v16923_v59  ;;  %15864 = vmatpush3.bf16.msra.mxu1 %v16924_v20  ;;  %v19746_v20 = vld [vmem:[#allocation29_spill] sm:$0xff] }
 0x4be   : > { %15837 = vmatprep.subr.bf16.mxu0 %v16925_v14  ;;  %15865 = vmatprep.subr.bf16.mxu1 %v16926_v37  ;;  %v19747_v37 = vld [vmem:[#allocation30_spill] sm:$0xff] }
 0x4c1   : > { %15838 = vmatpush3.bf16.msra.mxu0 %v16927_v21  ;;  %15866 = vmatpush3.bf16.msra.mxu1 %v16928_v23  ;;  %v19748_v23 = vld [vmem:[#allocation31_spill] sm:$0xff] }
 0x4c2   : > { %15839 = vmatprep.subr.bf16.mxu0 %v16929_v24  ;;  %15867 = vmatprep.subr.bf16.mxu1 %v16930_v61  ;;  %v19749_v61 = vld [vmem:[#allocation32_spill] sm:$0xff] }
 0x4c5   : > { %15840 = vmatpush3.bf16.msra.mxu0 %v16931_v2  ;;  %15868 = vmatpush3.bf16.msra.mxu1 %v16932_v15 }
 0x4c6   : > { %15841 = vmatprep.subr.bf16.mxu0 %v16933_v34  ;;  %15869 = vmatprep.subr.bf16.mxu1 %v16934_v31  ;;  %v19750_v31 = vld [vmem:[#allocation33_spill] sm:$0xff] }
 0x4c9   : > { %15842 = vmatpush3.bf16.msra.mxu0 %v16935_v44  ;;  %15870 = vmatpush3.bf16.msra.mxu1 %v16936_v11  ;;  %v19751_v11 = vld [vmem:[#allocation34_spill] sm:$0xff] }
 0x4ca   : > { %15843 = vmatprep.subr.bf16.mxu0 %v16937_v29  ;;  %15871 = vmatprep.subr.bf16.mxu1 %v16938_v49 }
 0x4cd   : > { %15844 = vmatpush3.bf16.msra.mxu0 %v16939_v62  ;;  %15872 = vmatpush3.bf16.msra.mxu1 %v16940_v39 }
 0x4ce   : > { %15885 = vmatprep.subr.bf16.mxu0 %v16941_v18  ;;  %15913 = vmatprep.subr.bf16.mxu1 %v16942_v0 }
 0x4ea   : > { %v5586_v63 = vpop.f32.mrb[84].mxu0  ;;  %v5637_v13 = vpop.f32.mrb[84].mxu1 }
 0x4eb   : > { %v18710_v48 = vpop.f32.mrb[85].mxu0  ;;  %v18712_v46 = vpop.f32.mrb[85].mxu1 }
 0x4ec   : > { %v5590_v19 = vpop.f32.mrb[86].mxu0  ;;  %v5641_v60 = vpop.f32.mrb[86].mxu1 }
 0x4ed   : > { %v5591_v4 = vpop.f32.mrb[87].mxu0  ;;  %v5642_v36 = vpop.f32.mrb[87].mxu1  ;;  %v19744_v60 = vld [vmem:[#allocation27_spill] sm:$0xff] }
 0x4ee   : > { %v19745_v36 = vld [vmem:[#allocation28_spill] sm:$0xff] }
 0x50a   : > { %v5688_v40 = vpop.f32.mrb[92].mxu0  ;;  %v5739_v12 = vpop.f32.mrb[92].mxu1 }
 0x50b   : > { %v5690_v6 = vpop.f32.mrb[93].mxu0  ;;  %v5741_v42 = vpop.f32.mrb[93].mxu1 }
 0x50c   : > { %v5692_v50 = vpop.f32.mrb[94].mxu0  ;;  %v5743_v55 = vpop.f32.mrb[94].mxu1 }
 0x50d   : > { %v5693_v9 = vpop.f32.mrb[95].mxu0  ;;  %v5744_v41 = vpop.f32.mrb[95].mxu1 }
 0x52a   : > { %v6110_v56 = vpop.f32.mrb[96].mxu0  ;;  %v6161_v30 = vpop.f32.mrb[96].mxu1 }
 0x52b   : > { %v18714_v43 = vadd.f32 %v6110_v56, %v5586_v63  ;;  %v18716_v53 = vadd.f32 %v6161_v30, %v5637_v13  ;;  %v6112_v38 = vpop.f32.mrb[97].mxu0  ;;  %v6163_v10 = vpop.f32.mrb[97].mxu1 }
 0x52c   : > { %v18719_v58 = vadd.f32 %v6112_v38, %v18710_v48  ;;  %v18722_v35 = vadd.f32 %v6163_v10, %v18712_v46  ;;  %v6114_v1 = vpop.f32.mrb[98].mxu0  ;;  %v6165_v32 = vpop.f32.mrb[98].mxu1  ;;  %v6906_v48 = vstv %s14706_s16  ;;  %v19743_v46 = vld [vmem:[#allocation26_spill] sm:$0xff]  ;;  %s19573_s16 = scalar_lea.hbm %s19626_s7, %s16603_s19 }
 0x52d   : > { %v6115_v51 = vpop.f32.mrb[99].mxu0  ;;  %v6166_v52 = vpop.f32.mrb[99].mxu1  ;;  %v18733_v19 = vmul.f32 %v6906_v48, %v19743_v46 }
 0x52e   : > { %v17293_v52 = vld [vmem:[#allocation12] sm:$0xff] }
 0x52f   : > { %v18737_v4 = vrot.slane %v18733_v19, %v19744_v60  ;;  %v18741_v47 = vrot.slane %v18733_v19, %v19745_v36  ;;  %v18745_v14 = vrot.slane %v18733_v19, %v19746_v20  ;;  %v18749_v21 = vrot.slane %v18733_v19, %v19747_v37 }
 0x54a   : > { %v6212_v33 = vpop.f32.mrb[100].mxu0  ;;  %v6263_v26 = vpop.f32.mrb[100].mxu1 }
 0x54b   : > { %v18724_v25 = vadd.f32 %v6212_v33, %v5688_v40  ;;  %v18726_v17 = vadd.f32 %v6263_v26, %v5739_v12  ;;  %v6214_v7 = vpop.f32.mrb[101].mxu0  ;;  %v6265_v27 = vpop.f32.mrb[101].mxu1  ;;  %v17294_v26 = vld [vmem:[#allocation12 + $0x10] sm:$0xff] }
 0x54c   : > { %v18728_v22 = vadd.f32 %v6214_v7, %v5690_v6  ;;  %v18730_v5 = vadd.f32 %v6265_v27, %v5741_v42  ;;  %v6216_v16 = vpop.f32.mrb[102].mxu0  ;;  %v6267_v54 = vpop.f32.mrb[102].mxu1 }
 0x54d   : > { %v6217_v63 = vpop.f32.mrb[103].mxu0  ;;  %v6268_v13 = vpop.f32.mrb[103].mxu1  ;;  %v17295_v54 = vld [vmem:[#allocation12 + $0x8] sm:$0xff] }
 0x54e   : > { %v17296_v13 = vld [vmem:[#allocation12 + $0x18] sm:$0xff] }
 0x562   : > { %v6688_v45 = vpop.f32.mrb[80].mxu0  ;;  %v6739_v59 = vpop.f32.mrb[80].mxu1 }
 0x563   : > { %v6882_v24 = vadd.f32 %v6688_v45, %v19748_v23  ;;  %v6884_v2 = vadd.f32 %v6739_v59, %v19749_v61  ;;  %v6690_v15 = vpop.f32.mrb[81].mxu0  ;;  %v6741_v34 = vpop.f32.mrb[81].mxu1 }
 0x564   : > { %v6883_v44 = vadd.f32 %v6690_v15, %v19750_v31  ;;  %v6885_v29 = vadd.f32 %v6741_v34, %v19751_v11  ;;  %v6692_v49 = vpop.f32.mrb[82].mxu0  ;;  %v6743_v62 = vpop.f32.mrb[82].mxu1  ;;  %v17297_v15 = vld [vmem:[#allocation12 + $0x40] sm:$0xff] }
 0x565   : > { %v6949_v39 = vadd.f32 %v18737_v4, %v6882_v24  ;;  %v6951_v18 = vadd.f32 %v18741_v47, %v6884_v2  ;;  %v6890_v0 = vadd.f32 %v6692_v49, %v19748_v23  ;;  %v6892_v40 = vadd.f32 %v6743_v62, %v19749_v61  ;;  %v6694_v12 = vpop.f32.mrb[83].mxu0  ;;  %v6745_v6 = vpop.f32.mrb[83].mxu1 }
 0x566   : > { %v6950_v42 = vadd.f32 %v18745_v14, %v6883_v44  ;;  %v6952_v50 = vadd.f32 %v18749_v21, %v6885_v29  ;;  %v6891_v55 = vadd.f32 %v6694_v12, %v19750_v31  ;;  %v6893_v9 = vadd.f32 %v6745_v6, %v19751_v11  ;;  %v17298_v44 = vld [vmem:[#allocation12 + $0x50] sm:$0xff]  ;;  %v17300_v12 = vld [vmem:[#allocation12 + $0x58] sm:$0xff] }
 0x567   : > { %v6973_v41 = vmax.f32 %v6949_v39, 0.0  ;;  %v6975_v56 = vmax.f32 %v6951_v18, 0.0  ;;  %v6957_v30 = vadd.f32 %v18737_v4, %v6890_v0  ;;  %v6959_v38 = vadd.f32 %v18741_v47, %v6892_v40  ;;  %v17299_v0 = vld [vmem:[#allocation12 + $0x48] sm:$0xff] }
 0x568   : > { %v6974_v10 = vmax.f32 %v6950_v42, 0.0  ;;  %v6976_v1 = vmax.f32 %v6952_v50, 0.0  ;;  %v6958_v32 = vadd.f32 %v18745_v14, %v6891_v55  ;;  %v6960_v51 = vadd.f32 %v18749_v21, %v6893_v9 }
 0x569   : > { %v18767_v33 = vmul.f32 %v17293_v52, %v6973_v41  ;;  %v18769_v7 = vmul.f32 %v17294_v26, %v6975_v56  ;;  %v6981_v27 = vmax.f32 %v6957_v30, 0.0  ;;  %v6983_v16 = vmax.f32 %v6959_v38, 0.0  ;;  %v7046_v30 = vld [vmem:[#allocation3 + $0x8] sm:$0x80] }
 0x56a   : > { %v6998_v63 = vmul.f32 %v17295_v54, %v6974_v10  ;;  %v18771_v48 = vmul.f32 %v17296_v13, %v6976_v1  ;;  %v6982_v45 = vmax.f32 %v6958_v32, 0.0  ;;  %v6984_v59 = vmax.f32 %v6960_v51, 0.0  ;;  %v6698_v24 = vpop.f32.mrb[104].mxu0  ;;  %v6749_v2 = vpop.f32.mrb[104].mxu1  ;;  %v16943_v1 = vld [vmem:[#allocation15 + $0x300] sm:$0xff]   ;;  %v16946_v54 = vld [vmem:[#allocation15 + $0x3c8] sm:$0xff]  }
 0x56b   : > { %7021 = vst [vmem:[#allocation3 + $0x40] sm:$0xff] %v18767_v33  ;;  %7023 = vst [vmem:[#allocation3 + $0x50] sm:$0xff] %v18769_v7  ;;  %v18775_v34 = vmul.f32 %v17297_v15, %v6981_v27  ;;  %v18777_v29 = vmul.f32 %v17298_v44, %v6983_v16  ;;  %v6874_v49 = vadd.f32 %v6698_v24, %v18714_v43  ;;  %v6700_v39 = vpop.f32.mrb[105].mxu0  ;;  %v6751_v18 = vpop.f32.mrb[105].mxu1  ;;  %v16944_v32 = vld [vmem:[#allocation15 + $0x380] sm:$0xff]   ;;  %v16945_v16 = vld [vmem:[#allocation15 + $0x348] sm:$0xff]  }
 0x56c   : > { %v6876_v62 = vadd.f32 %v6749_v2, %v18716_v53  ;;  %7022 = vst [vmem:[#allocation3 + $0x48] sm:$0xff] %v6998_v63  ;;  %7024 = vst [vmem:[#allocation3 + $0x58] sm:$0xff] %v18771_v48  ;;  %v18782_v40 = vmul.f32 %v17299_v0, %v6982_v45  ;;  %v18784_v6 = vmul.f32 %v17300_v12, %v6984_v59  ;;  %v6702_v55 = vpop.f32.mrb[106].mxu0  ;;  %v6753_v9 = vpop.f32.mrb[106].mxu1  ;;  %v7048_v24 = vld [vmem:[#allocation3 + $0x18] sm:$0x80] }
 0x56d   : > { %v6875_v42 = vadd.f32 %v6700_v39, %v18719_v58  ;;  %v6877_v50 = vadd.f32 %v6751_v18, %v18722_v35  ;;  %7029 = vst [vmem:[#allocation3 + $0x80] sm:$0xff] %v18775_v34  ;;  %7031 = vst [vmem:[#allocation3 + $0x90] sm:$0xff] %v18777_v29  ;;  %v6898_v43 = vadd.f32 %v6874_v49, %v19748_v23  ;;  %v6703_v41 = vpop.f32.mrb[107].mxu0  ;;  %v6754_v56 = vpop.f32.mrb[107].mxu1  ;;  %v16947_v44 = vld [vmem:[#allocation15 + $0x308] sm:$0xff]   ;;  %v17301_v39 = vld [vmem:[#allocation12 + $0x80] sm:$0xff] }
 0x56e   : > { %v6900_v53 = vadd.f32 %v6876_v62, %v19749_v61  ;;  %7030 = vst [vmem:[#allocation3 + $0x88] sm:$0xff] %v18782_v40  ;;  %7032 = vst [vmem:[#allocation3 + $0x98] sm:$0xff] %v18784_v6  ;;  %v7102_v38 = vpack.c.bf16 %v18782_v40, %v6998_v63  ;;  %v7104_v10 = vpack.c.bf16 %v18784_v6, %v18771_v48  ;;  %v16948_v49 = vld [vmem:[#allocation15 + $0x388] sm:$0xff]   ;;  %v7045_v62 = vld [vmem:[#allocation3] sm:$0x80] }
 0x56f   : > { %v6899_v58 = vadd.f32 %v6875_v42, %v19750_v31  ;;  %v6901_v35 = vadd.f32 %v6877_v50, %v19751_v11  ;;  %v6965_v51 = vadd.f32 %v18737_v4, %v6898_v43  ;;  %v7101_v26 = vpack.c.bf16 %v18775_v34, %v18767_v33  ;;  %v16950_v12 = vld [vmem:[#allocation15 + $0x3d0] sm:$0xff]   ;;  %v17303_v50 = vld [vmem:[#allocation12 + $0x88] sm:$0xff]  ;;  %v17304_v9 = vld [vmem:[#allocation12 + $0x98] sm:$0xff] }
 0x570   : > { %v6967_v52 = vadd.f32 %v18741_v47, %v6900_v53  ;;  %v7103_v27 = vpack.c.bf16 %v18777_v29, %v18769_v7  ;;  %v7078_v59 = vpack.c.bf16 %v6998_v63, %v7046_v30  ;;  %7837 = vmatprep.mubr.bf16.mxu0 %v7102_v38  ;;  %7885 = vmatprep.mubr.bf16.mxu1 %v7104_v10  ;;  %v16949_v63 = vld [vmem:[#allocation15 + $0x350] sm:$0xff]   ;;  %v16971_v61 = vld [vmem:[#allocation15 + $0x338] sm:$0xff]  }
 0x571   : > { %v6966_v13 = vadd.f32 %v18745_v14, %v6899_v58  ;;  %v6968_v45 = vadd.f32 %v18749_v21, %v6901_v35  ;;  %v6989_v2 = vmax.f32 %v6965_v51, 0.0  ;;  %7838 = vmatmul.mubr.bf16.vlgmr.msra.gmra.mrb[112].mxu0 %v7101_v26  ;;  %v17302_v14 = vld [vmem:[#allocation12 + $0x90] sm:$0xff]  ;;  %v7080_v21 = vpack.c.bf16 %v18771_v48, %v7048_v24  ;;  %v16954_v51 = vld [vmem:[#allocation15 + $0x3d8] sm:$0xff]   ;;  %v19752_v24 = vld [vmem:[#allocation35_spill] sm:$0xff] }
 0x572   : > { %v6991_v4 = vmax.f32 %v6967_v52, 0.0  ;;  %7886 = vmatmul.mubr.bf16.vlgmr.msra.gmra.mrb[112].mxu1 %v7103_v27  ;;  %15886 = vmatpush3.bf16.msra.mxu0 %v16943_v1  ;;  %v7047_v42 = vld [vmem:[#allocation3 + $0x10] sm:$0x80]  ;;  %v8015_v53 = vshrl.u32 %v7078_v59, 16  ;;  %v8018_v41 = vshll.u32 %v7078_v59, 16  ;;  %v7077_v56 = vpack.c.bf16 %v18767_v33, %v7045_v62  ;;  %v16958_v62 = vld [vmem:[#allocation15 + $0x3e0] sm:$0xff]  }
 0x573   : > { %v6990_v47 = vmax.f32 %v6966_v13, 0.0  ;;  %v6992_v15 = vmax.f32 %v6968_v45, 0.0  ;;  %15914 = vmatpush3.bf16.msra.mxu1 %v16944_v32  ;;  %v7013_v18 = vmul.f32 %v17301_v39, %v6989_v2  ;;  %15887 = vmatprep.subr.bf16.mxu0 %v16945_v16  ;;  %v16951_v58 = vld [vmem:[#allocation15 + $0x310] sm:$0xff]   ;;  %v7079_v38 = vpack.c.bf16 %v18769_v7, %v7047_v42  ;;  %v16953_v32 = vld [vmem:[#allocation15 + $0x358] sm:$0xff]  }
 0x574   : > { %v7015_v0 = vmul.f32 %v17302_v14, %v6991_v4  ;;  %15915 = vmatprep.subr.bf16.mxu1 %v16946_v54  ;;  %v16952_v35 = vld [vmem:[#allocation15 + $0x390] sm:$0xff]   ;;  %v18810_v52 = vrot.slane %v8015_v53, 3  ;;  %v18812_v33 = vrot.slane %v8018_v41, 4  ;;  %v8049_v26 = vshrl.u32 %v7080_v21, 16  ;;  %v16955_v7 = vld [vmem:[#allocation15 + $0x318] sm:$0xff]   ;;  %v19753_v4 = vld [vmem:[#allocation36_spill] sm:$0xff] }
 0x575   : > { %v7014_v55 = vmul.f32 %v17303_v50, %v6990_v47  ;;  %v7016_v43 = vmul.f32 %v17304_v9, %v6992_v15  ;;  %7037 = vst [vmem:[#allocation3 + $0xc0] sm:$0xff] %v7013_v18  ;;  %v7109_v10 = vpack.c.bf16 %v7013_v18, %v7013_v18  ;;  %v8052_v27 = vshll.u32 %v7080_v21, 16  ;;  %v16956_v13 = vld [vmem:[#allocation15 + $0x398] sm:$0xff]   ;;  %v19754_v15 = vld [vmem:[#allocation37_spill] sm:$0xff] }
 0x576   : > { %7039 = vst [vmem:[#allocation3 + $0xd0] sm:$0xff] %v7015_v0  ;;  %15888 = vmatpush3.bf16.msra.mxu0 %v16947_v44  ;;  %v7111_v1 = vpack.c.bf16 %v7015_v0, %v7015_v0  ;;  %v7998_v16 = vshrl.u32 %v7077_v56, 16  ;;  %v8001_v54 = vshll.u32 %v7077_v56, 16  ;;  %v8032_v45 = vshrl.u32 %v7079_v38, 16  ;;  %v19755_v39 = vld [vmem:[#allocation38_spill] sm:$0xff]  ;;  %v16959_v56 = vld [vmem:[#allocation15 + $0x320] sm:$0xff]  }
 0x577   : > { %7038 = vst [vmem:[#allocation3 + $0xc8] sm:$0xff] %v7014_v55  ;;  %7040 = vst [vmem:[#allocation3 + $0xd8] sm:$0xff] %v7016_v43  ;;  %15916 = vmatpush3.bf16.msra.mxu1 %v16948_v49  ;;  %v7110_v48 = vpack.c.bf16 %v7014_v55, %v7014_v55  ;;  %v7112_v30 = vpack.c.bf16 %v7016_v43, %v7016_v43  ;;  %15889 = vmatprep.subr.bf16.mxu0 %v16949_v63  ;;  %v8035_v59 = vshll.u32 %v7079_v38, 16  ;;  %v16957_v49 = vld [vmem:[#allocation15 + $0x360] sm:$0xff]  }
 0x578   : > { %15917 = vmatprep.subr.bf16.mxu1 %v16950_v12  ;;  %v18816_v2 = vrot.slane %v18733_v19, %v19752_v24  ;;  %v18820_v47 = vrot.slane %v18733_v19, %v19753_v4  ;;  %v18824_v44 = vrot.slane %v18733_v19, %v19754_v15  ;;  %v18828_v18 = vrot.slane %v18733_v19, %v19755_v39 }
 0x579   : > { %7845 = vmatprep.mubr.bf16.mxu0 %v7110_v48  ;;  %7893 = vmatprep.mubr.bf16.mxu1 %v7112_v30  ;;  %v18832_v0 = vrot.slane %v8049_v26, 3  ;;  %v18834_v21 = vrot.slane %v8052_v27, 4  ;;  %v18837_v9 = vrot.slane %v7998_v16, 3  ;;  %v18839_v43 = vrot.slane %v8001_v54, 4  ;;  %v16960_v48 = vld [vmem:[#allocation15 + $0x3a0] sm:$0xff]   ;;  %v16966_v26 = vld [vmem:[#allocation15 + $0x3f0] sm:$0xff]  }
 0x57a   : > { %7846 = vmatmul.mubr.bf16.gmra.mrb[116].mxu0 %v7109_v10  ;;  %7894 = vmatmul.mubr.bf16.gmra.mrb[116].mxu1 %v7111_v1  ;;  %v18844_v30 = vrot.slane %v8032_v45, 3  ;;  %v16963_v45 = vld [vmem:[#allocation15 + $0x328] sm:$0xff]  }
 0x57b   : > { %15890 = vmatpush3.bf16.msra.mxu0 %v16951_v58  ;;  %15918 = vmatpush3.bf16.msra.mxu1 %v16952_v35  ;;  %v18846_v58 = vrot.slane %v8035_v59, 4  ;;  %v16962_v35 = vld [vmem:[#allocation15 + $0x3e8] sm:$0xff]  }
 0x57c   : > { %15891 = vmatprep.subr.bf16.mxu0 %v16953_v32  ;;  %15919 = vmatprep.subr.bf16.mxu1 %v16954_v51  ;;  %v7069_v63 = vld [vmem:[#allocation3 + $0xc0] sm:$0x7f] }
 0x57d   : > { %v7071_v12 = vld [vmem:[#allocation3 + $0xd0] sm:$0x7f]  ;;  %v7085_v55 = vpack.c.bf16 %v7069_v63, %v18775_v34  ;;  %v16961_v34 = vld [vmem:[#allocation15 + $0x368] sm:$0xff]  }
 0x57e   : > { %v7070_v42 = vld [vmem:[#allocation3 + $0xc8] sm:$0x7f]  ;;  %v7072_v50 = vld [vmem:[#allocation3 + $0xd8] sm:$0x7f]  ;;  %v7087_v19 = vpack.c.bf16 %v7071_v12, %v18777_v29  ;;  %v19756_v12 = vld [vmem:[#allocation39_spill] sm:$0xff] }
 0x57f   : > { %v7086_v53 = vpack.c.bf16 %v7070_v42, %v18782_v40  ;;  %v7088_v41 = vpack.c.bf16 %v7072_v50, %v18784_v6  ;;  %15892 = vmatpush3.bf16.msra.mxu0 %v16955_v7  ;;  %15920 = vmatpush3.bf16.msra.mxu1 %v16956_v13  ;;  %v8006_v38 = vshrl.u32 %v7085_v55, 16  ;;  %v8009_v10 = vshll.u32 %v7085_v55, 16  ;;  %v19757_v50 = vld [vmem:[#allocation40_spill] sm:$0xff] }
 0x580   : > { %15893 = vmatprep.subr.bf16.mxu0 %v16957_v49  ;;  %15921 = vmatprep.subr.bf16.mxu1 %v16958_v62  ;;  %v8040_v1 = vshrl.u32 %v7087_v19, 16  ;;  %v8043_v29 = vshll.u32 %v7087_v19, 16 }
 0x581   : > { %v8023_v32 = vshrl.u32 %v7086_v53, 16  ;;  %v8026_v40 = vshll.u32 %v7086_v53, 16  ;;  %v8057_v51 = vshrl.u32 %v7088_v41, 16  ;;  %v8060_v6 = vshll.u32 %v7088_v41, 16  ;;  %v16964_v41 = vld [vmem:[#allocation15 + $0x3a8] sm:$0xff]  }
 0x582   : > { %v8008_v16 = vrot.slane %v8006_v38, 3  ;;  %v8011_v54 = vrot.slane %v8009_v10, 4  ;;  %v6790_v7 = vpop.f32.mrb[88].mxu0  ;;  %v6841_v13 = vpop.f32.mrb[88].mxu1  ;;  %v18856_v62 = vrot.slane %v8040_v1, 3  ;;  %v18858_v63 = vrot.slane %v8043_v29, 4 }
 0x583   : > { %15894 = vmatpush3.bf16.msra.mxu0 %v16959_v56  ;;  %15922 = vmatpush3.bf16.msra.mxu1 %v16960_v48  ;;  %v18852_v59 = vrot.slane %v8023_v32, 3  ;;  %v6886_v42 = vadd.f32 %v6790_v7, %v19756_v12  ;;  %v6888_v55 = vadd.f32 %v6841_v13, %v19757_v50  ;;  %v6792_v19 = vpop.f32.mrb[89].mxu0  ;;  %v6843_v53 = vpop.f32.mrb[89].mxu1  ;;  %v16965_v56 = vld [vmem:[#allocation15 + $0x370] sm:$0xff]   ;;  %v18862_v48 = vrot.slane %v8026_v40, 4  ;;  %v19759_v1 = vld [vmem:[#allocation42_spill] sm:$0xff] }
 0x584   : > { %15895 = vmatprep.subr.bf16.mxu0 %v16961_v34  ;;  %15923 = vmatprep.subr.bf16.mxu1 %v16962_v35  ;;  %v18864_v38 = vrot.slane %v8057_v51, 3  ;;  %v19758_v10 = vld [vmem:[#allocation41_spill] sm:$0xff]  ;;  %v6889_v49 = vadd.f32 %v6843_v53, %v19759_v1  ;;  %v6794_v29 = vpop.f32.mrb[90].mxu0  ;;  %v6845_v27 = vpop.f32.mrb[90].mxu1  ;;  %v18868_v7 = vrot.slane %v8060_v6, 4  ;;  %v18870_v13 = vor.u32 %v8011_v54, %v8008_v16 }
 0x585   : > { %v6887_v32 = vadd.f32 %v6792_v19, %v19758_v10  ;;  %v6953_v34 = vadd.f32 %v18816_v2, %v6886_v42  ;;  %v6955_v35 = vadd.f32 %v18820_v47, %v6888_v55  ;;  %v6894_v40 = vadd.f32 %v6794_v29, %v19756_v12  ;;  %v6796_v14 = vpop.f32.mrb[91].mxu0  ;;  %v6847_v39 = vpop.f32.mrb[91].mxu1  ;;  %v16967_v16 = vld [vmem:[#allocation15 + $0x330] sm:$0xff]  }
 0x586   : > { %v6896_v51 = vadd.f32 %v6845_v27, %v19757_v50  ;;  %v6956_v53 = vadd.f32 %v18828_v18, %v6889_v49  ;;  %v6895_v15 = vadd.f32 %v6796_v14, %v19758_v10  ;;  %v6897_v6 = vadd.f32 %v6847_v39, %v19759_v1  ;;  %v16968_v27 = vld [vmem:[#allocation15 + $0x3b0] sm:$0xff]   ;;  %v16969_v14 = vld [vmem:[#allocation15 + $0x378] sm:$0xff]   ;;  %v17305_v39 = vld [vmem:[#allocation12 + $0x20] sm:$0xff] }
 0x587   : > { %v6954_v19 = vadd.f32 %v18824_v44, %v6887_v32  ;;  %15896 = vmatpush3.bf16.msra.mxu0 %v16963_v45  ;;  %v6977_v54 = vmax.f32 %v6953_v34, 0.0  ;;  %v6979_v42 = vmax.f32 %v6955_v35, 0.0  ;;  %v6961_v55 = vadd.f32 %v18816_v2, %v6894_v40  ;;  %15924 = vmatpush3.bf16.msra.mxu1 %v16964_v41  ;;  %v17306_v34 = vld [vmem:[#allocation12 + $0x30] sm:$0xff]  ;;  %v17307_v41 = vld [vmem:[#allocation12 + $0x28] sm:$0xff] }
 0x588   : > { %v6963_v29 = vadd.f32 %v18820_v47, %v6896_v51  ;;  %15897 = vmatprep.subr.bf16.mxu0 %v16965_v56  ;;  %v6980_v24 = vmax.f32 %v6956_v53, 0.0  ;;  %v6962_v32 = vadd.f32 %v18824_v44, %v6895_v15  ;;  %v6964_v49 = vadd.f32 %v18828_v18, %v6897_v6  ;;  %15925 = vmatprep.subr.bf16.mxu1 %v16966_v26  ;;  %v16970_v51 = vld [vmem:[#allocation15 + $0x3f8] sm:$0xff]  }
 0x589   : > { %v6978_v4 = vmax.f32 %v6954_v19, 0.0  ;;  %v18884_v45 = vmul.f32 %v17305_v39, %v6977_v54  ;;  %v18886_v35 = vmul.f32 %v17306_v34, %v6979_v42  ;;  %v6985_v40 = vmax.f32 %v6961_v55, 0.0  ;;  %v17308_v19 = vld [vmem:[#allocation12 + $0x38] sm:$0xff]  ;;  %v17309_v54 = vld [vmem:[#allocation12 + $0x60] sm:$0xff]  ;;  %v17310_v55 = vld [vmem:[#allocation12 + $0x70] sm:$0xff] }
 0x58a   : > { %v6987_v11 = vmax.f32 %v6963_v29, 0.0  ;;  %v18890_v53 = vmul.f32 %v17308_v19, %v6980_v24  ;;  %v6986_v15 = vmax.f32 %v6962_v32, 0.0  ;;  %v6988_v31 = vmax.f32 %v6964_v49, 0.0  ;;  %v6800_v6 = vpop.f32.mrb[108].mxu0  ;;  %v6851_v26 = vpop.f32.mrb[108].mxu1  ;;  %v16972_v39 = vld [vmem:[#allocation15 + $0x3b8] sm:$0xff]  }
 0x58b   : > { %v18888_v56 = vmul.f32 %v17307_v41, %v6978_v4  ;;  %15898 = vmatpush3.bf16.msra.mxu0 %v16967_v16  ;;  %7025 = vst [vmem:[#allocation3 + $0x60] sm:$0xff] %v18884_v45  ;;  %7027 = vst [vmem:[#allocation3 + $0x70] sm:$0xff] %v18886_v35  ;;  %v18894_v42 = vmul.f32 %v17309_v54, %v6985_v40  ;;  %v6878_v4 = vadd.f32 %v6800_v6, %v18724_v25  ;;  %v6802_v32 = vpop.f32.mrb[109].mxu0  ;;  %v6853_v49 = vpop.f32.mrb[109].mxu1  ;;  %v16973_v16 = vld [vmem:[#allocation15 + $0x40] sm:$0xff]   ;;  %v17311_v34 = vld [vmem:[#allocation12 + $0x68] sm:$0xff] }
 0x58c   : > { %v18896_v29 = vmul.f32 %v17310_v55, %v6987_v11  ;;  %v6880_v24 = vadd.f32 %v6851_v26, %v18726_v17  ;;  %15926 = vmatpush3.bf16.msra.mxu1 %v16968_v27  ;;  %7028 = vst [vmem:[#allocation3 + $0x78] sm:$0xff] %v18890_v53  ;;  %v18902_v41 = vmul.f32 %v17311_v34, %v6986_v15  ;;  %v17312_v40 = vld [vmem:[#allocation12 + $0x78] sm:$0xff]  ;;  %v6804_v17 = vpop.f32.mrb[110].mxu0  ;;  %v6855_v6 = vpop.f32.mrb[110].mxu1  ;;  %v7050_v34 = vld [vmem:[#allocation3 + $0x28] sm:$0x80] }
 0x58d   : > { %7026 = vst [vmem:[#allocation3 + $0x68] sm:$0xff] %v18888_v56  ;;  %v18904_v19 = vmul.f32 %v17312_v40, %v6988_v31  ;;  %v6879_v11 = vadd.f32 %v6802_v32, %v18728_v22  ;;  %v6881_v25 = vadd.f32 %v6853_v49, %v18730_v5  ;;  %15899 = vmatprep.subr.bf16.mxu0 %v16969_v14  ;;  %7033 = vst [vmem:[#allocation3 + $0xa0] sm:$0xff] %v18894_v42  ;;  %v6805_v15 = vpop.f32.mrb[111].mxu0  ;;  %v6856_v54 = vpop.f32.mrb[111].mxu1  ;;  %v16974_v31 = vld [vmem:[#allocation15 + $0xc0] sm:$0xff]   ;;  %v16977_v32 = vld [vmem:[#allocation15 + $0x48] sm:$0xff]  }
 0x58e   : > { %7035 = vst [vmem:[#allocation3 + $0xb0] sm:$0xff] %v18896_v29  ;;  %v6902_v27 = vadd.f32 %v6878_v4, %v19756_v12  ;;  %v6904_v26 = vadd.f32 %v6880_v24, %v19757_v50  ;;  %15927 = vmatprep.subr.bf16.mxu1 %v16970_v51  ;;  %v18914_v22 = vor.u32 %v18862_v48, %v18852_v59  ;;  %7034 = vst [vmem:[#allocation3 + $0xa8] sm:$0xff] %v18902_v41  ;;  %v16975_v48 = vld [vmem:[#allocation15] sm:$0xff]   ;;  %v17314_v15 = vld [vmem:[#allocation12 + $0xb0] sm:$0xff] }
 0x58f   : > { %v18918_v5 = vor.u32 %v18868_v7, %v18864_v38  ;;  %7036 = vst [vmem:[#allocation3 + $0xb8] sm:$0xff] %v18904_v19  ;;  %v6903_v14 = vadd.f32 %v6879_v11, %v19758_v10  ;;  %v6905_v55 = vadd.f32 %v6881_v25, %v19759_v1  ;;  %15900 = vmatpush3.bf16.msra.mxu0 %v16971_v61  ;;  %v16976_v24 = vld [vmem:[#allocation15 + $0x80] sm:$0xff]  }
 0x590   : > { %v7106_v51 = vpack.c.bf16 %v18902_v41, %v18888_v56  ;;  %v7108_v59 = vpack.c.bf16 %v18904_v19, %v18890_v53  ;;  %v6969_v4 = vadd.f32 %v18816_v2, %v6902_v27  ;;  %v6971_v38 = vadd.f32 %v18820_v47, %v6904_v26  ;;  %15928 = vmatpush3.bf16.msra.mxu1 %v16972_v39  ;;  %v16978_v2 = vld [vmem:[#allocation15 + $0xc8] sm:$0xff]   ;;  %v7052_v39 = vld [vmem:[#allocation3 + $0x38] sm:$0x80] }
 0x591   : > { %15941 = vmatprep.subr.bf16.mxu0 %v16973_v16  ;;  %v7105_v7 = vpack.c.bf16 %v18894_v42, %v18884_v45  ;;  %v6970_v61 = vadd.f32 %v18824_v44, %v6903_v14  ;;  %v6972_v49 = vadd.f32 %v18828_v18, %v6905_v55  ;;  %v7107_v40 = vpack.c.bf16 %v18896_v29, %v18886_v35  ;;  %v16979_v27 = vld [vmem:[#allocation15 + $0x8] sm:$0xff]   ;;  %v16981_v55 = vld [vmem:[#allocation15 + $0x50] sm:$0xff]  }
 0x592   : > { %7933 = vmatprep.mubr.bf16.mxu0 %v7106_v51  ;;  %7981 = vmatprep.mubr.bf16.mxu1 %v7108_v59  ;;  %v6993_v11 = vmax.f32 %v6969_v4, 0.0  ;;  %v6995_v47 = vmax.f32 %v6971_v38, 0.0  ;;  %v19760_v16 = vor.u32 %v18812_v33, %v18810_v52  ;;  %v19761_v18 = vor.u32 %v18834_v21, %v18832_v0  ;;  %v17313_v0 = vld [vmem:[#allocation12 + $0xa0] sm:$0xff]  ;;  %v16980_v14 = vld [vmem:[#allocation15 + $0x88] sm:$0xff]   ;;  %v16982_v38 = vld [vmem:[#allocation15 + $0xd0] sm:$0xff]  }
 0x593   : > { %15969 = vmatprep.subr.bf16.mxu1 %v16974_v31  ;;  %7934 = vmatmul.mubr.bf16.vlgmr.msra.gmra.mrb[120].mxu0 %v7105_v7  ;;  %v6994_v17 = vmax.f32 %v6970_v61, 0.0  ;;  %v6996_v6 = vmax.f32 %v6972_v49, 0.0  ;;  %v19762_v26 = vor.u32 %v18839_v43, %v18837_v9  ;;  %v18957_v33 = vor.u32 %v18858_v63, %v18856_v62  ;;  %v7049_v51 = vld [vmem:[#allocation3 + $0x20] sm:$0x80]  ;;  %v17315_v59 = vld [vmem:[#allocation12 + $0xa8] sm:$0xff]  ;;  %v17316_v43 = vld [vmem:[#allocation12 + $0xb8] sm:$0xff] }
 0x594   : > { %v8030_v44 = vsel %vm3451_vm0, %v19760_v16, %v18914_v22  ;;  %v18946_v25 = vsel %vm3451_vm0, %v19761_v18, %v18918_v5  ;;  %7982 = vmatmul.mubr.bf16.vlgmr.msra.gmra.mrb[120].mxu1 %v7107_v40  ;;  %15942 = vmatpush3.bf16.msra.mxu0 %v16975_v48  ;;  %v7017_v21 = vmul.f32 %v17313_v0, %v6993_v11  ;;  %v16984_v49 = vld [vmem:[#allocation15 + $0x90] sm:$0xff]   ;;  %v16986_v16 = vld [vmem:[#allocation15 + $0xd8] sm:$0xff]   ;;  %v16989_v0 = vld [vmem:[#allocation15 + $0x60] sm:$0xff]  }
 0x595   : > { %v18953_v52 = vsel %vm3451_vm0, %v19762_v26, %v18870_v13  ;;  %v7019_v54 = vmul.f32 %v17314_v15, %v6995_v47  ;;  %v7082_v31 = vpack.c.bf16 %v18888_v56, %v7050_v34  ;;  %15970 = vmatpush3.bf16.msra.mxu1 %v16976_v24  ;;  %15943 = vmatprep.subr.bf16.mxu0 %v16977_v32  ;;  %v7051_v56 = vld [vmem:[#allocation3 + $0x30] sm:$0x80]  ;;  %v16988_v26 = vld [vmem:[#allocation15 + $0x98] sm:$0xff]  }
 0x596   : > { %v7018_v9 = vmul.f32 %v17315_v59, %v6994_v17  ;;  %v7020_v48 = vmul.f32 %v17316_v43, %v6996_v6  ;;  %v7084_v4 = vpack.c.bf16 %v18890_v53, %v7052_v39  ;;  %15971 = vmatprep.subr.bf16.mxu1 %v16978_v2  ;;  %v19763_v62 = vor.u32 %v18846_v58, %v18844_v30  ;;  %v16983_v32 = vld [vmem:[#allocation15 + $0x10] sm:$0xff]   ;;  %v16985_v2 = vld [vmem:[#allocation15 + $0x58] sm:$0xff]  }
 0x597   : > { %7041 = vst [vmem:[#allocation3 + $0xe0] sm:$0xff] %v7017_v21  ;;  %7043 = vst [vmem:[#allocation3 + $0xf0] sm:$0xff] %v7019_v54  ;;  %v7081_v53 = vpack.c.bf16 %v18884_v45, %v7049_v51  ;;  %v7113_v61 = vpack.c.bf16 %v7017_v21, %v7017_v21  ;;  %v8083_v30 = vshrl.u32 %v7082_v31, 16  ;;  %v8086_v58 = vshll.u32 %v7082_v31, 16  ;;  %v16987_v17 = vld [vmem:[#allocation15 + $0x18] sm:$0xff]   ;;  %v16990_v21 = vld [vmem:[#allocation15 + $0xe0] sm:$0xff]  }
 0x598   : > { %v18966_v63 = vsel %vm3451_vm0, %v19763_v62, %v18957_v33  ;;  %7042 = vst [vmem:[#allocation3 + $0xe8] sm:$0xff] %v7018_v9  ;;  %7044 = vst [vmem:[#allocation3 + $0xf8] sm:$0xff] %v7020_v48  ;;  %15944 = vmatpush3.bf16.msra.mxu0 %v16979_v27  ;;  %v7114_v7 = vpack.c.bf16 %v7018_v9, %v7018_v9  ;;  %v7116_v24 = vpack.c.bf16 %v7020_v48, %v7020_v48 }
 0x599   : > { %15972 = vmatpush3.bf16.msra.mxu1 %v16980_v14  ;;  %15945 = vmatprep.subr.bf16.mxu0 %v16981_v55  ;;  %v7083_v34 = vpack.c.bf16 %v18886_v35, %v7051_v56  ;;  %v7115_v40 = vpack.c.bf16 %v7019_v54, %v7019_v54  ;;  %v8117_v11 = vshrl.u32 %v7084_v4, 16  ;;  %v8066_v47 = vshrl.u32 %v7081_v53, 16 }
 0x59a   : > { %7941 = vmatprep.mubr.bf16.mxu0 %v7114_v7  ;;  %7989 = vmatprep.mubr.bf16.mxu1 %v7116_v24  ;;  %v8069_v39 = vshll.u32 %v7081_v53, 16  ;;  %v8120_v18 = vshll.u32 %v7084_v4, 16  ;;  %v18974_v15 = vrot.slane %v8083_v30, 3  ;;  %v8088_v54 = vrot.slane %v8086_v58, 4  ;;  %v16992_v7 = vld [vmem:[#allocation15 + $0xa0] sm:$0xff]   ;;  %v16993_v24 = vld [vmem:[#allocation15 + $0x68] sm:$0xff]  }
 0x59b   : > { %15973 = vmatprep.subr.bf16.mxu1 %v16982_v38  ;;  %7942 = vmatmul.mubr.bf16.gmra.mrb[124].mxu0 %v7113_v61  ;;  %v8100_v45 = vshrl.u32 %v7083_v34, 16  ;;  %v18970_v6 = vrot.slane %v8066_v47, 3  ;;  %v8103_v35 = vshll.u32 %v7083_v34, 16  ;;  %v8119_v31 = vrot.slane %v8117_v11, 3  ;;  %v16995_v11 = vld [vmem:[#allocation15 + $0x28] sm:$0xff]  }
 0x59c   : > { %7990 = vmatmul.mubr.bf16.gmra.mrb[124].mxu1 %v7115_v40  ;;  %15946 = vmatpush3.bf16.msra.mxu0 %v16983_v32  ;;  %v18972_v27 = vrot.slane %v8069_v39, 4  ;;  %v8122_v9 = vrot.slane %v8120_v18, 4 }
 0x59d   : > { %15974 = vmatpush3.bf16.msra.mxu1 %v16984_v49  ;;  %8565 = vmatprep.mubr.bf16.mxu0 %v8030_v44  ;;  %v8102_v48 = vrot.slane %v8100_v45, 3  ;;  %v8105_v38 = vrot.slane %v8103_v35, 4  ;;  %v16996_v45 = vld [vmem:[#allocation15 + $0xa8] sm:$0xff]  }
 0x59e   : > { %8613 = vmatprep.mubr.bf16.mxu1 %v18946_v25  ;;  %15947 = vmatprep.subr.bf16.mxu0 %v16985_v2  ;;  %v7073_v14 = vld [vmem:[#allocation3 + $0xe0] sm:$0x7f]  ;;  %v7075_v55 = vld [vmem:[#allocation3 + $0xf0] sm:$0x7f]  ;;  %v8072_v56 = vor.u32 %v18972_v27, %v18970_v6 }
 0x59f   : > { %v7074_v51 = vld [vmem:[#allocation3 + $0xe8] sm:$0x7f]  ;;  %v7076_v59 = vld [vmem:[#allocation3 + $0xf8] sm:$0x7f]  ;;  %15975 = vmatprep.subr.bf16.mxu1 %v16986_v16  ;;  %v7089_v43 = vpack.c.bf16 %v7073_v14, %v18894_v42  ;;  %v7091_v44 = vpack.c.bf16 %v7075_v55, %v18896_v29  ;;  %v16991_v25 = vld [vmem:[#allocation15 + $0x20] sm:$0xff]   ;;  %v8106_v27 = vor.u32 %v8105_v38, %v8102_v48  ;;  %v8123_v14 = vor.u32 %v8122_v9, %v8119_v31 }
 0x5a0   : > { %v7090_v4 = vpack.c.bf16 %v7074_v51, %v18902_v41  ;;  %v7092_v62 = vpack.c.bf16 %v7076_v59, %v18904_v19  ;;  %15948 = vmatpush3.bf16.msra.mxu0 %v16987_v17  ;;  %v16994_v29 = vld [vmem:[#allocation15 + $0xe8] sm:$0xff]   ;;  %v16997_v17 = vld [vmem:[#allocation15 + $0x70] sm:$0xff]   ;;  %v17001_v31 = vld [vmem:[#allocation15 + $0x78] sm:$0xff]  }
 0x5a1   : > { %15976 = vmatpush3.bf16.msra.mxu1 %v16988_v26  ;;  %15949 = vmatprep.subr.bf16.mxu0 %v16989_v0  ;;  %v8074_v32 = vshrl.u32 %v7089_v43, 16  ;;  %v8077_v53 = vshll.u32 %v7089_v43, 16  ;;  %v8108_v42 = vshrl.u32 %v7091_v44, 16  ;;  %v8111_v61 = vshll.u32 %v7091_v44, 16  ;;  %v16998_v26 = vld [vmem:[#allocation15 + $0xf0] sm:$0xff]   ;;  %v17002_v9 = vld [vmem:[#allocation15 + $0xf8] sm:$0xff]  }
 0x5a2   : > { %15977 = vmatprep.subr.bf16.mxu1 %v16990_v21  ;;  %v8091_v49 = vshrl.u32 %v7090_v4, 16  ;;  %v8094_v41 = vshll.u32 %v7090_v4, 16  ;;  %v8125_v30 = vshrl.u32 %v7092_v62, 16  ;;  %v8128_v19 = vshll.u32 %v7092_v62, 16  ;;  %v16999_v43 = vld [vmem:[#allocation15 + $0x30] sm:$0xff]   ;;  %v17003_v48 = vld [vmem:[#allocation15 + $0x38] sm:$0xff]  }
 0x5a3   : > { %v8076_v58 = vrot.slane %v8074_v32, 3  ;;  %v8079_v34 = vrot.slane %v8077_v53, 4  ;;  %v8110_v40 = vrot.slane %v8108_v42, 3  ;;  %v8113_v2 = vrot.slane %v8111_v61, 4  ;;  %v17004_v4 = vld [vmem:[#allocation15 + $0xb8] sm:$0xff]   ;;  %v17005_v62 = vld [vmem:[#allocation15 + $0x140] sm:$0xff]  }
 0x5a4   : > { %15950 = vmatpush3.bf16.msra.mxu0 %v16991_v25  ;;  %v8093_v47 = vrot.slane %v8091_v49, 3  ;;  %v8096_v39 = vrot.slane %v8094_v41, 4  ;;  %v8127_v16 = vrot.slane %v8125_v30, 3  ;;  %v8130_v18 = vrot.slane %v8128_v19, 4  ;;  %v17006_v25 = vld [vmem:[#allocation15 + $0x1c0] sm:$0xff]   ;;  %v17011_v32 = vld [vmem:[#allocation15 + $0x108] sm:$0xff]  }
 0x5a5   : > { %15978 = vmatpush3.bf16.msra.mxu1 %v16992_v7  ;;  %15951 = vmatprep.subr.bf16.mxu0 %v16993_v24  ;;  %v18983_v6 = vor.u32 %v8079_v34, %v8076_v58  ;;  %v18985_v35 = vor.u32 %v8113_v2, %v8110_v40  ;;  %v8089_v0 = vor.u32 %v8088_v54, %v18974_v15  ;;  %v17000_v54 = vld [vmem:[#allocation15 + $0xb0] sm:$0xff]   ;;  %v17008_v38 = vld [vmem:[#allocation15 + $0x180] sm:$0xff]   ;;  %v17009_v7 = vld [vmem:[#allocation15 + $0x148] sm:$0xff]  }
 0x5a6   : > { %15979 = vmatprep.subr.bf16.mxu1 %v16994_v29  ;;  %v18988_v21 = vor.u32 %v8096_v39, %v8093_v47  ;;  %v18990_v55 = vor.u32 %v8130_v18, %v8127_v16  ;;  %v17010_v24 = vld [vmem:[#allocation15 + $0x1c8] sm:$0xff]   ;;  %v17013_v42 = vld [vmem:[#allocation15 + $0x150] sm:$0xff]   ;;  %v17017_v49 = vld [vmem:[#allocation15 + $0x158] sm:$0xff]  }
 0x5a7   : > { %v18994_v51 = vsel %vm3451_vm0, %v8072_v56, %v18983_v6  ;;  %v18998_v59 = vsel %vm3451_vm0, %v8106_v27, %v18985_v35  ;;  %v17007_v56 = vld [vmem:[#allocation15 + $0x100] sm:$0xff]   ;;  %v17012_v53 = vld [vmem:[#allocation15 + $0x188] sm:$0xff]   ;;  %v17014_v61 = vld [vmem:[#allocation15 + $0x1d0] sm:$0xff]  }
 0x5a8   : > { %15952 = vmatpush3.bf16.msra.mxu0 %v16995_v11  ;;  %v8098_v44 = vsel %vm3451_vm0, %v8089_v0, %v18988_v21  ;;  %v8132_v15 = vsel %vm3451_vm0, %v8123_v14, %v18990_v55  ;;  %v17015_v29 = vld [vmem:[#allocation15 + $0x110] sm:$0xff]   ;;  %v17021_v41 = vld [vmem:[#allocation15 + $0x160] sm:$0xff]   ;;  %v17026_v34 = vld [vmem:[#allocation15 + $0x1e8] sm:$0xff]  }
 0x5a9   : > { %15980 = vmatpush3.bf16.msra.mxu1 %v16996_v45  ;;  %15953 = vmatprep.subr.bf16.mxu0 %v16997_v17  ;;  %v17022_v30 = vld [vmem:[#allocation15 + $0x1e0] sm:$0xff]   ;;  %v17028_v40 = vld [vmem:[#allocation15 + $0x1a8] sm:$0xff]   ;;  %v17029_v2 = vld [vmem:[#allocation15 + $0x170] sm:$0xff]  }
 0x5aa   : > { %15981 = vmatprep.subr.bf16.mxu1 %v16998_v26  ;;  %v17023_v19 = vld [vmem:[#allocation15 + $0x120] sm:$0xff]   ;;  %v17030_v11 = vld [vmem:[#allocation15 + $0x1f0] sm:$0xff]   ;;  %v17033_v16 = vld [vmem:[#allocation15 + $0x178] sm:$0xff]  }
 0x5ab   : > { %v17024_v58 = vld [vmem:[#allocation15 + $0x1a0] sm:$0xff]   ;;  %v17031_v47 = vld [vmem:[#allocation15 + $0x130] sm:$0xff]   ;;  %v17034_v18 = vld [vmem:[#allocation15 + $0x1f8] sm:$0xff]  }
 0x5ac   : > { %15954 = vmatpush3.bf16.msra.mxu0 %v16999_v43  ;;  %v17032_v39 = vld [vmem:[#allocation15 + $0x1b0] sm:$0xff]   ;;  %v7126_v45 = vld [vmem:[#allocation3 + $0x88] sm:$0xff]  ;;  %v17035_v27 = vld [vmem:[#allocation15 + $0x138] sm:$0xff]  }
 0x5ad   : > { %15982 = vmatpush3.bf16.msra.mxu1 %v17000_v54  ;;  %15955 = vmatprep.subr.bf16.mxu0 %v17001_v31  ;;  %v7142_v17 = vld [vmem:[#allocation3 + $0x108] sm:$0x1]  ;;  %v7128_v26 = vld [vmem:[#allocation3 + $0x98] sm:$0xff]  ;;  %v7118_v43 = vld [vmem:[#allocation3 + $0x48] sm:$0xfe] }
 0x5ae   : > { %15983 = vmatprep.subr.bf16.mxu1 %v17002_v9  ;;  %v7144_v0 = vld [vmem:[#allocation3 + $0x118] sm:$0x1]  ;;  %v7150_v54 = vpack.c.bf16 %v7126_v45, %v7118_v43  ;;  %v7120_v31 = vld [vmem:[#allocation3 + $0x58] sm:$0xfe]  ;;  %v17058_v45 = vld [vmem:[#allocation15 + $0x4e8] sm:$0xff]  }
 0x5af   : > { %v17036_v14 = vld [vmem:[#allocation15 + $0x1b8] sm:$0xff]   ;;  %v17059_v43 = vld [vmem:[#allocation15 + $0x428] sm:$0xff]  }
 0x5b0   : > { %15956 = vmatpush3.bf16.msra.mxu0 %v17003_v48  ;;  %v7136_v9 = vld [vmem:[#allocation3 + $0xd8] sm:$0xff]  ;;  %v17038_v48 = vld [vmem:[#allocation15 + $0x4c0] sm:$0xff]  }
 0x5b1   : > { %15984 = vmatpush3.bf16.msra.mxu1 %v17004_v4  ;;  %15997 = vmatprep.subr.bf16.mxu0 %v17005_v62  ;;  %v7152_v4 = vpack.c.bf16 %v7128_v26, %v7120_v31  ;;  %v7117_v26 = vld [vmem:[#allocation3 + $0x40] sm:$0xfe]  ;;  %v17060_v31 = vld [vmem:[#allocation15 + $0x4a8] sm:$0xff]  }
 0x5b2   : > { %16025 = vmatprep.subr.bf16.mxu1 %v17006_v25  ;;  %v19012_v25 = vpack.c.bf16 %v7144_v0, %v7136_v9  ;;  %v7133_v0 = vld [vmem:[#allocation3 + $0xc0] sm:$0xff]  ;;  %v17061_v9 = vld [vmem:[#allocation15 + $0x470] sm:$0xff]  }
 0x5b3   : > { %8566 = vmatmul.mubr.bf16.vlgmr.msra.gmra.mrb[128].mxu0 %v18953_v52  ;;  %v17016_v52 = vld [vmem:[#allocation15 + $0x190] sm:$0xff]  }
 0x5b4   : > { %8614 = vmatmul.mubr.bf16.vlgmr.msra.gmra.mrb[128].mxu1 %v18966_v63  ;;  %8573 = vmatprep.mubr.bf16.mxu0 %v18914_v22  ;;  %v17018_v22 = vld [vmem:[#allocation15 + $0x1d8] sm:$0xff]  }
 0x5b5   : > { %8621 = vmatprep.mubr.bf16.mxu1 %v18918_v5  ;;  %15998 = vmatpush3.bf16.msra.mxu0 %v17007_v56  ;;  %v17019_v5 = vld [vmem:[#allocation15 + $0x118] sm:$0xff]   ;;  %v17039_v56 = vld [vmem:[#allocation15 + $0x400] sm:$0xff]  }
 0x5b6   : > { %16026 = vmatpush3.bf16.msra.mxu1 %v17008_v38  ;;  %15999 = vmatprep.subr.bf16.mxu0 %v17009_v7  ;;  %v17020_v63 = vld [vmem:[#allocation15 + $0x198] sm:$0xff]   ;;  %v8868_v38 = vshll.u32 %v7150_v54, 16  ;;  %v17040_v7 = vld [vmem:[#allocation15 + $0x480] sm:$0xff]  }
 0x5b7   : > { %16027 = vmatprep.subr.bf16.mxu1 %v17010_v24  ;;  %v17041_v24 = vld [vmem:[#allocation15 + $0x448] sm:$0xff]  }
 0x5b9   : > { %16000 = vmatpush3.bf16.msra.mxu0 %v17011_v32  ;;  %v8892_v32 = vshll.u32 %v7152_v4, 16 }
 0x5ba   : > { %16028 = vmatpush3.bf16.msra.mxu1 %v17012_v53  ;;  %16001 = vmatprep.subr.bf16.mxu0 %v17013_v42  ;;  %v17042_v53 = vld [vmem:[#allocation15 + $0x4c8] sm:$0xff]  }
 0x5bb   : > { %8574 = vmatmul.mubr.bf16.gmra.mrb[132].mxu0 %v18870_v13  ;;  %16029 = vmatprep.subr.bf16.mxu1 %v17014_v61  ;;  %v17025_v13 = vld [vmem:[#allocation15 + $0x168] sm:$0xff]   ;;  %v8897_v61 = vshll.u32 %v19012_v25, 16 }
 0x5bc   : > { %8622 = vmatmul.mubr.bf16.gmra.mrb[132].mxu1 %v18957_v33  ;;  %8661 = vmatprep.mubr.bf16.mxu0 %v8098_v44  ;;  %v17027_v33 = vld [vmem:[#allocation15 + $0x128] sm:$0xff]  }
 0x5bd   : > { %16002 = vmatpush3.bf16.msra.mxu0 %v17015_v29  ;;  %8709 = vmatprep.mubr.bf16.mxu1 %v8132_v15  ;;  %v7134_v44 = vld [vmem:[#allocation3 + $0xc8] sm:$0xff]  ;;  %v17037_v15 = vld [vmem:[#allocation15 + $0x440] sm:$0xff]  }
 0x5be   : > { %16030 = vmatpush3.bf16.msra.mxu1 %v17016_v52  ;;  %16003 = vmatprep.subr.bf16.mxu0 %v17017_v49  ;;  %v19010_v62 = vpack.c.bf16 %v7142_v17, %v7134_v44  ;;  %v17043_v29 = vld [vmem:[#allocation15 + $0x408] sm:$0xff]   ;;  %v8870_v52 = vrot.slane %v8868_v38, 1  ;;  %v7141_v17 = vld [vmem:[#allocation3 + $0x100] sm:$0x1] }
 0x5bf   : > { %16031 = vmatprep.subr.bf16.mxu1 %v17018_v22  ;;  %v17044_v49 = vld [vmem:[#allocation15 + $0x488] sm:$0xff]   ;;  %v17045_v22 = vld [vmem:[#allocation15 + $0x450] sm:$0xff]  }
 0x5c0   : > { %v8873_v42 = vshll.u32 %v19010_v62, 16 }
 0x5c1   : > { %16004 = vmatpush3.bf16.msra.mxu0 %v17019_v5  ;;  %v8894_v5 = vrot.slane %v8892_v32, 1  ;;  %v17064_v32 = vld [vmem:[#allocation15 + $0x4b0] sm:$0xff]  }
 0x5c2   : > { %16032 = vmatpush3.bf16.msra.mxu1 %v17020_v63  ;;  %16005 = vmatprep.subr.bf16.mxu0 %v17021_v41  ;;  %v8866_v63 = vshrl.u32 %v7150_v54, 16  ;;  %v19020_v41 = vrot.slane %v8873_v42, 1  ;;  %v7135_v54 = vld [vmem:[#allocation3 + $0xd0] sm:$0xff] }
 0x5c3   : > { %16033 = vmatprep.subr.bf16.mxu1 %v17022_v30  ;;  %v19022_v30 = vrot.slane %v8897_v61, 1  ;;  %v17066_v61 = vld [vmem:[#allocation15 + $0x4f8] sm:$0xff]  }
 0x5c5   : > { %16006 = vmatpush3.bf16.msra.mxu0 %v17023_v19  ;;  %v8871_v19 = vor.u32 %v8870_v52, %v8866_v63  ;;  %v7130_v52 = vld [vmem:[#allocation3 + $0xa8] sm:$0xff]  ;;  %v7148_v63 = vld [vmem:[#allocation3 + $0x138] sm:$0x1] }
 0x5c6   : > { %16034 = vmatpush3.bf16.msra.mxu1 %v17024_v58  ;;  %16007 = vmatprep.subr.bf16.mxu0 %v17025_v13  ;;  %v17049_v13 = vld [vmem:[#allocation15 + $0x458] sm:$0xff]  }
 0x5c7   : > { %16035 = vmatprep.subr.bf16.mxu1 %v17026_v34  ;;  %v8876_v34 = vsel %vm4309_vm1, %v8871_v19, %v19020_v41  ;;  %v7122_v19 = vld [vmem:[#allocation3 + $0x68] sm:$0xfe] }
 0x5c9   : > { %16008 = vmatpush3.bf16.msra.mxu0 %v17027_v33  ;;  %v17050_v33 = vld [vmem:[#allocation15 + $0x4d8] sm:$0xff]  }
 0x5ca   : > { %16036 = vmatpush3.bf16.msra.mxu1 %v17028_v40  ;;  %16009 = vmatprep.subr.bf16.mxu0 %v17029_v2  ;;  %v17051_v2 = vld [vmem:[#allocation15 + $0x418] sm:$0xff]  }
 0x5cb   : > { %16037 = vmatprep.subr.bf16.mxu1 %v17030_v11  ;;  %v17052_v11 = vld [vmem:[#allocation15 + $0x498] sm:$0xff]  }
 0x5cd   : > { %16010 = vmatpush3.bf16.msra.mxu0 %v17031_v47  ;;  %v17053_v47 = vld [vmem:[#allocation15 + $0x460] sm:$0xff]  }
 0x5ce   : > { %16038 = vmatpush3.bf16.msra.mxu1 %v17032_v39  ;;  %16011 = vmatprep.subr.bf16.mxu0 %v17033_v16  ;;  %v17055_v39 = vld [vmem:[#allocation15 + $0x420] sm:$0xff]  }
 0x5cf   : > { %16039 = vmatprep.subr.bf16.mxu1 %v17034_v18  ;;  %v17056_v16 = vld [vmem:[#allocation15 + $0x4a0] sm:$0xff]   ;;  %v17057_v18 = vld [vmem:[#allocation15 + $0x468] sm:$0xff]  }
 0x5d1   : > { %16012 = vmatpush3.bf16.msra.mxu0 %v17035_v27  ;;  %v7127_v27 = vld [vmem:[#allocation3 + $0x90] sm:$0xff] }
 0x5d2   : > { %16040 = vmatpush3.bf16.msra.mxu1 %v17036_v14  ;;  %16053 = vmatprep.subr.bf16.mxu0 %v17037_v15  ;;  %v7143_v14 = vld [vmem:[#allocation3 + $0x110] sm:$0x1]  ;;  %v7119_v15 = vld [vmem:[#allocation3 + $0x50] sm:$0xfe] }
 0x5d3   : > { %16081 = vmatprep.subr.bf16.mxu1 %v17038_v48  ;;  %v7151_v48 = vpack.c.bf16 %v7127_v27, %v7119_v15  ;;  %v19032_v38 = vpack.c.bf16 %v7143_v14, %v7135_v54  ;;  %v17072_v15 = vld [vmem:[#allocation15 + $0x580] sm:$0xff]   ;;  %v17073_v54 = vld [vmem:[#allocation15 + $0x548] sm:$0xff]  }
 0x5d4   : > { %8662 = vmatmul.mubr.bf16.vlgmr.msra.gmra.mrb[136].mxu0 %v18994_v51  ;;  %v17046_v51 = vld [vmem:[#allocation15 + $0x4d0] sm:$0xff]  }
 0x5d5   : > { %8710 = vmatmul.mubr.bf16.vlgmr.msra.gmra.mrb[136].mxu1 %v18998_v59  ;;  %8669 = vmatprep.mubr.bf16.mxu0 %v18988_v21  ;;  %v8890_v59 = vshrl.u32 %v7152_v4, 16  ;;  %v17047_v21 = vld [vmem:[#allocation15 + $0x410] sm:$0xff]   ;;  %v8880_v42 = vshll.u32 %v7151_v48, 16 }
 0x5d6   : > { %8717 = vmatprep.mubr.bf16.mxu1 %v18990_v55  ;;  %16054 = vmatpush3.bf16.msra.mxu0 %v17039_v56  ;;  %v17048_v55 = vld [vmem:[#allocation15 + $0x490] sm:$0xff]   ;;  %v19030_v56 = vpack.c.bf16 %v7141_v17, %v7133_v0  ;;  %v17071_v0 = vld [vmem:[#allocation15 + $0x500] sm:$0xff]  }
 0x5d7   : > { %16082 = vmatpush3.bf16.msra.mxu1 %v17040_v7  ;;  %16055 = vmatprep.subr.bf16.mxu0 %v17041_v24  ;;  %v8895_v58 = vor.u32 %v8894_v5, %v8890_v59  ;;  %v17062_v4 = vld [vmem:[#allocation15 + $0x4f0] sm:$0xff]   ;;  %v8885_v5 = vshll.u32 %v19032_v38, 16  ;;  %v17068_v59 = vld [vmem:[#allocation15 + $0x4b8] sm:$0xff]  }
 0x5d8   : > { %16083 = vmatprep.subr.bf16.mxu1 %v17042_v53  ;;  %v17063_v7 = vld [vmem:[#allocation15 + $0x430] sm:$0xff]   ;;  %v17065_v53 = vld [vmem:[#allocation15 + $0x478] sm:$0xff]  }
 0x5d9   : > { %v8900_v40 = vsel %vm4309_vm1, %v8895_v58, %v19022_v30  ;;  %v8882_v58 = vrot.slane %v8880_v42, 1  ;;  %v8949_v42 = vshrl.u32 %v19030_v56, 16 }
 0x5da   : > { %16056 = vmatpush3.bf16.msra.mxu0 %v17043_v29  ;;  %v8861_v29 = vshll.u32 %v19030_v56, 16 }
 0x5db   : > { %16084 = vmatpush3.bf16.msra.mxu1 %v17044_v49  ;;  %16057 = vmatprep.subr.bf16.mxu0 %v17045_v22  ;;  %v7146_v49 = vld [vmem:[#allocation3 + $0x128] sm:$0x1]  ;;  %v17067_v22 = vld [vmem:[#allocation15 + $0x438] sm:$0xff]  }
 0x5dc   : > { %8670 = vmatmul.mubr.bf16.gmra.mrb[140].mxu0 %v18983_v6  ;;  %16085 = vmatprep.subr.bf16.mxu1 %v17046_v51  ;;  %v17054_v6 = vld [vmem:[#allocation15 + $0x4e0] sm:$0xff]   ;;  %v7132_v51 = vld [vmem:[#allocation3 + $0xb8] sm:$0xff] }
 0x5dd   : > { %8718 = vmatmul.mubr.bf16.gmra.mrb[140].mxu1 %v18985_v35  ;;  %9405 = vmatprep.mubr.bf16.mxu0 %v8876_v34  ;;  %v7125_v35 = vld [vmem:[#allocation3 + $0x80] sm:$0xff]  ;;  %v7154_v34 = vpack.c.bf16 %v7130_v52, %v7122_v19  ;;  %v8955_v52 = vshrl.u32 %v19032_v38, 16 }
 0x5de   : > { %16058 = vmatpush3.bf16.msra.mxu0 %v17047_v21  ;;  %9453 = vmatprep.mubr.bf16.mxu1 %v8900_v40  ;;  %v7149_v44 = vpack.c.bf16 %v7125_v35, %v7117_v26  ;;  %v7140_v40 = vld [vmem:[#allocation3 + $0xf8] sm:$0xff]  ;;  %v8958_v26 = vshrl.u32 %v19012_v25, 16 }
 0x5df   : > { %16086 = vmatpush3.bf16.msra.mxu1 %v17048_v55  ;;  %16059 = vmatprep.subr.bf16.mxu0 %v17049_v13  ;;  %v7138_v55 = vld [vmem:[#allocation3 + $0xe8] sm:$0xff]  ;;  %v17069_v13 = vld [vmem:[#allocation15 + $0x540] sm:$0xff]   ;;  %v19039_v17 = vpack.c.bf16 %v7148_v63, %v7140_v40  ;;  %v8916_v14 = vshll.u32 %v7154_v34, 16 }
 0x5e0   : > { %16087 = vmatprep.subr.bf16.mxu1 %v17050_v33  ;;  %v8856_v24 = vshll.u32 %v7149_v44, 16  ;;  %v7124_v33 = vld [vmem:[#allocation3 + $0x78] sm:$0xfe]  ;;  %v17086_v40 = vld [vmem:[#allocation15 + $0x5e0] sm:$0xff]  }
 0x5e1   : > { %v8945_v25 = vshll.u32 %v19039_v17, 16 }
 0x5e2   : > { %16060 = vmatpush3.bf16.msra.mxu0 %v17051_v2  ;;  %v8858_v21 = vrot.slane %v8856_v24, 1  ;;  %v8854_v2 = vshrl.u32 %v7149_v44, 16  ;;  %v8918_v24 = vrot.slane %v8916_v14, 1 }
 0x5e3   : > { %16088 = vmatpush3.bf16.msra.mxu1 %v17052_v11  ;;  %16061 = vmatprep.subr.bf16.mxu0 %v17053_v47  ;;  %v8863_v11 = vrot.slane %v8861_v29, 1  ;;  %v17070_v47 = vld [vmem:[#allocation15 + $0x5c0] sm:$0xff]  }
 0x5e4   : > { %16089 = vmatprep.subr.bf16.mxu1 %v17054_v6  ;;  %v7156_v6 = vpack.c.bf16 %v7132_v51, %v7124_v33  ;;  %v8859_v35 = vor.u32 %v8858_v21, %v8854_v2  ;;  %v17079_v51 = vld [vmem:[#allocation15 + $0x510] sm:$0xff]   ;;  %v17085_v33 = vld [vmem:[#allocation15 + $0x560] sm:$0xff]  }
 0x5e5   : > { %v17080_v21 = vld [vmem:[#allocation15 + $0x590] sm:$0xff]   ;;  %v17087_v2 = vld [vmem:[#allocation15 + $0x520] sm:$0xff]  }
 0x5e6   : > { %16062 = vmatpush3.bf16.msra.mxu0 %v17055_v39  ;;  %v8878_v39 = vshrl.u32 %v7151_v48, 16  ;;  %v17074_v48 = vld [vmem:[#allocation15 + $0x5c8] sm:$0xff]  }
 0x5e7   : > { %16090 = vmatpush3.bf16.msra.mxu1 %v17056_v16  ;;  %16063 = vmatprep.subr.bf16.mxu0 %v17057_v18  ;;  %v8887_v16 = vrot.slane %v8885_v5, 1  ;;  %v19036_v18 = vpack.c.bf16 %v7146_v49, %v7138_v55  ;;  %v8938_v49 = vshrl.u32 %v7156_v6, 16  ;;  %v8951_v5 = vor.u32 %v8949_v42, %v8863_v11  ;;  %v17081_v55 = vld [vmem:[#allocation15 + $0x558] sm:$0xff]  }
 0x5e8   : > { %16091 = vmatprep.subr.bf16.mxu1 %v17058_v45  ;;  %v8952_v45 = vshrl.u32 %v19010_v62, 16  ;;  %v8883_v27 = vor.u32 %v8882_v58, %v8878_v39  ;;  %v17082_v58 = vld [vmem:[#allocation15 + $0x5d8] sm:$0xff]   ;;  %v17090_v39 = vld [vmem:[#allocation15 + $0x5e8] sm:$0xff]  }
 0x5ea   : > { %16064 = vmatpush3.bf16.msra.mxu0 %v17059_v43  ;;  %v8864_v43 = vsel %vm4309_vm1, %v8859_v35, %v8863_v11  ;;  %v8954_v44 = vor.u32 %v8952_v45, %v19020_v41  ;;  %v8888_v62 = vsel %vm4309_vm1, %v8883_v27, %v8887_v16  ;;  %v17076_v41 = vld [vmem:[#allocation15 + $0x588] sm:$0xff]   ;;  %v17088_v11 = vld [vmem:[#allocation15 + $0x5a0] sm:$0xff]   ;;  %v7131_v35 = vld [vmem:[#allocation3 + $0xb0] sm:$0xff] }
 0x5eb   : > { %16092 = vmatpush3.bf16.msra.mxu1 %v17060_v31  ;;  %16065 = vmatprep.subr.bf16.mxu0 %v17061_v9  ;;  %v8940_v31 = vshll.u32 %v7156_v6, 16  ;;  %v8960_v9 = vor.u32 %v8958_v26, %v19022_v30  ;;  %v17078_v30 = vld [vmem:[#allocation15 + $0x5d0] sm:$0xff]   ;;  %v7129_v6 = vld [vmem:[#allocation3 + $0xa0] sm:$0xff] }
 0x5ec   : > { %16093 = vmatprep.subr.bf16.mxu1 %v17062_v4  ;;  %v8921_v4 = vshll.u32 %v19036_v18, 16  ;;  %v7121_v45 = vld [vmem:[#allocation3 + $0x60] sm:$0xfe]  ;;  %v7147_v26 = vld [vmem:[#allocation3 + $0x130] sm:$0x1] }
 0x5ed   : > { %v7137_v27 = vld [vmem:[#allocation3 + $0xe0] sm:$0xff]  ;;  %v7153_v14 = vpack.c.bf16 %v7129_v6, %v7121_v45 }
 0x5ee   : > { %16066 = vmatpush3.bf16.msra.mxu0 %v17063_v7  ;;  %v17075_v7 = vld [vmem:[#allocation15 + $0x508] sm:$0xff]   ;;  %v19049_v29 = vrot.slane %v8921_v4, 1  ;;  %v17095_v4 = vld [vmem:[#allocation15 + $0x530] sm:$0xff]  }
 0x5ef   : > { %16094 = vmatpush3.bf16.msra.mxu1 %v17064_v32  ;;  %16067 = vmatprep.subr.bf16.mxu0 %v17065_v53  ;;  %v17077_v32 = vld [vmem:[#allocation15 + $0x550] sm:$0xff]   ;;  %v8942_v53 = vrot.slane %v8940_v31, 1 }
 0x5f0   : > { %16095 = vmatprep.subr.bf16.mxu1 %v17066_v61  ;;  %v8914_v61 = vshrl.u32 %v7154_v34, 16  ;;  %v17084_v34 = vld [vmem:[#allocation15 + $0x598] sm:$0xff]  }
 0x5f1   : > { %v8943_v19 = vor.u32 %v8942_v53, %v8938_v49 }
 0x5f2   : > { %16068 = vmatpush3.bf16.msra.mxu0 %v17067_v22  ;;  %v19052_v22 = vrot.slane %v8945_v25, 1  ;;  %v8919_v63 = vor.u32 %v8918_v24, %v8914_v61  ;;  %v8904_v25 = vshll.u32 %v7153_v14, 16  ;;  %v17097_v24 = vld [vmem:[#allocation15 + $0x578] sm:$0xff]  }
 0x5f3   : > { %16096 = vmatpush3.bf16.msra.mxu1 %v17068_v59  ;;  %16109 = vmatprep.subr.bf16.mxu0 %v17069_v13  ;;  %v8957_v59 = vor.u32 %v8955_v52, %v8887_v16  ;;  %v17083_v13 = vld [vmem:[#allocation15 + $0x518] sm:$0xff]   ;;  %v7145_v16 = vld [vmem:[#allocation3 + $0x120] sm:$0x1] }
 0x5f4   : > { %16137 = vmatprep.subr.bf16.mxu1 %v17070_v47  ;;  %v8924_v56 = vsel %vm4309_vm1, %v8919_v63, %v19049_v29  ;;  %v8948_v38 = vsel %vm4309_vm1, %v8943_v19, %v19052_v22  ;;  %v17089_v47 = vld [vmem:[#allocation15 + $0x568] sm:$0xff]   ;;  %v8906_v61 = vrot.slane %v8904_v25, 1  ;;  %v17100_v52 = vld [vmem:[#allocation15 + $0x5b8] sm:$0xff]   ;;  %v8964_v19 = vshrl.u32 %v19036_v18, 16 }
 0x5f5   : > { %9406 = vmatmul.mubr.bf16.vlgmr.msra.gmra.mrb[144].mxu0 %v8864_v43  ;;  %v7123_v43 = vld [vmem:[#allocation3 + $0x70] sm:$0xfe] }
 0x5f6   : > { %9454 = vmatmul.mubr.bf16.vlgmr.msra.gmra.mrb[144].mxu1 %v8888_v62  ;;  %9413 = vmatprep.mubr.bf16.mxu0 %v8954_v44  ;;  %v7139_v44 = vld [vmem:[#allocation3 + $0xf0] sm:$0xff]  ;;  %v7155_v31 = vpack.c.bf16 %v7131_v35, %v7123_v43 }
 0x5f7   : > { %9461 = vmatprep.mubr.bf16.mxu1 %v8960_v9  ;;  %16110 = vmatpush3.bf16.msra.mxu0 %v17071_v0  ;;  %v17091_v0 = vld [vmem:[#allocation15 + $0x528] sm:$0xff]   ;;  %v17094_v62 = vld [vmem:[#allocation15 + $0x5f0] sm:$0xff]   ;;  %v7161_v9 = vpack.c.bf16 %v7145_v16, %v7137_v27 }
 0x5f8   : > { %16138 = vmatpush3.bf16.msra.mxu1 %v17072_v15  ;;  %16111 = vmatprep.subr.bf16.mxu0 %v17073_v54  ;;  %v17092_v15 = vld [vmem:[#allocation15 + $0x5a8] sm:$0xff]   ;;  %v17093_v54 = vld [vmem:[#allocation15 + $0x570] sm:$0xff]   ;;  %v8926_v63 = vshrl.u32 %v7155_v31, 16 }
 0x5f9   : > { %16139 = vmatprep.subr.bf16.mxu1 %v17074_v48  ;;  %v7163_v48 = vpack.c.bf16 %v7147_v26, %v7139_v44  ;;  %v8909_v53 = vshll.u32 %v7161_v9, 16 }
 0x5fb   : > { %16112 = vmatpush3.bf16.msra.mxu0 %v17075_v7  ;;  %v17096_v7 = vld [vmem:[#allocation15 + $0x5b0] sm:$0xff]   ;;  %v8933_v42 = vshll.u32 %v7163_v48, 16 }
 0x5fc   : > { %16140 = vmatpush3.bf16.msra.mxu1 %v17076_v41  ;;  %16113 = vmatprep.subr.bf16.mxu0 %v17077_v32  ;;  %v8928_v41 = vshll.u32 %v7155_v31, 16  ;;  %v17098_v32 = vld [vmem:[#allocation15 + $0x5f8] sm:$0xff]  }
 0x5fd   : > { %9414 = vmatmul.mubr.bf16.gmra.mrb[148].mxu0 %v8951_v5  ;;  %16141 = vmatprep.subr.bf16.mxu1 %v17078_v30  ;;  %v17099_v30 = vld [vmem:[#allocation15 + $0x538] sm:$0xff]   ;;  %v8902_v5 = vshrl.u32 %v7153_v14, 16 }
 0x5fe   : > { %9462 = vmatmul.mubr.bf16.gmra.mrb[148].mxu1 %v8957_v59  ;;  %9501 = vmatprep.mubr.bf16.mxu0 %v8924_v56  ;;  %v8930_v49 = vrot.slane %v8928_v41, 1  ;;  %v8935_v59 = vrot.slane %v8933_v42, 1  ;;  %v8970_v56 = vshrl.u32 %v19039_v17, 16 }
 0x5ff   : > { %16114 = vmatpush3.bf16.msra.mxu0 %v17079_v51  ;;  %9549 = vmatprep.mubr.bf16.mxu1 %v8948_v38  ;;  %v8911_v51 = vrot.slane %v8909_v53, 1  ;;  %v8966_v38 = vor.u32 %v8964_v19, %v19049_v29 }
 0x600   : > { %16142 = vmatpush3.bf16.msra.mxu1 %v17080_v21  ;;  %16115 = vmatprep.subr.bf16.mxu0 %v17081_v55  ;;  %v8907_v21 = vor.u32 %v8906_v61, %v8902_v5  ;;  %v8931_v55 = vor.u32 %v8930_v49, %v8926_v63 }
 0x601   : > { %16143 = vmatprep.subr.bf16.mxu1 %v17082_v58 }
 0x602   : > { %v8912_v58 = vsel %vm4309_vm1, %v8907_v21, %v8911_v51 }
 0x603   : > { %16116 = vmatpush3.bf16.msra.mxu0 %v17083_v13  ;;  %v8936_v13 = vsel %vm4309_vm1, %v8931_v55, %v8935_v59 }
 0x604   : > { %16144 = vmatpush3.bf16.msra.mxu1 %v17084_v34  ;;  %16117 = vmatprep.subr.bf16.mxu0 %v17085_v33  ;;  %v8972_v34 = vor.u32 %v8970_v56, %v19052_v22  ;;  %v8961_v33 = vshrl.u32 %v7161_v9, 16 }
 0x605   : > { %16145 = vmatprep.subr.bf16.mxu1 %v17086_v40  ;;  %v8967_v40 = vshrl.u32 %v7163_v48, 16 }
 0x607   : > { %16118 = vmatpush3.bf16.msra.mxu0 %v17087_v2  ;;  %v8963_v2 = vor.u32 %v8961_v33, %v8911_v51  ;;  %v8969_v18 = vor.u32 %v8967_v40, %v8935_v59 }
 0x608   : > { %16146 = vmatpush3.bf16.msra.mxu1 %v17088_v11  ;;  %16119 = vmatprep.subr.bf16.mxu0 %v17089_v47 }
 0x609   : > { %16147 = vmatprep.subr.bf16.mxu1 %v17090_v39 }
 0x60b   : > { %16120 = vmatpush3.bf16.msra.mxu0 %v17091_v0 }
 0x60c   : > { %16148 = vmatpush3.bf16.msra.mxu1 %v17092_v15  ;;  %16121 = vmatprep.subr.bf16.mxu0 %v17093_v54 }
 0x60d   : > { %16149 = vmatprep.subr.bf16.mxu1 %v17094_v62 }
 0x60f   : > { %16122 = vmatpush3.bf16.msra.mxu0 %v17095_v4 }
 0x610   : > { %16150 = vmatpush3.bf16.msra.mxu1 %v17096_v7  ;;  %16123 = vmatprep.subr.bf16.mxu0 %v17097_v24 }
 0x611   : > { %16151 = vmatprep.subr.bf16.mxu1 %v17098_v32 }
 0x613   : > { %16124 = vmatpush3.bf16.msra.mxu0 %v17099_v30 }
 0x614   : > { %16152 = vmatpush3.bf16.msra.mxu1 %v17100_v52 }
 0x616   : > { %9502 = vmatmul.mubr.bf16.vlgmr.msra.gmra.mrb[152].mxu0 %v8912_v58 }
 0x617   : > { %9550 = vmatmul.mubr.bf16.vlgmr.msra.gmra.mrb[152].mxu1 %v8936_v13  ;;  %9509 = vmatprep.mubr.bf16.mxu0 %v8966_v38 }
 0x618   : > { %9557 = vmatprep.mubr.bf16.mxu1 %v8972_v34 }
 0x61e   : > { %9510 = vmatmul.mubr.bf16.gmra.mrb[156].mxu0 %v8963_v2 }
 0x61f   : > { %9558 = vmatmul.mubr.bf16.gmra.mrb[156].mxu1 %v8969_v18  ;;  %10113 = vmatprep.mubr.bf16.mxu0 %v19741_v28 }
 0x620   : > { %10164 = vmatprep.mubr.bf16.mxu1 %v19741_v28 }
 0x644   : > { %v15845_v17 = vpop.f32.mrb[112].mxu0 }
 0x645   : > { %v15873_v29 = vpop.f32.mrb[112].mxu1  ;;  %v15846_v11 = vpop.f32.mrb[113].mxu0 }
 0x646   : > { %v15874_v47 = vpop.f32.mrb[113].mxu1  ;;  %v15847_v6 = vadd.f32 %v15846_v11, %v15845_v17  ;;  %v15848_v22 = vpop.f32.mrb[114].mxu0 }
 0x647   : > { %v15875_v39 = vadd.f32 %v15874_v47, %v15873_v29  ;;  %v15876_v16 = vpop.f32.mrb[114].mxu1  ;;  %v15849_v35 = vpop.f32.mrb[115].mxu0  ;;  %v9697_v47 = vld [vmem:[#allocation14 + $0x200] sm:$0xff] }
 0x648   : > { %v15877_v45 = vpop.f32.mrb[115].mxu1  ;;  %v15850_v26 = vadd.f32 %v15849_v35, %v15848_v22 }
 0x649   : > { %v7888_v27 = vadd.f32 %v15875_v39, %v15847_v6  ;;  %v15878_v0 = vadd.f32 %v15877_v45, %v15876_v16  ;;  %v9701_v6 = vld [vmem:[#allocation14 + $0x220] sm:$0xff]  ;;  %v9698_v39 = vld [vmem:[#allocation14 + $0x208] sm:$0xff] }
 0x64a   : > { %v15106_v16 = vcombine.low %v9697_v47, %v9701_v6  ;;  %v15107_v35 = vcombine.high %v9697_v47, %v9701_v6  ;;  %v9702_v45 = vld [vmem:[#allocation14 + $0x228] sm:$0xff] }
 0x64b   : > { %v7891_v14 = vadd.f32 %v15878_v0, %v15850_v26  ;;  %v15108_v0 = vcombine.low %v9698_v39, %v9702_v45 }
 0x64c   : > { %10081 = vmatprep.subr.bf16.mxu0 %v15107_v35 }
 0x64d   : > { %v15851_v43 = vpop.f32.mrb[116].mxu0  ;;  %v15879_v44 = vpop.f32.mrb[116].mxu1  ;;  %10082 = vmatpush1.bf16.msra.mxu0 %v15106_v16 }
 0x64e   : > { %v15852_v15 = vpop.f32.mrb[117].mxu0  ;;  %v15880_v54 = vpop.f32.mrb[117].mxu1 }
 0x64f   : > { %v15853_v31 = vadd.f32 %v15852_v15, %v15851_v43  ;;  %v15881_v62 = vadd.f32 %v15880_v54, %v15879_v44  ;;  %v15854_v9 = vpop.f32.mrb[118].mxu0  ;;  %v15882_v48 = vpop.f32.mrb[118].mxu1 }
 0x650   : > { %v15855_v4 = vpop.f32.mrb[119].mxu0  ;;  %v15883_v25 = vpop.f32.mrb[119].mxu1 }
 0x651   : > { %v7896_v7 = vadd.f32 %v15881_v62, %v15853_v31 }
 0x666   : > { %v15901_v24 = vpop.f32.mrb[120].mxu0 }
 0x667   : > { %v15929_v41 = vpop.f32.mrb[120].mxu1  ;;  %v15902_v32 = vpop.f32.mrb[121].mxu0 }
 0x668   : > { %v15903_v53 = vadd.f32 %v15902_v32, %v15901_v24  ;;  %v15930_v42 = vpop.f32.mrb[121].mxu1  ;;  %v15904_v30 = vpop.f32.mrb[122].mxu0  ;;  %v9709_v24 = vld [vmem:[#allocation14 + $0x260] sm:$0xff] }
 0x669   : > { %v15931_v61 = vadd.f32 %v15930_v42, %v15929_v41  ;;  %v15932_v52 = vpop.f32.mrb[122].mxu1  ;;  %v15905_v49 = vpop.f32.mrb[123].mxu0  ;;  %v9706_v41 = vld [vmem:[#allocation14 + $0x248] sm:$0xff] }
 0x66a   : > { %v7936_v5 = vadd.f32 %v15903_v53, %v7888_v27  ;;  %v15906_v51 = vadd.f32 %v15905_v49, %v15904_v30  ;;  %v15933_v63 = vpop.f32.mrb[123].mxu1  ;;  %v9717_v49 = vld [vmem:[#allocation14 + $0x2a0] sm:$0xff] }
 0x66b   : > { %v15934_v59 = vadd.f32 %v15933_v63, %v15932_v52  ;;  %v9713_v52 = vld [vmem:[#allocation14 + $0x280] sm:$0xff] }
 0x66c   : > { %v7984_v21 = vadd.f32 %v15931_v61, %v7936_v5  ;;  %v7939_v19 = vadd.f32 %v15906_v51, %v7891_v14  ;;  %v15109_v14 = vcombine.high %v9698_v39, %v9702_v45  ;;  %v9710_v61 = vld [vmem:[#allocation14 + $0x268] sm:$0xff]  ;;  %v15123_v63 = vcombine.high %v9713_v52, %v9717_v49  ;;  %v9729_v45 = vld [vmem:[#allocation14 + $0x300] sm:$0xff] }
 0x66d   : > { %v15116_v5 = vcombine.low %v9706_v41, %v9710_v61  ;;  %v15117_v51 = vcombine.high %v9706_v41, %v9710_v61  ;;  %v9738_v41 = vld [vmem:[#allocation14 + $0x348] sm:$0xff] }
 0x66e   : > { %v7987_v55 = vadd.f32 %v15934_v59, %v7939_v19  ;;  %v15907_v56 = vpop.f32.mrb[124].mxu0  ;;  %10132 = vmatprep.subr.bf16.mxu1 %v15109_v14  ;;  %v9714_v59 = vld [vmem:[#allocation14 + $0x288] sm:$0xff]  ;;  %v9721_v19 = vld [vmem:[#allocation14 + $0x2c0] sm:$0xff] }
 0x66f   : > { %v15935_v58 = vpop.f32.mrb[124].mxu1  ;;  %v15908_v38 = vpop.f32.mrb[125].mxu0  ;;  %10133 = vmatpush1.bf16.msra.mxu1 %v15108_v0  ;;  %v9730_v14 = vld [vmem:[#allocation14 + $0x308] sm:$0xff] }
 0x670   : > { %v15909_v13 = vadd.f32 %v15908_v38, %v15907_v56  ;;  %v15936_v34 = vpop.f32.mrb[125].mxu1  ;;  %v15910_v33 = vpop.f32.mrb[126].mxu0  ;;  %10134 = vmatprep.subr.bf16.mxu1 %v15117_v51  ;;  %v9749_v51 = vld [vmem:[#allocation14 + $0x3a0] sm:$0xff] }
 0x671   : > { %v15937_v40 = vadd.f32 %v15936_v34, %v15935_v58  ;;  %v15938_v2 = vpop.f32.mrb[126].mxu1  ;;  %v15911_v18 = vpop.f32.mrb[127].mxu0  ;;  %v9722_v34 = vld [vmem:[#allocation14 + $0x2c8] sm:$0xff] }
 0x672   : > { %v7944_v17 = vadd.f32 %v15909_v13, %v7896_v7  ;;  %v15939_v29 = vpop.f32.mrb[127].mxu1  ;;  %v9705_v7 = vld [vmem:[#allocation14 + $0x240] sm:$0xff]  ;;  %v9726_v33 = vld [vmem:[#allocation14 + $0x2e8] sm:$0xff]  ;;  %v15122_v2 = vcombine.low %v9713_v52, %v9717_v49 }
 0x673   : > { %v15114_v42 = vcombine.low %v9705_v7, %v9709_v24  ;;  %v15115_v30 = vcombine.high %v9705_v7, %v9709_v24  ;;  %v9725_v13 = vld [vmem:[#allocation14 + $0x2e0] sm:$0xff]  ;;  %10135 = vmatpush1.bf16.msra.mxu1 %v15116_v5  ;;  %v15133_v35 = vcombine.high %v9722_v34, %v9726_v33  ;;  %v19081_v7 = vld [vmem:[#allocation14 + $0x218] sm:$0xff] }
 0x674   : > { %v19066_v11 = vadd.f32 %v15937_v40, %v7944_v17  ;;  %v15131_v6 = vcombine.high %v9721_v19, %v9725_v13  ;;  %v19083_v24 = vld [vmem:[#allocation14 + $0x238] sm:$0xff]  ;;  %v9745_v5 = vld [vmem:[#allocation14 + $0x380] sm:$0xff] }
 0x675   : > { %10083 = vmatprep.subr.bf16.mxu0 %v15115_v30 }
 0x676   : > { %10084 = vmatpush1.bf16.msra.mxu0 %v15114_v42  ;;  %v15112_v42 = vcombine.low %v19081_v7, %v19083_v24 }
 0x677   : > { %10085 = vmatprep.subr.bf16.mxu0 %v15123_v63  ;;  %v9746_v63 = vld [vmem:[#allocation14 + $0x388] sm:$0xff] }
 0x67a   : > { %10086 = vmatpush1.bf16.msra.mxu0 %v15122_v2 }
 0x67b   : > { %10087 = vmatprep.subr.bf16.mxu0 %v15131_v6 }
 0x686   : > { %v15957_v22 = vpop.f32.mrb[128].mxu0 }
 0x687   : > { %v15985_v27 = vpop.f32.mrb[128].mxu1  ;;  %v15958_v26 = vpop.f32.mrb[129].mxu0 }
 0x688   : > { %v15959_v43 = vadd.f32 %v15958_v26, %v15957_v22  ;;  %v15986_v44 = vpop.f32.mrb[129].mxu1  ;;  %v15960_v15 = vpop.f32.mrb[130].mxu0 }
 0x689   : > { %v15987_v54 = vadd.f32 %v15986_v44, %v15985_v27  ;;  %v15988_v31 = vpop.f32.mrb[130].mxu1  ;;  %v15961_v62 = vpop.f32.mrb[131].mxu0  ;;  %v9733_v27 = vld [vmem:[#allocation14 + $0x320] sm:$0xff]  ;;  %v15130_v44 = vcombine.low %v9721_v19, %v9725_v13 }
 0x68a   : > { %v8568_v9 = vadd.f32 %v15959_v43, %v7984_v21  ;;  %v15962_v48 = vadd.f32 %v15961_v62, %v15960_v15  ;;  %v15989_v4 = vpop.f32.mrb[131].mxu1  ;;  %v9718_v21 = vld [vmem:[#allocation14 + $0x2a8] sm:$0xff]  ;;  %v9737_v62 = vld [vmem:[#allocation14 + $0x340] sm:$0xff]  ;;  %v15138_v30 = vcombine.low %v9729_v45, %v9733_v27 }
 0x68b   : > { %v15990_v25 = vadd.f32 %v15989_v4, %v15988_v31  ;;  %v15125_v38 = vcombine.high %v9714_v59, %v9718_v21  ;;  %v15124_v47 = vcombine.low %v9714_v59, %v9718_v21  ;;  %v9734_v43 = vld [vmem:[#allocation14 + $0x328] sm:$0xff]  ;;  %v15139_v31 = vcombine.high %v9729_v45, %v9733_v27  ;;  %10088 = vmatpush1.bf16.msra.mxu0 %v15130_v44  ;;  %v9753_v13 = vld [vmem:[#allocation14 + $0x3c0] sm:$0xff] }
 0x68c   : > { %v19068_v32 = vadd.f32 %v15987_v54, %v8568_v9  ;;  %v8571_v53 = vadd.f32 %v15962_v48, %v7987_v55  ;;  %v15132_v54 = vcombine.low %v9722_v34, %v9726_v33  ;;  %v19075_v9 = vld [vmem:[#allocation14 + $0x210] sm:$0xff]  ;;  %v15141_v4 = vcombine.high %v9730_v14, %v9734_v43  ;;  %v9750_v59 = vld [vmem:[#allocation14 + $0x3a8] sm:$0xff]  ;;  %v9757_v34 = vld [vmem:[#allocation14 + $0x3e0] sm:$0xff] }
 0x68d   : > { %10136 = vmatprep.subr.bf16.mxu1 %v15125_v38  ;;  %v19077_v48 = vld [vmem:[#allocation14 + $0x230] sm:$0xff]  ;;  %10089 = vmatprep.subr.bf16.mxu0 %v15139_v31  ;;  %v15140_v61 = vcombine.low %v9730_v14, %v9734_v43  ;;  %v15157_v38 = vcombine.high %v9746_v63, %v9750_v59  ;;  %v9754_v33 = vld [vmem:[#allocation14 + $0x3c8] sm:$0xff]  ;;  %v15156_v2 = vcombine.low %v9746_v63, %v9750_v59 }
 0x68e   : > { %v19070_v56 = vadd.f32 %v15990_v25, %v8571_v53  ;;  %v15963_v58 = vpop.f32.mrb[132].mxu0  ;;  %10137 = vmatpush1.bf16.msra.mxu1 %v15124_v47  ;;  %v9741_v25 = vld [vmem:[#allocation14 + $0x360] sm:$0xff]  ;;  %v9742_v53 = vld [vmem:[#allocation14 + $0x368] sm:$0xff]  ;;  %v15111_v6 = vcombine.high %v19075_v9, %v19077_v48 }
 0x68f   : > { %v15991_v55 = vpop.f32.mrb[132].mxu1  ;;  %v15964_v40 = vpop.f32.mrb[133].mxu0  ;;  %10138 = vmatprep.subr.bf16.mxu1 %v15133_v35  ;;  %v15147_v52 = vcombine.high %v9737_v62, %v9741_v25  ;;  %v15149_v49 = vcombine.high %v9738_v41, %v9742_v53  ;;  %10090 = vmatpush1.bf16.msra.mxu0 %v15138_v30  ;;  %v15146_v21 = vcombine.low %v9737_v62, %v9741_v25 }
 0x690   : > { %v15965_v18 = vadd.f32 %v15964_v40, %v15963_v58  ;;  %v15992_v17 = vpop.f32.mrb[133].mxu1  ;;  %v15966_v29 = vpop.f32.mrb[134].mxu0  ;;  %v15148_v19 = vcombine.low %v9738_v41, %v9742_v53  ;;  %v15155_v58 = vcombine.high %v9745_v5, %v9749_v51  ;;  %v15154_v40 = vcombine.low %v9745_v5, %v9749_v51 }
 0x691   : > { %v15993_v39 = vadd.f32 %v15992_v17, %v15991_v55  ;;  %v15994_v22 = vpop.f32.mrb[134].mxu1  ;;  %v15967_v16 = vpop.f32.mrb[135].mxu0  ;;  %10091 = vmatprep.subr.bf16.mxu0 %v15147_v52  ;;  %v9758_v55 = vld [vmem:[#allocation14 + $0x3e8] sm:$0xff]  ;;  %v15162_v29 = vcombine.low %v9753_v13, %v9757_v34 }
 0x692   : > { %v8576_v26 = vadd.f32 %v15965_v18, %v19066_v11  ;;  %v15995_v0 = vpop.f32.mrb[135].mxu1  ;;  %v15110_v11 = vcombine.low %v19075_v9, %v19077_v48  ;;  %10139 = vmatpush1.bf16.msra.mxu1 %v15132_v54  ;;  %v15163_v18 = vcombine.high %v9753_v13, %v9757_v34  ;;  %v15165_v17 = vcombine.high %v9754_v33, %v9758_v55  ;;  %v9724_v9 = vld [vmem:[#allocation14 + $0x2d8] sm:$0xff] }
 0x693   : > { %10140 = vmatprep.subr.bf16.mxu1 %v15141_v4  ;;  %10092 = vmatpush1.bf16.msra.mxu0 %v15146_v21  ;;  %v15164_v47 = vcombine.low %v9754_v33, %v9758_v55  ;;  %v9728_v48 = vld [vmem:[#allocation14 + $0x2f8] sm:$0xff] }
 0x694   : > { %v19073_v15 = vadd.f32 %v15993_v39, %v8576_v26  ;;  %10093 = vmatprep.subr.bf16.mxu0 %v15155_v58  ;;  %v15113_v39 = vcombine.high %v19081_v7, %v19083_v24 }
 0x696   : > { %10141 = vmatpush1.bf16.msra.mxu1 %v15140_v61 }
 0x697   : > { %10142 = vmatprep.subr.bf16.mxu1 %v15149_v49  ;;  %10094 = vmatpush1.bf16.msra.mxu0 %v15154_v40 }
 0x698   : > { %10095 = vmatprep.subr.bf16.mxu0 %v15163_v18 }
 0x69a   : > { %10143 = vmatpush1.bf16.msra.mxu1 %v15148_v19 }
 0x69b   : > { %10144 = vmatprep.subr.bf16.mxu1 %v15157_v38  ;;  %10096 = vmatpush1.bf16.msra.mxu0 %v15162_v29 }
 0x69c   : > { %10183 = vmatprep.subr.bf16.mxu0 %v15111_v6 }
 0x69e   : > { %10145 = vmatpush1.bf16.msra.mxu1 %v15156_v2 }
 0x69f   : > { %10146 = vmatprep.subr.bf16.mxu1 %v15165_v17 }
 0x6a2   : > { %10147 = vmatpush1.bf16.msra.mxu1 %v15164_v47 }
 0x6a3   : > { %10234 = vmatprep.subr.bf16.mxu1 %v15113_v39 }
 0x6a7   : > { %v16013_v22 = vpop.f32.mrb[136].mxu0 }
 0x6a8   : > { %v16041_v16 = vpop.f32.mrb[136].mxu1  ;;  %v16014_v35 = vpop.f32.mrb[137].mxu0 }
 0x6a9   : > { %v16015_v45 = vadd.f32 %v16014_v35, %v16013_v22  ;;  %v16042_v27 = vpop.f32.mrb[137].mxu1  ;;  %v16016_v26 = vpop.f32.mrb[138].mxu0 }
 0x6aa   : > { %v16043_v0 = vadd.f32 %v16042_v27, %v16041_v16  ;;  %v16044_v14 = vpop.f32.mrb[138].mxu1  ;;  %v16017_v43 = vpop.f32.mrb[139].mxu0 }
 0x6ab   : > { %v8664_v44 = vadd.f32 %v16015_v45, %v19068_v32  ;;  %v16018_v54 = vadd.f32 %v16017_v43, %v16016_v26  ;;  %v16045_v31 = vpop.f32.mrb[139].mxu1 }
 0x6ac   : > { %v16046_v62 = vadd.f32 %v16045_v31, %v16044_v14 }
 0x6ad   : > { %v8712_v4 = vadd.f32 %v16043_v0, %v8664_v44  ;;  %v8667_v25 = vadd.f32 %v16018_v54, %v19070_v56 }
 0x6af   : > { %v19093_v41 = vadd.f32 %v16046_v62, %v8667_v25  ;;  %v16019_v53 = vpop.f32.mrb[140].mxu0 }
 0x6b0   : > { %v16047_v30 = vpop.f32.mrb[140].mxu1  ;;  %v16020_v61 = vpop.f32.mrb[141].mxu0 }
 0x6b1   : > { %v16021_v52 = vadd.f32 %v16020_v61, %v16019_v53  ;;  %v16048_v49 = vpop.f32.mrb[141].mxu1  ;;  %v16022_v5 = vpop.f32.mrb[142].mxu0 }
 0x6b2   : > { %v16049_v51 = vadd.f32 %v16048_v49, %v16047_v30  ;;  %v16050_v63 = vpop.f32.mrb[142].mxu1  ;;  %v16023_v59 = vpop.f32.mrb[143].mxu0 }
 0x6b3   : > { %v8672_v21 = vadd.f32 %v16021_v52, %v19073_v15  ;;  %v16051_v32 = vpop.f32.mrb[143].mxu1 }
 0x6b5   : > { %v19096_v19 = vadd.f32 %v16049_v51, %v8672_v21 }
 0x6c8   : > { %v16069_v58 = vpop.f32.mrb[144].mxu0 }
 0x6c9   : > { %v16097_v38 = vpop.f32.mrb[144].mxu1  ;;  %v16070_v13 = vpop.f32.mrb[145].mxu0 }
 0x6ca   : > { %v16071_v56 = vadd.f32 %v16070_v13, %v16069_v58  ;;  %v16098_v34 = vpop.f32.mrb[145].mxu1  ;;  %v16072_v33 = vpop.f32.mrb[146].mxu0  ;;  %v9571_v13 = vstv %s14703_s22  ;;  %s17534_s22 = scalar_lea.vmem %s19575_s10, 384 }
 0x6cb   : > { %v16099_v55 = vadd.f32 %v16098_v34, %v16097_v38  ;;  %v16100_v40 = vpop.f32.mrb[146].mxu1  ;;  %v16073_v2 = vpop.f32.mrb[147].mxu0  ;;  %p17535_p4 = scmp.ne.s32.totalorder %s19575_s10, %s17534_s22 }
 0x6cc   : > { %v16074_v18 = vadd.f32 %v16073_v2, %v16072_v33  ;;  %v16101_v17 = vpop.f32.mrb[147].mxu1 }
 0x6cd   : > { %v9456_v29 = vadd.f32 %v16099_v55, %v16071_v56  ;;  %v16102_v47 = vadd.f32 %v16101_v17, %v16100_v40  ;;  %v9575_v56 = vstv %s14704_s0  ;;  %v17317_v55 = vld [vmem:[#allocation11 + $0x18] ss:$0 sm:$0xff]  ;;  %p17536_p6 = pnand %p17535_p4, %p19771_p13  ;;  %s17538_s0 = sshll.u32 %s17638_s30, 4  ;;  %s17539_s0 = int_to_ptr.vmem [resolvable:$false] %s17538_s0 }
 0x6ce   : > { %p17541_p11 = scmp.lt.s32.totalorder %s19575_s10, %s17539_s0 }
 0x6cf   : > { %v9459_v6 = vadd.f32 %v16102_v47, %v16074_v18  ;;  %p17537_p10 = pneg %p17536_p6 }
 0x6d0   : > { %v16075_v39 = vpop.f32.mrb[148].mxu0 }
 0x6d1   : > { %v16103_v22 = vpop.f32.mrb[148].mxu1  ;;  %v16076_v15 = vpop.f32.mrb[149].mxu0 }
 0x6d2   : > { %v16077_v16 = vadd.f32 %v16076_v15, %v16075_v39  ;;  %v16104_v35 = vpop.f32.mrb[149].mxu1  ;;  %v16078_v45 = vpop.f32.mrb[150].mxu0 }
 0x6d3   : > { %v16105_v27 = vadd.f32 %v16104_v35, %v16103_v22  ;;  %v16106_v26 = vpop.f32.mrb[150].mxu1  ;;  %v16079_v0 = vpop.f32.mrb[151].mxu0  ;;  %v9582_v45 = vstv %s14707_s1  ;;  %s17540_s1 = scalar_lea.vmem %s17539_s0, 768 }
 0x6d4   : > { %v16107_v14 = vpop.f32.mrb[151].mxu1  ;;  %p17542_p8 = scmp.lt.s32.totalorder %s17540_s1, %s17534_s22 }
 0x6d5   : > { %v9464_v43 = vadd.f32 %v16105_v27, %v16077_v16  ;;  %v9586_v14 = vstv %s14708_s4 }
 0x6d6   : > { %p17543_p3 = por %p17542_p8, %p17541_p11 }
 0x6d8   : > { %p17544_p2 = pnand %p17543_p3, %p17537_p10 }
 0x6e9   : > { %v16125_v44 = vpop.f32.mrb[152].mxu0 }
 0x6ea   : > { %v16153_v54 = vpop.f32.mrb[152].mxu1  ;;  %v16126_v31 = vpop.f32.mrb[153].mxu0 }
 0x6eb   : > { %v16127_v62 = vadd.f32 %v16126_v31, %v16125_v44  ;;  %v16154_v25 = vpop.f32.mrb[153].mxu1  ;;  %v16128_v53 = vpop.f32.mrb[154].mxu0  ;;  %v15103_v44 = vld [vmem:[%s17974_s23 + $0x30] sm:$0xff] }
 0x6ec   : > { %v16155_v30 = vadd.f32 %v16154_v25, %v16153_v54  ;;  %v16156_v61 = vpop.f32.mrb[154].mxu1  ;;  %v16129_v52 = vpop.f32.mrb[155].mxu0  ;;  %v9604_v54 = vstv %s19098_s8 }
 0x6ed   : > { %v9504_v49 = vadd.f32 %v16127_v62, %v9456_v29  ;;  %v16130_v5 = vadd.f32 %v16129_v52, %v16128_v53  ;;  %v16157_v51 = vpop.f32.mrb[155].mxu1  ;;  %v15104_v53 = vld [vmem:[%s17974_s23 + $0x38] sm:$0xff]  ;;  %v9578_v52 = vmul.f32 %v9575_v56, %v18645_v3  ;;  %v9708_v3 = vld [vmem:[#allocation14 + $0x258] sm:$0xff] }
 0x6ee   : > { %v16158_v63 = vadd.f32 %v16157_v51, %v16156_v61 }
 0x6ef   : > { %v9552_v59 = vadd.f32 %v16155_v30, %v9504_v49  ;;  %v9507_v21 = vadd.f32 %v16130_v5, %v9459_v6  ;;  %v9605_v30 = vmul.f32 %v15103_v44, %v9604_v54  ;;  %v17318_v49 = vld [vmem:[#allocation11] sm:$0xff]  ;;  %v9723_v44 = vld [vmem:[#allocation14 + $0x2d0] sm:$0xff] }
 0x6f1   : > { %v9565_v32 = vadd.f32 %v9552_v59, %v8712_v4  ;;  %v9555_v58 = vadd.f32 %v16158_v63, %v9507_v21  ;;  %v16131_v38 = vpop.f32.mrb[156].mxu0  ;;  %v9576_v4 = vmul.f32 %v9575_v56, %v18636_v8  ;;  %v9611_v59 = vstv %s15096_s29 }
 0x6f2   : > { %v16159_v34 = vpop.f32.mrb[156].mxu1  ;;  %v16132_v33 = vpop.f32.mrb[157].mxu0 }
 0x6f3   : > { %v9568_v40 = vadd.f32 %v17317_v55, %v9565_v32  ;;  %v9566_v2 = vadd.f32 %v9555_v58, %v19093_v41  ;;  %v16133_v18 = vadd.f32 %v16132_v33, %v16131_v38  ;;  %v16160_v17 = vpop.f32.mrb[157].mxu1  ;;  %v16134_v29 = vpop.f32.mrb[158].mxu0  ;;  %v9577_v41 = vmul.f32 %v9575_v56, %v18640_v57  ;;  %v17319_v32 = vld [vmem:[#allocation11 + $0x8] sm:$0xff]  ;;  %v9712_v56 = vld [vmem:[#allocation14 + $0x278] sm:$0xff] }
 0x6f4   : > { %v16161_v47 = vadd.f32 %v16160_v17, %v16159_v34  ;;  %v16162_v6 = vpop.f32.mrb[158].mxu1  ;;  %v16135_v39 = vpop.f32.mrb[159].mxu0  ;;  %v9606_v57 = vmul.f32 %v15104_v53, %v9604_v54  ;;  %v17320_v29 = vld [vmem:[#allocation11 + $0x10] sm:$0xff]  ;;  %v9732_v53 = vld [vmem:[#allocation14 + $0x318] sm:$0xff] }
 0x6f5   : > { %v9572_v22 = vmul.f32 %v9571_v13, %v9568_v40  ;;  %v9569_v15 = vadd.f32 %v17317_v55, %v9566_v2  ;;  %v9512_v16 = vadd.f32 %v16133_v18, %v9464_v43  ;;  %v16163_v35 = vpop.f32.mrb[159].mxu1  ;;  %v9711_v2 = vld [vmem:[#allocation14 + $0x270] sm:$0xff] }
 0x6f6   : > { %v9720_v35 = vld [vmem:[#allocation14 + $0x2b8] sm:$0xff] }
 0x6f7   : > { %v9579_v27 = vadd.f32 %v9576_v4, %v9572_v22  ;;  %v9573_v26 = vmul.f32 %v9571_v13, %v9569_v15  ;;  %v9560_v0 = vadd.f32 %v16161_v47, %v9512_v16  ;;  %v15121_v22 = vcombine.high %v9708_v3, %v9712_v56  ;;  %v9715_v4 = vld [vmem:[#allocation14 + $0x290] sm:$0xff]  ;;  %v9716_v16 = vld [vmem:[#allocation14 + $0x298] sm:$0xff] }
 0x6f8   : > { %v9719_v15 = vld [vmem:[#allocation14 + $0x2b0] sm:$0xff]  ;;  %v15128_v7 = vcombine.low %v9716_v16, %v9720_v35 }
 0x6f9   : > { %v9583_v31 = vmax.f32 %v9582_v45, %v9579_v27  ;;  %v9580_v62 = vadd.f32 %v9577_v41, %v9573_v26  ;;  %v9567_v25 = vadd.f32 %v9560_v0, %v19096_v19  ;;  %v15105_v19 = vld [vmem:[%s17974_s23 + $0x40] sm:$0xff]  ;;  %v15120_v26 = vcombine.low %v9708_v3, %v9712_v56  ;;  %s15100_s23 = sld [smem:[#allocation4 + $0x104]] }
 0x6fa   : > { %v9607_v17 = vmul.f32 %v15105_v19, %v9604_v54  ;;  %v15127_v0 = vcombine.high %v9715_v4, %v9719_v15  ;;  %v9727_v54 = vld [vmem:[#allocation14 + $0x2f0] sm:$0xff] }
 0x6fb   : > { %v9587_v8 = vmin.f32 %v9586_v14, %v9583_v31  ;;  %v9584_v43 = vmax.f32 %v9582_v45, %v9580_v62  ;;  %v9570_v61 = vadd.f32 %v17317_v55, %v9567_v25  ;;  %v9707_v55 = vld [vmem:[#allocation14 + $0x250] sm:$0xff]  ;;  %v15137_v31 = vcombine.high %v9724_v9, %v9728_v48 }
 0x6fc   : > { %v15119_v39 = vcombine.high %v9707_v55, %v9711_v2  ;;  %v15118_v27 = vcombine.low %v9707_v55, %v9711_v2  ;;  %v9731_v62 = vld [vmem:[#allocation14 + $0x310] sm:$0xff] }
 0x6fd   : > { %v9590_v5 = vmul.f32 %v17318_v49, %v9587_v8  ;;  %v9588_v51 = vmin.f32 %v9586_v14, %v9584_v43  ;;  %v9574_v63 = vmul.f32 %v9571_v13, %v9570_v61  ;;  %v9735_v25 = vld [vmem:[#allocation14 + $0x330] sm:$0xff]  ;;  %v9736_v8 = vld [vmem:[#allocation14 + $0x338] sm:$0xff]  ;;  %v15136_v43 = vcombine.low %v9724_v9, %v9728_v48  ;;  %v9642_v9 = vld [vmem:[#allocation14 + $0x48] sm:$0xff] }
 0x6fe   : > { %v15143_v61 = vcombine.high %v9731_v62, %v9735_v25  ;;  %v9739_v49 = vld [vmem:[#allocation14 + $0x350] sm:$0xff]  ;;  %v9646_v48 = vld [vmem:[#allocation14 + $0x68] sm:$0xff] }
 0x6ff   : > { %v19108_v21 = vadd.f32 %v9605_v30, %v9590_v5  ;;  %v9591_v58 = vmul.f32 %v17319_v32, %v9588_v51  ;;  %v9581_v38 = vadd.f32 %v9578_v52, %v9574_v63  ;;  %v15134_v30 = vcombine.low %v9723_v44, %v9727_v54  ;;  %v9743_v5 = vld [vmem:[#allocation14 + $0x370] sm:$0xff]  ;;  %v9740_v51 = vld [vmem:[#allocation14 + $0x358] sm:$0xff] }
 0x700   : > { %v15145_v52 = vcombine.high %v9732_v53, %v9736_v8  ;;  %v15142_v63 = vcombine.low %v9731_v62, %v9735_v25  ;;  %v15151_v32 = vcombine.high %v9739_v49, %v9743_v5  ;;  %v9751_v19 = vld [vmem:[#allocation14 + $0x3b0] sm:$0xff]  ;;  %v15150_v55 = vcombine.low %v9739_v49, %v9743_v5  ;;  %v9649_v62 = vld [vmem:[#allocation14 + $0x80] sm:$0xff] }
 0x701   : > { %v9612_v34 = vmul.f32 %v9611_v59, %v19108_v21  ;;  %v19112_v33 = vadd.f32 %v9606_v57, %v9591_v58  ;;  %v9585_v40 = vmax.f32 %v9582_v45, %v9581_v38  ;;  %v9744_v57 = vld [vmem:[#allocation14 + $0x378] sm:$0xff]  ;;  %v9747_v38 = vld [vmem:[#allocation14 + $0x390] sm:$0xff]  ;;  %v9653_v25 = vld [vmem:[#allocation14 + $0xa0] sm:$0xff] }
 0x702   : > { %v15153_v58 = vcombine.high %v9740_v51, %v9744_v57  ;;  %v15152_v2 = vcombine.low %v9740_v51, %v9744_v57  ;;  %v15159_v3 = vcombine.high %v9747_v38, %v9751_v19  ;;  %v9657_v49 = vld [vmem:[#allocation14 + $0xc0] sm:$0xff]  ;;  %v9658_v51 = vld [vmem:[#allocation14 + $0xc8] sm:$0xff] }
 0x703   : > { %9615 = vst [vmem:[#allocation2 + $0x8] sm:$0xff] %v9612_v34  ;;  %v9613_v18 = vmul.f32 %v9611_v59, %v19112_v33  ;;  %v9589_v13 = vmin.f32 %v9586_v14, %v9585_v40  ;;  %v15129_v14 = vcombine.high %v9716_v16, %v9720_v35  ;;  %v9752_v40 = vld [vmem:[#allocation14 + $0x3b8] sm:$0xff]  ;;  %v9637_v16 = vld [vmem:[#allocation14 + $0x20] sm:$0xff]  ;;  %v9634_v35 = vld [vmem:[#allocation14 + $0x8] sm:$0xff] }
 0x704   : > { %v9661_v5 = vld [vmem:[#allocation14 + $0xe0] sm:$0xff]  ;;  %v9662_v57 = vld [vmem:[#allocation14 + $0xe8] sm:$0xff] }
 0x705   : > { %9616 = vst [vmem:[#allocation2 + $0x10] sm:$0xff] %v9613_v18  ;;  %v9592_v47 = vmul.f32 %v17320_v29, %v9589_v13  ;;  %v19115_v6 = vpack.c.bf16 %v9613_v18, %v9612_v34  ;;  %v9748_v34 = vld [vmem:[#allocation14 + $0x398] sm:$0xff]  ;;  %v9755_v18 = vld [vmem:[#allocation14 + $0x3d0] sm:$0xff] }
 0x706   : > { %v15161_v56 = vcombine.high %v9748_v34, %v9752_v40  ;;  %v9759_v13 = vld [vmem:[#allocation14 + $0x3f0] sm:$0xff]  ;;  %v9760_v29 = vld [vmem:[#allocation14 + $0x3f8] sm:$0xff] }
 0x707   : > { %v19117_v45 = vadd.f32 %v9607_v17, %v9592_v47  ;;  %10114 = vmatmul.mubr.bf16.vlgmr.msra.gmra.mrb[160].mxu0 %v19115_v6  ;;  %10165 = vmatmul.mubr.bf16.vlgmr.msra.gmra.mrb[160].mxu1 %v19115_v6  ;;  %v9756_v17 = vld [vmem:[#allocation14 + $0x3d8] sm:$0xff]  ;;  %v15158_v47 = vcombine.low %v9747_v38, %v9751_v19  ;;  %v9669_v38 = vld [vmem:[#allocation14 + $0x120] sm:$0xff]  ;;  %v9666_v19 = vld [vmem:[#allocation14 + $0x108] sm:$0xff] }
 0x708   : > { %10184 = vmatpush1.bf16.msra.mxu0 %v15110_v11  ;;  %10235 = vmatpush1.bf16.msra.mxu1 %v15112_v42  ;;  %v15126_v11 = vcombine.low %v9715_v4, %v9719_v15  ;;  %v15135_v42 = vcombine.high %v9723_v44, %v9727_v54  ;;  %v15169_v4 = vcombine.high %v9756_v17, %v9760_v29  ;;  %v9633_v15 = vld [vmem:[#allocation14] sm:$0xff] }
 0x709   : > { %v9614_v41 = vmul.f32 %v9611_v59, %v19117_v45  ;;  %10185 = vmatprep.subr.bf16.mxu0 %v15119_v39  ;;  %10236 = vmatprep.subr.bf16.mxu1 %v15121_v22  ;;  %v15144_v59 = vcombine.low %v9732_v53, %v9736_v8  ;;  %v15160_v39 = vcombine.low %v9748_v34, %v9752_v40  ;;  %v9641_v44 = vld [vmem:[#allocation14 + $0x40] sm:$0xff]  ;;  %v9650_v53 = vld [vmem:[#allocation14 + $0x88] sm:$0xff] }
 0x70a   : > { %10123 = vmatprep.mubr.bf16.mxu0 %v19741_v28  ;;  %10174 = vmatprep.mubr.bf16.mxu1 %v19741_v28  ;;  %v15167_v22 = vcombine.high %v9755_v18, %v9759_v13  ;;  %v9645_v54 = vld [vmem:[#allocation14 + $0x60] sm:$0xff]  ;;  %v9654_v8 = vld [vmem:[#allocation14 + $0xa8] sm:$0xff]  ;;  %v15194_v40 = vcombine.low %v9657_v49, %v9661_v5 }
 0x70b   : > { %9617 = vst [vmem:[#allocation2 + $0x18] sm:$0xff] %v9614_v41  ;;  %v19130_v24 = vpack.c.bf16 %v9614_v41, %v9614_v41  ;;  %v15168_v41 = vcombine.low %v9756_v17, %v9760_v29  ;;  %v9670_v34 = vld [vmem:[#allocation14 + $0x128] sm:$0xff] }
 0x70c   : > { %10186 = vmatpush1.bf16.msra.mxu0 %v15118_v27  ;;  %10237 = vmatpush1.bf16.msra.mxu1 %v15120_v26  ;;  %v9638_v27 = vld [vmem:[#allocation14 + $0x28] sm:$0xff]  ;;  %v15166_v26 = vcombine.low %v9755_v18, %v9759_v13  ;;  %v9677_v18 = vld [vmem:[#allocation14 + $0x160] sm:$0xff] }
 0x70d   : > { %10187 = vmatprep.subr.bf16.mxu0 %v15127_v0  ;;  %10238 = vmatprep.subr.bf16.mxu1 %v15129_v14  ;;  %v15171_v0 = vcombine.high %v9633_v15, %v9637_v16  ;;  %v15173_v14 = vcombine.high %v9634_v35, %v9638_v27  ;;  %v9674_v13 = vld [vmem:[#allocation14 + $0x148] sm:$0xff] }
 0x70e   : > { %v9678_v17 = vld [vmem:[#allocation14 + $0x168] sm:$0xff] }
 0x70f   : > { %10124 = vmatmul.mubr.bf16.gmra.mrb[164].mxu0 %v19130_v24  ;;  %10175 = vmatmul.mubr.bf16.gmra.mrb[164].mxu1 %v19130_v24 }
 0x710   : > { %10188 = vmatpush1.bf16.msra.mxu0 %v15126_v11  ;;  %10239 = vmatpush1.bf16.msra.mxu1 %v15128_v7  ;;  %v15170_v11 = vcombine.low %v9633_v15, %v9637_v16  ;;  %v15172_v7 = vcombine.low %v9634_v35, %v9638_v27  ;;  %v9682_v15 = vld [vmem:[#allocation14 + $0x188] sm:$0xff]  ;;  %v15212_v27 = vcombine.low %v9674_v13, %v9678_v17 }
 0x711   : > { %10189 = vmatprep.subr.bf16.mxu0 %v15135_v42  ;;  %10240 = vmatprep.subr.bf16.mxu1 %v15137_v31  ;;  %v15179_v42 = vcombine.high %v9641_v44, %v9645_v54  ;;  %v15181_v31 = vcombine.high %v9642_v9, %v9646_v48  ;;  %v9686_v16 = vld [vmem:[#allocation14 + $0x1a8] sm:$0xff] }
 0x712   : > { %10215 = vmatprep.mubr.bf16.mxu0 %v19741_v28  ;;  %10266 = vmatprep.mubr.bf16.mxu1 %v19741_v28 }
 0x714   : > { %10190 = vmatpush1.bf16.msra.mxu0 %v15134_v30  ;;  %10241 = vmatpush1.bf16.msra.mxu1 %v15136_v43  ;;  %v15178_v30 = vcombine.low %v9641_v44, %v9645_v54  ;;  %v15180_v43 = vcombine.low %v9642_v9, %v9646_v48  ;;  %v9690_v44 = vld [vmem:[#allocation14 + $0x1c8] sm:$0xff]  ;;  %v15220_v48 = vcombine.low %v9682_v15, %v9686_v16 }
 0x715   : > { %10191 = vmatprep.subr.bf16.mxu0 %v15143_v61  ;;  %10242 = vmatprep.subr.bf16.mxu1 %v15145_v52  ;;  %v15187_v61 = vcombine.high %v9649_v62, %v9653_v25  ;;  %v15189_v52 = vcombine.high %v9650_v53, %v9654_v8  ;;  %v9694_v54 = vld [vmem:[#allocation14 + $0x1e8] sm:$0xff] }
 0x718   : > { %10192 = vmatpush1.bf16.msra.mxu0 %v15142_v63  ;;  %10243 = vmatpush1.bf16.msra.mxu1 %v15144_v59  ;;  %v15186_v63 = vcombine.low %v9649_v62, %v9653_v25  ;;  %v15195_v59 = vcombine.high %v9657_v49, %v9661_v5  ;;  %v9636_v62 = vld [vmem:[#allocation14 + $0x18] sm:$0xff]  ;;  %v9619_v49 = vld [vmem:[#allocation2 + $0xf] sm:$0xff] }
 0x719   : > { %10193 = vmatprep.subr.bf16.mxu0 %v15151_v32  ;;  %10244 = vmatprep.subr.bf16.mxu1 %v15153_v58  ;;  %v15197_v32 = vcombine.high %v9658_v51, %v9662_v57  ;;  %v9665_v58 = vld [vmem:[#allocation14 + $0x100] sm:$0xff]  ;;  %v9640_v25 = vld [vmem:[#allocation14 + $0x38] sm:$0xff] }
 0x71a   : > { %v15202_v29 = vcombine.low %v9665_v58, %v9669_v38  ;;  %v9644_v5 = vld [vmem:[#allocation14 + $0x58] sm:$0xff] }
 0x71c   : > { %10194 = vmatpush1.bf16.msra.mxu0 %v15150_v55  ;;  %10245 = vmatpush1.bf16.msra.mxu1 %v15152_v2  ;;  %v15196_v55 = vcombine.low %v9658_v51, %v9662_v57  ;;  %v15203_v2 = vcombine.high %v9665_v58, %v9669_v38  ;;  %v9648_v51 = vld [vmem:[#allocation14 + $0x78] sm:$0xff]  ;;  %v9651_v38 = vld [vmem:[#allocation14 + $0x90] sm:$0xff] }
 0x71d   : > { %10195 = vmatprep.subr.bf16.mxu0 %v15159_v3  ;;  %10246 = vmatprep.subr.bf16.mxu1 %v15161_v56  ;;  %v15205_v3 = vcombine.high %v9666_v19, %v9670_v34  ;;  %v9673_v56 = vld [vmem:[#allocation14 + $0x140] sm:$0xff]  ;;  %v15185_v58 = vcombine.high %v9644_v5, %v9648_v51 }
 0x71e   : > { %v15210_v35 = vcombine.low %v9673_v56, %v9677_v18  ;;  %v9618_v57 = vld [vmem:[#allocation2 + $0x7] sm:$0xff] }
 0x720   : > { %10196 = vmatpush1.bf16.msra.mxu0 %v15158_v47  ;;  %10247 = vmatpush1.bf16.msra.mxu1 %v15160_v39  ;;  %v15211_v47 = vcombine.high %v9673_v56, %v9677_v18  ;;  %v15213_v39 = vcombine.high %v9674_v13, %v9678_v17  ;;  %v9659_v18 = vld [vmem:[#allocation14 + $0xd0] sm:$0xff] }
 0x721   : > { %10197 = vmatprep.subr.bf16.mxu0 %v15167_v22  ;;  %10248 = vmatprep.subr.bf16.mxu1 %v15169_v4  ;;  %v9681_v22 = vld [vmem:[#allocation14 + $0x180] sm:$0xff]  ;;  %v9663_v13 = vld [vmem:[#allocation14 + $0xf0] sm:$0xff] }
 0x722   : > { %v9685_v4 = vld [vmem:[#allocation14 + $0x1a0] sm:$0xff]  ;;  %v9620_v17 = vld [vmem:[#allocation2 + $0x17] sm:$0xff] }
 0x723   : > { %v15218_v9 = vcombine.low %v9681_v22, %v9685_v4 }
 0x724   : > { %10198 = vmatpush1.bf16.msra.mxu0 %v15166_v26  ;;  %10249 = vmatpush1.bf16.msra.mxu1 %v15168_v41  ;;  %v15219_v26 = vcombine.high %v9681_v22, %v9685_v4  ;;  %v15221_v41 = vcombine.high %v9682_v15, %v9686_v16  ;;  %v19150_v22 = vpack.c.bf16 %v9620_v17, %v9620_v17  ;;  %v9667_v16 = vld [vmem:[#allocation14 + $0x110] sm:$0xff]  ;;  %v10821_v17 = vld [vmem:[#allocation14 + $0x460] sm:$0xff] }
 0x725   : > { %10605 = vmatprep.subr.bf16.mxu0 %v15171_v0  ;;  %10656 = vmatprep.subr.bf16.mxu1 %v15173_v14  ;;  %v9689_v0 = vld [vmem:[#allocation14 + $0x1c0] sm:$0xff]  ;;  %v15199_v4 = vcombine.high %v9659_v18, %v9663_v13 }
 0x726   : > { %v9693_v14 = vld [vmem:[#allocation14 + $0x1e0] sm:$0xff] }
 0x727   : > { %10216 = vmatmul.mubr.bf16.vlgmr.msra.gmra.mrb[168].mxu0 %v19115_v6  ;;  %10267 = vmatmul.mubr.bf16.vlgmr.msra.gmra.mrb[168].mxu1 %v19115_v6  ;;  %v15188_v6 = vcombine.low %v9650_v53, %v9654_v8  ;;  %v15226_v53 = vcombine.low %v9689_v0, %v9693_v14  ;;  %v15228_v8 = vcombine.low %v9690_v44, %v9694_v54 }
 0x728   : > { %10606 = vmatpush1.bf16.msra.mxu0 %v15170_v11  ;;  %10657 = vmatpush1.bf16.msra.mxu1 %v15172_v7  ;;  %v15227_v11 = vcombine.high %v9689_v0, %v9693_v14  ;;  %v15229_v7 = vcombine.high %v9690_v44, %v9694_v54  ;;  %v9675_v54 = vld [vmem:[#allocation14 + $0x150] sm:$0xff] }
 0x729   : > { %10607 = vmatprep.subr.bf16.mxu0 %v15179_v42  ;;  %10658 = vmatprep.subr.bf16.mxu1 %v15181_v31  ;;  %v9635_v42 = vld [vmem:[#allocation14 + $0x10] sm:$0xff] }
 0x72a   : > { %10225 = vmatprep.mubr.bf16.mxu0 %v19741_v28  ;;  %10276 = vmatprep.mubr.bf16.mxu1 %v19741_v28  ;;  %v9639_v31 = vld [vmem:[#allocation14 + $0x30] sm:$0xff] }
 0x72c   : > { %10608 = vmatpush1.bf16.msra.mxu0 %v15178_v30  ;;  %10659 = vmatpush1.bf16.msra.mxu1 %v15180_v43  ;;  %v15175_v30 = vcombine.high %v9635_v42, %v9639_v31  ;;  %v15177_v43 = vcombine.high %v9636_v62, %v9640_v25 }
 0x72d   : > { %10609 = vmatprep.subr.bf16.mxu0 %v15187_v61  ;;  %10660 = vmatprep.subr.bf16.mxu1 %v15189_v52  ;;  %v9643_v61 = vld [vmem:[#allocation14 + $0x50] sm:$0xff] }
 0x72e   : > { %v9647_v52 = vld [vmem:[#allocation14 + $0x70] sm:$0xff] }
 0x72f   : > { %10226 = vmatmul.mubr.bf16.gmra.mrb[172].mxu0 %v19130_v24  ;;  %10277 = vmatmul.mubr.bf16.gmra.mrb[172].mxu1 %v19130_v24  ;;  %v15204_v24 = vcombine.low %v9666_v19, %v9670_v34  ;;  %v9655_v19 = vld [vmem:[#allocation14 + $0xb0] sm:$0xff]  ;;  %v9652_v34 = vld [vmem:[#allocation14 + $0x98] sm:$0xff] }
 0x730   : > { %10610 = vmatpush1.bf16.msra.mxu0 %v15186_v63  ;;  %10661 = vmatpush1.bf16.msra.mxu1 %v15188_v6  ;;  %v15174_v63 = vcombine.low %v9635_v42, %v9639_v31  ;;  %v15176_v6 = vcombine.low %v9636_v62, %v9640_v25  ;;  %v9683_v25 = vld [vmem:[#allocation14 + $0x190] sm:$0xff] }
 0x731   : > { %10611 = vmatprep.subr.bf16.mxu0 %v15195_v59  ;;  %10662 = vmatprep.subr.bf16.mxu1 %v15197_v32  ;;  %v19144_v59 = vpack.c.bf16 %v9619_v49, %v9618_v57  ;;  %v15183_v32 = vcombine.high %v9643_v61, %v9647_v52  ;;  %v9692_v57 = vld [vmem:[#allocation14 + $0x1d8] sm:$0xff] }
 0x732   : > { %10637 = vmatprep.mubr.bf16.mxu0 %v19741_v28  ;;  %10688 = vmatprep.mubr.bf16.mxu1 %v19741_v28 }
 0x734   : > { %10612 = vmatpush1.bf16.msra.mxu0 %v15194_v40  ;;  %10663 = vmatpush1.bf16.msra.mxu1 %v15196_v55  ;;  %v9656_v40 = vld [vmem:[#allocation14 + $0xb8] sm:$0xff]  ;;  %v15182_v55 = vcombine.low %v9643_v61, %v9647_v52 }
 0x735   : > { %10613 = vmatprep.subr.bf16.mxu0 %v15203_v2  ;;  %10664 = vmatprep.subr.bf16.mxu1 %v15205_v3  ;;  %v15184_v2 = vcombine.low %v9644_v5, %v9648_v51  ;;  %v15191_v3 = vcombine.high %v9651_v38, %v9655_v19  ;;  %v15193_v56 = vcombine.high %v9652_v34, %v9656_v40  ;;  %v9691_v5 = vld [vmem:[#allocation14 + $0x1d0] sm:$0xff] }
 0x736   : > { %v9695_v51 = vld [vmem:[#allocation14 + $0x1f0] sm:$0xff] }
 0x738   : > { %10614 = vmatpush1.bf16.msra.mxu0 %v15202_v29  ;;  %10665 = vmatpush1.bf16.msra.mxu1 %v15204_v24  ;;  %v9660_v29 = vld [vmem:[#allocation14 + $0xd8] sm:$0xff] }
 0x739   : > { %10615 = vmatprep.subr.bf16.mxu0 %v15211_v47  ;;  %10666 = vmatprep.subr.bf16.mxu1 %v15213_v39  ;;  %v9664_v24 = vld [vmem:[#allocation14 + $0xf8] sm:$0xff]  ;;  %v15190_v47 = vcombine.low %v9651_v38, %v9655_v19  ;;  %v15192_v39 = vcombine.low %v9652_v34, %v9656_v40  ;;  %v10809_v19 = vld [vmem:[#allocation14 + $0x400] sm:$0xff]  ;;  %v10810_v40 = vld [vmem:[#allocation14 + $0x408] sm:$0xff] }
 0x73a   : > { %v15201_v15 = vcombine.high %v9660_v29, %v9664_v24  ;;  %v15200_v0 = vcombine.low %v9660_v29, %v9664_v24  ;;  %v10813_v34 = vld [vmem:[#allocation14 + $0x420] sm:$0xff]  ;;  %v10818_v29 = vld [vmem:[#allocation14 + $0x448] sm:$0xff] }
 0x73b   : > { %v10822_v24 = vld [vmem:[#allocation14 + $0x468] sm:$0xff] }
 0x73c   : > { %10616 = vmatpush1.bf16.msra.mxu0 %v15210_v35  ;;  %10667 = vmatpush1.bf16.msra.mxu1 %v15212_v27  ;;  %v9671_v35 = vld [vmem:[#allocation14 + $0x130] sm:$0xff]  ;;  %v9668_v27 = vld [vmem:[#allocation14 + $0x118] sm:$0xff] }
 0x73d   : > { %10617 = vmatprep.subr.bf16.mxu0 %v15219_v26  ;;  %10668 = vmatprep.subr.bf16.mxu1 %v15221_v41  ;;  %v9672_v26 = vld [vmem:[#allocation14 + $0x138] sm:$0xff]  ;;  %v15198_v41 = vcombine.low %v9659_v18, %v9663_v13  ;;  %v15207_v14 = vcombine.high %v9667_v16, %v9671_v35  ;;  %v10817_v13 = vld [vmem:[#allocation14 + $0x440] sm:$0xff] }
 0x73e   : > { %v15209_v44 = vcombine.high %v9668_v27, %v9672_v26  ;;  %v15208_v42 = vcombine.low %v9668_v27, %v9672_v26  ;;  %v10826_v27 = vld [vmem:[#allocation14 + $0x488] sm:$0xff] }
 0x73f   : > { %v10830_v26 = vld [vmem:[#allocation14 + $0x4a8] sm:$0xff] }
 0x740   : > { %10618 = vmatpush1.bf16.msra.mxu0 %v15218_v9  ;;  %10669 = vmatpush1.bf16.msra.mxu1 %v15220_v48  ;;  %v9679_v9 = vld [vmem:[#allocation14 + $0x170] sm:$0xff]  ;;  %v9676_v48 = vld [vmem:[#allocation14 + $0x158] sm:$0xff] }
 0x741   : > { %10619 = vmatprep.subr.bf16.mxu0 %v15227_v11  ;;  %10670 = vmatprep.subr.bf16.mxu1 %v15229_v7  ;;  %v9680_v11 = vld [vmem:[#allocation14 + $0x178] sm:$0xff]  ;;  %v15206_v7 = vcombine.low %v9667_v16, %v9671_v35  ;;  %v15215_v31 = vcombine.high %v9675_v54, %v9679_v9  ;;  %v10825_v16 = vld [vmem:[#allocation14 + $0x480] sm:$0xff] }
 0x742   : > { %v15217_v62 = vcombine.high %v9676_v48, %v9680_v11  ;;  %v15216_v61 = vcombine.low %v9676_v48, %v9680_v11  ;;  %v10829_v35 = vld [vmem:[#allocation14 + $0x4a0] sm:$0xff]  ;;  %v10834_v48 = vld [vmem:[#allocation14 + $0x4c8] sm:$0xff] }
 0x743   : > { %v10838_v11 = vld [vmem:[#allocation14 + $0x4e8] sm:$0xff] }
 0x744   : > { %10620 = vmatpush1.bf16.msra.mxu0 %v15226_v53  ;;  %10671 = vmatpush1.bf16.msra.mxu1 %v15228_v8  ;;  %v9687_v53 = vld [vmem:[#allocation14 + $0x1b0] sm:$0xff]  ;;  %v9684_v8 = vld [vmem:[#allocation14 + $0x198] sm:$0xff] }
 0x745   : > { %10707 = vmatprep.subr.bf16.mxu0 %v15175_v30  ;;  %10758 = vmatprep.subr.bf16.mxu1 %v15177_v43  ;;  %v9688_v30 = vld [vmem:[#allocation14 + $0x1b8] sm:$0xff]  ;;  %v15214_v43 = vcombine.low %v9675_v54, %v9679_v9  ;;  %v15223_v52 = vcombine.high %v9683_v25, %v9687_v53  ;;  %v10833_v54 = vld [vmem:[#allocation14 + $0x4c0] sm:$0xff] }
 0x746   : > { %v15225_v49 = vcombine.high %v9684_v8, %v9688_v30  ;;  %v10837_v9 = vld [vmem:[#allocation14 + $0x4e0] sm:$0xff] }
 0x747   : > { %10638 = vmatmul.mubr.bf16.vlgmr.msra.gmra.mrb[160].mxu0 %v19144_v59  ;;  %10689 = vmatmul.mubr.bf16.vlgmr.msra.gmra.mrb[160].mxu1 %v19144_v59 }
 0x748   : > { %10708 = vmatpush1.bf16.msra.mxu0 %v15174_v63  ;;  %10759 = vmatpush1.bf16.msra.mxu1 %v15176_v6  ;;  %v9696_v63 = vld [vmem:[#allocation14 + $0x1f8] sm:$0xff]  ;;  %v15222_v6 = vcombine.low %v9683_v25, %v9687_v53  ;;  %v10845_v25 = vld [vmem:[#allocation14 + $0x520] sm:$0xff]  ;;  %v10842_v53 = vld [vmem:[#allocation14 + $0x508] sm:$0xff] }
 0x749   : > { %10709 = vmatprep.subr.bf16.mxu0 %v15183_v32  ;;  %10760 = vmatprep.subr.bf16.mxu1 %v15185_v58  ;;  %v15224_v32 = vcombine.low %v9684_v8, %v9688_v30  ;;  %v15231_v58 = vcombine.high %v9691_v5, %v9695_v51  ;;  %v15233_v38 = vcombine.high %v9692_v57, %v9696_v63  ;;  %v10846_v8 = vld [vmem:[#allocation14 + $0x528] sm:$0xff] }
 0x74a   : > { %10647 = vmatprep.mubr.bf16.mxu0 %v19741_v28  ;;  %10698 = vmatprep.mubr.bf16.mxu1 %v19741_v28  ;;  %v15258_v30 = vcombine.low %v10833_v54, %v10837_v9 }
 0x74c   : > { %10710 = vmatpush1.bf16.msra.mxu0 %v15182_v55  ;;  %10761 = vmatpush1.bf16.msra.mxu1 %v15184_v2  ;;  %v10814_v55 = vld [vmem:[#allocation14 + $0x428] sm:$0xff]  ;;  %v15230_v2 = vcombine.low %v9691_v5, %v9695_v51  ;;  %v10853_v5 = vld [vmem:[#allocation14 + $0x560] sm:$0xff] }
 0x74d   : > { %10711 = vmatprep.subr.bf16.mxu0 %v15191_v3  ;;  %10762 = vmatprep.subr.bf16.mxu1 %v15193_v56  ;;  %v15232_v3 = vcombine.low %v9692_v57, %v9696_v63  ;;  %v15235_v56 = vcombine.high %v10809_v19, %v10813_v34  ;;  %v15237_v18 = vcombine.high %v10810_v40, %v10814_v55  ;;  %v10850_v51 = vld [vmem:[#allocation14 + $0x548] sm:$0xff] }
 0x74e   : > { %v10854_v57 = vld [vmem:[#allocation14 + $0x568] sm:$0xff] }
 0x74f   : > { %10648 = vmatmul.mubr.bf16.gmra.mrb[176].mxu0 %v19150_v22  ;;  %10699 = vmatmul.mubr.bf16.gmra.mrb[176].mxu1 %v19150_v22 }
 0x750   : > { %10712 = vmatpush1.bf16.msra.mxu0 %v15190_v47  ;;  %10763 = vmatpush1.bf16.msra.mxu1 %v15192_v39  ;;  %v15234_v47 = vcombine.low %v10809_v19, %v10813_v34  ;;  %v15236_v39 = vcombine.low %v10810_v40, %v10814_v55  ;;  %v10858_v19 = vld [vmem:[#allocation14 + $0x588] sm:$0xff]  ;;  %v15276_v55 = vcombine.low %v10850_v51, %v10854_v57 }
 0x751   : > { %10713 = vmatprep.subr.bf16.mxu0 %v15199_v4  ;;  %10764 = vmatprep.subr.bf16.mxu1 %v15201_v15  ;;  %v15243_v4 = vcombine.high %v10817_v13, %v10821_v17  ;;  %v15245_v15 = vcombine.high %v10818_v29, %v10822_v24  ;;  %v10862_v34 = vld [vmem:[#allocation14 + $0x5a8] sm:$0xff] }
 0x752   : > { %10739 = vmatprep.mubr.bf16.mxu0 %v19741_v28  ;;  %10790 = vmatprep.mubr.bf16.mxu1 %v19741_v28 }
 0x754   : > { %10714 = vmatpush1.bf16.msra.mxu0 %v15198_v41  ;;  %10765 = vmatpush1.bf16.msra.mxu1 %v15200_v0  ;;  %v15242_v41 = vcombine.low %v10817_v13, %v10821_v17  ;;  %v15244_v0 = vcombine.low %v10818_v29, %v10822_v24  ;;  %v10866_v13 = vld [vmem:[#allocation14 + $0x5c8] sm:$0xff]  ;;  %v15284_v24 = vcombine.low %v10858_v19, %v10862_v34 }
 0x755   : > { %10715 = vmatprep.subr.bf16.mxu0 %v15207_v14  ;;  %10766 = vmatprep.subr.bf16.mxu1 %v15209_v44  ;;  %v15251_v14 = vcombine.high %v10825_v16, %v10829_v35  ;;  %v15253_v44 = vcombine.high %v10826_v27, %v10830_v26  ;;  %v10870_v17 = vld [vmem:[#allocation14 + $0x5e8] sm:$0xff] }
 0x758   : > { %10716 = vmatpush1.bf16.msra.mxu0 %v15206_v7  ;;  %10767 = vmatpush1.bf16.msra.mxu1 %v15208_v42  ;;  %v15250_v7 = vcombine.low %v10825_v16, %v10829_v35  ;;  %v15259_v42 = vcombine.high %v10833_v54, %v10837_v9  ;;  %v10812_v16 = vld [vmem:[#allocation14 + $0x418] sm:$0xff]  ;;  %v9629_v54 = vld [vmem:[#allocation2 + $0x11] sm:$0xff] }
 0x759   : > { %10717 = vmatprep.subr.bf16.mxu0 %v15215_v31  ;;  %10768 = vmatprep.subr.bf16.mxu1 %v15217_v62  ;;  %v15261_v31 = vcombine.high %v10834_v48, %v10838_v11  ;;  %v10841_v62 = vld [vmem:[#allocation14 + $0x500] sm:$0xff]  ;;  %v10816_v35 = vld [vmem:[#allocation14 + $0x438] sm:$0xff] }
 0x75a   : > { %v15266_v63 = vcombine.low %v10841_v62, %v10845_v25  ;;  %v10820_v9 = vld [vmem:[#allocation14 + $0x458] sm:$0xff] }
 0x75c   : > { %10718 = vmatpush1.bf16.msra.mxu0 %v15214_v43  ;;  %10769 = vmatpush1.bf16.msra.mxu1 %v15216_v61  ;;  %v15260_v43 = vcombine.low %v10834_v48, %v10838_v11  ;;  %v15267_v61 = vcombine.high %v10841_v62, %v10845_v25  ;;  %v10824_v48 = vld [vmem:[#allocation14 + $0x478] sm:$0xff]  ;;  %v9628_v11 = vld [vmem:[#allocation2 + $0x9] sm:$0xff]  ;;  %v10827_v25 = vld [vmem:[#allocation14 + $0x490] sm:$0xff] }
 0x75d   : > { %10719 = vmatprep.subr.bf16.mxu0 %v15223_v52  ;;  %10770 = vmatprep.subr.bf16.mxu1 %v15225_v49  ;;  %v15269_v52 = vcombine.high %v10842_v53, %v10846_v8  ;;  %v10849_v49 = vld [vmem:[#allocation14 + $0x540] sm:$0xff]  ;;  %v15249_v62 = vcombine.high %v10820_v9, %v10824_v48 }
 0x75e   : > { %v15274_v40 = vcombine.low %v10849_v49, %v10853_v5 }
 0x760   : > { %10720 = vmatpush1.bf16.msra.mxu0 %v15222_v6  ;;  %10771 = vmatpush1.bf16.msra.mxu1 %v15224_v32  ;;  %v15275_v6 = vcombine.high %v10849_v49, %v10853_v5  ;;  %v15277_v32 = vcombine.high %v10850_v51, %v10854_v57  ;;  %v10835_v5 = vld [vmem:[#allocation14 + $0x4d0] sm:$0xff] }
 0x761   : > { %10721 = vmatprep.subr.bf16.mxu0 %v15231_v58  ;;  %10772 = vmatprep.subr.bf16.mxu1 %v15233_v38  ;;  %v10857_v58 = vld [vmem:[#allocation14 + $0x580] sm:$0xff]  ;;  %v10839_v51 = vld [vmem:[#allocation14 + $0x4f0] sm:$0xff] }
 0x762   : > { %v10861_v38 = vld [vmem:[#allocation14 + $0x5a0] sm:$0xff]  ;;  %v9630_v57 = vld [vmem:[#allocation2 + $0x19] sm:$0xff] }
 0x763   : > { %v15282_v29 = vcombine.low %v10857_v58, %v10861_v38 }
 0x764   : > { %10722 = vmatpush1.bf16.msra.mxu0 %v15230_v2  ;;  %10773 = vmatpush1.bf16.msra.mxu1 %v15232_v3  ;;  %v15283_v2 = vcombine.high %v10857_v58, %v10861_v38  ;;  %v15285_v3 = vcombine.high %v10858_v19, %v10862_v34  ;;  %v19170_v58 = vpack.c.bf16 %v9630_v57, %v9630_v57  ;;  %v10843_v34 = vld [vmem:[#allocation14 + $0x510] sm:$0xff] }
 0x765   : > { %11193 = vmatprep.subr.bf16.mxu0 %v15235_v56  ;;  %11244 = vmatprep.subr.bf16.mxu1 %v15237_v18  ;;  %v10865_v56 = vld [vmem:[#allocation14 + $0x5c0] sm:$0xff]  ;;  %v15263_v38 = vcombine.high %v10835_v5, %v10839_v51  ;;  %v17109_v57 = vld [vmem:[#allocation15 + $0x250] sm:$0xff]  }
 0x766   : > { %v10869_v18 = vld [vmem:[#allocation14 + $0x5e0] sm:$0xff] }
 0x767   : > { %10740 = vmatmul.mubr.bf16.vlgmr.msra.gmra.mrb[168].mxu0 %v19144_v59  ;;  %10791 = vmatmul.mubr.bf16.vlgmr.msra.gmra.mrb[168].mxu1 %v19144_v59  ;;  %v15252_v59 = vcombine.low %v10826_v27, %v10830_v26  ;;  %v15290_v27 = vcombine.low %v10865_v56, %v10869_v18  ;;  %v15292_v26 = vcombine.low %v10866_v13, %v10870_v17 }
 0x768   : > { %11194 = vmatpush1.bf16.msra.mxu0 %v15234_v47  ;;  %11245 = vmatpush1.bf16.msra.mxu1 %v15236_v39  ;;  %v15291_v47 = vcombine.high %v10865_v56, %v10869_v18  ;;  %v15293_v39 = vcombine.high %v10866_v13, %v10870_v17  ;;  %v10851_v17 = vld [vmem:[#allocation14 + $0x550] sm:$0xff] }
 0x769   : > { %11195 = vmatprep.subr.bf16.mxu0 %v15243_v4  ;;  %11246 = vmatprep.subr.bf16.mxu1 %v15245_v15  ;;  %v10811_v4 = vld [vmem:[#allocation14 + $0x410] sm:$0xff] }
 0x76a   : > { %10749 = vmatprep.mubr.bf16.mxu0 %v19741_v28  ;;  %10800 = vmatprep.mubr.bf16.mxu1 %v19741_v28  ;;  %v10815_v15 = vld [vmem:[#allocation14 + $0x430] sm:$0xff] }
 0x76c   : > { %11196 = vmatpush1.bf16.msra.mxu0 %v15242_v41  ;;  %11247 = vmatpush1.bf16.msra.mxu1 %v15244_v0  ;;  %v15239_v41 = vcombine.high %v10811_v4, %v10815_v15  ;;  %v15241_v0 = vcombine.high %v10812_v16, %v10816_v35 }
 0x76d   : > { %11197 = vmatprep.subr.bf16.mxu0 %v15251_v14  ;;  %11248 = vmatprep.subr.bf16.mxu1 %v15253_v44  ;;  %v10819_v14 = vld [vmem:[#allocation14 + $0x450] sm:$0xff] }
 0x76e   : > { %v10823_v44 = vld [vmem:[#allocation14 + $0x470] sm:$0xff] }
 0x76f   : > { %10750 = vmatmul.mubr.bf16.gmra.mrb[180].mxu0 %v19150_v22  ;;  %10801 = vmatmul.mubr.bf16.gmra.mrb[180].mxu1 %v19150_v22  ;;  %v15268_v22 = vcombine.low %v10842_v53, %v10846_v8  ;;  %v10831_v53 = vld [vmem:[#allocation14 + $0x4b0] sm:$0xff]  ;;  %v10828_v8 = vld [vmem:[#allocation14 + $0x498] sm:$0xff] }
 0x770   : > { %11198 = vmatpush1.bf16.msra.mxu0 %v15250_v7  ;;  %11249 = vmatpush1.bf16.msra.mxu1 %v15252_v59  ;;  %v15238_v7 = vcombine.low %v10811_v4, %v10815_v15  ;;  %v15240_v59 = vcombine.low %v10812_v16, %v10816_v35  ;;  %v10859_v35 = vld [vmem:[#allocation14 + $0x590] sm:$0xff] }
 0x771   : > { %11199 = vmatprep.subr.bf16.mxu0 %v15259_v42  ;;  %11250 = vmatprep.subr.bf16.mxu1 %v15261_v31  ;;  %v19164_v42 = vpack.c.bf16 %v9629_v54, %v9628_v11  ;;  %v15247_v31 = vcombine.high %v10819_v14, %v10823_v44  ;;  %v10868_v11 = vld [vmem:[#allocation14 + $0x5d8] sm:$0xff] }
 0x772   : > { %11225 = vmatprep.mubr.bf16.mxu0 %v19741_v28  ;;  %11276 = vmatprep.mubr.bf16.mxu1 %v19741_v28 }
 0x774   : > { %11200 = vmatpush1.bf16.msra.mxu0 %v15258_v30  ;;  %11251 = vmatpush1.bf16.msra.mxu1 %v15260_v43  ;;  %v10832_v30 = vld [vmem:[#allocation14 + $0x4b8] sm:$0xff]  ;;  %v15246_v43 = vcombine.low %v10819_v14, %v10823_v44 }
 0x775   : > { %11201 = vmatprep.subr.bf16.mxu0 %v15267_v61  ;;  %11252 = vmatprep.subr.bf16.mxu1 %v15269_v52  ;;  %v15248_v61 = vcombine.low %v10820_v9, %v10824_v48  ;;  %v15255_v52 = vcombine.high %v10827_v25, %v10831_v53  ;;  %v15257_v49 = vcombine.high %v10828_v8, %v10832_v30  ;;  %v10867_v9 = vld [vmem:[#allocation14 + $0x5d0] sm:$0xff] }
 0x776   : > { %v10871_v48 = vld [vmem:[#allocation14 + $0x5f0] sm:$0xff] }
 0x778   : > { %11202 = vmatpush1.bf16.msra.mxu0 %v15266_v63  ;;  %11253 = vmatpush1.bf16.msra.mxu1 %v15268_v22  ;;  %v10836_v63 = vld [vmem:[#allocation14 + $0x4d8] sm:$0xff] }
 0x779   : > { %11203 = vmatprep.subr.bf16.mxu0 %v15275_v6  ;;  %11254 = vmatprep.subr.bf16.mxu1 %v15277_v32  ;;  %v10840_v22 = vld [vmem:[#allocation14 + $0x4f8] sm:$0xff]  ;;  %v15254_v6 = vcombine.low %v10827_v25, %v10831_v53  ;;  %v15256_v32 = vcombine.low %v10828_v8, %v10832_v30  ;;  %v15294_v53 = vcombine.low %v10867_v9, %v10871_v48  ;;  %v17101_v30 = vld [vmem:[#allocation15 + $0x240] sm:$0xff]  }
 0x77a   : > { %v15265_v19 = vcombine.high %v10836_v63, %v10840_v22  ;;  %v15264_v56 = vcombine.low %v10836_v63, %v10840_v22  ;;  %v17111_v63 = vld [vmem:[#allocation15 + $0x210] sm:$0xff]  }
 0x77b   : > { %v17112_v22 = vld [vmem:[#allocation15 + $0x290] sm:$0xff]  }
 0x77c   : > { %11204 = vmatpush1.bf16.msra.mxu0 %v15274_v40  ;;  %11255 = vmatpush1.bf16.msra.mxu1 %v15276_v55  ;;  %v10847_v40 = vld [vmem:[#allocation14 + $0x530] sm:$0xff]  ;;  %v10844_v55 = vld [vmem:[#allocation14 + $0x518] sm:$0xff] }
 0x77d   : > { %11205 = vmatprep.subr.bf16.mxu0 %v15283_v2  ;;  %11256 = vmatprep.subr.bf16.mxu1 %v15285_v3  ;;  %v10848_v2 = vld [vmem:[#allocation14 + $0x538] sm:$0xff]  ;;  %v15262_v3 = vcombine.low %v10835_v5, %v10839_v51  ;;  %v15271_v18 = vcombine.high %v10843_v34, %v10847_v40  ;;  %v17106_v5 = vld [vmem:[#allocation15 + $0x2c8] sm:$0xff]  }
 0x77e   : > { %v15273_v13 = vcombine.high %v10844_v55, %v10848_v2  ;;  %v15272_v4 = vcombine.low %v10844_v55, %v10848_v2  ;;  %v17107_v51 = vld [vmem:[#allocation15 + $0x208] sm:$0xff]   ;;  %v17113_v2 = vld [vmem:[#allocation15 + $0x258] sm:$0xff]  }
 0x780   : > { %11206 = vmatpush1.bf16.msra.mxu0 %v15282_v29  ;;  %11257 = vmatpush1.bf16.msra.mxu1 %v15284_v24  ;;  %v10855_v29 = vld [vmem:[#allocation14 + $0x570] sm:$0xff]  ;;  %v10852_v24 = vld [vmem:[#allocation14 + $0x558] sm:$0xff] }
 0x781   : > { %11207 = vmatprep.subr.bf16.mxu0 %v15291_v47  ;;  %11258 = vmatprep.subr.bf16.mxu1 %v15293_v39  ;;  %v10856_v47 = vld [vmem:[#allocation14 + $0x578] sm:$0xff]  ;;  %v15270_v39 = vcombine.low %v10843_v34, %v10847_v40  ;;  %v15279_v15 = vcombine.high %v10851_v17, %v10855_v29 }
 0x782   : > { %v15281_v16 = vcombine.high %v10852_v24, %v10856_v47  ;;  %v15280_v14 = vcombine.low %v10852_v24, %v10856_v47  ;;  %v17120_v24 = vld [vmem:[#allocation15 + $0x2a0] sm:$0xff]   ;;  %v17121_v47 = vld [vmem:[#allocation15 + $0x268] sm:$0xff]  }
 0x784   : > { %11208 = vmatpush1.bf16.msra.mxu0 %v15290_v27  ;;  %11259 = vmatpush1.bf16.msra.mxu1 %v15292_v26  ;;  %v10863_v27 = vld [vmem:[#allocation14 + $0x5b0] sm:$0xff]  ;;  %v10860_v26 = vld [vmem:[#allocation14 + $0x598] sm:$0xff] }
 0x785   : > { %11295 = vmatprep.subr.bf16.mxu0 %v15239_v41  ;;  %11346 = vmatprep.subr.bf16.mxu1 %v15241_v0  ;;  %v10864_v41 = vld [vmem:[#allocation14 + $0x5b8] sm:$0xff]  ;;  %v15278_v0 = vcombine.low %v10851_v17, %v10855_v29  ;;  %v15287_v44 = vcombine.high %v10859_v35, %v10863_v27  ;;  %v17118_v17 = vld [vmem:[#allocation15 + $0x2e0] sm:$0xff]  }
 0x786   : > { %v15289_v54 = vcombine.high %v10860_v26, %v10864_v41  ;;  %v17119_v29 = vld [vmem:[#allocation15 + $0x220] sm:$0xff]  }
 0x787   : > { %11226 = vmatmul.mubr.bf16.vlgmr.msra.gmra.mrb[160].mxu0 %v19164_v42  ;;  %11277 = vmatmul.mubr.bf16.vlgmr.msra.gmra.mrb[160].mxu1 %v19164_v42 }
 0x788   : > { %11296 = vmatpush1.bf16.msra.mxu0 %v15238_v7  ;;  %11347 = vmatpush1.bf16.msra.mxu1 %v15240_v59  ;;  %v10872_v7 = vld [vmem:[#allocation14 + $0x5f8] sm:$0xff]  ;;  %v15286_v59 = vcombine.low %v10859_v35, %v10863_v27  ;;  %v17126_v35 = vld [vmem:[#allocation15 + $0x2f0] sm:$0xff]  }
 0x789   : > { %11297 = vmatprep.subr.bf16.mxu0 %v15247_v31  ;;  %11348 = vmatprep.subr.bf16.mxu1 %v15249_v62  ;;  %v15288_v31 = vcombine.low %v10860_v26, %v10864_v41  ;;  %v15295_v62 = vcombine.high %v10867_v9, %v10871_v48  ;;  %v15297_v25 = vcombine.high %v10868_v11, %v10872_v7  ;;  %v17127_v27 = vld [vmem:[#allocation15 + $0x230] sm:$0xff]   ;;  %v17129_v41 = vld [vmem:[#allocation15 + $0x278] sm:$0xff]   ;;  %v17134_v9 = vld [vmem:[#allocation15 + $0x3c0] sm:$0xff]  }
 0x78a   : > { %11235 = vmatprep.mubr.bf16.mxu0 %v19741_v28  ;;  %11286 = vmatprep.mubr.bf16.mxu1 %v19741_v28  ;;  %v15296_v8 = vcombine.low %v10868_v11, %v10872_v7  ;;  %v17128_v26 = vld [vmem:[#allocation15 + $0x2b0] sm:$0xff]  }
 0x78c   : > { %11298 = vmatpush1.bf16.msra.mxu0 %v15246_v43  ;;  %11349 = vmatpush1.bf16.msra.mxu1 %v15248_v61  ;;  %v17102_v43 = vld [vmem:[#allocation15 + $0x2c0] sm:$0xff]  }
 0x78d   : > { %11299 = vmatprep.subr.bf16.mxu0 %v15255_v52  ;;  %11350 = vmatprep.subr.bf16.mxu1 %v15257_v49  ;;  %v17103_v61 = vld [vmem:[#allocation15 + $0x200] sm:$0xff]   ;;  %v17105_v49 = vld [vmem:[#allocation15 + $0x248] sm:$0xff]  }
 0x78e   : > { %v17104_v52 = vld [vmem:[#allocation15 + $0x280] sm:$0xff]  }
 0x78f   : > { %11236 = vmatmul.mubr.bf16.gmra.mrb[184].mxu0 %v19170_v58  ;;  %11287 = vmatmul.mubr.bf16.gmra.mrb[184].mxu1 %v19170_v58 }
 0x790   : > { %11300 = vmatpush1.bf16.msra.mxu0 %v15254_v6  ;;  %11351 = vmatpush1.bf16.msra.mxu1 %v15256_v32 }
 0x791   : > { %11301 = vmatprep.subr.bf16.mxu0 %v15263_v38  ;;  %11352 = vmatprep.subr.bf16.mxu1 %v15265_v19 }
 0x792   : > { %11327 = vmatprep.mubr.bf16.mxu0 %v19741_v28  ;;  %11378 = vmatprep.mubr.bf16.mxu1 %v19741_v28 }
 0x794   : > { %11302 = vmatpush1.bf16.msra.mxu0 %v15262_v3  ;;  %11353 = vmatpush1.bf16.msra.mxu1 %v15264_v56  ;;  %v17114_v3 = vld [vmem:[#allocation15 + $0x2d8] sm:$0xff]  }
 0x795   : > { %11303 = vmatprep.subr.bf16.mxu0 %v15271_v18  ;;  %11354 = vmatprep.subr.bf16.mxu1 %v15273_v13  ;;  %v17115_v56 = vld [vmem:[#allocation15 + $0x218] sm:$0xff]   ;;  %v17117_v13 = vld [vmem:[#allocation15 + $0x260] sm:$0xff]  }
 0x796   : > { %v17116_v18 = vld [vmem:[#allocation15 + $0x298] sm:$0xff]  }
 0x798   : > { %11304 = vmatpush1.bf16.msra.mxu0 %v15270_v39  ;;  %11355 = vmatpush1.bf16.msra.mxu1 %v15272_v4  ;;  %v17122_v39 = vld [vmem:[#allocation15 + $0x2e8] sm:$0xff]  }
 0x799   : > { %11305 = vmatprep.subr.bf16.mxu0 %v15279_v15  ;;  %11356 = vmatprep.subr.bf16.mxu1 %v15281_v16  ;;  %v17123_v4 = vld [vmem:[#allocation15 + $0x228] sm:$0xff]   ;;  %v17125_v16 = vld [vmem:[#allocation15 + $0x270] sm:$0xff]  }
 0x79a   : > { %v17124_v15 = vld [vmem:[#allocation15 + $0x2a8] sm:$0xff]  }
 0x79c   : > { %11306 = vmatpush1.bf16.msra.mxu0 %v15278_v0  ;;  %11357 = vmatpush1.bf16.msra.mxu1 %v15280_v14  ;;  %v17130_v0 = vld [vmem:[#allocation15 + $0x2f8] sm:$0xff]  }
 0x79d   : > { %11307 = vmatprep.subr.bf16.mxu0 %v15287_v44  ;;  %11358 = vmatprep.subr.bf16.mxu1 %v15289_v54  ;;  %v17131_v14 = vld [vmem:[#allocation15 + $0x238] sm:$0xff]   ;;  %v17133_v54 = vld [vmem:[#allocation15 + $0x340] sm:$0xff]  }
 0x79e   : > { %v17132_v44 = vld [vmem:[#allocation15 + $0x2b8] sm:$0xff]  }
 0x7a0   : > { %11308 = vmatpush1.bf16.msra.mxu0 %v15286_v59  ;;  %11359 = vmatpush1.bf16.msra.mxu1 %v15288_v31 }
 0x7a1   : > { %11309 = vmatprep.subr.bf16.mxu0 %v15295_v62  ;;  %11360 = vmatprep.subr.bf16.mxu1 %v15297_v25 }
 0x7a4   : > { %11310 = vmatpush1.bf16.msra.mxu0 %v15294_v53  ;;  %11361 = vmatpush1.bf16.msra.mxu1 %v15296_v8 }
 0x7a5   : > { %16165 = vmatprep.subr.bf16.mxu0 %v17101_v30  ;;  %16193 = vmatprep.subr.bf16.mxu1 %v17102_v43 }
 0x7a7   : > { %11328 = vmatmul.mubr.bf16.vlgmr.msra.gmra.mrb[168].mxu0 %v19164_v42  ;;  %11379 = vmatmul.mubr.bf16.vlgmr.msra.gmra.mrb[168].mxu1 %v19164_v42  ;;  %v17108_v42 = vld [vmem:[#allocation15 + $0x288] sm:$0xff]  }
 0x7a8   : > { %11337 = vmatprep.mubr.bf16.mxu0 %v19741_v28  ;;  %11388 = vmatprep.mubr.bf16.mxu1 %v19741_v28  ;;  %v17110_v28 = vld [vmem:[#allocation15 + $0x2d0] sm:$0xff]  }
 0x7a9   : > { %16166 = vmatpush3.bf16.msra.mxu0 %v17103_v61  ;;  %16194 = vmatpush3.bf16.msra.mxu1 %v17104_v52 }
 0x7aa   : > { %16167 = vmatprep.subr.bf16.mxu0 %v17105_v49  ;;  %16195 = vmatprep.subr.bf16.mxu1 %v17106_v5 }
 0x7ad   : > { %16168 = vmatpush3.bf16.msra.mxu0 %v17107_v51  ;;  %16196 = vmatpush3.bf16.msra.mxu1 %v17108_v42 }
 0x7ae   : > { %16169 = vmatprep.subr.bf16.mxu0 %v17109_v57  ;;  %16197 = vmatprep.subr.bf16.mxu1 %v17110_v28 }
 0x7af   : > { %11338 = vmatmul.mubr.bf16.gmra.mrb[188].mxu0 %v19170_v58  ;;  %11389 = vmatmul.mubr.bf16.gmra.mrb[188].mxu1 %v19170_v58 }
 0x7b1   : > { %16170 = vmatpush3.bf16.msra.mxu0 %v17111_v63  ;;  %16198 = vmatpush3.bf16.msra.mxu1 %v17112_v22 }
 0x7b2   : > { %16171 = vmatprep.subr.bf16.mxu0 %v17113_v2  ;;  %16199 = vmatprep.subr.bf16.mxu1 %v17114_v3 }
 0x7b5   : > { %16172 = vmatpush3.bf16.msra.mxu0 %v17115_v56  ;;  %16200 = vmatpush3.bf16.msra.mxu1 %v17116_v18  ;;  %v11445_v18 = vstv %s15100_s23 }
 0x7b6   : > { %16173 = vmatprep.subr.bf16.mxu0 %v17117_v13  ;;  %16201 = vmatprep.subr.bf16.mxu1 %v17118_v17  ;;  %v19205_v13 = vmul.f32 %v11445_v18, %v19743_v46 }
 0x7b8   : > { %v19209_v17 = vrot.slane %v19205_v13, %v19744_v60 }
 0x7b9   : > { %16174 = vmatpush3.bf16.msra.mxu0 %v17119_v29  ;;  %16202 = vmatpush3.bf16.msra.mxu1 %v17120_v24  ;;  %v19213_v29 = vrot.slane %v19205_v13, %v19745_v36  ;;  %v19766_v36 = vld [vmem:[#allocation34_spill] sm:$0xff] }
 0x7ba   : > { %16175 = vmatprep.subr.bf16.mxu0 %v17121_v47  ;;  %16203 = vmatprep.subr.bf16.mxu1 %v17122_v39  ;;  %v19217_v39 = vrot.slane %v19205_v13, %v19746_v20 }
 0x7bd   : > { %16176 = vmatpush3.bf16.msra.mxu0 %v17123_v4  ;;  %16204 = vmatpush3.bf16.msra.mxu1 %v17124_v15  ;;  %v19221_v4 = vrot.slane %v19205_v13, %v19747_v37  ;;  %v19764_v15 = vld [vmem:[#allocation32_spill] sm:$0xff] }
 0x7be   : > { %16177 = vmatprep.subr.bf16.mxu0 %v17125_v16  ;;  %16205 = vmatprep.subr.bf16.mxu1 %v17126_v35 }
 0x7c1   : > { %16178 = vmatpush3.bf16.msra.mxu0 %v17127_v27  ;;  %16206 = vmatpush3.bf16.msra.mxu1 %v17128_v26  ;;  %v19765_v27 = vld [vmem:[#allocation33_spill] sm:$0xff] }
 0x7c2   : > { %16179 = vmatprep.subr.bf16.mxu0 %v17129_v41  ;;  %16207 = vmatprep.subr.bf16.mxu1 %v17130_v0 }
 0x7c5   : > { %16180 = vmatpush3.bf16.msra.mxu0 %v17131_v14  ;;  %16208 = vmatpush3.bf16.msra.mxu1 %v17132_v44 }
 0x7c6   : > { %16221 = vmatprep.subr.bf16.mxu0 %v17133_v54  ;;  %16249 = vmatprep.subr.bf16.mxu1 %v17134_v9 }
 0x7e2   : > { %v10125_v6 = vpop.f32.mrb[164].mxu0  ;;  %v10176_v32 = vpop.f32.mrb[164].mxu1 }
 0x7e3   : > { %v19182_v58 = vpop.f32.mrb[165].mxu0  ;;  %v19184_v38 = vpop.f32.mrb[165].mxu1 }
 0x7e4   : > { %v10129_v19 = vpop.f32.mrb[166].mxu0  ;;  %v10180_v34 = vpop.f32.mrb[166].mxu1 }
 0x7e5   : > { %v10130_v40 = vpop.f32.mrb[167].mxu0  ;;  %v10181_v55 = vpop.f32.mrb[167].mxu1 }
 0x802   : > { %v10227_v48 = vpop.f32.mrb[172].mxu0  ;;  %v10278_v11 = vpop.f32.mrb[172].mxu1 }
 0x803   : > { %v10229_v7 = vpop.f32.mrb[173].mxu0  ;;  %v10280_v59 = vpop.f32.mrb[173].mxu1 }
 0x804   : > { %v10231_v31 = vpop.f32.mrb[174].mxu0  ;;  %v10282_v62 = vpop.f32.mrb[174].mxu1 }
 0x805   : > { %v10232_v25 = vpop.f32.mrb[175].mxu0  ;;  %v10283_v53 = vpop.f32.mrb[175].mxu1 }
 0x822   : > { %v10649_v8 = vpop.f32.mrb[176].mxu0  ;;  %v10700_v30 = vpop.f32.mrb[176].mxu1 }
 0x823   : > { %v19186_v43 = vadd.f32 %v10649_v8, %v10125_v6  ;;  %v19188_v61 = vadd.f32 %v10700_v30, %v10176_v32  ;;  %v10651_v52 = vpop.f32.mrb[177].mxu0  ;;  %v10702_v49 = vpop.f32.mrb[177].mxu1 }
 0x824   : > { %v19191_v5 = vadd.f32 %v10651_v52, %v19182_v58  ;;  %v19194_v51 = vadd.f32 %v10702_v49, %v19184_v38  ;;  %v10653_v42 = vpop.f32.mrb[178].mxu0  ;;  %v10704_v57 = vpop.f32.mrb[178].mxu1 }
 0x825   : > { %v10654_v28 = vpop.f32.mrb[179].mxu0  ;;  %v10705_v63 = vpop.f32.mrb[179].mxu1  ;;  %v17321_v57 = vld [vmem:[#allocation12] sm:$0xff] }
 0x826   : > { %v17322_v63 = vld [vmem:[#allocation12 + $0x10] sm:$0xff] }
 0x842   : > { %v10751_v22 = vpop.f32.mrb[180].mxu0  ;;  %v10802_v19 = vpop.f32.mrb[180].mxu1 }
 0x843   : > { %v19196_v34 = vadd.f32 %v10751_v22, %v10227_v48  ;;  %v19198_v6 = vadd.f32 %v10802_v19, %v10278_v11  ;;  %v10753_v32 = vpop.f32.mrb[181].mxu0  ;;  %v10804_v40 = vpop.f32.mrb[181].mxu1 }
 0x844   : > { %v19200_v55 = vadd.f32 %v10753_v32, %v10229_v7  ;;  %v19202_v2 = vadd.f32 %v10804_v40, %v10280_v59  ;;  %v10755_v58 = vpop.f32.mrb[182].mxu0  ;;  %v10806_v3 = vpop.f32.mrb[182].mxu1  ;;  %v17323_v40 = vld [vmem:[#allocation12 + $0x8] sm:$0xff] }
 0x845   : > { %v10756_v38 = vpop.f32.mrb[183].mxu0  ;;  %v10807_v56 = vpop.f32.mrb[183].mxu1  ;;  %v17324_v3 = vld [vmem:[#allocation12 + $0x18] sm:$0xff] }
 0x85a   : > { %v11227_v24 = vpop.f32.mrb[160].mxu0  ;;  %v11278_v47 = vpop.f32.mrb[160].mxu1 }
 0x85b   : > { %v11421_v46 = vadd.f32 %v11227_v24, %v19748_v23  ;;  %v11423_v16 = vadd.f32 %v11278_v47, %v19764_v15  ;;  %v11229_v60 = vpop.f32.mrb[161].mxu0  ;;  %v11280_v35 = vpop.f32.mrb[161].mxu1 }
 0x85c   : > { %v11422_v26 = vadd.f32 %v11229_v60, %v19765_v27  ;;  %v11424_v41 = vadd.f32 %v11280_v35, %v19766_v36  ;;  %v11231_v0 = vpop.f32.mrb[162].mxu0  ;;  %v11282_v14 = vpop.f32.mrb[162].mxu1  ;;  %v17326_v60 = vld [vmem:[#allocation12 + $0x50] sm:$0xff] }
 0x85d   : > { %v11488_v44 = vadd.f32 %v19209_v17, %v11421_v46  ;;  %v11490_v20 = vadd.f32 %v19213_v29, %v11423_v16  ;;  %v11429_v54 = vadd.f32 %v11231_v0, %v19748_v23  ;;  %v11431_v37 = vadd.f32 %v11282_v14, %v19764_v15  ;;  %v11233_v9 = vpop.f32.mrb[163].mxu0  ;;  %v11284_v48 = vpop.f32.mrb[163].mxu1  ;;  %v17325_v46 = vld [vmem:[#allocation12 + $0x40] sm:$0xff] }
 0x85e   : > { %v11489_v11 = vadd.f32 %v19217_v39, %v11422_v26  ;;  %v11491_v7 = vadd.f32 %v19221_v4, %v11424_v41  ;;  %v11430_v59 = vadd.f32 %v11233_v9, %v19765_v27  ;;  %v11432_v31 = vadd.f32 %v11284_v48, %v19766_v36 }
 0x85f   : > { %v11512_v62 = vmax.f32 %v11488_v44, 0.0  ;;  %v11514_v25 = vmax.f32 %v11490_v20, 0.0  ;;  %v11496_v53 = vadd.f32 %v19209_v17, %v11429_v54  ;;  %v11498_v8 = vadd.f32 %v19213_v29, %v11431_v37  ;;  %v17327_v44 = vld [vmem:[#allocation12 + $0x48] sm:$0xff]  ;;  %v17328_v54 = vld [vmem:[#allocation12 + $0x58] sm:$0xff] }
 0x860   : > { %v11513_v30 = vmax.f32 %v11489_v11, 0.0  ;;  %v11515_v52 = vmax.f32 %v11491_v7, 0.0  ;;  %v11497_v49 = vadd.f32 %v19217_v39, %v11430_v59  ;;  %v11499_v42 = vadd.f32 %v19221_v4, %v11432_v31 }
 0x861   : > { %v19239_v28 = vmul.f32 %v17321_v57, %v11512_v62  ;;  %v19241_v22 = vmul.f32 %v17322_v63, %v11514_v25  ;;  %v11520_v19 = vmax.f32 %v11496_v53, 0.0  ;;  %v11522_v32 = vmax.f32 %v11498_v8, 0.0  ;;  %v17136_v63 = vld [vmem:[#allocation15 + $0x380] sm:$0xff]  }
 0x862   : > { %v19243_v58 = vmul.f32 %v17323_v40, %v11513_v30  ;;  %v11539_v38 = vmul.f32 %v17324_v3, %v11515_v52  ;;  %v11521_v56 = vmax.f32 %v11497_v49, 0.0  ;;  %v11523_v18 = vmax.f32 %v11499_v42, 0.0  ;;  %v11237_v24 = vpop.f32.mrb[184].mxu0  ;;  %v11288_v47 = vpop.f32.mrb[184].mxu1  ;;  %v11585_v30 = vld [vmem:[#allocation3 + $0x8] sm:$0x80] }
 0x863   : > { %11560 = vst [vmem:[#allocation3 + $0x40] sm:$0xff] %v19239_v28  ;;  %11562 = vst [vmem:[#allocation3 + $0x50] sm:$0xff] %v19241_v22  ;;  %v19247_v16 = vmul.f32 %v17325_v46, %v11520_v19  ;;  %v19249_v35 = vmul.f32 %v17326_v60, %v11522_v32  ;;  %v11413_v26 = vadd.f32 %v11237_v24, %v19186_v43  ;;  %v11239_v0 = vpop.f32.mrb[185].mxu0  ;;  %v11290_v14 = vpop.f32.mrb[185].mxu1  ;;  %v11587_v52 = vld [vmem:[#allocation3 + $0x18] sm:$0x80] }
 0x864   : > { %v11415_v41 = vadd.f32 %v11288_v47, %v19188_v61  ;;  %11561 = vst [vmem:[#allocation3 + $0x48] sm:$0xff] %v19243_v58  ;;  %11563 = vst [vmem:[#allocation3 + $0x58] sm:$0xff] %v11539_v38  ;;  %v19254_v20 = vmul.f32 %v17327_v44, %v11521_v56  ;;  %v19256_v37 = vmul.f32 %v17328_v54, %v11523_v18  ;;  %v11241_v11 = vpop.f32.mrb[186].mxu0  ;;  %v11292_v7 = vpop.f32.mrb[186].mxu1  ;;  %v11584_v42 = vld [vmem:[#allocation3] sm:$0x80] }
 0x865   : > { %v11414_v9 = vadd.f32 %v11239_v0, %v19191_v5  ;;  %v11416_v48 = vadd.f32 %v11290_v14, %v19194_v51  ;;  %11568 = vst [vmem:[#allocation3 + $0x80] sm:$0xff] %v19247_v16  ;;  %11570 = vst [vmem:[#allocation3 + $0x90] sm:$0xff] %v19249_v35  ;;  %v11437_v43 = vadd.f32 %v11413_v26, %v19748_v23  ;;  %v11242_v59 = vpop.f32.mrb[187].mxu0  ;;  %v11293_v31 = vpop.f32.mrb[187].mxu1  ;;  %v17137_v19 = vld [vmem:[#allocation15 + $0x348] sm:$0xff]   ;;  %v17329_v40 = vld [vmem:[#allocation12 + $0x80] sm:$0xff] }
 0x866   : > { %v11439_v61 = vadd.f32 %v11415_v41, %v19764_v15  ;;  %11569 = vst [vmem:[#allocation3 + $0x88] sm:$0xff] %v19254_v20  ;;  %11571 = vst [vmem:[#allocation3 + $0x98] sm:$0xff] %v19256_v37  ;;  %v11641_v62 = vpack.c.bf16 %v19254_v20, %v19243_v58  ;;  %v11643_v25 = vpack.c.bf16 %v19256_v37, %v11539_v38  ;;  %v17330_v56 = vld [vmem:[#allocation12 + $0x90] sm:$0xff]  ;;  %v17331_v46 = vld [vmem:[#allocation12 + $0x88] sm:$0xff] }
 0x867   : > { %v11438_v5 = vadd.f32 %v11414_v9, %v19765_v27  ;;  %v11440_v51 = vadd.f32 %v11416_v48, %v19766_v36  ;;  %v11504_v53 = vadd.f32 %v19209_v17, %v11437_v43  ;;  %v17135_v27 = vld [vmem:[#allocation15 + $0x300] sm:$0xff]   ;;  %v11640_v57 = vpack.c.bf16 %v19247_v16, %v19239_v28  ;;  %v17332_v26 = vld [vmem:[#allocation12 + $0x98] sm:$0xff]  ;;  %v17139_v14 = vld [vmem:[#allocation15 + $0x308] sm:$0xff]  }
 0x868   : > { %v11506_v23 = vadd.f32 %v19213_v29, %v11439_v61  ;;  %12376 = vmatprep.mubr.bf16.mxu0 %v11641_v62  ;;  %12424 = vmatprep.mubr.bf16.mxu1 %v11643_v25  ;;  %v11586_v29 = vld [vmem:[#allocation3 + $0x10] sm:$0x80]  ;;  %v11617_v24 = vpack.c.bf16 %v19243_v58, %v11585_v30  ;;  %v11619_v47 = vpack.c.bf16 %v11539_v38, %v11587_v52  ;;  %v17140_v54 = vld [vmem:[#allocation15 + $0x388] sm:$0xff]   ;;  %v17149_v30 = vld [vmem:[#allocation15 + $0x360] sm:$0xff]  }
 0x869   : > { %v11505_v15 = vadd.f32 %v19217_v39, %v11438_v5  ;;  %v11507_v8 = vadd.f32 %v19221_v4, %v11440_v51  ;;  %v11528_v49 = vmax.f32 %v11504_v53, 0.0  ;;  %v11642_v39 = vpack.c.bf16 %v19249_v35, %v19241_v22  ;;  %v17138_v4 = vld [vmem:[#allocation15 + $0x3c8] sm:$0xff]   ;;  %12377 = vmatmul.mubr.bf16.vlgmr.msra.gmra.mrb[192].mxu0 %v11640_v57  ;;  %v17141_v9 = vld [vmem:[#allocation15 + $0x350] sm:$0xff]   ;;  %v17145_v51 = vld [vmem:[#allocation15 + $0x358] sm:$0xff]  }
 0x86a   : > { %v11530_v36 = vmax.f32 %v11506_v23, 0.0  ;;  %v11616_v0 = vpack.c.bf16 %v19239_v28, %v11584_v42  ;;  %16222 = vmatpush3.bf16.msra.mxu0 %v17135_v27  ;;  %v11618_v44 = vpack.c.bf16 %v19241_v22, %v11586_v29  ;;  %v17142_v48 = vld [vmem:[#allocation15 + $0x3d0] sm:$0xff]   ;;  %v12554_v11 = vshrl.u32 %v11617_v24, 16  ;;  %v17146_v23 = vld [vmem:[#allocation15 + $0x3d8] sm:$0xff]  }
 0x86b   : > { %v11529_v17 = vmax.f32 %v11505_v15, 0.0  ;;  %v11531_v32 = vmax.f32 %v11507_v8, 0.0  ;;  %v11552_v3 = vmul.f32 %v17329_v40, %v11528_v49  ;;  %12425 = vmatmul.mubr.bf16.vlgmr.msra.gmra.mrb[192].mxu1 %v11642_v39  ;;  %16223 = vmatprep.subr.bf16.mxu0 %v17137_v19  ;;  %v12557_v7 = vshll.u32 %v11617_v24, 16  ;;  %v17143_v61 = vld [vmem:[#allocation15 + $0x310] sm:$0xff]   ;;  %v17147_v15 = vld [vmem:[#allocation15 + $0x318] sm:$0xff]   ;;  %v19768_v40 = vld [vmem:[#allocation36_spill] sm:$0xff] }
 0x86c   : > { %v11554_v18 = vmul.f32 %v17330_v56, %v11530_v36  ;;  %16250 = vmatpush3.bf16.msra.mxu1 %v17136_v63  ;;  %v12588_v28 = vshrl.u32 %v11619_v47, 16  ;;  %v12591_v43 = vshll.u32 %v11619_v47, 16  ;;  %v12537_v59 = vshrl.u32 %v11616_v0, 16  ;;  %v17144_v5 = vld [vmem:[#allocation15 + $0x390] sm:$0xff]   ;;  %v17148_v8 = vld [vmem:[#allocation15 + $0x398] sm:$0xff]   ;;  %v19767_v63 = vld [vmem:[#allocation35_spill] sm:$0xff] }
 0x86d   : > { %v11553_v60 = vmul.f32 %v17331_v46, %v11529_v17  ;;  %v11555_v41 = vmul.f32 %v17332_v26, %v11531_v32  ;;  %11576 = vst [vmem:[#allocation3 + $0xc0] sm:$0xff] %v11552_v3  ;;  %16251 = vmatprep.subr.bf16.mxu1 %v17138_v4  ;;  %v12540_v31 = vshll.u32 %v11616_v0, 16  ;;  %v11648_v22 = vpack.c.bf16 %v11552_v3, %v11552_v3  ;;  %v17150_v26 = vld [vmem:[#allocation15 + $0x3e0] sm:$0xff]  }
 0x86e   : > { %11578 = vst [vmem:[#allocation3 + $0xd0] sm:$0xff] %v11554_v18  ;;  %16224 = vmatpush3.bf16.msra.mxu0 %v17139_v14  ;;  %v12571_v62 = vshrl.u32 %v11618_v44, 16  ;;  %v12574_v25 = vshll.u32 %v11618_v44, 16  ;;  %v11650_v53 = vpack.c.bf16 %v11554_v18, %v11554_v18  ;;  %v19282_v52 = vrot.slane %v12554_v11, 3 }
 0x86f   : > { %11577 = vst [vmem:[#allocation3 + $0xc8] sm:$0xff] %v11553_v60  ;;  %11579 = vst [vmem:[#allocation3 + $0xd8] sm:$0xff] %v11555_v41  ;;  %v11649_v58 = vpack.c.bf16 %v11553_v60, %v11553_v60  ;;  %v11651_v38 = vpack.c.bf16 %v11555_v41, %v11555_v41  ;;  %16225 = vmatprep.subr.bf16.mxu0 %v17141_v9  ;;  %v19284_v27 = vrot.slane %v12557_v7, 4  ;;  %v19286_v49 = vrot.slane %v12588_v28, 3  ;;  %v19769_v60 = vld [vmem:[#allocation37_spill] sm:$0xff]  ;;  %v19770_v41 = vld [vmem:[#allocation38_spill] sm:$0xff] }
 0x870   : > { %16252 = vmatpush3.bf16.msra.mxu1 %v17140_v54  ;;  %v19288_v36 = vrot.slane %v12591_v43, 4  ;;  %v19292_v19 = vrot.slane %v19205_v13, %v19767_v63  ;;  %v19294_v17 = vrot.slane %v12537_v59, 3  ;;  %v19296_v32 = vrot.slane %v12540_v31, 4  ;;  %v17152_v9 = vld [vmem:[#allocation15 + $0x3a0] sm:$0xff]   ;;  %v17155_v63 = vld [vmem:[#allocation15 + $0x328] sm:$0xff]  }
 0x871   : > { %12384 = vmatprep.mubr.bf16.mxu0 %v11649_v58  ;;  %12432 = vmatprep.mubr.bf16.mxu1 %v11651_v38  ;;  %v19301_v3 = vrot.slane %v19205_v13, %v19768_v40  ;;  %v19303_v56 = vrot.slane %v12571_v62, 3  ;;  %v19305_v18 = vrot.slane %v12574_v25, 4  ;;  %v19318_v0 = vrot.slane %v19205_v13, %v19770_v41  ;;  %v17151_v38 = vld [vmem:[#allocation15 + $0x320] sm:$0xff]   ;;  %v17156_v41 = vld [vmem:[#allocation15 + $0x3a8] sm:$0xff]  }
 0x872   : > { %16253 = vmatprep.subr.bf16.mxu1 %v17142_v48  ;;  %12385 = vmatmul.mubr.bf16.gmra.mrb[196].mxu0 %v11648_v22  ;;  %v12560_v14 = vor.u32 %v19284_v27, %v19282_v52  ;;  %v17153_v48 = vld [vmem:[#allocation15 + $0x368] sm:$0xff]   ;;  %v12594_v11 = vor.u32 %v19288_v36, %v19286_v49 }
 0x873   : > { %12433 = vmatmul.mubr.bf16.gmra.mrb[196].mxu1 %v11650_v53  ;;  %16226 = vmatpush3.bf16.msra.mxu0 %v17143_v61  ;;  %v12577_v7 = vor.u32 %v19305_v18, %v19303_v56  ;;  %v17154_v53 = vld [vmem:[#allocation15 + $0x3e8] sm:$0xff]  }
 0x874   : > { %v11608_v42 = vld [vmem:[#allocation3 + $0xc0] sm:$0x7f]  ;;  %16254 = vmatpush3.bf16.msra.mxu1 %v17144_v5  ;;  %16227 = vmatprep.subr.bf16.mxu0 %v17145_v51 }
 0x875   : > { %v11610_v57 = vld [vmem:[#allocation3 + $0xd0] sm:$0x7f]  ;;  %v11624_v4 = vpack.c.bf16 %v11608_v42, %v19247_v16  ;;  %v19314_v16 = vrot.slane %v19205_v13, %v19769_v60  ;;  %16255 = vmatprep.subr.bf16.mxu1 %v17146_v23  ;;  %v12543_v13 = vor.u32 %v19296_v32, %v19294_v17  ;;  %v17172_v17 = vld [vmem:[#allocation15 + $0x88] sm:$0xff]  }
 0x876   : > { %v11609_v29 = vld [vmem:[#allocation3 + $0xc8] sm:$0x7f]  ;;  %v11611_v39 = vld [vmem:[#allocation3 + $0xd8] sm:$0x7f]  ;;  %v19310_v46 = vpack.c.bf16 %v11610_v57, %v19249_v35 }
 0x877   : > { %v11625_v24 = vpack.c.bf16 %v11609_v29, %v19254_v20  ;;  %v11627_v47 = vpack.c.bf16 %v11611_v39, %v19256_v37  ;;  %v12545_v44 = vshrl.u32 %v11624_v4, 16  ;;  %v12548_v20 = vshll.u32 %v11624_v4, 16  ;;  %16228 = vmatpush3.bf16.msra.mxu0 %v17147_v15 }
 0x878   : > { %16256 = vmatpush3.bf16.msra.mxu1 %v17148_v8  ;;  %16229 = vmatprep.subr.bf16.mxu0 %v17149_v30  ;;  %v12579_v31 = vshrl.u32 %v19310_v46, 16  ;;  %v12582_v22 = vshll.u32 %v19310_v46, 16 }
 0x879   : > { %v12562_v54 = vshrl.u32 %v11625_v24, 16  ;;  %v12565_v37 = vshll.u32 %v11625_v24, 16  ;;  %v12596_v58 = vshrl.u32 %v11627_v47, 16  ;;  %v12599_v35 = vshll.u32 %v11627_v47, 16  ;;  %16257 = vmatprep.subr.bf16.mxu1 %v17150_v26 }
 0x87a   : > { %v11329_v28 = vpop.f32.mrb[168].mxu0  ;;  %v11380_v43 = vpop.f32.mrb[168].mxu1  ;;  %v19328_v61 = vrot.slane %v12545_v44, 3  ;;  %v19330_v59 = vrot.slane %v12548_v20, 4  ;;  %v17157_v44 = vld [vmem:[#allocation15 + $0x370] sm:$0xff]  }
 0x87b   : > { %v11425_v5 = vadd.f32 %v11329_v28, %v19756_v12  ;;  %v11427_v51 = vadd.f32 %v11380_v43, %v19757_v50  ;;  %v11331_v62 = vpop.f32.mrb[169].mxu0  ;;  %v11382_v25 = vpop.f32.mrb[169].mxu1  ;;  %v19336_v23 = vrot.slane %v12562_v54, 3  ;;  %v19338_v15 = vrot.slane %v12565_v37, 4  ;;  %16230 = vmatpush3.bf16.msra.mxu0 %v17151_v38 }
 0x87c   : > { %v11426_v8 = vadd.f32 %v11331_v62, %v19758_v10  ;;  %v11428_v30 = vadd.f32 %v11382_v25, %v19759_v1  ;;  %v11333_v42 = vpop.f32.mrb[170].mxu0  ;;  %v11384_v57 = vpop.f32.mrb[170].mxu1  ;;  %v19342_v29 = vrot.slane %v12596_v58, 3  ;;  %v19344_v39 = vrot.slane %v12599_v35, 4  ;;  %16258 = vmatpush3.bf16.msra.mxu1 %v17152_v9  ;;  %16231 = vmatprep.subr.bf16.mxu0 %v17153_v48  ;;  %v17158_v35 = vld [vmem:[#allocation15 + $0x3f0] sm:$0xff]  }
 0x87d   : > { %v11492_v4 = vadd.f32 %v19292_v19, %v11425_v5  ;;  %v11494_v40 = vadd.f32 %v19301_v3, %v11427_v51  ;;  %v11433_v24 = vadd.f32 %v11333_v42, %v19756_v12  ;;  %v11435_v47 = vadd.f32 %v11384_v57, %v19757_v50  ;;  %v11335_v60 = vpop.f32.mrb[171].mxu0  ;;  %v11386_v26 = vpop.f32.mrb[171].mxu1  ;;  %16259 = vmatprep.subr.bf16.mxu1 %v17154_v53  ;;  %v17334_v48 = vld [vmem:[#allocation12 + $0x30] sm:$0xff]  ;;  %v17161_v53 = vld [vmem:[#allocation15 + $0x378] sm:$0xff]  }
 0x87e   : > { %v11493_v20 = vadd.f32 %v19314_v16, %v11426_v8  ;;  %v11495_v54 = vadd.f32 %v19318_v0, %v11428_v30  ;;  %v11434_v37 = vadd.f32 %v11335_v60, %v19758_v10  ;;  %v11436_v58 = vadd.f32 %v11386_v26, %v19759_v1  ;;  %v17159_v8 = vld [vmem:[#allocation15 + $0x330] sm:$0xff]   ;;  %v17333_v30 = vld [vmem:[#allocation12 + $0x20] sm:$0xff]  ;;  %v17336_v26 = vld [vmem:[#allocation12 + $0x38] sm:$0xff] }
 0x87f   : > { %v11516_v38 = vmax.f32 %v11492_v4, 0.0  ;;  %v11518_v28 = vmax.f32 %v11494_v40, 0.0  ;;  %v11500_v43 = vadd.f32 %v19292_v19, %v11433_v24  ;;  %v11502_v5 = vadd.f32 %v19301_v3, %v11435_v47  ;;  %16232 = vmatpush3.bf16.msra.mxu0 %v17155_v63  ;;  %v17160_v24 = vld [vmem:[#allocation15 + $0x3b0] sm:$0xff]   ;;  %v17335_v47 = vld [vmem:[#allocation12 + $0x28] sm:$0xff] }
 0x880   : > { %v11517_v9 = vmax.f32 %v11493_v20, 0.0  ;;  %v11519_v51 = vmax.f32 %v11495_v54, 0.0  ;;  %v11501_v62 = vadd.f32 %v19314_v16, %v11434_v37  ;;  %v11503_v25 = vadd.f32 %v19318_v0, %v11436_v58  ;;  %16260 = vmatpush3.bf16.msra.mxu1 %v17156_v41  ;;  %16233 = vmatprep.subr.bf16.mxu0 %v17157_v44  ;;  %v17337_v41 = vld [vmem:[#allocation12 + $0x60] sm:$0xff] }
 0x881   : > { %v19358_v42 = vmul.f32 %v17333_v30, %v11516_v38  ;;  %v19360_v57 = vmul.f32 %v17334_v48, %v11518_v28  ;;  %v11524_v4 = vmax.f32 %v11500_v43, 0.0  ;;  %v11526_v40 = vmax.f32 %v11502_v5, 0.0  ;;  %16261 = vmatprep.subr.bf16.mxu1 %v17158_v35  ;;  %v17162_v38 = vld [vmem:[#allocation15 + $0x3f8] sm:$0xff]   ;;  %v17338_v28 = vld [vmem:[#allocation12 + $0x70] sm:$0xff]  ;;  %v17339_v35 = vld [vmem:[#allocation12 + $0x68] sm:$0xff] }
 0x882   : > { %v19362_v60 = vmul.f32 %v17335_v47, %v11517_v9  ;;  %v19364_v20 = vmul.f32 %v17336_v26, %v11519_v51  ;;  %v11525_v63 = vmax.f32 %v11501_v62, 0.0  ;;  %v11527_v54 = vmax.f32 %v11503_v25, 0.0  ;;  %v11339_v37 = vpop.f32.mrb[188].mxu0  ;;  %v11390_v58 = vpop.f32.mrb[188].mxu1  ;;  %v17340_v30 = vld [vmem:[#allocation12 + $0x78] sm:$0xff] }
 0x883   : > { %11564 = vst [vmem:[#allocation3 + $0x60] sm:$0xff] %v19358_v42  ;;  %11566 = vst [vmem:[#allocation3 + $0x70] sm:$0xff] %v19360_v57  ;;  %v19368_v44 = vmul.f32 %v17337_v41, %v11524_v4  ;;  %v19370_v43 = vmul.f32 %v17338_v28, %v11526_v40  ;;  %v11417_v5 = vadd.f32 %v11339_v37, %v19196_v34  ;;  %v11341_v51 = vpop.f32.mrb[189].mxu0  ;;  %v11392_v62 = vpop.f32.mrb[189].mxu1  ;;  %16234 = vmatpush3.bf16.msra.mxu0 %v17159_v8  ;;  %v11589_v41 = vld [vmem:[#allocation3 + $0x28] sm:$0x80] }
 0x884   : > { %v11419_v9 = vadd.f32 %v11390_v58, %v19198_v6  ;;  %11565 = vst [vmem:[#allocation3 + $0x68] sm:$0xff] %v19362_v60  ;;  %11567 = vst [vmem:[#allocation3 + $0x78] sm:$0xff] %v19364_v20  ;;  %v19376_v25 = vmul.f32 %v17339_v35, %v11525_v63  ;;  %v19378_v48 = vmul.f32 %v17340_v30, %v11527_v54  ;;  %v11343_v47 = vpop.f32.mrb[190].mxu0  ;;  %v11394_v34 = vpop.f32.mrb[190].mxu1  ;;  %v17163_v6 = vld [vmem:[#allocation15 + $0x338] sm:$0xff]   ;;  %16262 = vmatpush3.bf16.msra.mxu1 %v17160_v24  ;;  %v17341_v35 = vld [vmem:[#allocation12 + $0xa0] sm:$0xff] }
 0x885   : > { %v11418_v4 = vadd.f32 %v11341_v51, %v19200_v55  ;;  %v11420_v40 = vadd.f32 %v11392_v62, %v19202_v2  ;;  %11572 = vst [vmem:[#allocation3 + $0xa0] sm:$0xff] %v19368_v44  ;;  %11574 = vst [vmem:[#allocation3 + $0xb0] sm:$0xff] %v19370_v43  ;;  %v11441_v26 = vadd.f32 %v11417_v5, %v19756_v12  ;;  %v11344_v37 = vpop.f32.mrb[191].mxu0  ;;  %v11395_v58 = vpop.f32.mrb[191].mxu1  ;;  %16235 = vmatprep.subr.bf16.mxu0 %v17161_v53  ;;  %v17164_v54 = vld [vmem:[#allocation15 + $0x3b8] sm:$0xff]   ;;  %v17165_v55 = vld [vmem:[#allocation15 + $0x40] sm:$0xff]  }
 0x886   : > { %v11443_v63 = vadd.f32 %v11419_v9, %v19757_v50  ;;  %v12581_v2 = vrot.slane %v12579_v31, 3  ;;  %v12584_v8 = vrot.slane %v12582_v22, 4  ;;  %11573 = vst [vmem:[#allocation3 + $0xa8] sm:$0xff] %v19376_v25  ;;  %11575 = vst [vmem:[#allocation3 + $0xb8] sm:$0xff] %v19378_v48  ;;  %16263 = vmatprep.subr.bf16.mxu1 %v17162_v38  ;;  %v11645_v24 = vpack.c.bf16 %v19376_v25, %v19362_v60  ;;  %v17166_v53 = vld [vmem:[#allocation15 + $0xc0] sm:$0xff]   ;;  %v17169_v62 = vld [vmem:[#allocation15 + $0x48] sm:$0xff]  }
 0x887   : > { %v11442_v12 = vadd.f32 %v11418_v4, %v19758_v10  ;;  %v11444_v50 = vadd.f32 %v11420_v40, %v19759_v1  ;;  %v19398_v31 = vor.u32 %v19330_v59, %v19328_v61  ;;  %v11508_v46 = vadd.f32 %v19292_v19, %v11441_v26  ;;  %v11591_v28 = vld [vmem:[#allocation3 + $0x38] sm:$0x80]  ;;  %16236 = vmatpush3.bf16.msra.mxu0 %v17163_v6  ;;  %v17168_v51 = vld [vmem:[#allocation15 + $0x80] sm:$0xff]   ;;  %v17342_v30 = vld [vmem:[#allocation12 + $0xb0] sm:$0xff] }
 0x888   : > { %v11510_v22 = vadd.f32 %v19301_v3, %v11443_v63  ;;  %v19404_v10 = vor.u32 %v19338_v15, %v19336_v23  ;;  %v19408_v1 = vor.u32 %v19344_v39, %v19342_v29  ;;  %12472 = vmatprep.mubr.bf16.mxu0 %v11645_v24  ;;  %v11647_v19 = vpack.c.bf16 %v19378_v48, %v19364_v20  ;;  %v17167_v23 = vld [vmem:[#allocation15] sm:$0xff]   ;;  %v11590_v40 = vld [vmem:[#allocation3 + $0x30] sm:$0x80]  ;;  %v17170_v34 = vld [vmem:[#allocation15 + $0xc8] sm:$0xff]  }
 0x889   : > { %v11509_v38 = vadd.f32 %v19314_v16, %v11442_v12  ;;  %v11511_v5 = vadd.f32 %v19318_v0, %v11444_v50  ;;  %v11532_v61 = vmax.f32 %v11508_v46, 0.0  ;;  %16264 = vmatpush3.bf16.msra.mxu1 %v17164_v54  ;;  %v19415_v59 = vpack.c.bf16 %v19362_v60, %v11589_v41  ;;  %16277 = vmatprep.subr.bf16.mxu0 %v17165_v55  ;;  %v11588_v0 = vld [vmem:[#allocation3 + $0x20] sm:$0x80]  ;;  %v17343_v6 = vld [vmem:[#allocation12 + $0xa8] sm:$0xff]  ;;  %v17344_v63 = vld [vmem:[#allocation12 + $0xb8] sm:$0xff] }
 0x88a   : > { %v11534_v3 = vmax.f32 %v11510_v22, 0.0  ;;  %v19417_v15 = vor.u32 %v12584_v8, %v12581_v2  ;;  %v19420_v16 = vpack.c.bf16 %v19364_v20, %v11591_v28  ;;  %12520 = vmatprep.mubr.bf16.mxu1 %v11647_v19  ;;  %16305 = vmatprep.subr.bf16.mxu1 %v17166_v53  ;;  %v11644_v9 = vpack.c.bf16 %v19368_v44, %v19358_v42  ;;  %v17174_v55 = vld [vmem:[#allocation15 + $0xd0] sm:$0xff]   ;;  %v17177_v53 = vld [vmem:[#allocation15 + $0x58] sm:$0xff]  }
 0x88b   : > { %v11533_v29 = vmax.f32 %v11509_v38, 0.0  ;;  %v11535_v39 = vmax.f32 %v11511_v5, 0.0  ;;  %v11556_v60 = vmul.f32 %v17341_v35, %v11532_v61  ;;  %v11646_v47 = vpack.c.bf16 %v19370_v43, %v19360_v57  ;;  %v17176_v12 = vld [vmem:[#allocation15 + $0x90] sm:$0xff]   ;;  %v17178_v46 = vld [vmem:[#allocation15 + $0xd8] sm:$0xff]   ;;  %v17181_v35 = vld [vmem:[#allocation15 + $0x60] sm:$0xff]  }
 0x88c   : > { %v11558_v4 = vmul.f32 %v17342_v30, %v11534_v3  ;;  %v19431_v20 = vsel %vm3451_vm0, %v12560_v14, %v19404_v10  ;;  %12473 = vmatmul.mubr.bf16.vlgmr.msra.gmra.mrb[200].mxu0 %v11644_v9  ;;  %v19438_v58 = vsel %vm3451_vm0, %v12594_v11, %v19408_v1  ;;  %v19445_v52 = vsel %vm3451_vm0, %v12543_v13, %v19398_v31  ;;  %v17171_v14 = vld [vmem:[#allocation15 + $0x8] sm:$0xff]   ;;  %v17173_v13 = vld [vmem:[#allocation15 + $0x50] sm:$0xff]   ;;  %v17179_v22 = vld [vmem:[#allocation15 + $0x18] sm:$0xff]  }
 0x88d   : > { %v11557_v26 = vmul.f32 %v17343_v6, %v11533_v29  ;;  %v11559_v37 = vmul.f32 %v17344_v63, %v11535_v39  ;;  %11580 = vst [vmem:[#allocation3 + $0xe0] sm:$0xff] %v11556_v60  ;;  %v11620_v27 = vpack.c.bf16 %v19358_v42, %v11588_v0  ;;  %12521 = vmatmul.mubr.bf16.vlgmr.msra.gmra.mrb[200].mxu1 %v11646_v47  ;;  %v12622_v42 = vshrl.u32 %v19415_v59, 16 }
 0x88e   : > { %11582 = vst [vmem:[#allocation3 + $0xf0] sm:$0xff] %v11558_v4  ;;  %16278 = vmatpush3.bf16.msra.mxu0 %v17167_v23  ;;  %v19453_v49 = vsel %vm3451_vm0, %v12577_v7, %v19417_v15  ;;  %v11622_v36 = vpack.c.bf16 %v19360_v57, %v11590_v40  ;;  %16306 = vmatpush3.bf16.msra.mxu1 %v17168_v51  ;;  %v12625_v54 = vshll.u32 %v19415_v59, 16  ;;  %v12656_v56 = vshrl.u32 %v19420_v16, 16  ;;  %v17175_v7 = vld [vmem:[#allocation15 + $0x10] sm:$0xff]  }
 0x88f   : > { %11581 = vst [vmem:[#allocation3 + $0xe8] sm:$0xff] %v11557_v26  ;;  %11583 = vst [vmem:[#allocation3 + $0xf8] sm:$0xff] %v11559_v37  ;;  %16279 = vmatprep.subr.bf16.mxu0 %v17169_v62  ;;  %v11653_v32 = vpack.c.bf16 %v11557_v26, %v11557_v26  ;;  %v11655_v11 = vpack.c.bf16 %v11559_v37, %v11559_v37  ;;  %16307 = vmatprep.subr.bf16.mxu1 %v17170_v34  ;;  %v12659_v18 = vshll.u32 %v19420_v16, 16  ;;  %v17180_v62 = vld [vmem:[#allocation15 + $0x98] sm:$0xff]  }
 0x890   : > { %v12605_v57 = vshrl.u32 %v11620_v27, 16  ;;  %v12608_v2 = vshll.u32 %v11620_v27, 16  ;;  %v11652_v8 = vpack.c.bf16 %v11556_v60, %v11556_v60  ;;  %v12639_v50 = vshrl.u32 %v11622_v36, 16 }
 0x891   : > { %12480 = vmatprep.mubr.bf16.mxu0 %v11653_v32  ;;  %12528 = vmatprep.mubr.bf16.mxu1 %v11655_v11  ;;  %v12642_v41 = vshll.u32 %v11622_v36, 16  ;;  %v11654_v24 = vpack.c.bf16 %v11558_v4, %v11558_v4  ;;  %v19460_v28 = vrot.slane %v12622_v42, 3  ;;  %v19462_v38 = vrot.slane %v12625_v54, 4 }
 0x892   : > { %16280 = vmatpush3.bf16.msra.mxu0 %v17171_v14  ;;  %16308 = vmatpush3.bf16.msra.mxu1 %v17172_v17  ;;  %v19464_v61 = vrot.slane %v12656_v56, 3  ;;  %v19466_v3 = vrot.slane %v12659_v18, 4  ;;  %v12607_v16 = vrot.slane %v12605_v57, 3  ;;  %v12610_v0 = vrot.slane %v12608_v2, 4  ;;  %v17185_v14 = vld [vmem:[#allocation15 + $0x68] sm:$0xff]  }
 0x893   : > { %16281 = vmatprep.subr.bf16.mxu0 %v17173_v13  ;;  %16309 = vmatprep.subr.bf16.mxu1 %v17174_v55  ;;  %v12641_v60 = vrot.slane %v12639_v50, 3  ;;  %v12644_v30 = vrot.slane %v12642_v41, 4  ;;  %v17186_v13 = vld [vmem:[#allocation15 + $0xe8] sm:$0xff]   ;;  %v12628_v18 = vor.u32 %v19462_v38, %v19460_v28  ;;  %v17191_v28 = vld [vmem:[#allocation15 + $0x30] sm:$0xff]  }
 0x894   : > { %v11612_v5 = vld [vmem:[#allocation3 + $0xe0] sm:$0x7f]  ;;  %12481 = vmatmul.mubr.bf16.gmra.mrb[204].mxu0 %v11652_v8  ;;  %v12611_v42 = vor.u32 %v12610_v0, %v12607_v16  ;;  %v12662_v57 = vor.u32 %v19466_v3, %v19464_v61  ;;  %v17187_v8 = vld [vmem:[#allocation15 + $0x28] sm:$0xff]   ;;  %v17192_v38 = vld [vmem:[#allocation15 + $0xb0] sm:$0xff]  }
 0x895   : > { %v11614_v19 = vld [vmem:[#allocation3 + $0xf0] sm:$0x7f]  ;;  %v11628_v29 = vpack.c.bf16 %v11612_v5, %v19368_v44  ;;  %12529 = vmatmul.mubr.bf16.gmra.mrb[204].mxu1 %v11654_v24  ;;  %13104 = vmatprep.mubr.bf16.mxu0 %v19431_v20  ;;  %v17182_v44 = vld [vmem:[#allocation15 + $0xe0] sm:$0xff]   ;;  %v12645_v55 = vor.u32 %v12644_v30, %v12641_v60  ;;  %v17188_v41 = vld [vmem:[#allocation15 + $0xa8] sm:$0xff]  }
 0x896   : > { %v11613_v59 = vld [vmem:[#allocation3 + $0xe8] sm:$0x7f]  ;;  %v11615_v23 = vld [vmem:[#allocation3 + $0xf8] sm:$0x7f]  ;;  %v11630_v39 = vpack.c.bf16 %v11614_v19, %v19370_v43  ;;  %16282 = vmatpush3.bf16.msra.mxu0 %v17175_v7  ;;  %16310 = vmatpush3.bf16.msra.mxu1 %v17176_v12  ;;  %v17189_v24 = vld [vmem:[#allocation15 + $0x70] sm:$0xff]  }
 0x897   : > { %v11629_v9 = vpack.c.bf16 %v11613_v59, %v19376_v25  ;;  %v11631_v51 = vpack.c.bf16 %v11615_v23, %v19378_v48  ;;  %13152 = vmatprep.mubr.bf16.mxu1 %v19438_v58  ;;  %16283 = vmatprep.subr.bf16.mxu0 %v17177_v53  ;;  %v12613_v43 = vshrl.u32 %v11628_v29, 16  ;;  %v12616_v4 = vshll.u32 %v11628_v29, 16  ;;  %v17183_v48 = vld [vmem:[#allocation15 + $0x20] sm:$0xff]   ;;  %v17193_v5 = vld [vmem:[#allocation15 + $0x78] sm:$0xff]   ;;  %v17201_v16 = vld [vmem:[#allocation15 + $0x148] sm:$0xff]  }
 0x898   : > { %v12647_v40 = vshrl.u32 %v11630_v39, 16  ;;  %v12650_v47 = vshll.u32 %v11630_v39, 16  ;;  %16311 = vmatprep.subr.bf16.mxu1 %v17178_v46  ;;  %v17184_v58 = vld [vmem:[#allocation15 + $0xa0] sm:$0xff]   ;;  %v17194_v19 = vld [vmem:[#allocation15 + $0xf8] sm:$0xff]   ;;  %v17202_v0 = vld [vmem:[#allocation15 + $0x1c8] sm:$0xff]  }
 0x899   : > { %v12630_v34 = vshrl.u32 %v11629_v9, 16  ;;  %v12633_v6 = vshll.u32 %v11629_v9, 16  ;;  %v12664_v25 = vshrl.u32 %v11631_v51, 16  ;;  %v12667_v26 = vshll.u32 %v11631_v51, 16  ;;  %v17195_v61 = vld [vmem:[#allocation15 + $0x38] sm:$0xff]   ;;  %v17197_v59 = vld [vmem:[#allocation15 + $0x140] sm:$0xff]  }
 0x89a   : > { %16284 = vmatpush3.bf16.msra.mxu0 %v17179_v22  ;;  %v12615_v20 = vrot.slane %v12613_v43, 3  ;;  %v12618_v63 = vrot.slane %v12616_v4, 4  ;;  %v12649_v37 = vrot.slane %v12647_v40, 3  ;;  %v12652_v27 = vrot.slane %v12650_v47, 4  ;;  %16312 = vmatpush3.bf16.msra.mxu1 %v17180_v62  ;;  %v17190_v22 = vld [vmem:[#allocation15 + $0xf0] sm:$0xff]   ;;  %v17196_v3 = vld [vmem:[#allocation15 + $0xb8] sm:$0xff]  }
 0x89b   : > { %16285 = vmatprep.subr.bf16.mxu0 %v17181_v35  ;;  %v12632_v36 = vrot.slane %v12630_v34, 3  ;;  %v12635_v17 = vrot.slane %v12633_v6, 4  ;;  %v12666_v32 = vrot.slane %v12664_v25, 3  ;;  %v12669_v11 = vrot.slane %v12667_v26, 4  ;;  %16313 = vmatprep.subr.bf16.mxu1 %v17182_v44  ;;  %v17198_v23 = vld [vmem:[#allocation15 + $0x1c0] sm:$0xff]   ;;  %v17203_v9 = vld [vmem:[#allocation15 + $0x108] sm:$0xff]  }
 0x89c   : > { %v19474_v54 = vor.u32 %v12618_v63, %v12615_v20  ;;  %v19476_v56 = vor.u32 %v12652_v27, %v12649_v37  ;;  %v17199_v29 = vld [vmem:[#allocation15 + $0x100] sm:$0xff]   ;;  %v17204_v51 = vld [vmem:[#allocation15 + $0x188] sm:$0xff]   ;;  %v17205_v62 = vld [vmem:[#allocation15 + $0x150] sm:$0xff]  }
 0x89d   : > { %v19480_v7 = vor.u32 %v12635_v17, %v12632_v36  ;;  %v19484_v2 = vor.u32 %v12669_v11, %v12666_v32  ;;  %v17200_v39 = vld [vmem:[#allocation15 + $0x180] sm:$0xff]   ;;  %v17206_v35 = vld [vmem:[#allocation15 + $0x1d0] sm:$0xff]   ;;  %v17209_v30 = vld [vmem:[#allocation15 + $0x158] sm:$0xff]  }
 0x89e   : > { %16286 = vmatpush3.bf16.msra.mxu0 %v17183_v48  ;;  %v19488_v12 = vsel %vm3451_vm0, %v12611_v42, %v19474_v54  ;;  %v19492_v50 = vsel %vm3451_vm0, %v12645_v55, %v19476_v56  ;;  %16314 = vmatpush3.bf16.msra.mxu1 %v17184_v58  ;;  %v17207_v60 = vld [vmem:[#allocation15 + $0x110] sm:$0xff]   ;;  %v17213_v44 = vld [vmem:[#allocation15 + $0x160] sm:$0xff]   ;;  %v17218_v47 = vld [vmem:[#allocation15 + $0x1e8] sm:$0xff]  }
 0x89f   : > { %16287 = vmatprep.subr.bf16.mxu0 %v17185_v14  ;;  %v12637_v53 = vsel %vm3451_vm0, %v12628_v18, %v19480_v7  ;;  %v12671_v46 = vsel %vm3451_vm0, %v12662_v57, %v19484_v2  ;;  %16315 = vmatprep.subr.bf16.mxu1 %v17186_v13  ;;  %v17214_v43 = vld [vmem:[#allocation15 + $0x1e0] sm:$0xff]   ;;  %v17220_v34 = vld [vmem:[#allocation15 + $0x1a8] sm:$0xff]   ;;  %v17221_v6 = vld [vmem:[#allocation15 + $0x170] sm:$0xff]  }
 0x8a0   : > { %v17215_v4 = vld [vmem:[#allocation15 + $0x120] sm:$0xff]   ;;  %v17222_v25 = vld [vmem:[#allocation15 + $0x1f0] sm:$0xff]   ;;  %v17225_v20 = vld [vmem:[#allocation15 + $0x178] sm:$0xff]  }
 0x8a1   : > { %v17216_v40 = vld [vmem:[#allocation15 + $0x1a0] sm:$0xff]   ;;  %v17223_v26 = vld [vmem:[#allocation15 + $0x130] sm:$0xff]   ;;  %v17226_v63 = vld [vmem:[#allocation15 + $0x1f8] sm:$0xff]  }
 0x8a2   : > { %16288 = vmatpush3.bf16.msra.mxu0 %v17187_v8  ;;  %16316 = vmatpush3.bf16.msra.mxu1 %v17188_v41  ;;  %v17224_v48 = vld [vmem:[#allocation15 + $0x1b0] sm:$0xff]   ;;  %v11665_v37 = vld [vmem:[#allocation3 + $0x88] sm:$0xff]  ;;  %v17227_v58 = vld [vmem:[#allocation15 + $0x138] sm:$0xff]  }
 0x8a3   : > { %16289 = vmatprep.subr.bf16.mxu0 %v17189_v24  ;;  %16317 = vmatprep.subr.bf16.mxu1 %v17190_v22  ;;  %v11681_v27 = vld [vmem:[#allocation3 + $0x108] sm:$0x1]  ;;  %v11667_v14 = vld [vmem:[#allocation3 + $0x98] sm:$0xff]  ;;  %v11657_v32 = vld [vmem:[#allocation3 + $0x48] sm:$0xfe] }
 0x8a4   : > { %v11683_v36 = vld [vmem:[#allocation3 + $0x118] sm:$0x1]  ;;  %v11673_v11 = vld [vmem:[#allocation3 + $0xc8] sm:$0xff]  ;;  %v17229_v13 = vld [vmem:[#allocation15 + $0x440] sm:$0xff]   ;;  %v11689_v42 = vpack.c.bf16 %v11665_v37, %v11657_v32 }
 0x8a5   : > { %v17228_v17 = vld [vmem:[#allocation15 + $0x1b8] sm:$0xff]   ;;  %v17230_v57 = vld [vmem:[#allocation15 + $0x4c0] sm:$0xff]   ;;  %v19504_v41 = vpack.c.bf16 %v11681_v27, %v11673_v11  ;;  %v17253_v37 = vld [vmem:[#allocation15 + $0x470] sm:$0xff]  }
 0x8a6   : > { %16290 = vmatpush3.bf16.msra.mxu0 %v17191_v28  ;;  %16318 = vmatpush3.bf16.msra.mxu1 %v17192_v38  ;;  %v11659_v55 = vld [vmem:[#allocation3 + $0x58] sm:$0xfe]  ;;  %v17232_v22 = vld [vmem:[#allocation15 + $0x480] sm:$0xff]   ;;  %v17233_v28 = vld [vmem:[#allocation15 + $0x448] sm:$0xff]  }
 0x8a7   : > { %16291 = vmatprep.subr.bf16.mxu0 %v17193_v5  ;;  %16319 = vmatprep.subr.bf16.mxu1 %v17194_v19  ;;  %v11675_v18 = vld [vmem:[#allocation3 + $0xd8] sm:$0xff]  ;;  %v11691_v8 = vpack.c.bf16 %v11667_v14, %v11659_v55  ;;  %v17234_v5 = vld [vmem:[#allocation15 + $0x4c8] sm:$0xff]   ;;  %v13412_v19 = vshll.u32 %v19504_v41, 16  ;;  %v17256_v11 = vld [vmem:[#allocation15 + $0x4b0] sm:$0xff]  }
 0x8a8   : > { %v19506_v24 = vpack.c.bf16 %v11683_v36, %v11675_v18  ;;  %v17258_v55 = vld [vmem:[#allocation15 + $0x4f8] sm:$0xff]  }
 0x8a9   : > { %v13431_v38 = vshll.u32 %v11691_v8, 16 }
 0x8aa   : > { %16292 = vmatpush3.bf16.msra.mxu0 %v17195_v61  ;;  %16320 = vmatpush3.bf16.msra.mxu1 %v17196_v3  ;;  %v13436_v61 = vshll.u32 %v19506_v24, 16  ;;  %v17235_v3 = vld [vmem:[#allocation15 + $0x408] sm:$0xff]  }
 0x8ab   : > { %16333 = vmatprep.subr.bf16.mxu0 %v17197_v59  ;;  %16361 = vmatprep.subr.bf16.mxu1 %v17198_v23  ;;  %v17236_v23 = vld [vmem:[#allocation15 + $0x488] sm:$0xff]  }
 0x8ad   : > { %13105 = vmatmul.mubr.bf16.vlgmr.msra.gmra.mrb[208].mxu0 %v19445_v52  ;;  %13153 = vmatmul.mubr.bf16.vlgmr.msra.gmra.mrb[208].mxu1 %v19453_v49  ;;  %v17208_v52 = vld [vmem:[#allocation15 + $0x190] sm:$0xff]   ;;  %v17212_v49 = vld [vmem:[#allocation15 + $0x198] sm:$0xff]  }
 0x8ae   : > { %13112 = vmatprep.mubr.bf16.mxu0 %v19404_v10  ;;  %13160 = vmatprep.mubr.bf16.mxu1 %v19408_v1  ;;  %v17210_v10 = vld [vmem:[#allocation15 + $0x1d8] sm:$0xff]  }
 0x8af   : > { %16334 = vmatpush3.bf16.msra.mxu0 %v17199_v29  ;;  %16362 = vmatpush3.bf16.msra.mxu1 %v17200_v39  ;;  %v17211_v1 = vld [vmem:[#allocation15 + $0x118] sm:$0xff]   ;;  %v17237_v29 = vld [vmem:[#allocation15 + $0x450] sm:$0xff]   ;;  %v13433_v39 = vrot.slane %v13431_v38, 1 }
 0x8b0   : > { %16335 = vmatprep.subr.bf16.mxu0 %v17201_v16  ;;  %16363 = vmatprep.subr.bf16.mxu1 %v17202_v0  ;;  %v13405_v16 = vshrl.u32 %v11689_v42, 16  ;;  %v19514_v0 = vrot.slane %v13412_v19, 1  ;;  %v17260_v38 = vld [vmem:[#allocation15 + $0x4b8] sm:$0xff]   ;;  %v11661_v19 = vld [vmem:[#allocation3 + $0x68] sm:$0xfe] }
 0x8b3   : > { %16336 = vmatpush3.bf16.msra.mxu0 %v17203_v9  ;;  %16364 = vmatpush3.bf16.msra.mxu1 %v17204_v51  ;;  %v19516_v9 = vrot.slane %v13436_v61, 1  ;;  %v11677_v61 = vld [vmem:[#allocation3 + $0xe8] sm:$0xff] }
 0x8b4   : > { %16337 = vmatprep.subr.bf16.mxu0 %v17205_v62  ;;  %16365 = vmatprep.subr.bf16.mxu1 %v17206_v35  ;;  %v17241_v35 = vld [vmem:[#allocation15 + $0x458] sm:$0xff]  }
 0x8b5   : > { %13113 = vmatmul.mubr.bf16.gmra.mrb[212].mxu0 %v19398_v31  ;;  %13161 = vmatmul.mubr.bf16.gmra.mrb[212].mxu1 %v19417_v15  ;;  %v17217_v31 = vld [vmem:[#allocation15 + $0x168] sm:$0xff]  }
 0x8b6   : > { %13200 = vmatprep.mubr.bf16.mxu0 %v12637_v53  ;;  %13248 = vmatprep.mubr.bf16.mxu1 %v12671_v46  ;;  %v17219_v15 = vld [vmem:[#allocation15 + $0x128] sm:$0xff]   ;;  %v17231_v53 = vld [vmem:[#allocation15 + $0x400] sm:$0xff]   ;;  %v13407_v46 = vshll.u32 %v11689_v42, 16 }
 0x8b7   : > { %16338 = vmatpush3.bf16.msra.mxu0 %v17207_v60  ;;  %16366 = vmatpush3.bf16.msra.mxu1 %v17208_v52  ;;  %v17242_v52 = vld [vmem:[#allocation15 + $0x4d8] sm:$0xff]  }
 0x8b8   : > { %16339 = vmatprep.subr.bf16.mxu0 %v17209_v30  ;;  %16367 = vmatprep.subr.bf16.mxu1 %v17210_v10  ;;  %v13409_v59 = vrot.slane %v13407_v46, 1  ;;  %v17243_v10 = vld [vmem:[#allocation15 + $0x418] sm:$0xff]  }
 0x8ba   : > { %v13410_v51 = vor.u32 %v13409_v59, %v13405_v16  ;;  %v17261_v59 = vld [vmem:[#allocation15 + $0x540] sm:$0xff]  }
 0x8bb   : > { %16340 = vmatpush3.bf16.msra.mxu0 %v17211_v1  ;;  %16368 = vmatpush3.bf16.msra.mxu1 %v17212_v49  ;;  %v17244_v1 = vld [vmem:[#allocation15 + $0x498] sm:$0xff]   ;;  %v17245_v49 = vld [vmem:[#allocation15 + $0x460] sm:$0xff]  }
 0x8bc   : > { %16341 = vmatprep.subr.bf16.mxu0 %v17213_v44  ;;  %16369 = vmatprep.subr.bf16.mxu1 %v17214_v43  ;;  %v13415_v60 = vsel %vm4309_vm1, %v13410_v51, %v19514_v0  ;;  %v17247_v44 = vld [vmem:[#allocation15 + $0x420] sm:$0xff]  }
 0x8bd   : > { %v17248_v43 = vld [vmem:[#allocation15 + $0x4a0] sm:$0xff]  }
 0x8bf   : > { %16342 = vmatpush3.bf16.msra.mxu0 %v17215_v4  ;;  %16370 = vmatpush3.bf16.msra.mxu1 %v17216_v40  ;;  %v17249_v4 = vld [vmem:[#allocation15 + $0x468] sm:$0xff]  }
 0x8c0   : > { %16343 = vmatprep.subr.bf16.mxu0 %v17217_v31  ;;  %16371 = vmatprep.subr.bf16.mxu1 %v17218_v47  ;;  %v17250_v40 = vld [vmem:[#allocation15 + $0x4e8] sm:$0xff]   ;;  %v11680_v31 = vld [vmem:[#allocation3 + $0x100] sm:$0x1]  ;;  %v11666_v47 = vld [vmem:[#allocation3 + $0x90] sm:$0xff] }
 0x8c3   : > { %16344 = vmatpush3.bf16.msra.mxu0 %v17219_v15  ;;  %16372 = vmatpush3.bf16.msra.mxu1 %v17220_v34  ;;  %v11656_v15 = vld [vmem:[#allocation3 + $0x40] sm:$0xfe] }
 0x8c4   : > { %16345 = vmatprep.subr.bf16.mxu0 %v17221_v6  ;;  %16373 = vmatprep.subr.bf16.mxu1 %v17222_v25  ;;  %v11672_v34 = vld [vmem:[#allocation3 + $0xc0] sm:$0xff]  ;;  %v11682_v6 = vld [vmem:[#allocation3 + $0x110] sm:$0x1]  ;;  %v17251_v25 = vld [vmem:[#allocation15 + $0x428] sm:$0xff]  }
 0x8c5   : > { %v19524_v14 = vpack.c.bf16 %v11680_v31, %v11672_v34  ;;  %v17266_v31 = vld [vmem:[#allocation15 + $0x5c8] sm:$0xff]  }
 0x8c7   : > { %16346 = vmatpush3.bf16.msra.mxu0 %v17223_v26  ;;  %16374 = vmatpush3.bf16.msra.mxu1 %v17224_v48  ;;  %v11658_v48 = vld [vmem:[#allocation3 + $0x50] sm:$0xfe]  ;;  %v13400_v18 = vshll.u32 %v19524_v14, 16 }
 0x8c8   : > { %16347 = vmatprep.subr.bf16.mxu0 %v17225_v20  ;;  %16375 = vmatprep.subr.bf16.mxu1 %v17226_v63  ;;  %v11674_v20 = vld [vmem:[#allocation3 + $0xd0] sm:$0xff]  ;;  %v17252_v63 = vld [vmem:[#allocation15 + $0x4a8] sm:$0xff]   ;;  %v11690_v27 = vpack.c.bf16 %v11666_v47, %v11658_v48 }
 0x8c9   : > { %v19526_v36 = vpack.c.bf16 %v11682_v6, %v11674_v20  ;;  %v13402_v16 = vrot.slane %v13400_v18, 1  ;;  %v17269_v6 = vld [vmem:[#allocation15 + $0x550] sm:$0xff]   ;;  %v17274_v18 = vld [vmem:[#allocation15 + $0x5d8] sm:$0xff]  }
 0x8ca   : > { %v13419_v42 = vshll.u32 %v11690_v27, 16  ;;  %v13417_v51 = vshrl.u32 %v11690_v27, 16 }
 0x8cb   : > { %16348 = vmatpush3.bf16.msra.mxu0 %v17227_v58  ;;  %16376 = vmatpush3.bf16.msra.mxu1 %v17228_v17  ;;  %v17254_v58 = vld [vmem:[#allocation15 + $0x4f0] sm:$0xff]   ;;  %v13424_v46 = vshll.u32 %v19526_v36, 16 }
 0x8cc   : > { %16389 = vmatprep.subr.bf16.mxu0 %v17229_v13  ;;  %16417 = vmatprep.subr.bf16.mxu1 %v17230_v57  ;;  %v17255_v17 = vld [vmem:[#allocation15 + $0x430] sm:$0xff]   ;;  %v17257_v13 = vld [vmem:[#allocation15 + $0x478] sm:$0xff]   ;;  %v11669_v57 = vld [vmem:[#allocation3 + $0xa8] sm:$0xff] }
 0x8ce   : > { %13201 = vmatmul.mubr.bf16.vlgmr.msra.gmra.mrb[216].mxu0 %v19488_v12  ;;  %13249 = vmatmul.mubr.bf16.vlgmr.msra.gmra.mrb[216].mxu1 %v19492_v50  ;;  %v17238_v12 = vld [vmem:[#allocation15 + $0x4d0] sm:$0xff]   ;;  %v13429_v50 = vshrl.u32 %v11691_v8, 16  ;;  %v11685_v8 = vld [vmem:[#allocation3 + $0x128] sm:$0x1] }
 0x8cf   : > { %13208 = vmatprep.mubr.bf16.mxu0 %v19480_v7  ;;  %13256 = vmatprep.mubr.bf16.mxu1 %v19484_v2  ;;  %v17239_v7 = vld [vmem:[#allocation15 + $0x410] sm:$0xff]  }
 0x8d0   : > { %16390 = vmatpush3.bf16.msra.mxu0 %v17231_v53  ;;  %16418 = vmatpush3.bf16.msra.mxu1 %v17232_v22  ;;  %v17240_v2 = vld [vmem:[#allocation15 + $0x490] sm:$0xff]   ;;  %v13434_v62 = vor.u32 %v13433_v39, %v13429_v50  ;;  %v17259_v53 = vld [vmem:[#allocation15 + $0x438] sm:$0xff]   ;;  %v17262_v50 = vld [vmem:[#allocation15 + $0x5c0] sm:$0xff]  }
 0x8d1   : > { %16391 = vmatprep.subr.bf16.mxu0 %v17233_v28  ;;  %16419 = vmatprep.subr.bf16.mxu1 %v17234_v5  ;;  %v11671_v22 = vld [vmem:[#allocation3 + $0xb8] sm:$0xff] }
 0x8d2   : > { %v13439_v30 = vsel %vm4309_vm1, %v13434_v62, %v19516_v9  ;;  %v11687_v28 = vld [vmem:[#allocation3 + $0x138] sm:$0x1]  ;;  %v19530_v62 = vpack.c.bf16 %v11685_v8, %v11677_v61  ;;  %v11684_v61 = vld [vmem:[#allocation3 + $0x120] sm:$0x1] }
 0x8d3   : > { %v11679_v39 = vld [vmem:[#allocation3 + $0xf8] sm:$0xff] }
 0x8d4   : > { %16392 = vmatpush3.bf16.msra.mxu0 %v17235_v3  ;;  %16420 = vmatpush3.bf16.msra.mxu1 %v17236_v23  ;;  %v13421_v3 = vrot.slane %v13419_v42, 1  ;;  %v11693_v23 = vpack.c.bf16 %v11669_v57, %v11661_v19  ;;  %v13460_v47 = vshll.u32 %v19530_v62, 16  ;;  %v17275_v57 = vld [vmem:[#allocation15 + $0x518] sm:$0xff]   ;;  %v17282_v19 = vld [vmem:[#allocation15 + $0x5e8] sm:$0xff]  }
 0x8d5   : > { %16393 = vmatprep.subr.bf16.mxu0 %v17237_v29  ;;  %16421 = vmatprep.subr.bf16.mxu1 %v17238_v12  ;;  %v11663_v29 = vld [vmem:[#allocation3 + $0x78] sm:$0xfe] }
 0x8d6   : > { %13209 = vmatmul.mubr.bf16.gmra.mrb[220].mxu0 %v19474_v54  ;;  %13257 = vmatmul.mubr.bf16.gmra.mrb[220].mxu1 %v19476_v56  ;;  %v17246_v54 = vld [vmem:[#allocation15 + $0x4e0] sm:$0xff]   ;;  %v13453_v48 = vshrl.u32 %v11693_v23, 16  ;;  %v19543_v20 = vrot.slane %v13460_v47, 1  ;;  %v17276_v8 = vld [vmem:[#allocation15 + $0x598] sm:$0xff]  }
 0x8d7   : > { %13944 = vmatprep.mubr.bf16.mxu0 %v13415_v60  ;;  %13992 = vmatprep.mubr.bf16.mxu1 %v13439_v30  ;;  %v11664_v56 = vld [vmem:[#allocation3 + $0x80] sm:$0xff]  ;;  %v13491_v60 = vshrl.u32 %v19504_v41, 16  ;;  %v13422_v30 = vor.u32 %v13421_v3, %v13417_v51  ;;  %v11670_v3 = vld [vmem:[#allocation3 + $0xb0] sm:$0xff] }
 0x8d8   : > { %16394 = vmatpush3.bf16.msra.mxu0 %v17239_v7  ;;  %16422 = vmatpush3.bf16.msra.mxu1 %v17240_v2  ;;  %v11688_v26 = vpack.c.bf16 %v11664_v56, %v11656_v15  ;;  %v11695_v7 = vpack.c.bf16 %v11671_v22, %v11663_v29  ;;  %v13426_v2 = vrot.slane %v13424_v46, 1  ;;  %v17267_v15 = vld [vmem:[#allocation15 + $0x508] sm:$0xff]   ;;  %v17278_v46 = vld [vmem:[#allocation15 + $0x5e0] sm:$0xff]   ;;  %v11686_v29 = vld [vmem:[#allocation3 + $0x130] sm:$0x1] }
 0x8d9   : > { %16395 = vmatprep.subr.bf16.mxu0 %v17241_v35  ;;  %16423 = vmatprep.subr.bf16.mxu1 %v17242_v52  ;;  %v19533_v52 = vpack.c.bf16 %v11687_v28, %v11679_v39  ;;  %v17279_v22 = vld [vmem:[#allocation15 + $0x520] sm:$0xff]   ;;  %v17283_v39 = vld [vmem:[#allocation15 + $0x528] sm:$0xff]   ;;  %v17285_v51 = vld [vmem:[#allocation15 + $0x570] sm:$0xff]  }
 0x8da   : > { %v13395_v32 = vshll.u32 %v11688_v26, 16  ;;  %v13393_v12 = vshrl.u32 %v11688_v26, 16  ;;  %v13479_v56 = vshll.u32 %v11695_v7, 16  ;;  %v13427_v41 = vsel %vm4309_vm1, %v13422_v30, %v13426_v2  ;;  %v17280_v28 = vld [vmem:[#allocation15 + $0x5a0] sm:$0xff]  }
 0x8db   : > { %v13488_v26 = vshrl.u32 %v19524_v14, 16 }
 0x8dc   : > { %16396 = vmatpush3.bf16.msra.mxu0 %v17243_v10  ;;  %16424 = vmatpush3.bf16.msra.mxu1 %v17244_v1  ;;  %v13397_v5 = vrot.slane %v13395_v32, 1  ;;  %v13497_v10 = vshrl.u32 %v19506_v24, 16  ;;  %v17263_v1 = vld [vmem:[#allocation15 + $0x500] sm:$0xff]   ;;  %v13484_v24 = vshll.u32 %v19533_v52, 16 }
 0x8dd   : > { %16397 = vmatprep.subr.bf16.mxu0 %v17245_v49  ;;  %16425 = vmatprep.subr.bf16.mxu1 %v17246_v54  ;;  %v13455_v49 = vshll.u32 %v11693_v23, 16  ;;  %v11676_v23 = vld [vmem:[#allocation3 + $0xe0] sm:$0xff] }
 0x8de   : > { %v13398_v35 = vor.u32 %v13397_v5, %v13393_v12  ;;  %v19546_v27 = vrot.slane %v13484_v24, 1  ;;  %v11668_v5 = vld [vmem:[#allocation3 + $0xa0] sm:$0xff] }
 0x8df   : > { %v13457_v34 = vrot.slane %v13455_v49, 1  ;;  %v17288_v49 = vld [vmem:[#allocation15 + $0x5b0] sm:$0xff]  }
 0x8e0   : > { %16398 = vmatpush3.bf16.msra.mxu0 %v17247_v44  ;;  %16426 = vmatpush3.bf16.msra.mxu1 %v17248_v43  ;;  %v13403_v54 = vsel %vm4309_vm1, %v13398_v35, %v13402_v16  ;;  %v13493_v44 = vor.u32 %v13491_v60, %v19514_v0  ;;  %v17264_v43 = vld [vmem:[#allocation15 + $0x580] sm:$0xff]   ;;  %v17268_v0 = vld [vmem:[#allocation15 + $0x588] sm:$0xff]   ;;  %v17286_v35 = vld [vmem:[#allocation15 + $0x5f0] sm:$0xff]   ;;  %v11700_v60 = vpack.c.bf16 %v11684_v61, %v11676_v23 }
 0x8e1   : > { %16399 = vmatprep.subr.bf16.mxu0 %v17249_v4  ;;  %16427 = vmatprep.subr.bf16.mxu1 %v17250_v40  ;;  %v17265_v4 = vld [vmem:[#allocation15 + $0x548] sm:$0xff]   ;;  %v13499_v40 = vor.u32 %v13497_v10, %v19516_v9  ;;  %v17270_v9 = vld [vmem:[#allocation15 + $0x5d0] sm:$0xff]   ;;  %v13458_v32 = vor.u32 %v13457_v34, %v13453_v48 }
 0x8e2   : > { %v17287_v10 = vld [vmem:[#allocation15 + $0x530] sm:$0xff]  }
 0x8e3   : > { %v13463_v14 = vsel %vm4309_vm1, %v13458_v32, %v19543_v20 }
 0x8e4   : > { %16400 = vmatpush3.bf16.msra.mxu0 %v17251_v25  ;;  %16428 = vmatpush3.bf16.msra.mxu1 %v17252_v63  ;;  %v13481_v25 = vrot.slane %v13479_v56, 1  ;;  %v13494_v63 = vshrl.u32 %v19526_v36, 16 }
 0x8e5   : > { %16401 = vmatprep.subr.bf16.mxu0 %v17253_v37  ;;  %16429 = vmatprep.subr.bf16.mxu1 %v17254_v58  ;;  %v13477_v37 = vshrl.u32 %v11695_v7, 16  ;;  %v13490_v58 = vor.u32 %v13488_v26, %v13402_v16  ;;  %v11662_v16 = vld [vmem:[#allocation3 + $0x70] sm:$0xfe]  ;;  %v17284_v7 = vld [vmem:[#allocation15 + $0x5a8] sm:$0xff]  }
 0x8e7   : > { %v13482_v42 = vor.u32 %v13481_v25, %v13477_v37  ;;  %v13503_v25 = vshrl.u32 %v19530_v62, 16 }
 0x8e8   : > { %16402 = vmatpush3.bf16.msra.mxu0 %v17255_v17  ;;  %16430 = vmatpush3.bf16.msra.mxu1 %v17256_v11  ;;  %v17271_v17 = vld [vmem:[#allocation15 + $0x510] sm:$0xff]   ;;  %v13496_v11 = vor.u32 %v13494_v63, %v13426_v2  ;;  %v11694_v2 = vpack.c.bf16 %v11670_v3, %v11662_v16 }
 0x8e9   : > { %16403 = vmatprep.subr.bf16.mxu0 %v17257_v13  ;;  %16431 = vmatprep.subr.bf16.mxu1 %v17258_v55  ;;  %v17272_v13 = vld [vmem:[#allocation15 + $0x590] sm:$0xff]   ;;  %v17273_v55 = vld [vmem:[#allocation15 + $0x558] sm:$0xff]   ;;  %v13487_v36 = vsel %vm4309_vm1, %v13482_v42, %v19546_v27  ;;  %v13505_v63 = vor.u32 %v13503_v25, %v19543_v20 }
 0x8ea   : > { %v13465_v34 = vshrl.u32 %v11694_v2, 16 }
 0x8ec   : > { %16404 = vmatpush3.bf16.msra.mxu0 %v17259_v53  ;;  %16432 = vmatpush3.bf16.msra.mxu1 %v17260_v38  ;;  %v17277_v53 = vld [vmem:[#allocation15 + $0x560] sm:$0xff]   ;;  %v17281_v38 = vld [vmem:[#allocation15 + $0x568] sm:$0xff]  }
 0x8ed   : > { %16445 = vmatprep.subr.bf16.mxu0 %v17261_v59  ;;  %16473 = vmatprep.subr.bf16.mxu1 %v17262_v50  ;;  %v11660_v59 = vld [vmem:[#allocation3 + $0x60] sm:$0xfe]  ;;  %v11678_v50 = vld [vmem:[#allocation3 + $0xf0] sm:$0xff] }
 0x8ee   : > { %v11692_v12 = vpack.c.bf16 %v11668_v5, %v11660_v59  ;;  %v11702_v30 = vpack.c.bf16 %v11686_v29, %v11678_v50 }
 0x8ef   : > { %13945 = vmatmul.mubr.bf16.vlgmr.msra.gmra.mrb[224].mxu0 %v13403_v54  ;;  %13993 = vmatmul.mubr.bf16.vlgmr.msra.gmra.mrb[224].mxu1 %v13427_v41  ;;  %v17289_v54 = vld [vmem:[#allocation15 + $0x578] sm:$0xff]  }
 0x8f0   : > { %13952 = vmatprep.mubr.bf16.mxu0 %v13493_v44  ;;  %14000 = vmatprep.mubr.bf16.mxu1 %v13499_v40  ;;  %v13467_v44 = vshll.u32 %v11694_v2, 16  ;;  %v13472_v56 = vshll.u32 %v11702_v30, 16  ;;  %v17291_v41 = vld [vmem:[#allocation15 + $0x538] sm:$0xff]   ;;  %v13441_v24 = vshrl.u32 %v11692_v12, 16  ;;  %v13506_v32 = vshrl.u32 %v11702_v30, 16 }
 0x8f1   : > { %16446 = vmatpush3.bf16.msra.mxu0 %v17263_v1  ;;  %16474 = vmatpush3.bf16.msra.mxu1 %v17264_v43  ;;  %v13443_v1 = vshll.u32 %v11692_v12, 16  ;;  %v17290_v43 = vld [vmem:[#allocation15 + $0x5f8] sm:$0xff]  }
 0x8f2   : > { %16447 = vmatprep.subr.bf16.mxu0 %v17265_v4  ;;  %16475 = vmatprep.subr.bf16.mxu1 %v17266_v31  ;;  %v13448_v4 = vshll.u32 %v11700_v60, 16  ;;  %v17292_v31 = vld [vmem:[#allocation15 + $0x5b8] sm:$0xff]   ;;  %v13469_v47 = vrot.slane %v13467_v44, 1 }
 0x8f3   : > { %v13445_v40 = vrot.slane %v13443_v1, 1 }
 0x8f4   : > { %v13470_v26 = vor.u32 %v13469_v47, %v13465_v34 }
 0x8f5   : > { %16448 = vmatpush3.bf16.msra.mxu0 %v17267_v15  ;;  %16476 = vmatpush3.bf16.msra.mxu1 %v17268_v0  ;;  %v13450_v15 = vrot.slane %v13448_v4, 1  ;;  %v13474_v0 = vrot.slane %v13472_v56, 1 }
 0x8f6   : > { %16449 = vmatprep.subr.bf16.mxu0 %v17269_v6  ;;  %16477 = vmatprep.subr.bf16.mxu1 %v17270_v9  ;;  %v13446_v6 = vor.u32 %v13445_v40, %v13441_v24  ;;  %v13509_v9 = vshrl.u32 %v19533_v52, 16 }
 0x8f7   : > { %13953 = vmatmul.mubr.bf16.gmra.mrb[228].mxu0 %v13490_v58  ;;  %14001 = vmatmul.mubr.bf16.gmra.mrb[228].mxu1 %v13496_v11  ;;  %v13475_v37 = vsel %vm4309_vm1, %v13470_v26, %v13474_v0  ;;  %v13508_v62 = vor.u32 %v13506_v32, %v13474_v0 }
 0x8f8   : > { %14040 = vmatprep.mubr.bf16.mxu0 %v13463_v14  ;;  %14088 = vmatprep.mubr.bf16.mxu1 %v13487_v36  ;;  %v13451_v48 = vsel %vm4309_vm1, %v13446_v6, %v13450_v15  ;;  %v13511_v58 = vor.u32 %v13509_v9, %v19546_v27 }
 0x8f9   : > { %16450 = vmatpush3.bf16.msra.mxu0 %v17271_v17  ;;  %16478 = vmatpush3.bf16.msra.mxu1 %v17272_v13  ;;  %v13500_v17 = vshrl.u32 %v11700_v60, 16 }
 0x8fa   : > { %16451 = vmatprep.subr.bf16.mxu0 %v17273_v55  ;;  %16479 = vmatprep.subr.bf16.mxu1 %v17274_v18 }
 0x8fb   : > { %v13502_v11 = vor.u32 %v13500_v17, %v13450_v15 }
 0x8fd   : > { %16452 = vmatpush3.bf16.msra.mxu0 %v17275_v57  ;;  %16480 = vmatpush3.bf16.msra.mxu1 %v17276_v8 }
 0x8fe   : > { %16453 = vmatprep.subr.bf16.mxu0 %v17277_v53  ;;  %16481 = vmatprep.subr.bf16.mxu1 %v17278_v46 }
 0x901   : > { %16454 = vmatpush3.bf16.msra.mxu0 %v17279_v22  ;;  %16482 = vmatpush3.bf16.msra.mxu1 %v17280_v28 }
 0x902   : > { %16455 = vmatprep.subr.bf16.mxu0 %v17281_v38  ;;  %16483 = vmatprep.subr.bf16.mxu1 %v17282_v19 }
 0x905   : > { %16456 = vmatpush3.bf16.msra.mxu0 %v17283_v39  ;;  %16484 = vmatpush3.bf16.msra.mxu1 %v17284_v7 }
 0x906   : > { %16457 = vmatprep.subr.bf16.mxu0 %v17285_v51  ;;  %16485 = vmatprep.subr.bf16.mxu1 %v17286_v35 }
 0x909   : > { %16458 = vmatpush3.bf16.msra.mxu0 %v17287_v10  ;;  %16486 = vmatpush3.bf16.msra.mxu1 %v17288_v49 }
 0x90a   : > { %16459 = vmatprep.subr.bf16.mxu0 %v17289_v54  ;;  %16487 = vmatprep.subr.bf16.mxu1 %v17290_v43 }
 0x90d   : > { %16460 = vmatpush3.bf16.msra.mxu0 %v17291_v41  ;;  %16488 = vmatpush3.bf16.msra.mxu1 %v17292_v31 }
 0x910   : > { %14041 = vmatmul.mubr.bf16.vlgmr.msra.gmra.mrb[232].mxu0 %v13451_v48  ;;  %14089 = vmatmul.mubr.bf16.vlgmr.msra.gmra.mrb[232].mxu1 %v13475_v37 }
 0x911   : > { %14048 = vmatprep.mubr.bf16.mxu0 %v13505_v63  ;;  %14096 = vmatprep.mubr.bf16.mxu1 %v13511_v58 }
 0x918   : > { %14049 = vmatmul.mubr.bf16.gmra.mrb[236].mxu0 %v13502_v11  ;;  %14097 = vmatmul.mubr.bf16.gmra.mrb[236].mxu1 %v13508_v62 }
 0x93c   : > { %v16181_v13 = vpop.f32.mrb[192].mxu0 }
 0x93d   : > { %v16182_v42 = vpop.f32.mrb[193].mxu0 }
 0x93e   : > { %v16209_v52 = vpop.f32.mrb[192].mxu1  ;;  %v16183_v55 = vadd.f32 %v16182_v42, %v16181_v13  ;;  %v16184_v20 = vpop.f32.mrb[194].mxu0 }
 0x93f   : > { %v16210_v14 = vpop.f32.mrb[193].mxu1  ;;  %v16185_v57 = vpop.f32.mrb[195].mxu0 }
 0x940   : > { %v16211_v18 = vadd.f32 %v16210_v14, %v16209_v52  ;;  %v16212_v36 = vpop.f32.mrb[194].mxu1  ;;  %v16186_v8 = vadd.f32 %v16185_v57, %v16184_v20 }
 0x941   : > { %v16213_v27 = vpop.f32.mrb[195].mxu1 }
 0x942   : > { %v12427_v53 = vadd.f32 %v16211_v18, %v16183_v55  ;;  %v16214_v46 = vadd.f32 %v16213_v27, %v16212_v36 }
 0x944   : > { %v12430_v22 = vadd.f32 %v16214_v46, %v16186_v8 }
 0x945   : > { %v16187_v28 = vpop.f32.mrb[196].mxu0 }
 0x946   : > { %v16215_v38 = vpop.f32.mrb[196].mxu1  ;;  %v16188_v5 = vpop.f32.mrb[197].mxu0 }
 0x947   : > { %v16189_v19 = vadd.f32 %v16188_v5, %v16187_v28  ;;  %v16216_v61 = vpop.f32.mrb[197].mxu1  ;;  %v16190_v3 = vpop.f32.mrb[198].mxu0 }
 0x948   : > { %v16217_v59 = vadd.f32 %v16216_v61, %v16215_v38  ;;  %v16218_v23 = vpop.f32.mrb[198].mxu1  ;;  %v16191_v29 = vpop.f32.mrb[199].mxu0 }
 0x949   : > { %v16219_v39 = vpop.f32.mrb[199].mxu1 }
 0x94a   : > { %v12435_v12 = vadd.f32 %v16217_v59, %v16189_v19 }
 0x95f   : > { %v16237_v16 = vpop.f32.mrb[200].mxu0 }
 0x960   : > { %v16265_v50 = vpop.f32.mrb[200].mxu1  ;;  %v16238_v7 = vpop.f32.mrb[201].mxu0 }
 0x961   : > { %v16239_v51 = vadd.f32 %v16238_v7, %v16237_v16  ;;  %v16266_v2 = vpop.f32.mrb[201].mxu1  ;;  %v16240_v35 = vpop.f32.mrb[202].mxu0 }
 0x962   : > { %v16267_v60 = vadd.f32 %v16266_v2, %v16265_v50  ;;  %v16268_v30 = vpop.f32.mrb[202].mxu1  ;;  %v16241_v10 = vpop.f32.mrb[203].mxu0 }
 0x963   : > { %v12475_v1 = vadd.f32 %v16239_v51, %v12427_v53  ;;  %v16242_v49 = vadd.f32 %v16241_v10, %v16240_v35  ;;  %v16269_v54 = vpop.f32.mrb[203].mxu1 }
 0x964   : > { %v16270_v44 = vadd.f32 %v16269_v54, %v16268_v30 }
 0x965   : > { %v12523_v43 = vadd.f32 %v16267_v60, %v12475_v1  ;;  %v12478_v4 = vadd.f32 %v16242_v49, %v12430_v22 }
 0x967   : > { %v12526_v56 = vadd.f32 %v16270_v44, %v12478_v4  ;;  %v16243_v41 = vpop.f32.mrb[204].mxu0 }
 0x968   : > { %v16271_v40 = vpop.f32.mrb[204].mxu1  ;;  %v16244_v31 = vpop.f32.mrb[205].mxu0 }
 0x969   : > { %v16245_v47 = vadd.f32 %v16244_v31, %v16243_v41  ;;  %v16272_v24 = vpop.f32.mrb[205].mxu1  ;;  %v16246_v15 = vpop.f32.mrb[206].mxu0 }
 0x96a   : > { %v16273_v34 = vadd.f32 %v16272_v24, %v16271_v40  ;;  %v16274_v0 = vpop.f32.mrb[206].mxu1  ;;  %v16247_v6 = vpop.f32.mrb[207].mxu0 }
 0x96b   : > { %v12483_v25 = vadd.f32 %v16245_v47, %v12435_v12  ;;  %v16275_v26 = vpop.f32.mrb[207].mxu1 }
 0x96d   : > { %v12531_v9 = vadd.f32 %v16273_v34, %v12483_v25 }
 0x980   : > { %v16293_v48 = vpop.f32.mrb[208].mxu0  ;;  %v16321_v63 = vpop.f32.mrb[208].mxu1 }
 0x981   : > { %v16294_v37 = vpop.f32.mrb[209].mxu0  ;;  %v16322_v17 = vpop.f32.mrb[209].mxu1 }
 0x982   : > { %v16295_v58 = vadd.f32 %v16294_v37, %v16293_v48  ;;  %v16296_v32 = vpop.f32.mrb[210].mxu0  ;;  %v16323_v11 = vadd.f32 %v16322_v17, %v16321_v63  ;;  %v16324_v62 = vpop.f32.mrb[210].mxu1 }
 0x983   : > { %v16297_v13 = vpop.f32.mrb[211].mxu0  ;;  %v16325_v55 = vpop.f32.mrb[211].mxu1 }
 0x984   : > { %v13107_v52 = vadd.f32 %v16295_v58, %v12523_v43  ;;  %v16298_v42 = vadd.f32 %v16297_v13, %v16296_v32  ;;  %v16326_v14 = vadd.f32 %v16325_v55, %v16324_v62 }
 0x986   : > { %v13155_v20 = vadd.f32 %v16323_v11, %v13107_v52  ;;  %v13110_v18 = vadd.f32 %v16298_v42, %v12526_v56 }
 0x988   : > { %v13158_v36 = vadd.f32 %v16326_v14, %v13110_v18  ;;  %v16299_v57 = vpop.f32.mrb[212].mxu0  ;;  %v16327_v8 = vpop.f32.mrb[212].mxu1 }
 0x989   : > { %v16300_v27 = vpop.f32.mrb[213].mxu0  ;;  %v16328_v46 = vpop.f32.mrb[213].mxu1 }
 0x98a   : > { %v16301_v53 = vadd.f32 %v16300_v27, %v16299_v57  ;;  %v16302_v22 = vpop.f32.mrb[214].mxu0  ;;  %v16329_v28 = vadd.f32 %v16328_v46, %v16327_v8  ;;  %v16330_v38 = vpop.f32.mrb[214].mxu1 }
 0x98b   : > { %v16303_v5 = vpop.f32.mrb[215].mxu0  ;;  %v16331_v61 = vpop.f32.mrb[215].mxu1 }
 0x98c   : > { %v13115_v19 = vadd.f32 %v16301_v53, %v12531_v9 }
 0x98e   : > { %v13163_v3 = vadd.f32 %v16329_v28, %v13115_v19 }
 0x9a1   : > { %v16349_v59 = vpop.f32.mrb[216].mxu0  ;;  %v16377_v23 = vpop.f32.mrb[216].mxu1 }
 0x9a2   : > { %v16350_v29 = vpop.f32.mrb[217].mxu0  ;;  %v16378_v12 = vpop.f32.mrb[217].mxu1 }
 0x9a3   : > { %v16351_v39 = vadd.f32 %v16350_v29, %v16349_v59  ;;  %v16352_v16 = vpop.f32.mrb[218].mxu0  ;;  %v16379_v50 = vadd.f32 %v16378_v12, %v16377_v23  ;;  %v16380_v7 = vpop.f32.mrb[218].mxu1 }
 0x9a4   : > { %v16353_v51 = vpop.f32.mrb[219].mxu0  ;;  %v16381_v60 = vpop.f32.mrb[219].mxu1 }
 0x9a5   : > { %v13203_v2 = vadd.f32 %v16351_v39, %v13155_v20  ;;  %v16354_v35 = vadd.f32 %v16353_v51, %v16352_v16  ;;  %v16382_v30 = vadd.f32 %v16381_v60, %v16380_v7  ;;  %v14114_v60 = vstv %s15098_s28 }
 0x9a7   : > { %v13251_v10 = vadd.f32 %v16379_v50, %v13203_v2  ;;  %v13206_v1 = vadd.f32 %v16354_v35, %v13158_v36  ;;  %v14110_v35 = vstv %s15097_s12 }
 0x9a9   : > { %v19558_v49 = vadd.f32 %v16382_v30, %v13206_v1  ;;  %v16355_v54 = vpop.f32.mrb[220].mxu0  ;;  %v16383_v44 = vpop.f32.mrb[220].mxu1 }
 0x9aa   : > { %v16356_v43 = vpop.f32.mrb[221].mxu0  ;;  %v16384_v56 = vpop.f32.mrb[221].mxu1 }
 0x9ab   : > { %v16357_v4 = vadd.f32 %v16356_v43, %v16355_v54  ;;  %v16358_v41 = vpop.f32.mrb[222].mxu0  ;;  %v16385_v40 = vadd.f32 %v16384_v56, %v16383_v44  ;;  %v16386_v31 = vpop.f32.mrb[222].mxu1  ;;  %v17345_v54 = vld [vmem:[#allocation11 + $0x18] ss:$0 sm:$0xff] }
 0x9ac   : > { %v16359_v47 = vpop.f32.mrb[223].mxu0  ;;  %v16387_v15 = vpop.f32.mrb[223].mxu1 }
 0x9ad   : > { %v13211_v24 = vadd.f32 %v16357_v4, %v13163_v3  ;;  %v14115_v15 = vmul.f32 %v14114_v60, %v19108_v21  ;;  %v17346_v21 = vld [vmem:[#allocation11] sm:$0xff] }
 0x9af   : > { %v19560_v34 = vadd.f32 %v16385_v40, %v13211_v24 }
 0x9c2   : > { %v16405_v0 = vpop.f32.mrb[224].mxu0  ;;  %v16433_v6 = vpop.f32.mrb[224].mxu1 }
 0x9c3   : > { %v16406_v25 = vpop.f32.mrb[225].mxu0  ;;  %v16434_v9 = vpop.f32.mrb[225].mxu1 }
 0x9c4   : > { %v16407_v26 = vadd.f32 %v16406_v25, %v16405_v0  ;;  %v16408_v48 = vpop.f32.mrb[226].mxu0  ;;  %v16435_v63 = vadd.f32 %v16434_v9, %v16433_v6  ;;  %v16436_v37 = vpop.f32.mrb[226].mxu1  ;;  %v14121_v25 = vstv %s15101_s20 }
 0x9c5   : > { %v16409_v58 = vpop.f32.mrb[227].mxu0  ;;  %v16437_v32 = vpop.f32.mrb[227].mxu1 }
 0x9c6   : > { %v16410_v17 = vadd.f32 %v16409_v58, %v16408_v48  ;;  %v13995_v11 = vadd.f32 %v16435_v63, %v16407_v26  ;;  %v16438_v62 = vadd.f32 %v16437_v32, %v16436_v37  ;;  %v14116_v48 = vmul.f32 %v14114_v60, %v19112_v33 }
 0x9c8   : > { %v13998_v13 = vadd.f32 %v16438_v62, %v16410_v17 }
 0x9ca   : > { %v16411_v52 = vpop.f32.mrb[228].mxu0  ;;  %v16439_v42 = vpop.f32.mrb[228].mxu1 }
 0x9cb   : > { %v16412_v55 = vpop.f32.mrb[229].mxu0  ;;  %v16440_v20 = vpop.f32.mrb[229].mxu1 }
 0x9cc   : > { %v16413_v14 = vadd.f32 %v16412_v55, %v16411_v52  ;;  %v16414_v18 = vpop.f32.mrb[230].mxu0  ;;  %v16441_v36 = vadd.f32 %v16440_v20, %v16439_v42  ;;  %v16442_v57 = vpop.f32.mrb[230].mxu1  ;;  %v14117_v55 = vmul.f32 %v14114_v60, %v19117_v45 }
 0x9cd   : > { %v16415_v8 = vpop.f32.mrb[231].mxu0  ;;  %v16443_v27 = vpop.f32.mrb[231].mxu1 }
 0x9ce   : > { %v14003_v53 = vadd.f32 %v16441_v36, %v16413_v14  ;;  %v17347_v14 = vld [vmem:[#allocation11 + $0x8] sm:$0xff]  ;;  %v17348_v36 = vld [vmem:[#allocation11 + $0x10] sm:$0xff] }
 0x9e3   : > { %v16461_v46 = vpop.f32.mrb[232].mxu0  ;;  %v16489_v22 = vpop.f32.mrb[232].mxu1 }
 0x9e4   : > { %v16462_v28 = vpop.f32.mrb[233].mxu0  ;;  %v16490_v5 = vpop.f32.mrb[233].mxu1 }
 0x9e5   : > { %v16463_v38 = vadd.f32 %v16462_v28, %v16461_v46  ;;  %v16464_v19 = vpop.f32.mrb[234].mxu0  ;;  %v16491_v61 = vadd.f32 %v16490_v5, %v16489_v22  ;;  %v16492_v3 = vpop.f32.mrb[234].mxu1 }
 0x9e6   : > { %v16465_v59 = vpop.f32.mrb[235].mxu0  ;;  %v16493_v39 = vpop.f32.mrb[235].mxu1 }
 0x9e7   : > { %v14043_v23 = vadd.f32 %v16463_v38, %v13995_v11  ;;  %v16466_v29 = vadd.f32 %v16465_v59, %v16464_v19  ;;  %v16494_v12 = vadd.f32 %v16493_v39, %v16492_v3 }
 0x9e9   : > { %v14091_v16 = vadd.f32 %v16491_v61, %v14043_v23  ;;  %v14046_v50 = vadd.f32 %v16466_v29, %v13998_v13 }
 0x9eb   : > { %v14104_v7 = vadd.f32 %v14091_v16, %v13251_v10  ;;  %v14094_v51 = vadd.f32 %v16494_v12, %v14046_v50  ;;  %v16467_v2 = vpop.f32.mrb[236].mxu0  ;;  %v16495_v30 = vpop.f32.mrb[236].mxu1 }
 0x9ec   : > { %v16468_v1 = vpop.f32.mrb[237].mxu0  ;;  %v16496_v56 = vpop.f32.mrb[237].mxu1 }
 0x9ed   : > { %v14107_v44 = vadd.f32 %v17345_v54, %v14104_v7  ;;  %v14105_v43 = vadd.f32 %v14094_v51, %v19558_v49  ;;  %v16469_v4 = vadd.f32 %v16468_v1, %v16467_v2  ;;  %v16470_v41 = vpop.f32.mrb[238].mxu0  ;;  %v16497_v40 = vadd.f32 %v16496_v56, %v16495_v30  ;;  %v16498_v31 = vpop.f32.mrb[238].mxu1 }
 0x9ee   : > { %v16471_v47 = vpop.f32.mrb[239].mxu0  ;;  %v16499_v6 = vpop.f32.mrb[239].mxu1  ;;  %v14125_v49 = vstv %s15102_s21 }
 0x9ef   : > { %v14111_v24 = vmul.f32 %v14110_v35, %v14107_v44  ;;  %v14108_v10 = vadd.f32 %v17345_v54, %v14105_v43  ;;  %v14051_v0 = vadd.f32 %v16469_v4, %v14003_v53 }
 0x9f1   : > { %v14118_v26 = vadd.f32 %v14115_v15, %v14111_v24  ;;  %v14112_v9 = vmul.f32 %v14110_v35, %v14108_v10  ;;  %v14099_v63 = vadd.f32 %v16497_v40, %v14051_v0 }
 0x9f3   : > { %v14122_v37 = vmax.f32 %v14121_v25, %v14118_v26  ;;  %v14119_v58 = vadd.f32 %v14116_v48, %v14112_v9  ;;  %v14106_v17 = vadd.f32 %v14099_v63, %v19560_v34 }
 0x9f5   : > { %v14126_v32 = vmin.f32 %v14125_v49, %v14122_v37  ;;  %v14123_v11 = vmax.f32 %v14121_v25, %v14119_v58  ;;  %v14109_v62 = vadd.f32 %v17345_v54, %v14106_v17 }
 0x9f7   : > { %v14129_v13 = vmul.f32 %v17346_v21, %v14126_v32  ;;  %v14127_v52 = vmin.f32 %v14125_v49, %v14123_v11  ;;  %v14113_v42 = vmul.f32 %v14110_v35, %v14109_v62 }
 0x9f9   : > { %v14130_v33 = vmul.f32 %v17347_v14, %v14127_v52  ;;  %v14120_v20 = vadd.f32 %v14117_v55, %v14113_v42  ;;  %14132 = vst [vmem:[%s406_s11] sm:$0xff] %v14129_v13 }
 0x9fb   : > { %v14124_v18 = vmax.f32 %v14121_v25, %v14120_v20  ;;  %14133 = vst [vmem:[%s406_s11 + $0x8] sm:$0xff] %v14130_v33 }
 0x9fd   : > { %v14128_v34 = vmin.f32 %v14125_v49, %v14124_v18 }
 0x9ff   : > { %v14131_v45 = vmul.f32 %v17348_v36, %v14128_v34 }
 0xa01   : > { %14134 = vst [vmem:[%s406_s11 + $0x10] sm:$0xff] %v14131_v45 }
 0xa02   : > { %17547 = shalt.err (!%p17544_p2)
}
 0xa03   : > { %s17548_s4 = scalar_lea.hbm %s19573_s16, 384  ;;  %s17552_s23 = scalar_lea.hbm %s19626_s7, 768 }
 0xa04   : > { %p17549_p0 = scmp.ne.s32.totalorder %s19573_s16, %s17548_s4  ;;  %p17553_p7 = scmp.lt.u32.totalorder %s19573_s16, %s19626_s7 }
 0xa05   : > { %p17554_p9 = scmp.lt.u32.totalorder %s17552_s23, %s17548_s4  ;;  %p17556_p4 = scmp.lt.u32.totalorder %s17548_s4, %s19573_s16 }
 0xa06   : > { %p17550_p1 = pnand %p17549_p0, %p19771_p13 }
 0xa07   : > { %p17555_p12 = por %p17554_p9, %p17553_p7 }
 0xa08   : > { %p17551_p5 = pneg %p17550_p1 }
 0xa09   : > { %p17557_p6 = por %p17556_p4, %p17555_p12 }
 0xa0b   : > { %p17558_p10 = pnand %p17557_p6, %p17551_p5 }
 0xa0d   : > { %17561 = shalt.err (!%p17558_p10)
}
 0xa0e   : > { %s17639_s20 = smov 128   ;;  %s17640_s21 = smov 8  }
 0xa0f   : > { %16628 = dma.vmem_to_hbm [thread:$0]  (%p19771_p13), %s19575_s10, 384, %s19573_s16, %s14136_s18, %s17639_s20, %s17639_s20, %s17640_s21  }
 0xa10 PF: > { %s14164_s11 = sand.u32 1, %s17608_s24   ;;  %p19772_p11 = scmp.ne.s32.totalorder %s19689_s15, 0 }
 0xa11   : > { %p19773_p8 = scmp.ge.s32.totalorder %s17620_s27, 2  ;;  %s14165_s19 = scalar_lea.sflag [#allocation6], %s14164_s11 }
 0xa13   : > { %p16654_p3 = pnand %p19773_p8, %p19772_p11 }
 0xa15   : > { %17603 = dma.done.wait (!%p16654_p3), %s14165_s19, 384  }
 0xa16   : > { %17605 = vsyncadd (!%p16654_p3), %s14165_s19, 4294966912  ;;  %p26_p2 = scmp.ge.s32.totalorder %s17836_s17, 4   ;;  %s19774_s24 = smov %s17612_s25 }
 0xa17   : > { %s19775_s25 = smov %s17616_s26  ;;  %s19776_s26 = smov %s17847_s9 }
 0xa18   : > { %s19777_s27 = smov %s17836_s17  ;;  %28 = sbr.rel (!%p26_p2) target bundleno = 16 (0x10), region = 135 }
 0xa1f   :  { %14170 = vsyncpa [#allocation5], 1 }
 0xa20   :  { %14172 = vsyncpa [#allocation5 + $0x1], 1 }
 0xa21   :  { %14173 = vsyncpa [#allocation10], 1 }
 0xa22   :  { %14175 = vsyncpa [#allocation10 + $0x1], 1 }
 0xa23   :  { %14176 = vsyncpa [#allocation13], 1 }
 0xa24   :  { %14177 = vsyncpa [#allocation16], 1 }
 0xa25   :  { %14178 = vsyncpa [#allocation6], 1 }
 0xa26   :  { %14180 = vsyncpa [#allocation6 + $0x1], 1 }
 0xa27   :  { %14181 = vsyncpa [#allocation7], 1 }
 0xa28   :  { %14183 = vsyncpa [#allocation7 + $0x1], 1 }

</bundles_post_ra>
